<compile_context>
chip_gen: v5e
topology: v5e:2x2
jax: 0.10.0
libtpu: 0.0.40
codegen_flags: <defaults>
</compile_context>

<pallas_src>
import jax
import jax.numpy as jnp
import numpy as np
from jax.experimental import pallas as pl
from jax.experimental.pallas import tpu as pltpu


# ----------------------------------------------------------------------------
# Host-side constant builders (0/1 selection matrices, built once in __init__)
# ----------------------------------------------------------------------------
def _shift_mats_T(H, W):
    """S_t^T with shape (9, P, P): (x @ S_t^T)[:, h*W+w] = x[:, (h+dy)*W+(w+dx)]
    for tap t=(dy+1)*3+(dx+1), zero outside the image (== SAME zero padding)."""
    P = H * W
    m = np.zeros((9, P, P), np.float32)
    for t in range(9):
        dy, dx = t // 3 - 1, t % 3 - 1
        for h in range(H):
            hh = h + dy
            if not (0 <= hh < H):
                continue
            for w in range(W):
                ww = w + dx
                if 0 <= ww < W:
                    m[t, hh * W + ww, h * W + w] = 1.0
    return m


def _pool_mats_T(H, W):
    """G_j^T with shape (4, P, P/4): (x @ G_j^T)[:, r*W2+c] = x[:, (2r+dy)*W+(2c+dx)]."""
    H2, W2 = H // 2, W // 2
    m = np.zeros((4, H * W, H2 * W2), np.float32)
    for j in range(4):
        dy, dx = j // 2, j % 2
        for r in range(H2):
            for c in range(W2):
                m[j, (2 * r + dy) * W + (2 * c + dx), r * W2 + c] = 1.0
    return m


def _upsample_mat_T(H, W):
    """U^T with shape (P, 4P): (x @ U^T)[:, h*(2W)+w] = x[:, (h//2)*W + (w//2)]."""
    H2, W2 = 2 * H, 2 * W
    m = np.zeros((H * W, H2 * W2), np.float32)
    for h in range(H2):
        for w in range(W2):
            m[(h // 2) * W + (w // 2), h * W2 + w] = 1.0
    return m


# ----------------------------------------------------------------------------
# Fused Pallas kernel (whole encoder-decoder forward for one image per grid step)
# ----------------------------------------------------------------------------
def _make_fused_kernel(enc_plan, dec_plan):
    """enc_plan / dec_plan are static lists of dicts holding Python-int indices
    into the kernel's input-ref tuple (index 0 is the activation input x)."""
    f32, bf16 = jnp.float32, jnp.bfloat16

    def kernel(*args):
        o_ref = args[-1]
        refs = args[:-1]

        def conv3x3_relu(parts, shift_idx, bias_idx):
            # parts: list of (value (Cin_i, P) f32, weight-ref index -> (9, Cout, Cin_i))
            s_ref = refs[shift_idx]
            bias = refs[bias_idx][...]                       # (Cout, 1), broadcast over lanes
            cout = bias.shape[0]
            p = parts[0][0].shape[-1]
            parts_bf = [(v.astype(bf16), widx) for v, widx in parts]
            acc = jnp.zeros((cout, p), f32)
            for t in range(9):                               # taps folded in-kernel, 1 acc
                s_t = s_ref[t]                               # (P, P) bf16 0/1 selection
                for v_bf, widx in parts_bf:
                    shifted = jnp.dot(v_bf, s_t, preferred_element_type=f32)   # (Cin, P)
                    acc = acc + jnp.dot(refs[widx][t], shifted,
                                        preferred_element_type=f32)            # (Cout, P)
            return jnp.maximum(acc + bias, 0.0)

        def maxpool2x2(v, pool_idx):
            p_ref = refs[pool_idx]
            v_bf = v.astype(bf16)
            r = jnp.dot(v_bf, p_ref[0], preferred_element_type=f32)
            for j in range(1, 4):
                r = jnp.maximum(r, jnp.dot(v_bf, p_ref[j], preferred_element_type=f32))
            return r

        def upsample2x(v, up_idx):
            return jnp.dot(v.astype(bf16), refs[up_idx][...], preferred_element_type=f32)

        # ---- forward (mirrors EncoderDecoderBody.forward) ----
        x = refs[0][0].astype(f32)                           # (Cin, P)
        skips = []
        for st in enc_plan:
            if st["pool"] is not None:
                x = maxpool2x2(x, st["pool"])
            x = conv3x3_relu([(x, st["w"])], st["shift"], st["b"])
            skips.append(x)
        for st in dec_plan:
            x = upsample2x(x, st["up"])
            parts = [(x, st["wx"])]
            if st["ws"] is not None:                         # concat(skip) == split-weight add
                parts.append((skips[st["skip"]], st["ws"]))
            x = conv3x3_relu(parts, st["shift"], st["b"])

        o_ref[0] = x.astype(o_ref.dtype)                     # (Cout, P): lane-dense store

    return kernel


# ----------------------------------------------------------------------------
# Public wrapper: NCHW in / NCHW out, single pallas_call
# ----------------------------------------------------------------------------
class EncoderDecoderBodyPallas:
    def __init__(self, params, skip=True, input_hw=(16, 16)):
        self.skip = skip
        H, W = input_hw
        encoders, decoders = params["encoders"], params["decoders"]

        consts, const_specs = [], []

        def add(arr):
            arr = jnp.asarray(arr)
            consts.append(arr)
            zeros = (0,) * arr.ndim
            const_specs.append(pl.BlockSpec(arr.shape, lambda n, _z=zeros: _z))
            return len(consts)                 # ref index inside kernel (0 is x)

        cache = {}

        def shared(kind, h, w, builder):       # shift/pool/up matrices shared by resolution
            key = (kind, h, w)
            if key not in cache:
                cache[key] = add(jnp.asarray(builder(h, w), jnp.bfloat16))
            return cache[key]

        enc_plan, enc_cout = [], []
        h, w = H, W
        for i, (wt, bias) in enumerate(encoders):
            cin, cout = int(wt.shape[2]), int(wt.shape[3])
            st = {"pool": None}
            if i > 0:
                st["pool"] = shared("pool", h, w, _pool_mats_T)
                h, w = h // 2, w // 2
            st["shift"] = shared("shift", h, w, _shift_mats_T)
            st["w"] = add(jnp.transpose(wt.reshape(9, cin, cout), (0, 2, 1)).astype(jnp.float32))
            st["b"] = add(bias.reshape(cout, 1).astype(jnp.float32))
            enc_plan.append(st)
            enc_cout.append(cout)

        dec_plan = []
        up_c = enc_cout[-1]
        for i, (wt, bias) in enumerate(decoders):
            cin, cout = int(wt.shape[2]), int(wt.shape[3])
            st = {"up": shared("up", h, w, _upsample_mat_T)}
            h, w = 2 * h, 2 * w
            st["shift"] = shared("shift", h, w, _shift_mats_T)
            w9 = wt.reshape(9, cin, cout)
            if self.skip:
                skip_stage = len(encoders) - 2 - i           # skips[-i-2]
                skip_c = enc_cout[skip_stage]
                assert cin == up_c + skip_c
                # conv(concat(up, skip)) == conv_a(up) + conv_b(skip)
                st["wx"] = add(jnp.transpose(w9[:, :up_c, :], (0, 2, 1)).astype(jnp.float32))
                st["ws"] = add(jnp.transpose(w9[:, up_c:, :], (0, 2, 1)).astype(jnp.float32))
                st["skip"] = skip_stage
            else:
                assert cin == up_c
                st["wx"] = add(jnp.transpose(w9, (0, 2, 1)).astype(jnp.float32))
                st["ws"] = None
                st["skip"] = None
            st["b"] = add(bias.reshape(cout, 1).astype(jnp.float32))
            dec_plan.append(st)
            up_c = cout

        assert (h, w) == (H, W)
        self._consts = consts
        self._const_specs = const_specs
        self._kernel = _make_fused_kernel(enc_plan, dec_plan)
        self._cin = int(encoders[0][0].shape[2])
        self._cout = up_c
        self._hw = (H, W)

    def __call__(self, x_nchw):
        N, C, H, W = x_nchw.shape
        assert (H, W) == self._hw and C == self._cin
        P = H * W
        x = x_nchw.reshape(N, C, P)            # NCHW -> (N, C, H*W): no transpose needed

        out = pl.pallas_call(
            self._kernel,
            out_shape=jax.ShapeDtypeStruct((N, self._cout, P), x_nchw.dtype),
            grid_spec=pltpu.PrefetchScalarGridSpec(
                num_scalar_prefetch=0,
                grid=(N,),                      # batch axis; "parallel" -> 2 TCs on v7x
                in_specs=[pl.BlockSpec((1, C, P), lambda n: (n, 0, 0))] + self._const_specs,
                out_specs=pl.BlockSpec((1, self._cout, P), lambda n: (n, 0, 0)),
            ),
            compiler_params=pltpu.CompilerParams(
                dimension_semantics=("parallel",)),
        )(x, *self._consts)
        return out.reshape(N, self._cout, H, W)


# ----------------------------------------------------------------------------
# Deterministic parameter init + pure-JAX reference for verification
# ----------------------------------------------------------------------------
def init_params(key):
    def conv_init(k, cin, cout):
        kw, kb = jax.random.split(k)
        w = jax.random.normal(kw, (3, 3, cin, cout), jnp.float32) / np.sqrt(9 * cin)
        b = 0.01 * jax.random.normal(kb, (cout,), jnp.float32)
        return w, b

    keys = jax.random.split(key, 5)
    encoders = [conv_init(keys[0], 4, 8),
                conv_init(keys[1], 8, 16),
                conv_init(keys[2], 16, 32)]
    decoders = [conv_init(keys[3], 32 + 16, 16),
                conv_init(keys[4], 16 + 8, 8)]
    return {"encoders": encoders, "decoders": decoders}


def _conv_ref(x, w, b):
    y = jax.lax.conv_general_dilated(
        x, w, window_strides=(1, 1), padding="SAME",
        dimension_numbers=("NHWC", "HWIO", "NHWC"))
    return jnp.maximum(y + b, 0.0)


def _pool_ref(x):
    return jax.lax.reduce_window(x, -jnp.inf, jax.lax.max,
                                 (1, 2, 2, 1), (1, 2, 2, 1), "VALID")


def forward_ref(params, x_nchw, skip=True):
    x = jnp.transpose(x_nchw, (0, 2, 3, 1))
    skips = []
    for idx, (w, b) in enumerate(params["encoders"]):
        if idx > 0:
            x = _pool_ref(x)
        x = _conv_ref(x, w, b)
        skips.append(x)
    for i, (w, b) in enumerate(params["decoders"]):
        s = skips[-i - 2] if skip else None
        x = jnp.repeat(jnp.repeat(x, 2, axis=1), 2, axis=2)
        if s is not None:
            x = jnp.concatenate([x, s], axis=-1)
        x = _conv_ref(x, w, b)
    return jnp.transpose(x, (0, 3, 1, 2))


# ----------------------------------------------------------------------------
if __name__ == "__main__":
    key = jax.random.PRNGKey(0)
    pkey, xkey = jax.random.split(key)
    params = init_params(pkey)

    x = jax.random.normal(xkey, (2, 4, 16, 16), jnp.float32)   # NCHW, like PyTorch

    model = EncoderDecoderBodyPallas(params, skip=True, input_hw=(16, 16))
    fwd = jax.jit(model.__call__)
    out = jax.block_until_ready(fwd(x))
    ref = jax.block_until_ready(forward_ref(params, x, skip=True))

    assert out.shape == (2, 8, 16, 16), out.shape
    np.testing.assert_allclose(np.asarray(out), np.asarray(ref),
                               rtol=5e-2, atol=5e-2)
    print("KERNEL_OK")
</pallas_src>

<mosaic_0001>
module attributes {stable_mosaic.version = 11 : i64} {
  func.func @kernel(%arg0: i32, %arg1: memref<1x4x256xf32, #tpu.memory_space<vmem>>, %arg2: memref<9x256x256xbf16, #tpu.memory_space<vmem>>, %arg3: memref<9x8x4xf32, #tpu.memory_space<vmem>>, %arg4: memref<8x1xf32, #tpu.memory_space<vmem>>, %arg5: memref<4x256x64xbf16, #tpu.memory_space<vmem>>, %arg6: memref<9x64x64xbf16, #tpu.memory_space<vmem>>, %arg7: memref<9x16x8xf32, #tpu.memory_space<vmem>>, %arg8: memref<16x1xf32, #tpu.memory_space<vmem>>, %arg9: memref<4x64x16xbf16, #tpu.memory_space<vmem>>, %arg10: memref<9x16x16xbf16, #tpu.memory_space<vmem>>, %arg11: memref<9x32x16xf32, #tpu.memory_space<vmem>>, %arg12: memref<32x1xf32, #tpu.memory_space<vmem>>, %arg13: memref<16x64xbf16, #tpu.memory_space<vmem>>, %arg14: memref<9x16x32xf32, #tpu.memory_space<vmem>>, %arg15: memref<9x16x16xf32, #tpu.memory_space<vmem>>, %arg16: memref<16x1xf32, #tpu.memory_space<vmem>>, %arg17: memref<64x256xbf16, #tpu.memory_space<vmem>>, %arg18: memref<9x8x16xf32, #tpu.memory_space<vmem>>, %arg19: memref<9x8x8xf32, #tpu.memory_space<vmem>>, %arg20: memref<8x1xf32, #tpu.memory_space<vmem>>, %arg21: memref<1x8x256xf32, #tpu.memory_space<vmem>>) attributes {dimension_semantics = [#tpu.dimension_semantics<parallel>], iteration_bounds = array<i64: 2>, scalar_prefetch = 0 : i64, scratch_operands = 0 : i64, tpu.core_type = #tpu.core_type<tc>, window_params = [{transform_indices = @transform_0, window_bounds = array<i64: 1, 4, 256>}, {pipeline_mode = #tpu.pipeline_mode<synchronous>, transform_indices = @transform_1, window_bounds = array<i64: 9, 256, 256>}, {pipeline_mode = #tpu.pipeline_mode<synchronous>, transform_indices = @transform_2, window_bounds = array<i64: 9, 8, 4>}, {pipeline_mode = #tpu.pipeline_mode<synchronous>, transform_indices = @transform_3, window_bounds = array<i64: 8, 1>}, {pipeline_mode = #tpu.pipeline_mode<synchronous>, transform_indices = @transform_4, window_bounds = array<i64: 4, 256, 64>}, {pipeline_mode = #tpu.pipeline_mode<synchronous>, transform_indices = @transform_5, window_bounds = array<i64: 9, 64, 64>}, {pipeline_mode = #tpu.pipeline_mode<synchronous>, transform_indices = @transform_6, window_bounds = array<i64: 9, 16, 8>}, {pipeline_mode = #tpu.pipeline_mode<synchronous>, transform_indices = @transform_7, window_bounds = array<i64: 16, 1>}, {pipeline_mode = #tpu.pipeline_mode<synchronous>, transform_indices = @transform_8, window_bounds = array<i64: 4, 64, 16>}, {pipeline_mode = #tpu.pipeline_mode<synchronous>, transform_indices = @transform_9, window_bounds = array<i64: 9, 16, 16>}, {pipeline_mode = #tpu.pipeline_mode<synchronous>, transform_indices = @transform_10, window_bounds = array<i64: 9, 32, 16>}, {pipeline_mode = #tpu.pipeline_mode<synchronous>, transform_indices = @transform_11, window_bounds = array<i64: 32, 1>}, {pipeline_mode = #tpu.pipeline_mode<synchronous>, transform_indices = @transform_12, window_bounds = array<i64: 16, 64>}, {pipeline_mode = #tpu.pipeline_mode<synchronous>, transform_indices = @transform_13, window_bounds = array<i64: 9, 16, 32>}, {pipeline_mode = #tpu.pipeline_mode<synchronous>, transform_indices = @transform_14, window_bounds = array<i64: 9, 16, 16>}, {pipeline_mode = #tpu.pipeline_mode<synchronous>, transform_indices = @transform_15, window_bounds = array<i64: 16, 1>}, {pipeline_mode = #tpu.pipeline_mode<synchronous>, transform_indices = @transform_16, window_bounds = array<i64: 64, 256>}, {pipeline_mode = #tpu.pipeline_mode<synchronous>, transform_indices = @transform_17, window_bounds = array<i64: 9, 8, 16>}, {pipeline_mode = #tpu.pipeline_mode<synchronous>, transform_indices = @transform_18, window_bounds = array<i64: 9, 8, 8>}, {pipeline_mode = #tpu.pipeline_mode<synchronous>, transform_indices = @transform_19, window_bounds = array<i64: 8, 1>}, {transform_indices = @transform_20, window_bounds = array<i64: 1, 8, 256>}]} {
    %c0 = arith.constant 0 : index
    %c0_0 = arith.constant 0 : index
    %c0_1 = arith.constant 0 : index
    %0 = vector.load %arg1[%c0, %c0_0, %c0_1] : memref<1x4x256xf32, #tpu.memory_space<vmem>>, vector<1x4x256xf32>
    %1 = vector.shape_cast %0 : vector<1x4x256xf32> to vector<4x256xf32>
    %c0_2 = arith.constant 0 : index
    %c0_3 = arith.constant 0 : index
    %2 = vector.load %arg4[%c0_2, %c0_3] : memref<8x1xf32, #tpu.memory_space<vmem>>, vector<8x1xf32>
    %3 = arith.truncf %1 : vector<4x256xf32> to vector<4x256xbf16>
    %cst = arith.constant 0.000000e+00 : f32
    %4 = vector.broadcast %cst : f32 to vector<8x256xf32>
    %c0_4 = arith.constant 0 : index
    %c0_5 = arith.constant 0 : index
    %c0_6 = arith.constant 0 : index
    %5 = vector.load %arg2[%c0_4, %c0_5, %c0_6] : memref<9x256x256xbf16, #tpu.memory_space<vmem>>, vector<1x256x256xbf16>
    %6 = vector.shape_cast %5 : vector<1x256x256xbf16> to vector<256x256xbf16>
    %cst_7 = arith.constant dense<0.000000e+00> : vector<4x256xf32>
    %7 = tpu.matmul %3, %6, %cst_7 {dimension_numbers = #tpu.dot_dimension_numbers<[1], [0], [0], [1], [0, 0, 1, 1], [], []>} : vector<4x256xbf16>, vector<256x256xbf16>, vector<4x256xf32> -> vector<4x256xf32>
    %c0_8 = arith.constant 0 : index
    %c0_9 = arith.constant 0 : index
    %c0_10 = arith.constant 0 : index
    %8 = vector.load %arg3[%c0_8, %c0_9, %c0_10] : memref<9x8x4xf32, #tpu.memory_space<vmem>>, vector<1x8x4xf32>
    %9 = vector.shape_cast %8 : vector<1x8x4xf32> to vector<8x4xf32>
    %cst_11 = arith.constant dense<0.000000e+00> : vector<8x256xf32>
    %10 = tpu.matmul %9, %7, %cst_11 {dimension_numbers = #tpu.dot_dimension_numbers<[1], [0], [0], [1], [0, 0, 1, 1], [], []>} : vector<8x4xf32>, vector<4x256xf32>, vector<8x256xf32> -> vector<8x256xf32>
    %11 = arith.addf %4, %10 : vector<8x256xf32>
    %c1 = arith.constant 1 : index
    %c0_12 = arith.constant 0 : index
    %c0_13 = arith.constant 0 : index
    %12 = vector.load %arg2[%c1, %c0_12, %c0_13] : memref<9x256x256xbf16, #tpu.memory_space<vmem>>, vector<1x256x256xbf16>
    %13 = vector.shape_cast %12 : vector<1x256x256xbf16> to vector<256x256xbf16>
    %cst_14 = arith.constant dense<0.000000e+00> : vector<4x256xf32>
    %14 = tpu.matmul %3, %13, %cst_14 {dimension_numbers = #tpu.dot_dimension_numbers<[1], [0], [0], [1], [0, 0, 1, 1], [], []>} : vector<4x256xbf16>, vector<256x256xbf16>, vector<4x256xf32> -> vector<4x256xf32>
    %c1_15 = arith.constant 1 : index
    %c0_16 = arith.constant 0 : index
    %c0_17 = arith.constant 0 : index
    %15 = vector.load %arg3[%c1_15, %c0_16, %c0_17] : memref<9x8x4xf32, #tpu.memory_space<vmem>>, vector<1x8x4xf32>
    %16 = vector.shape_cast %15 : vector<1x8x4xf32> to vector<8x4xf32>
    %cst_18 = arith.constant dense<0.000000e+00> : vector<8x256xf32>
    %17 = tpu.matmul %16, %14, %cst_18 {dimension_numbers = #tpu.dot_dimension_numbers<[1], [0], [0], [1], [0, 0, 1, 1], [], []>} : vector<8x4xf32>, vector<4x256xf32>, vector<8x256xf32> -> vector<8x256xf32>
    %18 = arith.addf %11, %17 : vector<8x256xf32>
    %c2 = arith.constant 2 : index
    %c0_19 = arith.constant 0 : index
    %c0_20 = arith.constant 0 : index
    %19 = vector.load %arg2[%c2, %c0_19, %c0_20] : memref<9x256x256xbf16, #tpu.memory_space<vmem>>, vector<1x256x256xbf16>
    %20 = vector.shape_cast %19 : vector<1x256x256xbf16> to vector<256x256xbf16>
    %cst_21 = arith.constant dense<0.000000e+00> : vector<4x256xf32>
    %21 = tpu.matmul %3, %20, %cst_21 {dimension_numbers = #tpu.dot_dimension_numbers<[1], [0], [0], [1], [0, 0, 1, 1], [], []>} : vector<4x256xbf16>, vector<256x256xbf16>, vector<4x256xf32> -> vector<4x256xf32>
    %c2_22 = arith.constant 2 : index
    %c0_23 = arith.constant 0 : index
    %c0_24 = arith.constant 0 : index
    %22 = vector.load %arg3[%c2_22, %c0_23, %c0_24] : memref<9x8x4xf32, #tpu.memory_space<vmem>>, vector<1x8x4xf32>
    %23 = vector.shape_cast %22 : vector<1x8x4xf32> to vector<8x4xf32>
    %cst_25 = arith.constant dense<0.000000e+00> : vector<8x256xf32>
    %24 = tpu.matmul %23, %21, %cst_25 {dimension_numbers = #tpu.dot_dimension_numbers<[1], [0], [0], [1], [0, 0, 1, 1], [], []>} : vector<8x4xf32>, vector<4x256xf32>, vector<8x256xf32> -> vector<8x256xf32>
    %25 = arith.addf %18, %24 : vector<8x256xf32>
    %c3 = arith.constant 3 : index
    %c0_26 = arith.constant 0 : index
    %c0_27 = arith.constant 0 : index
    %26 = vector.load %arg2[%c3, %c0_26, %c0_27] : memref<9x256x256xbf16, #tpu.memory_space<vmem>>, vector<1x256x256xbf16>
    %27 = vector.shape_cast %26 : vector<1x256x256xbf16> to vector<256x256xbf16>
    %cst_28 = arith.constant dense<0.000000e+00> : vector<4x256xf32>
    %28 = tpu.matmul %3, %27, %cst_28 {dimension_numbers = #tpu.dot_dimension_numbers<[1], [0], [0], [1], [0, 0, 1, 1], [], []>} : vector<4x256xbf16>, vector<256x256xbf16>, vector<4x256xf32> -> vector<4x256xf32>
    %c3_29 = arith.constant 3 : index
    %c0_30 = arith.constant 0 : index
    %c0_31 = arith.constant 0 : index
    %29 = vector.load %arg3[%c3_29, %c0_30, %c0_31] : memref<9x8x4xf32, #tpu.memory_space<vmem>>, vector<1x8x4xf32>
    %30 = vector.shape_cast %29 : vector<1x8x4xf32> to vector<8x4xf32>
    %cst_32 = arith.constant dense<0.000000e+00> : vector<8x256xf32>
    %31 = tpu.matmul %30, %28, %cst_32 {dimension_numbers = #tpu.dot_dimension_numbers<[1], [0], [0], [1], [0, 0, 1, 1], [], []>} : vector<8x4xf32>, vector<4x256xf32>, vector<8x256xf32> -> vector<8x256xf32>
    %32 = arith.addf %25, %31 : vector<8x256xf32>
    %c4 = arith.constant 4 : index
    %c0_33 = arith.constant 0 : index
    %c0_34 = arith.constant 0 : index
    %33 = vector.load %arg2[%c4, %c0_33, %c0_34] : memref<9x256x256xbf16, #tpu.memory_space<vmem>>, vector<1x256x256xbf16>
    %34 = vector.shape_cast %33 : vector<1x256x256xbf16> to vector<256x256xbf16>
    %cst_35 = arith.constant dense<0.000000e+00> : vector<4x256xf32>
    %35 = tpu.matmul %3, %34, %cst_35 {dimension_numbers = #tpu.dot_dimension_numbers<[1], [0], [0], [1], [0, 0, 1, 1], [], []>} : vector<4x256xbf16>, vector<256x256xbf16>, vector<4x256xf32> -> vector<4x256xf32>
    %c4_36 = arith.constant 4 : index
    %c0_37 = arith.constant 0 : index
    %c0_38 = arith.constant 0 : index
    %36 = vector.load %arg3[%c4_36, %c0_37, %c0_38] : memref<9x8x4xf32, #tpu.memory_space<vmem>>, vector<1x8x4xf32>
    %37 = vector.shape_cast %36 : vector<1x8x4xf32> to vector<8x4xf32>
    %cst_39 = arith.constant dense<0.000000e+00> : vector<8x256xf32>
    %38 = tpu.matmul %37, %35, %cst_39 {dimension_numbers = #tpu.dot_dimension_numbers<[1], [0], [0], [1], [0, 0, 1, 1], [], []>} : vector<8x4xf32>, vector<4x256xf32>, vector<8x256xf32> -> vector<8x256xf32>
    %39 = arith.addf %32, %38 : vector<8x256xf32>
    %c5 = arith.constant 5 : index
    %c0_40 = arith.constant 0 : index
    %c0_41 = arith.constant 0 : index
    %40 = vector.load %arg2[%c5, %c0_40, %c0_41] : memref<9x256x256xbf16, #tpu.memory_space<vmem>>, vector<1x256x256xbf16>
    %41 = vector.shape_cast %40 : vector<1x256x256xbf16> to vector<256x256xbf16>
    %cst_42 = arith.constant dense<0.000000e+00> : vector<4x256xf32>
    %42 = tpu.matmul %3, %41, %cst_42 {dimension_numbers = #tpu.dot_dimension_numbers<[1], [0], [0], [1], [0, 0, 1, 1], [], []>} : vector<4x256xbf16>, vector<256x256xbf16>, vector<4x256xf32> -> vector<4x256xf32>
    %c5_43 = arith.constant 5 : index
    %c0_44 = arith.constant 0 : index
    %c0_45 = arith.constant 0 : index
    %43 = vector.load %arg3[%c5_43, %c0_44, %c0_45] : memref<9x8x4xf32, #tpu.memory_space<vmem>>, vector<1x8x4xf32>
    %44 = vector.shape_cast %43 : vector<1x8x4xf32> to vector<8x4xf32>
    %cst_46 = arith.constant dense<0.000000e+00> : vector<8x256xf32>
    %45 = tpu.matmul %44, %42, %cst_46 {dimension_numbers = #tpu.dot_dimension_numbers<[1], [0], [0], [1], [0, 0, 1, 1], [], []>} : vector<8x4xf32>, vector<4x256xf32>, vector<8x256xf32> -> vector<8x256xf32>
    %46 = arith.addf %39, %45 : vector<8x256xf32>
    %c6 = arith.constant 6 : index
    %c0_47 = arith.constant 0 : index
    %c0_48 = arith.constant 0 : index
    %47 = vector.load %arg2[%c6, %c0_47, %c0_48] : memref<9x256x256xbf16, #tpu.memory_space<vmem>>, vector<1x256x256xbf16>
    %48 = vector.shape_cast %47 : vector<1x256x256xbf16> to vector<256x256xbf16>
    %cst_49 = arith.constant dense<0.000000e+00> : vector<4x256xf32>
    %49 = tpu.matmul %3, %48, %cst_49 {dimension_numbers = #tpu.dot_dimension_numbers<[1], [0], [0], [1], [0, 0, 1, 1], [], []>} : vector<4x256xbf16>, vector<256x256xbf16>, vector<4x256xf32> -> vector<4x256xf32>
    %c6_50 = arith.constant 6 : index
    %c0_51 = arith.constant 0 : index
    %c0_52 = arith.constant 0 : index
    %50 = vector.load %arg3[%c6_50, %c0_51, %c0_52] : memref<9x8x4xf32, #tpu.memory_space<vmem>>, vector<1x8x4xf32>
    %51 = vector.shape_cast %50 : vector<1x8x4xf32> to vector<8x4xf32>
    %cst_53 = arith.constant dense<0.000000e+00> : vector<8x256xf32>
    %52 = tpu.matmul %51, %49, %cst_53 {dimension_numbers = #tpu.dot_dimension_numbers<[1], [0], [0], [1], [0, 0, 1, 1], [], []>} : vector<8x4xf32>, vector<4x256xf32>, vector<8x256xf32> -> vector<8x256xf32>
    %53 = arith.addf %46, %52 : vector<8x256xf32>
    %c7 = arith.constant 7 : index
    %c0_54 = arith.constant 0 : index
    %c0_55 = arith.constant 0 : index
    %54 = vector.load %arg2[%c7, %c0_54, %c0_55] : memref<9x256x256xbf16, #tpu.memory_space<vmem>>, vector<1x256x256xbf16>
    %55 = vector.shape_cast %54 : vector<1x256x256xbf16> to vector<256x256xbf16>
    %cst_56 = arith.constant dense<0.000000e+00> : vector<4x256xf32>
    %56 = tpu.matmul %3, %55, %cst_56 {dimension_numbers = #tpu.dot_dimension_numbers<[1], [0], [0], [1], [0, 0, 1, 1], [], []>} : vector<4x256xbf16>, vector<256x256xbf16>, vector<4x256xf32> -> vector<4x256xf32>
    %c7_57 = arith.constant 7 : index
    %c0_58 = arith.constant 0 : index
    %c0_59 = arith.constant 0 : index
    %57 = vector.load %arg3[%c7_57, %c0_58, %c0_59] : memref<9x8x4xf32, #tpu.memory_space<vmem>>, vector<1x8x4xf32>
    %58 = vector.shape_cast %57 : vector<1x8x4xf32> to vector<8x4xf32>
    %cst_60 = arith.constant dense<0.000000e+00> : vector<8x256xf32>
    %59 = tpu.matmul %58, %56, %cst_60 {dimension_numbers = #tpu.dot_dimension_numbers<[1], [0], [0], [1], [0, 0, 1, 1], [], []>} : vector<8x4xf32>, vector<4x256xf32>, vector<8x256xf32> -> vector<8x256xf32>
    %60 = arith.addf %53, %59 : vector<8x256xf32>
    %c8 = arith.constant 8 : index
    %c0_61 = arith.constant 0 : index
    %c0_62 = arith.constant 0 : index
    %61 = vector.load %arg2[%c8, %c0_61, %c0_62] : memref<9x256x256xbf16, #tpu.memory_space<vmem>>, vector<1x256x256xbf16>
    %62 = vector.shape_cast %61 : vector<1x256x256xbf16> to vector<256x256xbf16>
    %cst_63 = arith.constant dense<0.000000e+00> : vector<4x256xf32>
    %63 = tpu.matmul %3, %62, %cst_63 {dimension_numbers = #tpu.dot_dimension_numbers<[1], [0], [0], [1], [0, 0, 1, 1], [], []>} : vector<4x256xbf16>, vector<256x256xbf16>, vector<4x256xf32> -> vector<4x256xf32>
    %c8_64 = arith.constant 8 : index
    %c0_65 = arith.constant 0 : index
    %c0_66 = arith.constant 0 : index
    %64 = vector.load %arg3[%c8_64, %c0_65, %c0_66] : memref<9x8x4xf32, #tpu.memory_space<vmem>>, vector<1x8x4xf32>
    %65 = vector.shape_cast %64 : vector<1x8x4xf32> to vector<8x4xf32>
    %cst_67 = arith.constant dense<0.000000e+00> : vector<8x256xf32>
    %66 = tpu.matmul %65, %63, %cst_67 {dimension_numbers = #tpu.dot_dimension_numbers<[1], [0], [0], [1], [0, 0, 1, 1], [], []>} : vector<8x4xf32>, vector<4x256xf32>, vector<8x256xf32> -> vector<8x256xf32>
    %67 = arith.addf %60, %66 : vector<8x256xf32>
    %68 = vector.broadcast %2 : vector<8x1xf32> to vector<8x256xf32>
    %69 = arith.addf %67, %68 : vector<8x256xf32>
    %cst_68 = arith.constant 0.000000e+00 : f32
    %70 = vector.broadcast %cst_68 : f32 to vector<8x256xf32>
    %71 = arith.maximumf %69, %70 : vector<8x256xf32>
    %72 = arith.truncf %71 : vector<8x256xf32> to vector<8x256xbf16>
    %c0_69 = arith.constant 0 : index
    %c0_70 = arith.constant 0 : index
    %c0_71 = arith.constant 0 : index
    %73 = vector.load %arg5[%c0_69, %c0_70, %c0_71] : memref<4x256x64xbf16, #tpu.memory_space<vmem>>, vector<1x256x64xbf16>
    %74 = vector.shape_cast %73 : vector<1x256x64xbf16> to vector<256x64xbf16>
    %cst_72 = arith.constant dense<0.000000e+00> : vector<8x64xf32>
    %75 = tpu.matmul %72, %74, %cst_72 {dimension_numbers = #tpu.dot_dimension_numbers<[1], [0], [0], [1], [0, 0, 1, 1], [], []>} : vector<8x256xbf16>, vector<256x64xbf16>, vector<8x64xf32> -> vector<8x64xf32>
    %c1_73 = arith.constant 1 : index
    %c0_74 = arith.constant 0 : index
    %c0_75 = arith.constant 0 : index
    %76 = vector.load %arg5[%c1_73, %c0_74, %c0_75] : memref<4x256x64xbf16, #tpu.memory_space<vmem>>, vector<1x256x64xbf16>
    %77 = vector.shape_cast %76 : vector<1x256x64xbf16> to vector<256x64xbf16>
    %cst_76 = arith.constant dense<0.000000e+00> : vector<8x64xf32>
    %78 = tpu.matmul %72, %77, %cst_76 {dimension_numbers = #tpu.dot_dimension_numbers<[1], [0], [0], [1], [0, 0, 1, 1], [], []>} : vector<8x256xbf16>, vector<256x64xbf16>, vector<8x64xf32> -> vector<8x64xf32>
    %79 = arith.maximumf %75, %78 : vector<8x64xf32>
    %c2_77 = arith.constant 2 : index
    %c0_78 = arith.constant 0 : index
    %c0_79 = arith.constant 0 : index
    %80 = vector.load %arg5[%c2_77, %c0_78, %c0_79] : memref<4x256x64xbf16, #tpu.memory_space<vmem>>, vector<1x256x64xbf16>
    %81 = vector.shape_cast %80 : vector<1x256x64xbf16> to vector<256x64xbf16>
    %cst_80 = arith.constant dense<0.000000e+00> : vector<8x64xf32>
    %82 = tpu.matmul %72, %81, %cst_80 {dimension_numbers = #tpu.dot_dimension_numbers<[1], [0], [0], [1], [0, 0, 1, 1], [], []>} : vector<8x256xbf16>, vector<256x64xbf16>, vector<8x64xf32> -> vector<8x64xf32>
    %83 = arith.maximumf %79, %82 : vector<8x64xf32>
    %c3_81 = arith.constant 3 : index
    %c0_82 = arith.constant 0 : index
    %c0_83 = arith.constant 0 : index
    %84 = vector.load %arg5[%c3_81, %c0_82, %c0_83] : memref<4x256x64xbf16, #tpu.memory_space<vmem>>, vector<1x256x64xbf16>
    %85 = vector.shape_cast %84 : vector<1x256x64xbf16> to vector<256x64xbf16>
    %cst_84 = arith.constant dense<0.000000e+00> : vector<8x64xf32>
    %86 = tpu.matmul %72, %85, %cst_84 {dimension_numbers = #tpu.dot_dimension_numbers<[1], [0], [0], [1], [0, 0, 1, 1], [], []>} : vector<8x256xbf16>, vector<256x64xbf16>, vector<8x64xf32> -> vector<8x64xf32>
    %87 = arith.maximumf %83, %86 : vector<8x64xf32>
    %c0_85 = arith.constant 0 : index
    %c0_86 = arith.constant 0 : index
    %88 = vector.load %arg8[%c0_85, %c0_86] : memref<16x1xf32, #tpu.memory_space<vmem>>, vector<16x1xf32>
    %89 = arith.truncf %87 : vector<8x64xf32> to vector<8x64xbf16>
    %cst_87 = arith.constant 0.000000e+00 : f32
    %90 = vector.broadcast %cst_87 : f32 to vector<16x64xf32>
    %c0_88 = arith.constant 0 : index
    %c0_89 = arith.constant 0 : index
    %c0_90 = arith.constant 0 : index
    %91 = vector.load %arg6[%c0_88, %c0_89, %c0_90] : memref<9x64x64xbf16, #tpu.memory_space<vmem>>, vector<1x64x64xbf16>
    %92 = vector.shape_cast %91 : vector<1x64x64xbf16> to vector<64x64xbf16>
    %cst_91 = arith.constant dense<0.000000e+00> : vector<8x64xf32>
    %93 = tpu.matmul %89, %92, %cst_91 {dimension_numbers = #tpu.dot_dimension_numbers<[1], [0], [0], [1], [0, 0, 1, 1], [], []>} : vector<8x64xbf16>, vector<64x64xbf16>, vector<8x64xf32> -> vector<8x64xf32>
    %c0_92 = arith.constant 0 : index
    %c0_93 = arith.constant 0 : index
    %c0_94 = arith.constant 0 : index
    %94 = vector.load %arg7[%c0_92, %c0_93, %c0_94] : memref<9x16x8xf32, #tpu.memory_space<vmem>>, vector<1x16x8xf32>
    %95 = vector.shape_cast %94 : vector<1x16x8xf32> to vector<16x8xf32>
    %cst_95 = arith.constant dense<0.000000e+00> : vector<16x64xf32>
    %96 = tpu.matmul %95, %93, %cst_95 {dimension_numbers = #tpu.dot_dimension_numbers<[1], [0], [0], [1], [0, 0, 1, 1], [], []>} : vector<16x8xf32>, vector<8x64xf32>, vector<16x64xf32> -> vector<16x64xf32>
    %97 = arith.addf %90, %96 : vector<16x64xf32>
    %c1_96 = arith.constant 1 : index
    %c0_97 = arith.constant 0 : index
    %c0_98 = arith.constant 0 : index
    %98 = vector.load %arg6[%c1_96, %c0_97, %c0_98] : memref<9x64x64xbf16, #tpu.memory_space<vmem>>, vector<1x64x64xbf16>
    %99 = vector.shape_cast %98 : vector<1x64x64xbf16> to vector<64x64xbf16>
    %cst_99 = arith.constant dense<0.000000e+00> : vector<8x64xf32>
    %100 = tpu.matmul %89, %99, %cst_99 {dimension_numbers = #tpu.dot_dimension_numbers<[1], [0], [0], [1], [0, 0, 1, 1], [], []>} : vector<8x64xbf16>, vector<64x64xbf16>, vector<8x64xf32> -> vector<8x64xf32>
    %c1_100 = arith.constant 1 : index
    %c0_101 = arith.constant 0 : index
    %c0_102 = arith.constant 0 : index
    %101 = vector.load %arg7[%c1_100, %c0_101, %c0_102] : memref<9x16x8xf32, #tpu.memory_space<vmem>>, vector<1x16x8xf32>
    %102 = vector.shape_cast %101 : vector<1x16x8xf32> to vector<16x8xf32>
    %cst_103 = arith.constant dense<0.000000e+00> : vector<16x64xf32>
    %103 = tpu.matmul %102, %100, %cst_103 {dimension_numbers = #tpu.dot_dimension_numbers<[1], [0], [0], [1], [0, 0, 1, 1], [], []>} : vector<16x8xf32>, vector<8x64xf32>, vector<16x64xf32> -> vector<16x64xf32>
    %104 = arith.addf %97, %103 : vector<16x64xf32>
    %c2_104 = arith.constant 2 : index
    %c0_105 = arith.constant 0 : index
    %c0_106 = arith.constant 0 : index
    %105 = vector.load %arg6[%c2_104, %c0_105, %c0_106] : memref<9x64x64xbf16, #tpu.memory_space<vmem>>, vector<1x64x64xbf16>
    %106 = vector.shape_cast %105 : vector<1x64x64xbf16> to vector<64x64xbf16>
    %cst_107 = arith.constant dense<0.000000e+00> : vector<8x64xf32>
    %107 = tpu.matmul %89, %106, %cst_107 {dimension_numbers = #tpu.dot_dimension_numbers<[1], [0], [0], [1], [0, 0, 1, 1], [], []>} : vector<8x64xbf16>, vector<64x64xbf16>, vector<8x64xf32> -> vector<8x64xf32>
    %c2_108 = arith.constant 2 : index
    %c0_109 = arith.constant 0 : index
    %c0_110 = arith.constant 0 : index
    %108 = vector.load %arg7[%c2_108, %c0_109, %c0_110] : memref<9x16x8xf32, #tpu.memory_space<vmem>>, vector<1x16x8xf32>
    %109 = vector.shape_cast %108 : vector<1x16x8xf32> to vector<16x8xf32>
    %cst_111 = arith.constant dense<0.000000e+00> : vector<16x64xf32>
    %110 = tpu.matmul %109, %107, %cst_111 {dimension_numbers = #tpu.dot_dimension_numbers<[1], [0], [0], [1], [0, 0, 1, 1], [], []>} : vector<16x8xf32>, vector<8x64xf32>, vector<16x64xf32> -> vector<16x64xf32>
    %111 = arith.addf %104, %110 : vector<16x64xf32>
    %c3_112 = arith.constant 3 : index
    %c0_113 = arith.constant 0 : index
    %c0_114 = arith.constant 0 : index
    %112 = vector.load %arg6[%c3_112, %c0_113, %c0_114] : memref<9x64x64xbf16, #tpu.memory_space<vmem>>, vector<1x64x64xbf16>
    %113 = vector.shape_cast %112 : vector<1x64x64xbf16> to vector<64x64xbf16>
    %cst_115 = arith.constant dense<0.000000e+00> : vector<8x64xf32>
    %114 = tpu.matmul %89, %113, %cst_115 {dimension_numbers = #tpu.dot_dimension_numbers<[1], [0], [0], [1], [0, 0, 1, 1], [], []>} : vector<8x64xbf16>, vector<64x64xbf16>, vector<8x64xf32> -> vector<8x64xf32>
    %c3_116 = arith.constant 3 : index
    %c0_117 = arith.constant 0 : index
    %c0_118 = arith.constant 0 : index
    %115 = vector.load %arg7[%c3_116, %c0_117, %c0_118] : memref<9x16x8xf32, #tpu.memory_space<vmem>>, vector<1x16x8xf32>
    %116 = vector.shape_cast %115 : vector<1x16x8xf32> to vector<16x8xf32>
    %cst_119 = arith.constant dense<0.000000e+00> : vector<16x64xf32>
    %117 = tpu.matmul %116, %114, %cst_119 {dimension_numbers = #tpu.dot_dimension_numbers<[1], [0], [0], [1], [0, 0, 1, 1], [], []>} : vector<16x8xf32>, vector<8x64xf32>, vector<16x64xf32> -> vector<16x64xf32>
    %118 = arith.addf %111, %117 : vector<16x64xf32>
    %c4_120 = arith.constant 4 : index
    %c0_121 = arith.constant 0 : index
    %c0_122 = arith.constant 0 : index
    %119 = vector.load %arg6[%c4_120, %c0_121, %c0_122] : memref<9x64x64xbf16, #tpu.memory_space<vmem>>, vector<1x64x64xbf16>
    %120 = vector.shape_cast %119 : vector<1x64x64xbf16> to vector<64x64xbf16>
    %cst_123 = arith.constant dense<0.000000e+00> : vector<8x64xf32>
    %121 = tpu.matmul %89, %120, %cst_123 {dimension_numbers = #tpu.dot_dimension_numbers<[1], [0], [0], [1], [0, 0, 1, 1], [], []>} : vector<8x64xbf16>, vector<64x64xbf16>, vector<8x64xf32> -> vector<8x64xf32>
    %c4_124 = arith.constant 4 : index
    %c0_125 = arith.constant 0 : index
    %c0_126 = arith.constant 0 : index
    %122 = vector.load %arg7[%c4_124, %c0_125, %c0_126] : memref<9x16x8xf32, #tpu.memory_space<vmem>>, vector<1x16x8xf32>
    %123 = vector.shape_cast %122 : vector<1x16x8xf32> to vector<16x8xf32>
    %cst_127 = arith.constant dense<0.000000e+00> : vector<16x64xf32>
    %124 = tpu.matmul %123, %121, %cst_127 {dimension_numbers = #tpu.dot_dimension_numbers<[1], [0], [0], [1], [0, 0, 1, 1], [], []>} : vector<16x8xf32>, vector<8x64xf32>, vector<16x64xf32> -> vector<16x64xf32>
    %125 = arith.addf %118, %124 : vector<16x64xf32>
    %c5_128 = arith.constant 5 : index
    %c0_129 = arith.constant 0 : index
    %c0_130 = arith.constant 0 : index
    %126 = vector.load %arg6[%c5_128, %c0_129, %c0_130] : memref<9x64x64xbf16, #tpu.memory_space<vmem>>, vector<1x64x64xbf16>
    %127 = vector.shape_cast %126 : vector<1x64x64xbf16> to vector<64x64xbf16>
    %cst_131 = arith.constant dense<0.000000e+00> : vector<8x64xf32>
    %128 = tpu.matmul %89, %127, %cst_131 {dimension_numbers = #tpu.dot_dimension_numbers<[1], [0], [0], [1], [0, 0, 1, 1], [], []>} : vector<8x64xbf16>, vector<64x64xbf16>, vector<8x64xf32> -> vector<8x64xf32>
    %c5_132 = arith.constant 5 : index
    %c0_133 = arith.constant 0 : index
    %c0_134 = arith.constant 0 : index
    %129 = vector.load %arg7[%c5_132, %c0_133, %c0_134] : memref<9x16x8xf32, #tpu.memory_space<vmem>>, vector<1x16x8xf32>
    %130 = vector.shape_cast %129 : vector<1x16x8xf32> to vector<16x8xf32>
    %cst_135 = arith.constant dense<0.000000e+00> : vector<16x64xf32>
    %131 = tpu.matmul %130, %128, %cst_135 {dimension_numbers = #tpu.dot_dimension_numbers<[1], [0], [0], [1], [0, 0, 1, 1], [], []>} : vector<16x8xf32>, vector<8x64xf32>, vector<16x64xf32> -> vector<16x64xf32>
    %132 = arith.addf %125, %131 : vector<16x64xf32>
    %c6_136 = arith.constant 6 : index
    %c0_137 = arith.constant 0 : index
    %c0_138 = arith.constant 0 : index
    %133 = vector.load %arg6[%c6_136, %c0_137, %c0_138] : memref<9x64x64xbf16, #tpu.memory_space<vmem>>, vector<1x64x64xbf16>
    %134 = vector.shape_cast %133 : vector<1x64x64xbf16> to vector<64x64xbf16>
    %cst_139 = arith.constant dense<0.000000e+00> : vector<8x64xf32>
    %135 = tpu.matmul %89, %134, %cst_139 {dimension_numbers = #tpu.dot_dimension_numbers<[1], [0], [0], [1], [0, 0, 1, 1], [], []>} : vector<8x64xbf16>, vector<64x64xbf16>, vector<8x64xf32> -> vector<8x64xf32>
    %c6_140 = arith.constant 6 : index
    %c0_141 = arith.constant 0 : index
    %c0_142 = arith.constant 0 : index
    %136 = vector.load %arg7[%c6_140, %c0_141, %c0_142] : memref<9x16x8xf32, #tpu.memory_space<vmem>>, vector<1x16x8xf32>
    %137 = vector.shape_cast %136 : vector<1x16x8xf32> to vector<16x8xf32>
    %cst_143 = arith.constant dense<0.000000e+00> : vector<16x64xf32>
    %138 = tpu.matmul %137, %135, %cst_143 {dimension_numbers = #tpu.dot_dimension_numbers<[1], [0], [0], [1], [0, 0, 1, 1], [], []>} : vector<16x8xf32>, vector<8x64xf32>, vector<16x64xf32> -> vector<16x64xf32>
    %139 = arith.addf %132, %138 : vector<16x64xf32>
    %c7_144 = arith.constant 7 : index
    %c0_145 = arith.constant 0 : index
    %c0_146 = arith.constant 0 : index
    %140 = vector.load %arg6[%c7_144, %c0_145, %c0_146] : memref<9x64x64xbf16, #tpu.memory_space<vmem>>, vector<1x64x64xbf16>
    %141 = vector.shape_cast %140 : vector<1x64x64xbf16> to vector<64x64xbf16>
    %cst_147 = arith.constant dense<0.000000e+00> : vector<8x64xf32>
    %142 = tpu.matmul %89, %141, %cst_147 {dimension_numbers = #tpu.dot_dimension_numbers<[1], [0], [0], [1], [0, 0, 1, 1], [], []>} : vector<8x64xbf16>, vector<64x64xbf16>, vector<8x64xf32> -> vector<8x64xf32>
    %c7_148 = arith.constant 7 : index
    %c0_149 = arith.constant 0 : index
    %c0_150 = arith.constant 0 : index
    %143 = vector.load %arg7[%c7_148, %c0_149, %c0_150] : memref<9x16x8xf32, #tpu.memory_space<vmem>>, vector<1x16x8xf32>
    %144 = vector.shape_cast %143 : vector<1x16x8xf32> to vector<16x8xf32>
    %cst_151 = arith.constant dense<0.000000e+00> : vector<16x64xf32>
    %145 = tpu.matmul %144, %142, %cst_151 {dimension_numbers = #tpu.dot_dimension_numbers<[1], [0], [0], [1], [0, 0, 1, 1], [], []>} : vector<16x8xf32>, vector<8x64xf32>, vector<16x64xf32> -> vector<16x64xf32>
    %146 = arith.addf %139, %145 : vector<16x64xf32>
    %c8_152 = arith.constant 8 : index
    %c0_153 = arith.constant 0 : index
    %c0_154 = arith.constant 0 : index
    %147 = vector.load %arg6[%c8_152, %c0_153, %c0_154] : memref<9x64x64xbf16, #tpu.memory_space<vmem>>, vector<1x64x64xbf16>
    %148 = vector.shape_cast %147 : vector<1x64x64xbf16> to vector<64x64xbf16>
    %cst_155 = arith.constant dense<0.000000e+00> : vector<8x64xf32>
    %149 = tpu.matmul %89, %148, %cst_155 {dimension_numbers = #tpu.dot_dimension_numbers<[1], [0], [0], [1], [0, 0, 1, 1], [], []>} : vector<8x64xbf16>, vector<64x64xbf16>, vector<8x64xf32> -> vector<8x64xf32>
    %c8_156 = arith.constant 8 : index
    %c0_157 = arith.constant 0 : index
    %c0_158 = arith.constant 0 : index
    %150 = vector.load %arg7[%c8_156, %c0_157, %c0_158] : memref<9x16x8xf32, #tpu.memory_space<vmem>>, vector<1x16x8xf32>
    %151 = vector.shape_cast %150 : vector<1x16x8xf32> to vector<16x8xf32>
    %cst_159 = arith.constant dense<0.000000e+00> : vector<16x64xf32>
    %152 = tpu.matmul %151, %149, %cst_159 {dimension_numbers = #tpu.dot_dimension_numbers<[1], [0], [0], [1], [0, 0, 1, 1], [], []>} : vector<16x8xf32>, vector<8x64xf32>, vector<16x64xf32> -> vector<16x64xf32>
    %153 = arith.addf %146, %152 : vector<16x64xf32>
    %154 = vector.broadcast %88 : vector<16x1xf32> to vector<16x64xf32>
    %155 = arith.addf %153, %154 : vector<16x64xf32>
    %cst_160 = arith.constant 0.000000e+00 : f32
    %156 = vector.broadcast %cst_160 : f32 to vector<16x64xf32>
    %157 = arith.maximumf %155, %156 : vector<16x64xf32>
    %158 = arith.truncf %157 : vector<16x64xf32> to vector<16x64xbf16>
    %c0_161 = arith.constant 0 : index
    %c0_162 = arith.constant 0 : index
    %c0_163 = arith.constant 0 : index
    %159 = vector.load %arg9[%c0_161, %c0_162, %c0_163] : memref<4x64x16xbf16, #tpu.memory_space<vmem>>, vector<1x64x16xbf16>
    %160 = vector.shape_cast %159 : vector<1x64x16xbf16> to vector<64x16xbf16>
    %cst_164 = arith.constant dense<0.000000e+00> : vector<16x16xf32>
    %161 = tpu.matmul %158, %160, %cst_164 {dimension_numbers = #tpu.dot_dimension_numbers<[1], [0], [0], [1], [0, 0, 1, 1], [], []>} : vector<16x64xbf16>, vector<64x16xbf16>, vector<16x16xf32> -> vector<16x16xf32>
    %c1_165 = arith.constant 1 : index
    %c0_166 = arith.constant 0 : index
    %c0_167 = arith.constant 0 : index
    %162 = vector.load %arg9[%c1_165, %c0_166, %c0_167] : memref<4x64x16xbf16, #tpu.memory_space<vmem>>, vector<1x64x16xbf16>
    %163 = vector.shape_cast %162 : vector<1x64x16xbf16> to vector<64x16xbf16>
    %cst_168 = arith.constant dense<0.000000e+00> : vector<16x16xf32>
    %164 = tpu.matmul %158, %163, %cst_168 {dimension_numbers = #tpu.dot_dimension_numbers<[1], [0], [0], [1], [0, 0, 1, 1], [], []>} : vector<16x64xbf16>, vector<64x16xbf16>, vector<16x16xf32> -> vector<16x16xf32>
    %165 = arith.maximumf %161, %164 : vector<16x16xf32>
    %c2_169 = arith.constant 2 : index
    %c0_170 = arith.constant 0 : index
    %c0_171 = arith.constant 0 : index
    %166 = vector.load %arg9[%c2_169, %c0_170, %c0_171] : memref<4x64x16xbf16, #tpu.memory_space<vmem>>, vector<1x64x16xbf16>
    %167 = vector.shape_cast %166 : vector<1x64x16xbf16> to vector<64x16xbf16>
    %cst_172 = arith.constant dense<0.000000e+00> : vector<16x16xf32>
    %168 = tpu.matmul %158, %167, %cst_172 {dimension_numbers = #tpu.dot_dimension_numbers<[1], [0], [0], [1], [0, 0, 1, 1], [], []>} : vector<16x64xbf16>, vector<64x16xbf16>, vector<16x16xf32> -> vector<16x16xf32>
    %169 = arith.maximumf %165, %168 : vector<16x16xf32>
    %c3_173 = arith.constant 3 : index
    %c0_174 = arith.constant 0 : index
    %c0_175 = arith.constant 0 : index
    %170 = vector.load %arg9[%c3_173, %c0_174, %c0_175] : memref<4x64x16xbf16, #tpu.memory_space<vmem>>, vector<1x64x16xbf16>
    %171 = vector.shape_cast %170 : vector<1x64x16xbf16> to vector<64x16xbf16>
    %cst_176 = arith.constant dense<0.000000e+00> : vector<16x16xf32>
    %172 = tpu.matmul %158, %171, %cst_176 {dimension_numbers = #tpu.dot_dimension_numbers<[1], [0], [0], [1], [0, 0, 1, 1], [], []>} : vector<16x64xbf16>, vector<64x16xbf16>, vector<16x16xf32> -> vector<16x16xf32>
    %173 = arith.maximumf %169, %172 : vector<16x16xf32>
    %c0_177 = arith.constant 0 : index
    %c0_178 = arith.constant 0 : index
    %174 = vector.load %arg12[%c0_177, %c0_178] : memref<32x1xf32, #tpu.memory_space<vmem>>, vector<32x1xf32>
    %175 = arith.truncf %173 : vector<16x16xf32> to vector<16x16xbf16>
    %cst_179 = arith.constant 0.000000e+00 : f32
    %176 = vector.broadcast %cst_179 : f32 to vector<32x16xf32>
    %c0_180 = arith.constant 0 : index
    %c0_181 = arith.constant 0 : index
    %c0_182 = arith.constant 0 : index
    %177 = vector.load %arg10[%c0_180, %c0_181, %c0_182] : memref<9x16x16xbf16, #tpu.memory_space<vmem>>, vector<1x16x16xbf16>
    %178 = vector.shape_cast %177 : vector<1x16x16xbf16> to vector<16x16xbf16>
    %cst_183 = arith.constant dense<0.000000e+00> : vector<16x16xf32>
    %179 = tpu.matmul %175, %178, %cst_183 {dimension_numbers = #tpu.dot_dimension_numbers<[1], [0], [0], [1], [0, 0, 1, 1], [], []>} : vector<16x16xbf16>, vector<16x16xbf16>, vector<16x16xf32> -> vector<16x16xf32>
    %c0_184 = arith.constant 0 : index
    %c0_185 = arith.constant 0 : index
    %c0_186 = arith.constant 0 : index
    %180 = vector.load %arg11[%c0_184, %c0_185, %c0_186] : memref<9x32x16xf32, #tpu.memory_space<vmem>>, vector<1x32x16xf32>
    %181 = vector.shape_cast %180 : vector<1x32x16xf32> to vector<32x16xf32>
    %cst_187 = arith.constant dense<0.000000e+00> : vector<32x16xf32>
    %182 = tpu.matmul %181, %179, %cst_187 {dimension_numbers = #tpu.dot_dimension_numbers<[1], [0], [0], [1], [0, 0, 1, 1], [], []>} : vector<32x16xf32>, vector<16x16xf32>, vector<32x16xf32> -> vector<32x16xf32>
    %183 = arith.addf %176, %182 : vector<32x16xf32>
    %c1_188 = arith.constant 1 : index
    %c0_189 = arith.constant 0 : index
    %c0_190 = arith.constant 0 : index
    %184 = vector.load %arg10[%c1_188, %c0_189, %c0_190] : memref<9x16x16xbf16, #tpu.memory_space<vmem>>, vector<1x16x16xbf16>
    %185 = vector.shape_cast %184 : vector<1x16x16xbf16> to vector<16x16xbf16>
    %cst_191 = arith.constant dense<0.000000e+00> : vector<16x16xf32>
    %186 = tpu.matmul %175, %185, %cst_191 {dimension_numbers = #tpu.dot_dimension_numbers<[1], [0], [0], [1], [0, 0, 1, 1], [], []>} : vector<16x16xbf16>, vector<16x16xbf16>, vector<16x16xf32> -> vector<16x16xf32>
    %c1_192 = arith.constant 1 : index
    %c0_193 = arith.constant 0 : index
    %c0_194 = arith.constant 0 : index
    %187 = vector.load %arg11[%c1_192, %c0_193, %c0_194] : memref<9x32x16xf32, #tpu.memory_space<vmem>>, vector<1x32x16xf32>
    %188 = vector.shape_cast %187 : vector<1x32x16xf32> to vector<32x16xf32>
    %cst_195 = arith.constant dense<0.000000e+00> : vector<32x16xf32>
    %189 = tpu.matmul %188, %186, %cst_195 {dimension_numbers = #tpu.dot_dimension_numbers<[1], [0], [0], [1], [0, 0, 1, 1], [], []>} : vector<32x16xf32>, vector<16x16xf32>, vector<32x16xf32> -> vector<32x16xf32>
    %190 = arith.addf %183, %189 : vector<32x16xf32>
    %c2_196 = arith.constant 2 : index
    %c0_197 = arith.constant 0 : index
    %c0_198 = arith.constant 0 : index
    %191 = vector.load %arg10[%c2_196, %c0_197, %c0_198] : memref<9x16x16xbf16, #tpu.memory_space<vmem>>, vector<1x16x16xbf16>
    %192 = vector.shape_cast %191 : vector<1x16x16xbf16> to vector<16x16xbf16>
    %cst_199 = arith.constant dense<0.000000e+00> : vector<16x16xf32>
    %193 = tpu.matmul %175, %192, %cst_199 {dimension_numbers = #tpu.dot_dimension_numbers<[1], [0], [0], [1], [0, 0, 1, 1], [], []>} : vector<16x16xbf16>, vector<16x16xbf16>, vector<16x16xf32> -> vector<16x16xf32>
    %c2_200 = arith.constant 2 : index
    %c0_201 = arith.constant 0 : index
    %c0_202 = arith.constant 0 : index
    %194 = vector.load %arg11[%c2_200, %c0_201, %c0_202] : memref<9x32x16xf32, #tpu.memory_space<vmem>>, vector<1x32x16xf32>
    %195 = vector.shape_cast %194 : vector<1x32x16xf32> to vector<32x16xf32>
    %cst_203 = arith.constant dense<0.000000e+00> : vector<32x16xf32>
    %196 = tpu.matmul %195, %193, %cst_203 {dimension_numbers = #tpu.dot_dimension_numbers<[1], [0], [0], [1], [0, 0, 1, 1], [], []>} : vector<32x16xf32>, vector<16x16xf32>, vector<32x16xf32> -> vector<32x16xf32>
    %197 = arith.addf %190, %196 : vector<32x16xf32>
    %c3_204 = arith.constant 3 : index
    %c0_205 = arith.constant 0 : index
    %c0_206 = arith.constant 0 : index
    %198 = vector.load %arg10[%c3_204, %c0_205, %c0_206] : memref<9x16x16xbf16, #tpu.memory_space<vmem>>, vector<1x16x16xbf16>
    %199 = vector.shape_cast %198 : vector<1x16x16xbf16> to vector<16x16xbf16>
    %cst_207 = arith.constant dense<0.000000e+00> : vector<16x16xf32>
    %200 = tpu.matmul %175, %199, %cst_207 {dimension_numbers = #tpu.dot_dimension_numbers<[1], [0], [0], [1], [0, 0, 1, 1], [], []>} : vector<16x16xbf16>, vector<16x16xbf16>, vector<16x16xf32> -> vector<16x16xf32>
    %c3_208 = arith.constant 3 : index
    %c0_209 = arith.constant 0 : index
    %c0_210 = arith.constant 0 : index
    %201 = vector.load %arg11[%c3_208, %c0_209, %c0_210] : memref<9x32x16xf32, #tpu.memory_space<vmem>>, vector<1x32x16xf32>
    %202 = vector.shape_cast %201 : vector<1x32x16xf32> to vector<32x16xf32>
    %cst_211 = arith.constant dense<0.000000e+00> : vector<32x16xf32>
    %203 = tpu.matmul %202, %200, %cst_211 {dimension_numbers = #tpu.dot_dimension_numbers<[1], [0], [0], [1], [0, 0, 1, 1], [], []>} : vector<32x16xf32>, vector<16x16xf32>, vector<32x16xf32> -> vector<32x16xf32>
    %204 = arith.addf %197, %203 : vector<32x16xf32>
    %c4_212 = arith.constant 4 : index
    %c0_213 = arith.constant 0 : index
    %c0_214 = arith.constant 0 : index
    %205 = vector.load %arg10[%c4_212, %c0_213, %c0_214] : memref<9x16x16xbf16, #tpu.memory_space<vmem>>, vector<1x16x16xbf16>
    %206 = vector.shape_cast %205 : vector<1x16x16xbf16> to vector<16x16xbf16>
    %cst_215 = arith.constant dense<0.000000e+00> : vector<16x16xf32>
    %207 = tpu.matmul %175, %206, %cst_215 {dimension_numbers = #tpu.dot_dimension_numbers<[1], [0], [0], [1], [0, 0, 1, 1], [], []>} : vector<16x16xbf16>, vector<16x16xbf16>, vector<16x16xf32> -> vector<16x16xf32>
    %c4_216 = arith.constant 4 : index
    %c0_217 = arith.constant 0 : index
    %c0_218 = arith.constant 0 : index
    %208 = vector.load %arg11[%c4_216, %c0_217, %c0_218] : memref<9x32x16xf32, #tpu.memory_space<vmem>>, vector<1x32x16xf32>
    %209 = vector.shape_cast %208 : vector<1x32x16xf32> to vector<32x16xf32>
    %cst_219 = arith.constant dense<0.000000e+00> : vector<32x16xf32>
    %210 = tpu.matmul %209, %207, %cst_219 {dimension_numbers = #tpu.dot_dimension_numbers<[1], [0], [0], [1], [0, 0, 1, 1], [], []>} : vector<32x16xf32>, vector<16x16xf32>, vector<32x16xf32> -> vector<32x16xf32>
    %211 = arith.addf %204, %210 : vector<32x16xf32>
    %c5_220 = arith.constant 5 : index
    %c0_221 = arith.constant 0 : index
    %c0_222 = arith.constant 0 : index
    %212 = vector.load %arg10[%c5_220, %c0_221, %c0_222] : memref<9x16x16xbf16, #tpu.memory_space<vmem>>, vector<1x16x16xbf16>
    %213 = vector.shape_cast %212 : vector<1x16x16xbf16> to vector<16x16xbf16>
    %cst_223 = arith.constant dense<0.000000e+00> : vector<16x16xf32>
    %214 = tpu.matmul %175, %213, %cst_223 {dimension_numbers = #tpu.dot_dimension_numbers<[1], [0], [0], [1], [0, 0, 1, 1], [], []>} : vector<16x16xbf16>, vector<16x16xbf16>, vector<16x16xf32> -> vector<16x16xf32>
    %c5_224 = arith.constant 5 : index
    %c0_225 = arith.constant 0 : index
    %c0_226 = arith.constant 0 : index
    %215 = vector.load %arg11[%c5_224, %c0_225, %c0_226] : memref<9x32x16xf32, #tpu.memory_space<vmem>>, vector<1x32x16xf32>
    %216 = vector.shape_cast %215 : vector<1x32x16xf32> to vector<32x16xf32>
    %cst_227 = arith.constant dense<0.000000e+00> : vector<32x16xf32>
    %217 = tpu.matmul %216, %214, %cst_227 {dimension_numbers = #tpu.dot_dimension_numbers<[1], [0], [0], [1], [0, 0, 1, 1], [], []>} : vector<32x16xf32>, vector<16x16xf32>, vector<32x16xf32> -> vector<32x16xf32>
    %218 = arith.addf %211, %217 : vector<32x16xf32>
    %c6_228 = arith.constant 6 : index
    %c0_229 = arith.constant 0 : index
    %c0_230 = arith.constant 0 : index
    %219 = vector.load %arg10[%c6_228, %c0_229, %c0_230] : memref<9x16x16xbf16, #tpu.memory_space<vmem>>, vector<1x16x16xbf16>
    %220 = vector.shape_cast %219 : vector<1x16x16xbf16> to vector<16x16xbf16>
    %cst_231 = arith.constant dense<0.000000e+00> : vector<16x16xf32>
    %221 = tpu.matmul %175, %220, %cst_231 {dimension_numbers = #tpu.dot_dimension_numbers<[1], [0], [0], [1], [0, 0, 1, 1], [], []>} : vector<16x16xbf16>, vector<16x16xbf16>, vector<16x16xf32> -> vector<16x16xf32>
    %c6_232 = arith.constant 6 : index
    %c0_233 = arith.constant 0 : index
    %c0_234 = arith.constant 0 : index
    %222 = vector.load %arg11[%c6_232, %c0_233, %c0_234] : memref<9x32x16xf32, #tpu.memory_space<vmem>>, vector<1x32x16xf32>
    %223 = vector.shape_cast %222 : vector<1x32x16xf32> to vector<32x16xf32>
    %cst_235 = arith.constant dense<0.000000e+00> : vector<32x16xf32>
    %224 = tpu.matmul %223, %221, %cst_235 {dimension_numbers = #tpu.dot_dimension_numbers<[1], [0], [0], [1], [0, 0, 1, 1], [], []>} : vector<32x16xf32>, vector<16x16xf32>, vector<32x16xf32> -> vector<32x16xf32>
    %225 = arith.addf %218, %224 : vector<32x16xf32>
    %c7_236 = arith.constant 7 : index
    %c0_237 = arith.constant 0 : index
    %c0_238 = arith.constant 0 : index
    %226 = vector.load %arg10[%c7_236, %c0_237, %c0_238] : memref<9x16x16xbf16, #tpu.memory_space<vmem>>, vector<1x16x16xbf16>
    %227 = vector.shape_cast %226 : vector<1x16x16xbf16> to vector<16x16xbf16>
    %cst_239 = arith.constant dense<0.000000e+00> : vector<16x16xf32>
    %228 = tpu.matmul %175, %227, %cst_239 {dimension_numbers = #tpu.dot_dimension_numbers<[1], [0], [0], [1], [0, 0, 1, 1], [], []>} : vector<16x16xbf16>, vector<16x16xbf16>, vector<16x16xf32> -> vector<16x16xf32>
    %c7_240 = arith.constant 7 : index
    %c0_241 = arith.constant 0 : index
    %c0_242 = arith.constant 0 : index
    %229 = vector.load %arg11[%c7_240, %c0_241, %c0_242] : memref<9x32x16xf32, #tpu.memory_space<vmem>>, vector<1x32x16xf32>
    %230 = vector.shape_cast %229 : vector<1x32x16xf32> to vector<32x16xf32>
    %cst_243 = arith.constant dense<0.000000e+00> : vector<32x16xf32>
    %231 = tpu.matmul %230, %228, %cst_243 {dimension_numbers = #tpu.dot_dimension_numbers<[1], [0], [0], [1], [0, 0, 1, 1], [], []>} : vector<32x16xf32>, vector<16x16xf32>, vector<32x16xf32> -> vector<32x16xf32>
    %232 = arith.addf %225, %231 : vector<32x16xf32>
    %c8_244 = arith.constant 8 : index
    %c0_245 = arith.constant 0 : index
    %c0_246 = arith.constant 0 : index
    %233 = vector.load %arg10[%c8_244, %c0_245, %c0_246] : memref<9x16x16xbf16, #tpu.memory_space<vmem>>, vector<1x16x16xbf16>
    %234 = vector.shape_cast %233 : vector<1x16x16xbf16> to vector<16x16xbf16>
    %cst_247 = arith.constant dense<0.000000e+00> : vector<16x16xf32>
    %235 = tpu.matmul %175, %234, %cst_247 {dimension_numbers = #tpu.dot_dimension_numbers<[1], [0], [0], [1], [0, 0, 1, 1], [], []>} : vector<16x16xbf16>, vector<16x16xbf16>, vector<16x16xf32> -> vector<16x16xf32>
    %c8_248 = arith.constant 8 : index
    %c0_249 = arith.constant 0 : index
    %c0_250 = arith.constant 0 : index
    %236 = vector.load %arg11[%c8_248, %c0_249, %c0_250] : memref<9x32x16xf32, #tpu.memory_space<vmem>>, vector<1x32x16xf32>
    %237 = vector.shape_cast %236 : vector<1x32x16xf32> to vector<32x16xf32>
    %cst_251 = arith.constant dense<0.000000e+00> : vector<32x16xf32>
    %238 = tpu.matmul %237, %235, %cst_251 {dimension_numbers = #tpu.dot_dimension_numbers<[1], [0], [0], [1], [0, 0, 1, 1], [], []>} : vector<32x16xf32>, vector<16x16xf32>, vector<32x16xf32> -> vector<32x16xf32>
    %239 = arith.addf %232, %238 : vector<32x16xf32>
    %240 = vector.broadcast %174 : vector<32x1xf32> to vector<32x16xf32>
    %241 = arith.addf %239, %240 : vector<32x16xf32>
    %cst_252 = arith.constant 0.000000e+00 : f32
    %242 = vector.broadcast %cst_252 : f32 to vector<32x16xf32>
    %243 = arith.maximumf %241, %242 : vector<32x16xf32>
    %244 = arith.truncf %243 : vector<32x16xf32> to vector<32x16xbf16>
    %c0_253 = arith.constant 0 : index
    %c0_254 = arith.constant 0 : index
    %245 = vector.load %arg13[%c0_253, %c0_254] : memref<16x64xbf16, #tpu.memory_space<vmem>>, vector<16x64xbf16>
    %cst_255 = arith.constant dense<0.000000e+00> : vector<32x64xf32>
    %246 = tpu.matmul %244, %245, %cst_255 {dimension_numbers = #tpu.dot_dimension_numbers<[1], [0], [0], [1], [0, 0, 1, 1], [], []>} : vector<32x16xbf16>, vector<16x64xbf16>, vector<32x64xf32> -> vector<32x64xf32>
    %c0_256 = arith.constant 0 : index
    %c0_257 = arith.constant 0 : index
    %247 = vector.load %arg16[%c0_256, %c0_257] : memref<16x1xf32, #tpu.memory_space<vmem>>, vector<16x1xf32>
    %248 = arith.truncf %246 : vector<32x64xf32> to vector<32x64xbf16>
    %249 = arith.truncf %157 : vector<16x64xf32> to vector<16x64xbf16>
    %cst_258 = arith.constant 0.000000e+00 : f32
    %250 = vector.broadcast %cst_258 : f32 to vector<16x64xf32>
    %c0_259 = arith.constant 0 : index
    %c0_260 = arith.constant 0 : index
    %c0_261 = arith.constant 0 : index
    %251 = vector.load %arg6[%c0_259, %c0_260, %c0_261] : memref<9x64x64xbf16, #tpu.memory_space<vmem>>, vector<1x64x64xbf16>
    %252 = vector.shape_cast %251 : vector<1x64x64xbf16> to vector<64x64xbf16>
    %cst_262 = arith.constant dense<0.000000e+00> : vector<32x64xf32>
    %253 = tpu.matmul %248, %252, %cst_262 {dimension_numbers = #tpu.dot_dimension_numbers<[1], [0], [0], [1], [0, 0, 1, 1], [], []>} : vector<32x64xbf16>, vector<64x64xbf16>, vector<32x64xf32> -> vector<32x64xf32>
    %c0_263 = arith.constant 0 : index
    %c0_264 = arith.constant 0 : index
    %c0_265 = arith.constant 0 : index
    %254 = vector.load %arg14[%c0_263, %c0_264, %c0_265] : memref<9x16x32xf32, #tpu.memory_space<vmem>>, vector<1x16x32xf32>
    %255 = vector.shape_cast %254 : vector<1x16x32xf32> to vector<16x32xf32>
    %cst_266 = arith.constant dense<0.000000e+00> : vector<16x64xf32>
    %256 = tpu.matmul %255, %253, %cst_266 {dimension_numbers = #tpu.dot_dimension_numbers<[1], [0], [0], [1], [0, 0, 1, 1], [], []>} : vector<16x32xf32>, vector<32x64xf32>, vector<16x64xf32> -> vector<16x64xf32>
    %257 = arith.addf %250, %256 : vector<16x64xf32>
    %cst_267 = arith.constant dense<0.000000e+00> : vector<16x64xf32>
    %258 = tpu.matmul %249, %252, %cst_267 {dimension_numbers = #tpu.dot_dimension_numbers<[1], [0], [0], [1], [0, 0, 1, 1], [], []>} : vector<16x64xbf16>, vector<64x64xbf16>, vector<16x64xf32> -> vector<16x64xf32>
    %c0_268 = arith.constant 0 : index
    %c0_269 = arith.constant 0 : index
    %c0_270 = arith.constant 0 : index
    %259 = vector.load %arg15[%c0_268, %c0_269, %c0_270] : memref<9x16x16xf32, #tpu.memory_space<vmem>>, vector<1x16x16xf32>
    %260 = vector.shape_cast %259 : vector<1x16x16xf32> to vector<16x16xf32>
    %cst_271 = arith.constant dense<0.000000e+00> : vector<16x64xf32>
    %261 = tpu.matmul %260, %258, %cst_271 {dimension_numbers = #tpu.dot_dimension_numbers<[1], [0], [0], [1], [0, 0, 1, 1], [], []>} : vector<16x16xf32>, vector<16x64xf32>, vector<16x64xf32> -> vector<16x64xf32>
    %262 = arith.addf %257, %261 : vector<16x64xf32>
    %c1_272 = arith.constant 1 : index
    %c0_273 = arith.constant 0 : index
    %c0_274 = arith.constant 0 : index
    %263 = vector.load %arg6[%c1_272, %c0_273, %c0_274] : memref<9x64x64xbf16, #tpu.memory_space<vmem>>, vector<1x64x64xbf16>
    %264 = vector.shape_cast %263 : vector<1x64x64xbf16> to vector<64x64xbf16>
    %cst_275 = arith.constant dense<0.000000e+00> : vector<32x64xf32>
    %265 = tpu.matmul %248, %264, %cst_275 {dimension_numbers = #tpu.dot_dimension_numbers<[1], [0], [0], [1], [0, 0, 1, 1], [], []>} : vector<32x64xbf16>, vector<64x64xbf16>, vector<32x64xf32> -> vector<32x64xf32>
    %c1_276 = arith.constant 1 : index
    %c0_277 = arith.constant 0 : index
    %c0_278 = arith.constant 0 : index
    %266 = vector.load %arg14[%c1_276, %c0_277, %c0_278] : memref<9x16x32xf32, #tpu.memory_space<vmem>>, vector<1x16x32xf32>
    %267 = vector.shape_cast %266 : vector<1x16x32xf32> to vector<16x32xf32>
    %cst_279 = arith.constant dense<0.000000e+00> : vector<16x64xf32>
    %268 = tpu.matmul %267, %265, %cst_279 {dimension_numbers = #tpu.dot_dimension_numbers<[1], [0], [0], [1], [0, 0, 1, 1], [], []>} : vector<16x32xf32>, vector<32x64xf32>, vector<16x64xf32> -> vector<16x64xf32>
    %269 = arith.addf %262, %268 : vector<16x64xf32>
    %cst_280 = arith.constant dense<0.000000e+00> : vector<16x64xf32>
    %270 = tpu.matmul %249, %264, %cst_280 {dimension_numbers = #tpu.dot_dimension_numbers<[1], [0], [0], [1], [0, 0, 1, 1], [], []>} : vector<16x64xbf16>, vector<64x64xbf16>, vector<16x64xf32> -> vector<16x64xf32>
    %c1_281 = arith.constant 1 : index
    %c0_282 = arith.constant 0 : index
    %c0_283 = arith.constant 0 : index
    %271 = vector.load %arg15[%c1_281, %c0_282, %c0_283] : memref<9x16x16xf32, #tpu.memory_space<vmem>>, vector<1x16x16xf32>
    %272 = vector.shape_cast %271 : vector<1x16x16xf32> to vector<16x16xf32>
    %cst_284 = arith.constant dense<0.000000e+00> : vector<16x64xf32>
    %273 = tpu.matmul %272, %270, %cst_284 {dimension_numbers = #tpu.dot_dimension_numbers<[1], [0], [0], [1], [0, 0, 1, 1], [], []>} : vector<16x16xf32>, vector<16x64xf32>, vector<16x64xf32> -> vector<16x64xf32>
    %274 = arith.addf %269, %273 : vector<16x64xf32>
    %c2_285 = arith.constant 2 : index
    %c0_286 = arith.constant 0 : index
    %c0_287 = arith.constant 0 : index
    %275 = vector.load %arg6[%c2_285, %c0_286, %c0_287] : memref<9x64x64xbf16, #tpu.memory_space<vmem>>, vector<1x64x64xbf16>
    %276 = vector.shape_cast %275 : vector<1x64x64xbf16> to vector<64x64xbf16>
    %cst_288 = arith.constant dense<0.000000e+00> : vector<32x64xf32>
    %277 = tpu.matmul %248, %276, %cst_288 {dimension_numbers = #tpu.dot_dimension_numbers<[1], [0], [0], [1], [0, 0, 1, 1], [], []>} : vector<32x64xbf16>, vector<64x64xbf16>, vector<32x64xf32> -> vector<32x64xf32>
    %c2_289 = arith.constant 2 : index
    %c0_290 = arith.constant 0 : index
    %c0_291 = arith.constant 0 : index
    %278 = vector.load %arg14[%c2_289, %c0_290, %c0_291] : memref<9x16x32xf32, #tpu.memory_space<vmem>>, vector<1x16x32xf32>
    %279 = vector.shape_cast %278 : vector<1x16x32xf32> to vector<16x32xf32>
    %cst_292 = arith.constant dense<0.000000e+00> : vector<16x64xf32>
    %280 = tpu.matmul %279, %277, %cst_292 {dimension_numbers = #tpu.dot_dimension_numbers<[1], [0], [0], [1], [0, 0, 1, 1], [], []>} : vector<16x32xf32>, vector<32x64xf32>, vector<16x64xf32> -> vector<16x64xf32>
    %281 = arith.addf %274, %280 : vector<16x64xf32>
    %cst_293 = arith.constant dense<0.000000e+00> : vector<16x64xf32>
    %282 = tpu.matmul %249, %276, %cst_293 {dimension_numbers = #tpu.dot_dimension_numbers<[1], [0], [0], [1], [0, 0, 1, 1], [], []>} : vector<16x64xbf16>, vector<64x64xbf16>, vector<16x64xf32> -> vector<16x64xf32>
    %c2_294 = arith.constant 2 : index
    %c0_295 = arith.constant 0 : index
    %c0_296 = arith.constant 0 : index
    %283 = vector.load %arg15[%c2_294, %c0_295, %c0_296] : memref<9x16x16xf32, #tpu.memory_space<vmem>>, vector<1x16x16xf32>
    %284 = vector.shape_cast %283 : vector<1x16x16xf32> to vector<16x16xf32>
    %cst_297 = arith.constant dense<0.000000e+00> : vector<16x64xf32>
    %285 = tpu.matmul %284, %282, %cst_297 {dimension_numbers = #tpu.dot_dimension_numbers<[1], [0], [0], [1], [0, 0, 1, 1], [], []>} : vector<16x16xf32>, vector<16x64xf32>, vector<16x64xf32> -> vector<16x64xf32>
    %286 = arith.addf %281, %285 : vector<16x64xf32>
    %c3_298 = arith.constant 3 : index
    %c0_299 = arith.constant 0 : index
    %c0_300 = arith.constant 0 : index
    %287 = vector.load %arg6[%c3_298, %c0_299, %c0_300] : memref<9x64x64xbf16, #tpu.memory_space<vmem>>, vector<1x64x64xbf16>
    %288 = vector.shape_cast %287 : vector<1x64x64xbf16> to vector<64x64xbf16>
    %cst_301 = arith.constant dense<0.000000e+00> : vector<32x64xf32>
    %289 = tpu.matmul %248, %288, %cst_301 {dimension_numbers = #tpu.dot_dimension_numbers<[1], [0], [0], [1], [0, 0, 1, 1], [], []>} : vector<32x64xbf16>, vector<64x64xbf16>, vector<32x64xf32> -> vector<32x64xf32>
    %c3_302 = arith.constant 3 : index
    %c0_303 = arith.constant 0 : index
    %c0_304 = arith.constant 0 : index
    %290 = vector.load %arg14[%c3_302, %c0_303, %c0_304] : memref<9x16x32xf32, #tpu.memory_space<vmem>>, vector<1x16x32xf32>
    %291 = vector.shape_cast %290 : vector<1x16x32xf32> to vector<16x32xf32>
    %cst_305 = arith.constant dense<0.000000e+00> : vector<16x64xf32>
    %292 = tpu.matmul %291, %289, %cst_305 {dimension_numbers = #tpu.dot_dimension_numbers<[1], [0], [0], [1], [0, 0, 1, 1], [], []>} : vector<16x32xf32>, vector<32x64xf32>, vector<16x64xf32> -> vector<16x64xf32>
    %293 = arith.addf %286, %292 : vector<16x64xf32>
    %cst_306 = arith.constant dense<0.000000e+00> : vector<16x64xf32>
    %294 = tpu.matmul %249, %288, %cst_306 {dimension_numbers = #tpu.dot_dimension_numbers<[1], [0], [0], [1], [0, 0, 1, 1], [], []>} : vector<16x64xbf16>, vector<64x64xbf16>, vector<16x64xf32> -> vector<16x64xf32>
    %c3_307 = arith.constant 3 : index
    %c0_308 = arith.constant 0 : index
    %c0_309 = arith.constant 0 : index
    %295 = vector.load %arg15[%c3_307, %c0_308, %c0_309] : memref<9x16x16xf32, #tpu.memory_space<vmem>>, vector<1x16x16xf32>
    %296 = vector.shape_cast %295 : vector<1x16x16xf32> to vector<16x16xf32>
    %cst_310 = arith.constant dense<0.000000e+00> : vector<16x64xf32>
    %297 = tpu.matmul %296, %294, %cst_310 {dimension_numbers = #tpu.dot_dimension_numbers<[1], [0], [0], [1], [0, 0, 1, 1], [], []>} : vector<16x16xf32>, vector<16x64xf32>, vector<16x64xf32> -> vector<16x64xf32>
    %298 = arith.addf %293, %297 : vector<16x64xf32>
    %c4_311 = arith.constant 4 : index
    %c0_312 = arith.constant 0 : index
    %c0_313 = arith.constant 0 : index
    %299 = vector.load %arg6[%c4_311, %c0_312, %c0_313] : memref<9x64x64xbf16, #tpu.memory_space<vmem>>, vector<1x64x64xbf16>
    %300 = vector.shape_cast %299 : vector<1x64x64xbf16> to vector<64x64xbf16>
    %cst_314 = arith.constant dense<0.000000e+00> : vector<32x64xf32>
    %301 = tpu.matmul %248, %300, %cst_314 {dimension_numbers = #tpu.dot_dimension_numbers<[1], [0], [0], [1], [0, 0, 1, 1], [], []>} : vector<32x64xbf16>, vector<64x64xbf16>, vector<32x64xf32> -> vector<32x64xf32>
    %c4_315 = arith.constant 4 : index
    %c0_316 = arith.constant 0 : index
    %c0_317 = arith.constant 0 : index
    %302 = vector.load %arg14[%c4_315, %c0_316, %c0_317] : memref<9x16x32xf32, #tpu.memory_space<vmem>>, vector<1x16x32xf32>
    %303 = vector.shape_cast %302 : vector<1x16x32xf32> to vector<16x32xf32>
    %cst_318 = arith.constant dense<0.000000e+00> : vector<16x64xf32>
    %304 = tpu.matmul %303, %301, %cst_318 {dimension_numbers = #tpu.dot_dimension_numbers<[1], [0], [0], [1], [0, 0, 1, 1], [], []>} : vector<16x32xf32>, vector<32x64xf32>, vector<16x64xf32> -> vector<16x64xf32>
    %305 = arith.addf %298, %304 : vector<16x64xf32>
    %cst_319 = arith.constant dense<0.000000e+00> : vector<16x64xf32>
    %306 = tpu.matmul %249, %300, %cst_319 {dimension_numbers = #tpu.dot_dimension_numbers<[1], [0], [0], [1], [0, 0, 1, 1], [], []>} : vector<16x64xbf16>, vector<64x64xbf16>, vector<16x64xf32> -> vector<16x64xf32>
    %c4_320 = arith.constant 4 : index
    %c0_321 = arith.constant 0 : index
    %c0_322 = arith.constant 0 : index
    %307 = vector.load %arg15[%c4_320, %c0_321, %c0_322] : memref<9x16x16xf32, #tpu.memory_space<vmem>>, vector<1x16x16xf32>
    %308 = vector.shape_cast %307 : vector<1x16x16xf32> to vector<16x16xf32>
    %cst_323 = arith.constant dense<0.000000e+00> : vector<16x64xf32>
    %309 = tpu.matmul %308, %306, %cst_323 {dimension_numbers = #tpu.dot_dimension_numbers<[1], [0], [0], [1], [0, 0, 1, 1], [], []>} : vector<16x16xf32>, vector<16x64xf32>, vector<16x64xf32> -> vector<16x64xf32>
    %310 = arith.addf %305, %309 : vector<16x64xf32>
    %c5_324 = arith.constant 5 : index
    %c0_325 = arith.constant 0 : index
    %c0_326 = arith.constant 0 : index
    %311 = vector.load %arg6[%c5_324, %c0_325, %c0_326] : memref<9x64x64xbf16, #tpu.memory_space<vmem>>, vector<1x64x64xbf16>
    %312 = vector.shape_cast %311 : vector<1x64x64xbf16> to vector<64x64xbf16>
    %cst_327 = arith.constant dense<0.000000e+00> : vector<32x64xf32>
    %313 = tpu.matmul %248, %312, %cst_327 {dimension_numbers = #tpu.dot_dimension_numbers<[1], [0], [0], [1], [0, 0, 1, 1], [], []>} : vector<32x64xbf16>, vector<64x64xbf16>, vector<32x64xf32> -> vector<32x64xf32>
    %c5_328 = arith.constant 5 : index
    %c0_329 = arith.constant 0 : index
    %c0_330 = arith.constant 0 : index
    %314 = vector.load %arg14[%c5_328, %c0_329, %c0_330] : memref<9x16x32xf32, #tpu.memory_space<vmem>>, vector<1x16x32xf32>
    %315 = vector.shape_cast %314 : vector<1x16x32xf32> to vector<16x32xf32>
    %cst_331 = arith.constant dense<0.000000e+00> : vector<16x64xf32>
    %316 = tpu.matmul %315, %313, %cst_331 {dimension_numbers = #tpu.dot_dimension_numbers<[1], [0], [0], [1], [0, 0, 1, 1], [], []>} : vector<16x32xf32>, vector<32x64xf32>, vector<16x64xf32> -> vector<16x64xf32>
    %317 = arith.addf %310, %316 : vector<16x64xf32>
    %cst_332 = arith.constant dense<0.000000e+00> : vector<16x64xf32>
    %318 = tpu.matmul %249, %312, %cst_332 {dimension_numbers = #tpu.dot_dimension_numbers<[1], [0], [0], [1], [0, 0, 1, 1], [], []>} : vector<16x64xbf16>, vector<64x64xbf16>, vector<16x64xf32> -> vector<16x64xf32>
    %c5_333 = arith.constant 5 : index
    %c0_334 = arith.constant 0 : index
    %c0_335 = arith.constant 0 : index
    %319 = vector.load %arg15[%c5_333, %c0_334, %c0_335] : memref<9x16x16xf32, #tpu.memory_space<vmem>>, vector<1x16x16xf32>
    %320 = vector.shape_cast %319 : vector<1x16x16xf32> to vector<16x16xf32>
    %cst_336 = arith.constant dense<0.000000e+00> : vector<16x64xf32>
    %321 = tpu.matmul %320, %318, %cst_336 {dimension_numbers = #tpu.dot_dimension_numbers<[1], [0], [0], [1], [0, 0, 1, 1], [], []>} : vector<16x16xf32>, vector<16x64xf32>, vector<16x64xf32> -> vector<16x64xf32>
    %322 = arith.addf %317, %321 : vector<16x64xf32>
    %c6_337 = arith.constant 6 : index
    %c0_338 = arith.constant 0 : index
    %c0_339 = arith.constant 0 : index
    %323 = vector.load %arg6[%c6_337, %c0_338, %c0_339] : memref<9x64x64xbf16, #tpu.memory_space<vmem>>, vector<1x64x64xbf16>
    %324 = vector.shape_cast %323 : vector<1x64x64xbf16> to vector<64x64xbf16>
    %cst_340 = arith.constant dense<0.000000e+00> : vector<32x64xf32>
    %325 = tpu.matmul %248, %324, %cst_340 {dimension_numbers = #tpu.dot_dimension_numbers<[1], [0], [0], [1], [0, 0, 1, 1], [], []>} : vector<32x64xbf16>, vector<64x64xbf16>, vector<32x64xf32> -> vector<32x64xf32>
    %c6_341 = arith.constant 6 : index
    %c0_342 = arith.constant 0 : index
    %c0_343 = arith.constant 0 : index
    %326 = vector.load %arg14[%c6_341, %c0_342, %c0_343] : memref<9x16x32xf32, #tpu.memory_space<vmem>>, vector<1x16x32xf32>
    %327 = vector.shape_cast %326 : vector<1x16x32xf32> to vector<16x32xf32>
    %cst_344 = arith.constant dense<0.000000e+00> : vector<16x64xf32>
    %328 = tpu.matmul %327, %325, %cst_344 {dimension_numbers = #tpu.dot_dimension_numbers<[1], [0], [0], [1], [0, 0, 1, 1], [], []>} : vector<16x32xf32>, vector<32x64xf32>, vector<16x64xf32> -> vector<16x64xf32>
    %329 = arith.addf %322, %328 : vector<16x64xf32>
    %cst_345 = arith.constant dense<0.000000e+00> : vector<16x64xf32>
    %330 = tpu.matmul %249, %324, %cst_345 {dimension_numbers = #tpu.dot_dimension_numbers<[1], [0], [0], [1], [0, 0, 1, 1], [], []>} : vector<16x64xbf16>, vector<64x64xbf16>, vector<16x64xf32> -> vector<16x64xf32>
    %c6_346 = arith.constant 6 : index
    %c0_347 = arith.constant 0 : index
    %c0_348 = arith.constant 0 : index
    %331 = vector.load %arg15[%c6_346, %c0_347, %c0_348] : memref<9x16x16xf32, #tpu.memory_space<vmem>>, vector<1x16x16xf32>
    %332 = vector.shape_cast %331 : vector<1x16x16xf32> to vector<16x16xf32>
    %cst_349 = arith.constant dense<0.000000e+00> : vector<16x64xf32>
    %333 = tpu.matmul %332, %330, %cst_349 {dimension_numbers = #tpu.dot_dimension_numbers<[1], [0], [0], [1], [0, 0, 1, 1], [], []>} : vector<16x16xf32>, vector<16x64xf32>, vector<16x64xf32> -> vector<16x64xf32>
    %334 = arith.addf %329, %333 : vector<16x64xf32>
    %c7_350 = arith.constant 7 : index
    %c0_351 = arith.constant 0 : index
    %c0_352 = arith.constant 0 : index
    %335 = vector.load %arg6[%c7_350, %c0_351, %c0_352] : memref<9x64x64xbf16, #tpu.memory_space<vmem>>, vector<1x64x64xbf16>
    %336 = vector.shape_cast %335 : vector<1x64x64xbf16> to vector<64x64xbf16>
    %cst_353 = arith.constant dense<0.000000e+00> : vector<32x64xf32>
    %337 = tpu.matmul %248, %336, %cst_353 {dimension_numbers = #tpu.dot_dimension_numbers<[1], [0], [0], [1], [0, 0, 1, 1], [], []>} : vector<32x64xbf16>, vector<64x64xbf16>, vector<32x64xf32> -> vector<32x64xf32>
    %c7_354 = arith.constant 7 : index
    %c0_355 = arith.constant 0 : index
    %c0_356 = arith.constant 0 : index
    %338 = vector.load %arg14[%c7_354, %c0_355, %c0_356] : memref<9x16x32xf32, #tpu.memory_space<vmem>>, vector<1x16x32xf32>
    %339 = vector.shape_cast %338 : vector<1x16x32xf32> to vector<16x32xf32>
    %cst_357 = arith.constant dense<0.000000e+00> : vector<16x64xf32>
    %340 = tpu.matmul %339, %337, %cst_357 {dimension_numbers = #tpu.dot_dimension_numbers<[1], [0], [0], [1], [0, 0, 1, 1], [], []>} : vector<16x32xf32>, vector<32x64xf32>, vector<16x64xf32> -> vector<16x64xf32>
    %341 = arith.addf %334, %340 : vector<16x64xf32>
    %cst_358 = arith.constant dense<0.000000e+00> : vector<16x64xf32>
    %342 = tpu.matmul %249, %336, %cst_358 {dimension_numbers = #tpu.dot_dimension_numbers<[1], [0], [0], [1], [0, 0, 1, 1], [], []>} : vector<16x64xbf16>, vector<64x64xbf16>, vector<16x64xf32> -> vector<16x64xf32>
    %c7_359 = arith.constant 7 : index
    %c0_360 = arith.constant 0 : index
    %c0_361 = arith.constant 0 : index
    %343 = vector.load %arg15[%c7_359, %c0_360, %c0_361] : memref<9x16x16xf32, #tpu.memory_space<vmem>>, vector<1x16x16xf32>
    %344 = vector.shape_cast %343 : vector<1x16x16xf32> to vector<16x16xf32>
    %cst_362 = arith.constant dense<0.000000e+00> : vector<16x64xf32>
    %345 = tpu.matmul %344, %342, %cst_362 {dimension_numbers = #tpu.dot_dimension_numbers<[1], [0], [0], [1], [0, 0, 1, 1], [], []>} : vector<16x16xf32>, vector<16x64xf32>, vector<16x64xf32> -> vector<16x64xf32>
    %346 = arith.addf %341, %345 : vector<16x64xf32>
    %c8_363 = arith.constant 8 : index
    %c0_364 = arith.constant 0 : index
    %c0_365 = arith.constant 0 : index
    %347 = vector.load %arg6[%c8_363, %c0_364, %c0_365] : memref<9x64x64xbf16, #tpu.memory_space<vmem>>, vector<1x64x64xbf16>
    %348 = vector.shape_cast %347 : vector<1x64x64xbf16> to vector<64x64xbf16>
    %cst_366 = arith.constant dense<0.000000e+00> : vector<32x64xf32>
    %349 = tpu.matmul %248, %348, %cst_366 {dimension_numbers = #tpu.dot_dimension_numbers<[1], [0], [0], [1], [0, 0, 1, 1], [], []>} : vector<32x64xbf16>, vector<64x64xbf16>, vector<32x64xf32> -> vector<32x64xf32>
    %c8_367 = arith.constant 8 : index
    %c0_368 = arith.constant 0 : index
    %c0_369 = arith.constant 0 : index
    %350 = vector.load %arg14[%c8_367, %c0_368, %c0_369] : memref<9x16x32xf32, #tpu.memory_space<vmem>>, vector<1x16x32xf32>
    %351 = vector.shape_cast %350 : vector<1x16x32xf32> to vector<16x32xf32>
    %cst_370 = arith.constant dense<0.000000e+00> : vector<16x64xf32>
    %352 = tpu.matmul %351, %349, %cst_370 {dimension_numbers = #tpu.dot_dimension_numbers<[1], [0], [0], [1], [0, 0, 1, 1], [], []>} : vector<16x32xf32>, vector<32x64xf32>, vector<16x64xf32> -> vector<16x64xf32>
    %353 = arith.addf %346, %352 : vector<16x64xf32>
    %cst_371 = arith.constant dense<0.000000e+00> : vector<16x64xf32>
    %354 = tpu.matmul %249, %348, %cst_371 {dimension_numbers = #tpu.dot_dimension_numbers<[1], [0], [0], [1], [0, 0, 1, 1], [], []>} : vector<16x64xbf16>, vector<64x64xbf16>, vector<16x64xf32> -> vector<16x64xf32>
    %c8_372 = arith.constant 8 : index
    %c0_373 = arith.constant 0 : index
    %c0_374 = arith.constant 0 : index
    %355 = vector.load %arg15[%c8_372, %c0_373, %c0_374] : memref<9x16x16xf32, #tpu.memory_space<vmem>>, vector<1x16x16xf32>
    %356 = vector.shape_cast %355 : vector<1x16x16xf32> to vector<16x16xf32>
    %cst_375 = arith.constant dense<0.000000e+00> : vector<16x64xf32>
    %357 = tpu.matmul %356, %354, %cst_375 {dimension_numbers = #tpu.dot_dimension_numbers<[1], [0], [0], [1], [0, 0, 1, 1], [], []>} : vector<16x16xf32>, vector<16x64xf32>, vector<16x64xf32> -> vector<16x64xf32>
    %358 = arith.addf %353, %357 : vector<16x64xf32>
    %359 = vector.broadcast %247 : vector<16x1xf32> to vector<16x64xf32>
    %360 = arith.addf %358, %359 : vector<16x64xf32>
    %cst_376 = arith.constant 0.000000e+00 : f32
    %361 = vector.broadcast %cst_376 : f32 to vector<16x64xf32>
    %362 = arith.maximumf %360, %361 : vector<16x64xf32>
    %363 = arith.truncf %362 : vector<16x64xf32> to vector<16x64xbf16>
    %c0_377 = arith.constant 0 : index
    %c0_378 = arith.constant 0 : index
    %364 = vector.load %arg17[%c0_377, %c0_378] : memref<64x256xbf16, #tpu.memory_space<vmem>>, vector<64x256xbf16>
    %cst_379 = arith.constant dense<0.000000e+00> : vector<16x256xf32>
    %365 = tpu.matmul %363, %364, %cst_379 {dimension_numbers = #tpu.dot_dimension_numbers<[1], [0], [0], [1], [0, 0, 1, 1], [], []>} : vector<16x64xbf16>, vector<64x256xbf16>, vector<16x256xf32> -> vector<16x256xf32>
    %c0_380 = arith.constant 0 : index
    %c0_381 = arith.constant 0 : index
    %366 = vector.load %arg20[%c0_380, %c0_381] : memref<8x1xf32, #tpu.memory_space<vmem>>, vector<8x1xf32>
    %367 = arith.truncf %365 : vector<16x256xf32> to vector<16x256xbf16>
    %368 = arith.truncf %71 : vector<8x256xf32> to vector<8x256xbf16>
    %cst_382 = arith.constant 0.000000e+00 : f32
    %369 = vector.broadcast %cst_382 : f32 to vector<8x256xf32>
    %c0_383 = arith.constant 0 : index
    %c0_384 = arith.constant 0 : index
    %c0_385 = arith.constant 0 : index
    %370 = vector.load %arg2[%c0_383, %c0_384, %c0_385] : memref<9x256x256xbf16, #tpu.memory_space<vmem>>, vector<1x256x256xbf16>
    %371 = vector.shape_cast %370 : vector<1x256x256xbf16> to vector<256x256xbf16>
    %cst_386 = arith.constant dense<0.000000e+00> : vector<16x256xf32>
    %372 = tpu.matmul %367, %371, %cst_386 {dimension_numbers = #tpu.dot_dimension_numbers<[1], [0], [0], [1], [0, 0, 1, 1], [], []>} : vector<16x256xbf16>, vector<256x256xbf16>, vector<16x256xf32> -> vector<16x256xf32>
    %c0_387 = arith.constant 0 : index
    %c0_388 = arith.constant 0 : index
    %c0_389 = arith.constant 0 : index
    %373 = vector.load %arg18[%c0_387, %c0_388, %c0_389] : memref<9x8x16xf32, #tpu.memory_space<vmem>>, vector<1x8x16xf32>
    %374 = vector.shape_cast %373 : vector<1x8x16xf32> to vector<8x16xf32>
    %cst_390 = arith.constant dense<0.000000e+00> : vector<8x256xf32>
    %375 = tpu.matmul %374, %372, %cst_390 {dimension_numbers = #tpu.dot_dimension_numbers<[1], [0], [0], [1], [0, 0, 1, 1], [], []>} : vector<8x16xf32>, vector<16x256xf32>, vector<8x256xf32> -> vector<8x256xf32>
    %376 = arith.addf %369, %375 : vector<8x256xf32>
    %cst_391 = arith.constant dense<0.000000e+00> : vector<8x256xf32>
    %377 = tpu.matmul %368, %371, %cst_391 {dimension_numbers = #tpu.dot_dimension_numbers<[1], [0], [0], [1], [0, 0, 1, 1], [], []>} : vector<8x256xbf16>, vector<256x256xbf16>, vector<8x256xf32> -> vector<8x256xf32>
    %c0_392 = arith.constant 0 : index
    %c0_393 = arith.constant 0 : index
    %c0_394 = arith.constant 0 : index
    %378 = vector.load %arg19[%c0_392, %c0_393, %c0_394] : memref<9x8x8xf32, #tpu.memory_space<vmem>>, vector<1x8x8xf32>
    %379 = vector.shape_cast %378 : vector<1x8x8xf32> to vector<8x8xf32>
    %cst_395 = arith.constant dense<0.000000e+00> : vector<8x256xf32>
    %380 = tpu.matmul %379, %377, %cst_395 {dimension_numbers = #tpu.dot_dimension_numbers<[1], [0], [0], [1], [0, 0, 1, 1], [], []>} : vector<8x8xf32>, vector<8x256xf32>, vector<8x256xf32> -> vector<8x256xf32>
    %381 = arith.addf %376, %380 : vector<8x256xf32>
    %c1_396 = arith.constant 1 : index
    %c0_397 = arith.constant 0 : index
    %c0_398 = arith.constant 0 : index
    %382 = vector.load %arg2[%c1_396, %c0_397, %c0_398] : memref<9x256x256xbf16, #tpu.memory_space<vmem>>, vector<1x256x256xbf16>
    %383 = vector.shape_cast %382 : vector<1x256x256xbf16> to vector<256x256xbf16>
    %cst_399 = arith.constant dense<0.000000e+00> : vector<16x256xf32>
    %384 = tpu.matmul %367, %383, %cst_399 {dimension_numbers = #tpu.dot_dimension_numbers<[1], [0], [0], [1], [0, 0, 1, 1], [], []>} : vector<16x256xbf16>, vector<256x256xbf16>, vector<16x256xf32> -> vector<16x256xf32>
    %c1_400 = arith.constant 1 : index
    %c0_401 = arith.constant 0 : index
    %c0_402 = arith.constant 0 : index
    %385 = vector.load %arg18[%c1_400, %c0_401, %c0_402] : memref<9x8x16xf32, #tpu.memory_space<vmem>>, vector<1x8x16xf32>
    %386 = vector.shape_cast %385 : vector<1x8x16xf32> to vector<8x16xf32>
    %cst_403 = arith.constant dense<0.000000e+00> : vector<8x256xf32>
    %387 = tpu.matmul %386, %384, %cst_403 {dimension_numbers = #tpu.dot_dimension_numbers<[1], [0], [0], [1], [0, 0, 1, 1], [], []>} : vector<8x16xf32>, vector<16x256xf32>, vector<8x256xf32> -> vector<8x256xf32>
    %388 = arith.addf %381, %387 : vector<8x256xf32>
    %cst_404 = arith.constant dense<0.000000e+00> : vector<8x256xf32>
    %389 = tpu.matmul %368, %383, %cst_404 {dimension_numbers = #tpu.dot_dimension_numbers<[1], [0], [0], [1], [0, 0, 1, 1], [], []>} : vector<8x256xbf16>, vector<256x256xbf16>, vector<8x256xf32> -> vector<8x256xf32>
    %c1_405 = arith.constant 1 : index
    %c0_406 = arith.constant 0 : index
    %c0_407 = arith.constant 0 : index
    %390 = vector.load %arg19[%c1_405, %c0_406, %c0_407] : memref<9x8x8xf32, #tpu.memory_space<vmem>>, vector<1x8x8xf32>
    %391 = vector.shape_cast %390 : vector<1x8x8xf32> to vector<8x8xf32>
    %cst_408 = arith.constant dense<0.000000e+00> : vector<8x256xf32>
    %392 = tpu.matmul %391, %389, %cst_408 {dimension_numbers = #tpu.dot_dimension_numbers<[1], [0], [0], [1], [0, 0, 1, 1], [], []>} : vector<8x8xf32>, vector<8x256xf32>, vector<8x256xf32> -> vector<8x256xf32>
    %393 = arith.addf %388, %392 : vector<8x256xf32>
    %c2_409 = arith.constant 2 : index
    %c0_410 = arith.constant 0 : index
    %c0_411 = arith.constant 0 : index
    %394 = vector.load %arg2[%c2_409, %c0_410, %c0_411] : memref<9x256x256xbf16, #tpu.memory_space<vmem>>, vector<1x256x256xbf16>
    %395 = vector.shape_cast %394 : vector<1x256x256xbf16> to vector<256x256xbf16>
    %cst_412 = arith.constant dense<0.000000e+00> : vector<16x256xf32>
    %396 = tpu.matmul %367, %395, %cst_412 {dimension_numbers = #tpu.dot_dimension_numbers<[1], [0], [0], [1], [0, 0, 1, 1], [], []>} : vector<16x256xbf16>, vector<256x256xbf16>, vector<16x256xf32> -> vector<16x256xf32>
    %c2_413 = arith.constant 2 : index
    %c0_414 = arith.constant 0 : index
    %c0_415 = arith.constant 0 : index
    %397 = vector.load %arg18[%c2_413, %c0_414, %c0_415] : memref<9x8x16xf32, #tpu.memory_space<vmem>>, vector<1x8x16xf32>
    %398 = vector.shape_cast %397 : vector<1x8x16xf32> to vector<8x16xf32>
    %cst_416 = arith.constant dense<0.000000e+00> : vector<8x256xf32>
    %399 = tpu.matmul %398, %396, %cst_416 {dimension_numbers = #tpu.dot_dimension_numbers<[1], [0], [0], [1], [0, 0, 1, 1], [], []>} : vector<8x16xf32>, vector<16x256xf32>, vector<8x256xf32> -> vector<8x256xf32>
    %400 = arith.addf %393, %399 : vector<8x256xf32>
    %cst_417 = arith.constant dense<0.000000e+00> : vector<8x256xf32>
    %401 = tpu.matmul %368, %395, %cst_417 {dimension_numbers = #tpu.dot_dimension_numbers<[1], [0], [0], [1], [0, 0, 1, 1], [], []>} : vector<8x256xbf16>, vector<256x256xbf16>, vector<8x256xf32> -> vector<8x256xf32>
    %c2_418 = arith.constant 2 : index
    %c0_419 = arith.constant 0 : index
    %c0_420 = arith.constant 0 : index
    %402 = vector.load %arg19[%c2_418, %c0_419, %c0_420] : memref<9x8x8xf32, #tpu.memory_space<vmem>>, vector<1x8x8xf32>
    %403 = vector.shape_cast %402 : vector<1x8x8xf32> to vector<8x8xf32>
    %cst_421 = arith.constant dense<0.000000e+00> : vector<8x256xf32>
    %404 = tpu.matmul %403, %401, %cst_421 {dimension_numbers = #tpu.dot_dimension_numbers<[1], [0], [0], [1], [0, 0, 1, 1], [], []>} : vector<8x8xf32>, vector<8x256xf32>, vector<8x256xf32> -> vector<8x256xf32>
    %405 = arith.addf %400, %404 : vector<8x256xf32>
    %c3_422 = arith.constant 3 : index
    %c0_423 = arith.constant 0 : index
    %c0_424 = arith.constant 0 : index
    %406 = vector.load %arg2[%c3_422, %c0_423, %c0_424] : memref<9x256x256xbf16, #tpu.memory_space<vmem>>, vector<1x256x256xbf16>
    %407 = vector.shape_cast %406 : vector<1x256x256xbf16> to vector<256x256xbf16>
    %cst_425 = arith.constant dense<0.000000e+00> : vector<16x256xf32>
    %408 = tpu.matmul %367, %407, %cst_425 {dimension_numbers = #tpu.dot_dimension_numbers<[1], [0], [0], [1], [0, 0, 1, 1], [], []>} : vector<16x256xbf16>, vector<256x256xbf16>, vector<16x256xf32> -> vector<16x256xf32>
    %c3_426 = arith.constant 3 : index
    %c0_427 = arith.constant 0 : index
    %c0_428 = arith.constant 0 : index
    %409 = vector.load %arg18[%c3_426, %c0_427, %c0_428] : memref<9x8x16xf32, #tpu.memory_space<vmem>>, vector<1x8x16xf32>
    %410 = vector.shape_cast %409 : vector<1x8x16xf32> to vector<8x16xf32>
    %cst_429 = arith.constant dense<0.000000e+00> : vector<8x256xf32>
    %411 = tpu.matmul %410, %408, %cst_429 {dimension_numbers = #tpu.dot_dimension_numbers<[1], [0], [0], [1], [0, 0, 1, 1], [], []>} : vector<8x16xf32>, vector<16x256xf32>, vector<8x256xf32> -> vector<8x256xf32>
    %412 = arith.addf %405, %411 : vector<8x256xf32>
    %cst_430 = arith.constant dense<0.000000e+00> : vector<8x256xf32>
    %413 = tpu.matmul %368, %407, %cst_430 {dimension_numbers = #tpu.dot_dimension_numbers<[1], [0], [0], [1], [0, 0, 1, 1], [], []>} : vector<8x256xbf16>, vector<256x256xbf16>, vector<8x256xf32> -> vector<8x256xf32>
    %c3_431 = arith.constant 3 : index
    %c0_432 = arith.constant 0 : index
    %c0_433 = arith.constant 0 : index
    %414 = vector.load %arg19[%c3_431, %c0_432, %c0_433] : memref<9x8x8xf32, #tpu.memory_space<vmem>>, vector<1x8x8xf32>
    %415 = vector.shape_cast %414 : vector<1x8x8xf32> to vector<8x8xf32>
    %cst_434 = arith.constant dense<0.000000e+00> : vector<8x256xf32>
    %416 = tpu.matmul %415, %413, %cst_434 {dimension_numbers = #tpu.dot_dimension_numbers<[1], [0], [0], [1], [0, 0, 1, 1], [], []>} : vector<8x8xf32>, vector<8x256xf32>, vector<8x256xf32> -> vector<8x256xf32>
    %417 = arith.addf %412, %416 : vector<8x256xf32>
    %c4_435 = arith.constant 4 : index
    %c0_436 = arith.constant 0 : index
    %c0_437 = arith.constant 0 : index
    %418 = vector.load %arg2[%c4_435, %c0_436, %c0_437] : memref<9x256x256xbf16, #tpu.memory_space<vmem>>, vector<1x256x256xbf16>
    %419 = vector.shape_cast %418 : vector<1x256x256xbf16> to vector<256x256xbf16>
    %cst_438 = arith.constant dense<0.000000e+00> : vector<16x256xf32>
    %420 = tpu.matmul %367, %419, %cst_438 {dimension_numbers = #tpu.dot_dimension_numbers<[1], [0], [0], [1], [0, 0, 1, 1], [], []>} : vector<16x256xbf16>, vector<256x256xbf16>, vector<16x256xf32> -> vector<16x256xf32>
    %c4_439 = arith.constant 4 : index
    %c0_440 = arith.constant 0 : index
    %c0_441 = arith.constant 0 : index
    %421 = vector.load %arg18[%c4_439, %c0_440, %c0_441] : memref<9x8x16xf32, #tpu.memory_space<vmem>>, vector<1x8x16xf32>
    %422 = vector.shape_cast %421 : vector<1x8x16xf32> to vector<8x16xf32>
    %cst_442 = arith.constant dense<0.000000e+00> : vector<8x256xf32>
    %423 = tpu.matmul %422, %420, %cst_442 {dimension_numbers = #tpu.dot_dimension_numbers<[1], [0], [0], [1], [0, 0, 1, 1], [], []>} : vector<8x16xf32>, vector<16x256xf32>, vector<8x256xf32> -> vector<8x256xf32>
    %424 = arith.addf %417, %423 : vector<8x256xf32>
    %cst_443 = arith.constant dense<0.000000e+00> : vector<8x256xf32>
    %425 = tpu.matmul %368, %419, %cst_443 {dimension_numbers = #tpu.dot_dimension_numbers<[1], [0], [0], [1], [0, 0, 1, 1], [], []>} : vector<8x256xbf16>, vector<256x256xbf16>, vector<8x256xf32> -> vector<8x256xf32>
    %c4_444 = arith.constant 4 : index
    %c0_445 = arith.constant 0 : index
    %c0_446 = arith.constant 0 : index
    %426 = vector.load %arg19[%c4_444, %c0_445, %c0_446] : memref<9x8x8xf32, #tpu.memory_space<vmem>>, vector<1x8x8xf32>
    %427 = vector.shape_cast %426 : vector<1x8x8xf32> to vector<8x8xf32>
    %cst_447 = arith.constant dense<0.000000e+00> : vector<8x256xf32>
    %428 = tpu.matmul %427, %425, %cst_447 {dimension_numbers = #tpu.dot_dimension_numbers<[1], [0], [0], [1], [0, 0, 1, 1], [], []>} : vector<8x8xf32>, vector<8x256xf32>, vector<8x256xf32> -> vector<8x256xf32>
    %429 = arith.addf %424, %428 : vector<8x256xf32>
    %c5_448 = arith.constant 5 : index
    %c0_449 = arith.constant 0 : index
    %c0_450 = arith.constant 0 : index
    %430 = vector.load %arg2[%c5_448, %c0_449, %c0_450] : memref<9x256x256xbf16, #tpu.memory_space<vmem>>, vector<1x256x256xbf16>
    %431 = vector.shape_cast %430 : vector<1x256x256xbf16> to vector<256x256xbf16>
    %cst_451 = arith.constant dense<0.000000e+00> : vector<16x256xf32>
    %432 = tpu.matmul %367, %431, %cst_451 {dimension_numbers = #tpu.dot_dimension_numbers<[1], [0], [0], [1], [0, 0, 1, 1], [], []>} : vector<16x256xbf16>, vector<256x256xbf16>, vector<16x256xf32> -> vector<16x256xf32>
    %c5_452 = arith.constant 5 : index
    %c0_453 = arith.constant 0 : index
    %c0_454 = arith.constant 0 : index
    %433 = vector.load %arg18[%c5_452, %c0_453, %c0_454] : memref<9x8x16xf32, #tpu.memory_space<vmem>>, vector<1x8x16xf32>
    %434 = vector.shape_cast %433 : vector<1x8x16xf32> to vector<8x16xf32>
    %cst_455 = arith.constant dense<0.000000e+00> : vector<8x256xf32>
    %435 = tpu.matmul %434, %432, %cst_455 {dimension_numbers = #tpu.dot_dimension_numbers<[1], [0], [0], [1], [0, 0, 1, 1], [], []>} : vector<8x16xf32>, vector<16x256xf32>, vector<8x256xf32> -> vector<8x256xf32>
    %436 = arith.addf %429, %435 : vector<8x256xf32>
    %cst_456 = arith.constant dense<0.000000e+00> : vector<8x256xf32>
    %437 = tpu.matmul %368, %431, %cst_456 {dimension_numbers = #tpu.dot_dimension_numbers<[1], [0], [0], [1], [0, 0, 1, 1], [], []>} : vector<8x256xbf16>, vector<256x256xbf16>, vector<8x256xf32> -> vector<8x256xf32>
    %c5_457 = arith.constant 5 : index
    %c0_458 = arith.constant 0 : index
    %c0_459 = arith.constant 0 : index
    %438 = vector.load %arg19[%c5_457, %c0_458, %c0_459] : memref<9x8x8xf32, #tpu.memory_space<vmem>>, vector<1x8x8xf32>
    %439 = vector.shape_cast %438 : vector<1x8x8xf32> to vector<8x8xf32>
    %cst_460 = arith.constant dense<0.000000e+00> : vector<8x256xf32>
    %440 = tpu.matmul %439, %437, %cst_460 {dimension_numbers = #tpu.dot_dimension_numbers<[1], [0], [0], [1], [0, 0, 1, 1], [], []>} : vector<8x8xf32>, vector<8x256xf32>, vector<8x256xf32> -> vector<8x256xf32>
    %441 = arith.addf %436, %440 : vector<8x256xf32>
    %c6_461 = arith.constant 6 : index
    %c0_462 = arith.constant 0 : index
    %c0_463 = arith.constant 0 : index
    %442 = vector.load %arg2[%c6_461, %c0_462, %c0_463] : memref<9x256x256xbf16, #tpu.memory_space<vmem>>, vector<1x256x256xbf16>
    %443 = vector.shape_cast %442 : vector<1x256x256xbf16> to vector<256x256xbf16>
    %cst_464 = arith.constant dense<0.000000e+00> : vector<16x256xf32>
    %444 = tpu.matmul %367, %443, %cst_464 {dimension_numbers = #tpu.dot_dimension_numbers<[1], [0], [0], [1], [0, 0, 1, 1], [], []>} : vector<16x256xbf16>, vector<256x256xbf16>, vector<16x256xf32> -> vector<16x256xf32>
    %c6_465 = arith.constant 6 : index
    %c0_466 = arith.constant 0 : index
    %c0_467 = arith.constant 0 : index
    %445 = vector.load %arg18[%c6_465, %c0_466, %c0_467] : memref<9x8x16xf32, #tpu.memory_space<vmem>>, vector<1x8x16xf32>
    %446 = vector.shape_cast %445 : vector<1x8x16xf32> to vector<8x16xf32>
    %cst_468 = arith.constant dense<0.000000e+00> : vector<8x256xf32>
    %447 = tpu.matmul %446, %444, %cst_468 {dimension_numbers = #tpu.dot_dimension_numbers<[1], [0], [0], [1], [0, 0, 1, 1], [], []>} : vector<8x16xf32>, vector<16x256xf32>, vector<8x256xf32> -> vector<8x256xf32>
    %448 = arith.addf %441, %447 : vector<8x256xf32>
    %cst_469 = arith.constant dense<0.000000e+00> : vector<8x256xf32>
    %449 = tpu.matmul %368, %443, %cst_469 {dimension_numbers = #tpu.dot_dimension_numbers<[1], [0], [0], [1], [0, 0, 1, 1], [], []>} : vector<8x256xbf16>, vector<256x256xbf16>, vector<8x256xf32> -> vector<8x256xf32>
    %c6_470 = arith.constant 6 : index
    %c0_471 = arith.constant 0 : index
    %c0_472 = arith.constant 0 : index
    %450 = vector.load %arg19[%c6_470, %c0_471, %c0_472] : memref<9x8x8xf32, #tpu.memory_space<vmem>>, vector<1x8x8xf32>
    %451 = vector.shape_cast %450 : vector<1x8x8xf32> to vector<8x8xf32>
    %cst_473 = arith.constant dense<0.000000e+00> : vector<8x256xf32>
    %452 = tpu.matmul %451, %449, %cst_473 {dimension_numbers = #tpu.dot_dimension_numbers<[1], [0], [0], [1], [0, 0, 1, 1], [], []>} : vector<8x8xf32>, vector<8x256xf32>, vector<8x256xf32> -> vector<8x256xf32>
    %453 = arith.addf %448, %452 : vector<8x256xf32>
    %c7_474 = arith.constant 7 : index
    %c0_475 = arith.constant 0 : index
    %c0_476 = arith.constant 0 : index
    %454 = vector.load %arg2[%c7_474, %c0_475, %c0_476] : memref<9x256x256xbf16, #tpu.memory_space<vmem>>, vector<1x256x256xbf16>
    %455 = vector.shape_cast %454 : vector<1x256x256xbf16> to vector<256x256xbf16>
    %cst_477 = arith.constant dense<0.000000e+00> : vector<16x256xf32>
    %456 = tpu.matmul %367, %455, %cst_477 {dimension_numbers = #tpu.dot_dimension_numbers<[1], [0], [0], [1], [0, 0, 1, 1], [], []>} : vector<16x256xbf16>, vector<256x256xbf16>, vector<16x256xf32> -> vector<16x256xf32>
    %c7_478 = arith.constant 7 : index
    %c0_479 = arith.constant 0 : index
    %c0_480 = arith.constant 0 : index
    %457 = vector.load %arg18[%c7_478, %c0_479, %c0_480] : memref<9x8x16xf32, #tpu.memory_space<vmem>>, vector<1x8x16xf32>
    %458 = vector.shape_cast %457 : vector<1x8x16xf32> to vector<8x16xf32>
    %cst_481 = arith.constant dense<0.000000e+00> : vector<8x256xf32>
    %459 = tpu.matmul %458, %456, %cst_481 {dimension_numbers = #tpu.dot_dimension_numbers<[1], [0], [0], [1], [0, 0, 1, 1], [], []>} : vector<8x16xf32>, vector<16x256xf32>, vector<8x256xf32> -> vector<8x256xf32>
    %460 = arith.addf %453, %459 : vector<8x256xf32>
    %cst_482 = arith.constant dense<0.000000e+00> : vector<8x256xf32>
    %461 = tpu.matmul %368, %455, %cst_482 {dimension_numbers = #tpu.dot_dimension_numbers<[1], [0], [0], [1], [0, 0, 1, 1], [], []>} : vector<8x256xbf16>, vector<256x256xbf16>, vector<8x256xf32> -> vector<8x256xf32>
    %c7_483 = arith.constant 7 : index
    %c0_484 = arith.constant 0 : index
    %c0_485 = arith.constant 0 : index
    %462 = vector.load %arg19[%c7_483, %c0_484, %c0_485] : memref<9x8x8xf32, #tpu.memory_space<vmem>>, vector<1x8x8xf32>
    %463 = vector.shape_cast %462 : vector<1x8x8xf32> to vector<8x8xf32>
    %cst_486 = arith.constant dense<0.000000e+00> : vector<8x256xf32>
    %464 = tpu.matmul %463, %461, %cst_486 {dimension_numbers = #tpu.dot_dimension_numbers<[1], [0], [0], [1], [0, 0, 1, 1], [], []>} : vector<8x8xf32>, vector<8x256xf32>, vector<8x256xf32> -> vector<8x256xf32>
    %465 = arith.addf %460, %464 : vector<8x256xf32>
    %c8_487 = arith.constant 8 : index
    %c0_488 = arith.constant 0 : index
    %c0_489 = arith.constant 0 : index
    %466 = vector.load %arg2[%c8_487, %c0_488, %c0_489] : memref<9x256x256xbf16, #tpu.memory_space<vmem>>, vector<1x256x256xbf16>
    %467 = vector.shape_cast %466 : vector<1x256x256xbf16> to vector<256x256xbf16>
    %cst_490 = arith.constant dense<0.000000e+00> : vector<16x256xf32>
    %468 = tpu.matmul %367, %467, %cst_490 {dimension_numbers = #tpu.dot_dimension_numbers<[1], [0], [0], [1], [0, 0, 1, 1], [], []>} : vector<16x256xbf16>, vector<256x256xbf16>, vector<16x256xf32> -> vector<16x256xf32>
    %c8_491 = arith.constant 8 : index
    %c0_492 = arith.constant 0 : index
    %c0_493 = arith.constant 0 : index
    %469 = vector.load %arg18[%c8_491, %c0_492, %c0_493] : memref<9x8x16xf32, #tpu.memory_space<vmem>>, vector<1x8x16xf32>
    %470 = vector.shape_cast %469 : vector<1x8x16xf32> to vector<8x16xf32>
    %cst_494 = arith.constant dense<0.000000e+00> : vector<8x256xf32>
    %471 = tpu.matmul %470, %468, %cst_494 {dimension_numbers = #tpu.dot_dimension_numbers<[1], [0], [0], [1], [0, 0, 1, 1], [], []>} : vector<8x16xf32>, vector<16x256xf32>, vector<8x256xf32> -> vector<8x256xf32>
    %472 = arith.addf %465, %471 : vector<8x256xf32>
    %cst_495 = arith.constant dense<0.000000e+00> : vector<8x256xf32>
    %473 = tpu.matmul %368, %467, %cst_495 {dimension_numbers = #tpu.dot_dimension_numbers<[1], [0], [0], [1], [0, 0, 1, 1], [], []>} : vector<8x256xbf16>, vector<256x256xbf16>, vector<8x256xf32> -> vector<8x256xf32>
    %c8_496 = arith.constant 8 : index
    %c0_497 = arith.constant 0 : index
    %c0_498 = arith.constant 0 : index
    %474 = vector.load %arg19[%c8_496, %c0_497, %c0_498] : memref<9x8x8xf32, #tpu.memory_space<vmem>>, vector<1x8x8xf32>
    %475 = vector.shape_cast %474 : vector<1x8x8xf32> to vector<8x8xf32>
    %cst_499 = arith.constant dense<0.000000e+00> : vector<8x256xf32>
    %476 = tpu.matmul %475, %473, %cst_499 {dimension_numbers = #tpu.dot_dimension_numbers<[1], [0], [0], [1], [0, 0, 1, 1], [], []>} : vector<8x8xf32>, vector<8x256xf32>, vector<8x256xf32> -> vector<8x256xf32>
    %477 = arith.addf %472, %476 : vector<8x256xf32>
    %478 = vector.broadcast %366 : vector<8x1xf32> to vector<8x256xf32>
    %479 = arith.addf %477, %478 : vector<8x256xf32>
    %cst_500 = arith.constant 0.000000e+00 : f32
    %480 = vector.broadcast %cst_500 : f32 to vector<8x256xf32>
    %481 = arith.maximumf %479, %480 : vector<8x256xf32>
    %c0_501 = arith.constant 0 : index
    %c0_502 = arith.constant 0 : index
    %c0_503 = arith.constant 0 : index
    %482 = vector.load %arg21[%c0_501, %c0_502, %c0_503] : memref<1x8x256xf32, #tpu.memory_space<vmem>>, vector<1x8x256xf32>
    %483 = vector.shape_cast %482 : vector<1x8x256xf32> to vector<8x256xf32>
    %484 = vector.shape_cast %481 : vector<8x256xf32> to vector<1x8x256xf32>
    tpu.vector_store %arg21[%c0_501, %c0_502, %c0_503], %484 {strides = array<i32>} : memref<1x8x256xf32, #tpu.memory_space<vmem>>, vector<1x8x256xf32>,
    return
  }
  func.func @transform_0(%arg0: i32) -> (i32, i32, i32) {
    %c0_i32 = arith.constant 0 : i32
    %c0_i32_0 = arith.constant 0 : i32
    %c0_i32_1 = arith.constant 0 : i32
    return %arg0, %c0_i32, %c0_i32_0 : i32, i32, i32
  }
  func.func @transform_1(%arg0: i32) -> (i32, i32, i32) {
    %c0_i32 = arith.constant 0 : i32
    %c0_i32_0 = arith.constant 0 : i32
    %c0_i32_1 = arith.constant 0 : i32
    %c0_i32_2 = arith.constant 0 : i32
    return %c0_i32, %c0_i32_0, %c0_i32_1 : i32, i32, i32
  }
  func.func @transform_2(%arg0: i32) -> (i32, i32, i32) {
    %c0_i32 = arith.constant 0 : i32
    %c0_i32_0 = arith.constant 0 : i32
    %c0_i32_1 = arith.constant 0 : i32
    %c0_i32_2 = arith.constant 0 : i32
    return %c0_i32, %c0_i32_0, %c0_i32_1 : i32, i32, i32
  }
  func.func @transform_3(%arg0: i32) -> (i32, i32) {
    %c0_i32 = arith.constant 0 : i32
    %c0_i32_0 = arith.constant 0 : i32
    %c0_i32_1 = arith.constant 0 : i32
    return %c0_i32, %c0_i32_0 : i32, i32
  }
  func.func @transform_4(%arg0: i32) -> (i32, i32, i32) {
    %c0_i32 = arith.constant 0 : i32
    %c0_i32_0 = arith.constant 0 : i32
    %c0_i32_1 = arith.constant 0 : i32
    %c0_i32_2 = arith.constant 0 : i32
    return %c0_i32, %c0_i32_0, %c0_i32_1 : i32, i32, i32
  }
  func.func @transform_5(%arg0: i32) -> (i32, i32, i32) {
    %c0_i32 = arith.constant 0 : i32
    %c0_i32_0 = arith.constant 0 : i32
    %c0_i32_1 = arith.constant 0 : i32
    %c0_i32_2 = arith.constant 0 : i32
    return %c0_i32, %c0_i32_0, %c0_i32_1 : i32, i32, i32
  }
  func.func @transform_6(%arg0: i32) -> (i32, i32, i32) {
    %c0_i32 = arith.constant 0 : i32
    %c0_i32_0 = arith.constant 0 : i32
    %c0_i32_1 = arith.constant 0 : i32
    %c0_i32_2 = arith.constant 0 : i32
    return %c0_i32, %c0_i32_0, %c0_i32_1 : i32, i32, i32
  }
  func.func @transform_7(%arg0: i32) -> (i32, i32) {
    %c0_i32 = arith.constant 0 : i32
    %c0_i32_0 = arith.constant 0 : i32
    %c0_i32_1 = arith.constant 0 : i32
    return %c0_i32, %c0_i32_0 : i32, i32
  }
  func.func @transform_8(%arg0: i32) -> (i32, i32, i32) {
    %c0_i32 = arith.constant 0 : i32
    %c0_i32_0 = arith.constant 0 : i32
    %c0_i32_1 = arith.constant 0 : i32
    %c0_i32_2 = arith.constant 0 : i32
    return %c0_i32, %c0_i32_0, %c0_i32_1 : i32, i32, i32
  }
  func.func @transform_9(%arg0: i32) -> (i32, i32, i32) {
    %c0_i32 = arith.constant 0 : i32
    %c0_i32_0 = arith.constant 0 : i32
    %c0_i32_1 = arith.constant 0 : i32
    %c0_i32_2 = arith.constant 0 : i32
    return %c0_i32, %c0_i32_0, %c0_i32_1 : i32, i32, i32
  }
  func.func @transform_10(%arg0: i32) -> (i32, i32, i32) {
    %c0_i32 = arith.constant 0 : i32
    %c0_i32_0 = arith.constant 0 : i32
    %c0_i32_1 = arith.constant 0 : i32
    %c0_i32_2 = arith.constant 0 : i32
    return %c0_i32, %c0_i32_0, %c0_i32_1 : i32, i32, i32
  }
  func.func @transform_11(%arg0: i32) -> (i32, i32) {
    %c0_i32 = arith.constant 0 : i32
    %c0_i32_0 = arith.constant 0 : i32
    %c0_i32_1 = arith.constant 0 : i32
    return %c0_i32, %c0_i32_0 : i32, i32
  }
  func.func @transform_12(%arg0: i32) -> (i32, i32) {
    %c0_i32 = arith.constant 0 : i32
    %c0_i32_0 = arith.constant 0 : i32
    %c0_i32_1 = arith.constant 0 : i32
    return %c0_i32, %c0_i32_0 : i32, i32
  }
  func.func @transform_13(%arg0: i32) -> (i32, i32, i32) {
    %c0_i32 = arith.constant 0 : i32
    %c0_i32_0 = arith.constant 0 : i32
    %c0_i32_1 = arith.constant 0 : i32
    %c0_i32_2 = arith.constant 0 : i32
    return %c0_i32, %c0_i32_0, %c0_i32_1 : i32, i32, i32
  }
  func.func @transform_14(%arg0: i32) -> (i32, i32, i32) {
    %c0_i32 = arith.constant 0 : i32
    %c0_i32_0 = arith.constant 0 : i32
    %c0_i32_1 = arith.constant 0 : i32
    %c0_i32_2 = arith.constant 0 : i32
    return %c0_i32, %c0_i32_0, %c0_i32_1 : i32, i32, i32
  }
  func.func @transform_15(%arg0: i32) -> (i32, i32) {
    %c0_i32 = arith.constant 0 : i32
    %c0_i32_0 = arith.constant 0 : i32
    %c0_i32_1 = arith.constant 0 : i32
    return %c0_i32, %c0_i32_0 : i32, i32
  }
  func.func @transform_16(%arg0: i32) -> (i32, i32) {
    %c0_i32 = arith.constant 0 : i32
    %c0_i32_0 = arith.constant 0 : i32
    %c0_i32_1 = arith.constant 0 : i32
    return %c0_i32, %c0_i32_0 : i32, i32
  }
  func.func @transform_17(%arg0: i32) -> (i32, i32, i32) {
    %c0_i32 = arith.constant 0 : i32
    %c0_i32_0 = arith.constant 0 : i32
    %c0_i32_1 = arith.constant 0 : i32
    %c0_i32_2 = arith.constant 0 : i32
    return %c0_i32, %c0_i32_0, %c0_i32_1 : i32, i32, i32
  }
  func.func @transform_18(%arg0: i32) -> (i32, i32, i32) {
    %c0_i32 = arith.constant 0 : i32
    %c0_i32_0 = arith.constant 0 : i32
    %c0_i32_1 = arith.constant 0 : i32
    %c0_i32_2 = arith.constant 0 : i32
    return %c0_i32, %c0_i32_0, %c0_i32_1 : i32, i32, i32
  }
  func.func @transform_19(%arg0: i32) -> (i32, i32) {
    %c0_i32 = arith.constant 0 : i32
    %c0_i32_0 = arith.constant 0 : i32
    %c0_i32_1 = arith.constant 0 : i32
    return %c0_i32, %c0_i32_0 : i32, i32
  }
  func.func @transform_20(%arg0: i32) -> (i32, i32, i32) {
    %c0_i32 = arith.constant 0 : i32
    %c0_i32_0 = arith.constant 0 : i32
    %c0_i32_1 = arith.constant 0 : i32
    return %arg0, %c0_i32, %c0_i32_0 : i32, i32, i32
  }
}

</mosaic_0001>

<bundles_post_ra>
// kernel: a_call__.1
= control target key start
LH: loop header
LB: loop body
LE: loop exit
PB: predicated region body
PF: predicated region fallthrough
CT: control target
= control target key end

     0   :  { %s14704_s0 = inlined_call_operand.vmem [shape: f32[2,4,256], index: 0, kind: input, shape index: {}]   ;;  %s14705_s1 = inlined_call_operand.hbm [shape: bf16[9,256,256], index: 1, kind: input, shape index: {}]   ;;  %s14706_s2 = inlined_call_operand.hbm [shape: f32[9,8,4], index: 2, kind: input, shape index: {}]   ;;  %s14707_s3 = inlined_call_operand.hbm [shape: f32[8,1], index: 3, kind: input, shape index: {}]   ;;  %s14708_s4 = inlined_call_operand.hbm [shape: bf16[4,256,64], index: 4, kind: input, shape index: {}]   ;;  %s14709_s5 = inlined_call_operand.hbm [shape: bf16[9,64,64], index: 5, kind: input, shape index: {}]   ;;  %s14710_s6 = inlined_call_operand.hbm [shape: f32[9,16,8], index: 6, kind: input, shape index: {}]   ;;  %s14711_s7 = inlined_call_operand.hbm [shape: f32[16,1], index: 7, kind: input, shape index: {}]   ;;  %s14712_s8 = inlined_call_operand.hbm [shape: bf16[4,64,16], index: 8, kind: input, shape index: {}]   ;;  %s14713_s9 = inlined_call_operand.hbm [shape: bf16[9,16,16], index: 9, kind: input, shape index: {}]   ;;  %s14714_s10 = inlined_call_operand.hbm [shape: f32[9,32,16], index: 10, kind: input, shape index: {}]   ;;  %s14715_s11 = inlined_call_operand.hbm [shape: f32[32,1], index: 11, kind: input, shape index: {}]   ;;  %s14716_s12 = inlined_call_operand.hbm [shape: bf16[16,64], index: 12, kind: input, shape index: {}]   ;;  %s14717_s13 = inlined_call_operand.hbm [shape: f32[9,16,32], index: 13, kind: input, shape index: {}]   ;;  %s14718_s14 = inlined_call_operand.hbm [shape: f32[9,16,16], index: 14, kind: input, shape index: {}]   ;;  %s14719_s15 = inlined_call_operand.hbm [shape: f32[16,1], index: 15, kind: input, shape index: {}]   ;;  %s14720_s16 = inlined_call_operand.hbm [shape: bf16[64,256], index: 16, kind: input, shape index: {}]   ;;  %s14721_s17 = inlined_call_operand.hbm [shape: f32[9,8,16], index: 17, kind: input, shape index: {}]   ;;  %s14722_s18 = inlined_call_operand.hbm [shape: f32[9,8,8], index: 18, kind: input, shape index: {}]   ;;  %s14723_s19 = inlined_call_operand.hbm [shape: f32[8,1], index: 19, kind: input, shape index: {}]   ;;  %s14724_s20 = inlined_call_operand.vmem [shape: f32[2,8,256], index: 20, kind: output, shape index: {}]  }
   0x1   :  { %15277 = sst [smem:[#allocation316_spill]] %s14704_s0 }
   0x2   :  { %15278 = sst [smem:[#allocation317_spill]] %s14705_s1 }
   0x3   :  { %15279 = sst [smem:[#allocation318_spill]] %s14706_s2 }
   0x4   :  { %15280 = sst [smem:[#allocation319_spill]] %s14707_s3 }
   0x5   :  { %15281 = sst [smem:[#allocation320_spill]] %s14708_s4 }
   0x6   :  { %15282 = sst [smem:[#allocation321_spill]] %s14710_s6 }
   0x7   :  { %15283 = sst [smem:[#allocation322_spill]] %s14724_s20 }
   0x8   :  { %25 = vsyncpa [#allocation3], 0 }
   0x9   :  { %26 = vsyncpa [#allocation5], 0 }
   0xa   :  { %27 = vsyncpa [#allocation8], 0 }
   0xb   :  { %28 = vsyncpa [#allocation11], 0 }
   0xc   :  { %29 = vsyncpa [#allocation14], 0 }
   0xd   :  { %30 = vsyncpa [#allocation17], 0 }
   0xe   :  { %31 = vsyncpa [#allocation20], 0 }
   0xf   :  { %32 = vsyncpa [#allocation23], 0 }
  0x10   :  { %33 = vsyncpa [#allocation26], 0 }
  0x11   :  { %34 = vsyncpa [#allocation29], 0  ;;  %s12344_s1 = smov 0  }
  0x12 LB: > { %15284 = sst [smem:[#allocation41_spill]] %s12213_s1  ;;  %s12350_s22 = sadd.s32 4294967295, %s12213_s1   ;;  %s12213_s1 = sphi %s12344_s1, %s40_s1  }
  0x13   : > { %15285 = sst [smem:[#allocation42_spill]] %s12350_s22  ;;  %p8988_p0 = scmp.ge.s32.totalorder %s12213_s1, 1 }
  0x14   : > { %p496_p1 = scmp.lt.s32.totalorder %s12213_s1, 3  ;;  %p11496_p2 = scmp.eq.s32.totalorder %s12350_s22, 0 }
  0x15   : > { %s15286_s2 = sld [smem:[#allocation318_spill]]  ;;  %s12215_s29 = smov [#allocation4]  }
  0x16   : > { %p12358_p3 = pnand %p8988_p0, %p496_p1  ;;  %s15289_s28 = sld [smem:[#allocation320_spill]] }
  0x17   : > { %s523_s30 = sshll.u32 %s12215_s29, 4  ;;  %s12216_s21 = smov [#allocation7]   ;;  %s524_s30 = int_to_ptr.vmem [resolvable:$true] %s523_s30 }
  0x18   : > { %s15287_s3 = scalar_select %p12358_p3, 1, 0 }
  0x19   : > { %p11438_p4 = pneg %p12358_p3  ;;  %s549_s23 = sshll.u32 %s12216_s21, 4  ;;  %s550_s23 = int_to_ptr.vmem [resolvable:$true] %s549_s23 }
  0x1a   : > { %15288 = sst [smem:[#allocation43_spill]] %s15287_s3  ;;  %s12217_s24 = smov 128  }
  0x1b   : > { %s521_s25 = sshll.u32 %s15286_s2, 4  ;;  %p12369_p5 = pnand %p11496_p2, %p11438_p4  ;;  %s522_s25 = int_to_ptr.hbm [resolvable:$true] %s521_s25 }
  0x1c   : > { %s547_s4 = sshll.u32 %s15289_s28, 4  ;;  %s12218_s2 = smov 8   ;;  %s548_s4 = int_to_ptr.hbm [resolvable:$true] %s547_s4 }
  0x1d   : > { %11444 = dma.hbm_to_vmem [thread:$0]  (!%p12369_p5), %s522_s25, 1152, %s524_s30, [#allocation5], %s12217_s24, %s12217_s24, %s12218_s2  }
  0x1e   : > { %s15291_s6 = sld [smem:[#allocation321_spill]]  ;;  %s14729_s29 = smov 64  }
  0x1f   : > { %s14731_s1 = smov 4   ;;  %s12221_s21 = smov [#allocation10]  }
  0x20   : > { %11450 = dma.hbm_to_vmem [thread:$0]  (!%p12369_p5), %s548_s4, 8192, %s550_s23, [#allocation8], %s14729_s29, %s14729_s29, %s14731_s1  }
  0x21   : > { %s577_s20 = sshll.u32 %s12221_s21, 4  ;;  %s603_s25 = sshll.u32 %s14712_s8, 4  ;;  %s578_s20 = int_to_ptr.vmem [resolvable:$true] %s577_s20  ;;  %s604_s25 = int_to_ptr.hbm [resolvable:$true] %s603_s25 }
  0x22   : > { %s631_s27 = sshll.u32 %s14714_s10, 4  ;;  %s12222_s4 = smov [#allocation13]   ;;  %s632_s27 = int_to_ptr.hbm [resolvable:$true] %s631_s27 }
  0x23   : > { %s605_s23 = sshll.u32 %s12222_s4, 4  ;;  %s12223_s22 = smov [#allocation16]   ;;  %s606_s23 = int_to_ptr.vmem [resolvable:$true] %s605_s23 }
  0x24   : > { %s575_s28 = sshll.u32 %s15291_s6, 4  ;;  %s633_s3 = sshll.u32 %s12223_s22, 4  ;;  %s576_s28 = int_to_ptr.hbm [resolvable:$true] %s575_s28  ;;  %s634_s3 = int_to_ptr.vmem [resolvable:$true] %s633_s3 }
  0x25   : > { %11456 = dma.hbm_to_vmem [thread:$0]  (!%p12369_p5), %s576_s28, 2304, %s578_s20, [#allocation11], %s12217_s24, %s12217_s24, %s12218_s2  }
  0x26   : > { %11462 = dma.hbm_to_vmem [thread:$0]  (!%p12369_p5), %s604_s25, 2048, %s606_s23, [#allocation14], %s14729_s29, %s14729_s29, %s14731_s1  }
  0x27   : > { %s659_s20 = sshll.u32 %s14716_s12, 4  ;;  %s687_s26 = sshll.u32 %s14718_s14, 4  ;;  %s660_s20 = int_to_ptr.hbm [resolvable:$true] %s659_s20  ;;  %s688_s26 = int_to_ptr.hbm [resolvable:$true] %s687_s26 }
  0x28   : > { %11468 = dma.hbm_to_vmem [thread:$0]  (!%p12369_p5), %s632_s27, 4608, %s634_s3, [#allocation17], %s12217_s24, %s12217_s24, %s12218_s2  }
  0x29   : > { %s12224_s4 = smov [#allocation19]   ;;  %s12225_s6 = smov [#allocation22]  }
  0x2a   : > { %s661_s25 = sshll.u32 %s12224_s4, 4  ;;  %s689_s23 = sshll.u32 %s12225_s6, 4  ;;  %s662_s25 = int_to_ptr.vmem [resolvable:$true] %s661_s25  ;;  %s690_s23 = int_to_ptr.vmem [resolvable:$true] %s689_s23 }
  0x2b   : > { %11474 = dma.hbm_to_vmem [thread:$0]  (!%p12369_p5), %s660_s20, 128, %s662_s25, [#allocation20], %s14729_s29, %s14729_s29, %s14731_s1  }
  0x2c   : > { %s715_s27 = sshll.u32 %s14720_s16, 4  ;;  %s743_s30 = sshll.u32 %s14722_s18, 4  ;;  %s716_s27 = int_to_ptr.hbm [resolvable:$true] %s715_s27  ;;  %s744_s30 = int_to_ptr.hbm [resolvable:$true] %s743_s30 }
  0x2d   : > { %11480 = dma.hbm_to_vmem [thread:$0]  (!%p12369_p5), %s688_s26, 2304, %s690_s23, [#allocation23], %s12217_s24, %s12217_s24, %s12218_s2  }
  0x2e   : > { %s12226_s4 = smov [#allocation25]   ;;  %s12227_s25 = smov [#allocation28]  }
  0x2f   : > { %s717_s20 = sshll.u32 %s12226_s4, 4  ;;  %s745_s6 = sshll.u32 %s12227_s25, 4  ;;  %s718_s20 = int_to_ptr.vmem [resolvable:$true] %s717_s20  ;;  %s746_s6 = int_to_ptr.vmem [resolvable:$true] %s745_s6 }
  0x30   : > { %11486 = dma.hbm_to_vmem [thread:$0]  (!%p12369_p5), %s716_s27, 1024, %s718_s20, [#allocation26], %s12217_s24, %s12217_s24, %s12218_s2  }
  0x31   : > { %s15292_s29 = sld [smem:[#allocation317_spill]]  ;;  %s12228_s1 = smov [#allocation2]  }
  0x32   : > { %11492 = dma.hbm_to_vmem [thread:$0]  (!%p12369_p5), %s744_s30, 1152, %s746_s6, [#allocation29], %s12217_s24, %s12217_s24, %s12218_s2  }
  0x33   : > { %s15293_s28 = sld [smem:[#allocation319_spill]]  ;;  %s509_s27 = sshll.u32 %s12228_s1, 4  ;;  %s510_s27 = int_to_ptr.vmem [resolvable:$true] %s509_s27 }
  0x34   : > { %s561_s30 = sshll.u32 %s14709_s5, 4  ;;  %s589_s21 = sshll.u32 %s14711_s7, 4  ;;  %s562_s30 = int_to_ptr.hbm [resolvable:$true] %s561_s30  ;;  %s590_s21 = int_to_ptr.hbm [resolvable:$true] %s589_s21 }
  0x35   : > { %s12230_s23 = smov [#allocation9]   ;;  %s645_s1 = sshll.u32 %s14715_s11, 4  ;;  %s646_s1 = int_to_ptr.hbm [resolvable:$true] %s645_s1 }
  0x36   : > { %s563_s3 = sshll.u32 %s12230_s23, 4  ;;  %s12232_s23 = smov [#allocation15]   ;;  %s564_s3 = int_to_ptr.vmem [resolvable:$true] %s563_s3 }
  0x37   : > { %s507_s26 = sshll.u32 %s15292_s29, 4  ;;  %s12229_s29 = smov [#allocation6]   ;;  %s508_s26 = int_to_ptr.hbm [resolvable:$true] %s507_s26 }
  0x38   : > { %11441 = dma.hbm_to_vmem [thread:$0]  (!%p12369_p5), %s508_s26, 36864, %s510_s27, [#allocation3], %s12217_s24, %s12217_s24, %s12218_s2  }
  0x39   : > { %s536_s4 = sshll.u32 %s15293_s28, 4  ;;  %s538_s20 = sshll.u32 %s12229_s29, 4  ;;  %s537_s4 = int_to_ptr.hbm [resolvable:$true] %s536_s4  ;;  %s539_s20 = int_to_ptr.vmem [resolvable:$true] %s538_s20 }
  0x3a   : > { %11447 = dma.hbm_to_vmem [thread:$0]  (!%p12369_p5), %s537_s4, 128, %s539_s20, [#allocation5]  }
  0x3b   : > { %s15294_s26 = smov 4   ;;  %s15295_s28 = smov 64  }
  0x3c   : > { %11453 = dma.hbm_to_vmem [thread:$0]  (!%p12369_p5), %s562_s30, 4608, %s564_s3, [#allocation8], %s15295_s28, %s15295_s28, %s15294_s26  }
  0x3d   : > { %s12231_s27 = smov [#allocation12]   ;;  %s617_s4 = sshll.u32 %s14713_s9, 4  ;;  %s618_s4 = int_to_ptr.hbm [resolvable:$true] %s617_s4 }
  0x3e   : > { %s591_s29 = sshll.u32 %s12231_s27, 4  ;;  %s619_s30 = sshll.u32 %s12232_s23, 4  ;;  %s592_s29 = int_to_ptr.vmem [resolvable:$true] %s591_s29  ;;  %s620_s30 = int_to_ptr.vmem [resolvable:$true] %s619_s30 }
  0x3f   : > { %11459 = dma.hbm_to_vmem [thread:$0]  (!%p12369_p5), %s590_s21, 256, %s592_s29, [#allocation11], %s12217_s24, %s12217_s24, %s12218_s2  }
  0x40   : > { %11465 = dma.hbm_to_vmem [thread:$0]  (!%p12369_p5), %s618_s4, 1152, %s620_s30, [#allocation14], %s15295_s28, %s15295_s28, %s15294_s26  }
  0x41   : > { %s12233_s3 = smov [#allocation18]   ;;  %s673_s21 = sshll.u32 %s14717_s13, 4  ;;  %s674_s21 = int_to_ptr.hbm [resolvable:$true] %s673_s21 }
  0x42   : > { %s647_s27 = sshll.u32 %s12233_s3, 4  ;;  %s701_s6 = sshll.u32 %s14719_s15, 4  ;;  %s648_s27 = int_to_ptr.vmem [resolvable:$true] %s647_s27  ;;  %s702_s6 = int_to_ptr.hbm [resolvable:$true] %s701_s6 }
  0x43   : > { %11471 = dma.hbm_to_vmem [thread:$0]  (!%p12369_p5), %s646_s1, 512, %s648_s27, [#allocation17], %s12217_s24, %s12217_s24, %s12218_s2  }
  0x44   : > { %s12234_s23 = smov [#allocation21]   ;;  %s12235_s28 = smov [#allocation24]  }
  0x45   : > { %s675_s26 = sshll.u32 %s12234_s23, 4  ;;  %s703_s4 = sshll.u32 %s12235_s28, 4  ;;  %s676_s26 = int_to_ptr.vmem [resolvable:$true] %s675_s26  ;;  %s704_s4 = int_to_ptr.vmem [resolvable:$true] %s703_s4 }
  0x46   : > { %11477 = dma.hbm_to_vmem [thread:$0]  (!%p12369_p5), %s674_s21, 2304, %s676_s26, [#allocation20], %s12217_s24, %s12217_s24, %s12218_s2  }
  0x47   : > { %s729_s1 = sshll.u32 %s14721_s17, 4  ;;  %s758_s22 = sshll.u32 %s14723_s19, 4  ;;  %s730_s1 = int_to_ptr.hbm [resolvable:$true] %s729_s1  ;;  %s759_s22 = int_to_ptr.hbm [resolvable:$true] %s758_s22 }
  0x48   : > { %11483 = dma.hbm_to_vmem [thread:$0]  (!%p12369_p5), %s702_s6, 256, %s704_s4, [#allocation23], %s12217_s24, %s12217_s24, %s12218_s2  }
  0x49   : > { %s12236_s29 = smov [#allocation27]   ;;  %s12237_s20 = smov [#allocation30]  }
  0x4a   : > { %s731_s21 = sshll.u32 %s12236_s29, 4  ;;  %s760_s23 = sshll.u32 %s12237_s20, 4  ;;  %s732_s21 = int_to_ptr.vmem [resolvable:$true] %s731_s21  ;;  %s761_s23 = int_to_ptr.vmem [resolvable:$true] %s760_s23 }
  0x4b   : > { %11489 = dma.hbm_to_vmem [thread:$0]  (!%p12369_p5), %s730_s1, 1152, %s732_s21, [#allocation26], %s12217_s24, %s12217_s24, %s12218_s2  }
  0x4c   : > { %11495 = dma.hbm_to_vmem [thread:$0]  (!%p12369_p5), %s759_s22, 128, %s761_s23, [#allocation29]  }
  0x4d   : > { %781 = sbr.rel (%p12358_p3) target bundleno = 7800 (0x1e78), region = 100 }
  0x52   : > { %s15297_s6 = sld [smem:[#allocation42_spill]] }
  0x53   : > { %12172 = dma.done.wait (%p11496_p2), [#allocation3], 36864  }
  0x54   : > { %12174 = vsyncadd (%p11496_p2), [#allocation3], 4294930432 }
  0x55   : > { %12176 = dma.done.wait (%p11496_p2), [#allocation5], 1280  }
  0x56   : > { %12178 = vsyncadd (%p11496_p2), [#allocation5], 4294966016 }
  0x57   : > { %12180 = dma.done.wait (%p11496_p2), [#allocation8], 12800  }
  0x58   : > { %12182 = vsyncadd (%p11496_p2), [#allocation8], 4294954496 }
  0x59   : > { %12184 = dma.done.wait (%p11496_p2), [#allocation11], 2560  }
  0x5a   : > { %12186 = vsyncadd (%p11496_p2), [#allocation11], 4294964736 }
  0x5b   : > { %12188 = dma.done.wait (%p11496_p2), [#allocation14], 3200  }
  0x5c   : > { %12190 = vsyncadd (%p11496_p2), [#allocation14], 4294964096 }
  0x5d   : > { %12192 = dma.done.wait (%p11496_p2), [#allocation17], 5120  }
  0x5e   : > { %12194 = vsyncadd (%p11496_p2), [#allocation17], 4294962176 }
  0x5f   : > { %12196 = dma.done.wait (%p11496_p2), [#allocation20], 2432  }
  0x60   : > { %12198 = vsyncadd (%p11496_p2), [#allocation20], 4294964864 }
  0x61   : > { %12200 = dma.done.wait (%p11496_p2), [#allocation23], 2560  }
  0x62   : > { %12202 = vsyncadd (%p11496_p2), [#allocation23], 4294964736 }
  0x63   : > { %12204 = dma.done.wait (%p11496_p2), [#allocation26], 2176  }
  0x64   : > { %12206 = vsyncadd (%p11496_p2), [#allocation26], 4294965120 }
  0x65   : > { %12208 = dma.done.wait (%p11496_p2), [#allocation29], 1280  }
  0x66   : > { %12210 = vsyncadd (%p11496_p2), [#allocation29], 4294966016  ;;  %v9091_v0 = vld [vmem:[#allocation2 + $0x70] sm:$0xf]  ;;  %v10955_v1 = vld [vmem:[#allocation2 + $0x74] sm:$0xf0] }
  0x67   : > { %v9155_v2 = vld [vmem:[#allocation2 + $0xf0] sm:$0xf]  ;;  %v12555_v3 = vor.u32 %v10955_v1, %v9091_v0  ;;  %v10971_v4 = vld [vmem:[#allocation2 + $0xf4] sm:$0xf0]  ;;  %v10954_v5 = vld [vmem:[#allocation2 + $0x74] sm:$0xf] }
  0x68   : > { %v9093_v6 = vld [vmem:[#allocation2 + $0x78] sm:$0xf0]  ;;  %v12557_v7 = vor.u32 %v10971_v4, %v9155_v2  ;;  %v10970_v9 = vld [vmem:[#allocation2 + $0xf4] sm:$0xf]  ;;  %v9083_v11 = vld [vmem:[#allocation2 + $0x60] sm:$0xf] }
  0x69   : > { %v12559_v8 = vor.u32 %v10954_v5, %v9093_v6  ;;  %v9157_v10 = vld [vmem:[#allocation2 + $0xf8] sm:$0xf0]  ;;  %1143 = vmatpush.bf16.msra.mxu0 %v12555_v3  ;;  %v10953_v13 = vld [vmem:[#allocation2 + $0x64] sm:$0xf0]  ;;  %v9147_v14 = vld [vmem:[#allocation2 + $0xe0] sm:$0xf] }
  0x6a   : > { %v12562_v12 = vor.u32 %v10970_v9, %v9157_v10  ;;  %v10969_v15 = vld [vmem:[#allocation2 + $0xe4] sm:$0xf0]  ;;  %1156 = vmatpush.bf16.msra.mxu1 %v12557_v7  ;;  %v12566_v16 = vor.u32 %v10953_v13, %v9083_v11  ;;  %v10952_v18 = vld [vmem:[#allocation2 + $0x64] sm:$0xf]  ;;  %v9085_v19 = vld [vmem:[#allocation2 + $0x68] sm:$0xf0] }
  0x6b   : > { %1169 = vmatpush.bf16.msra.mxu2 %v12559_v8  ;;  %v12568_v17 = vor.u32 %v10969_v15, %v9147_v14  ;;  %v10968_v20 = vld [vmem:[#allocation2 + $0xe4] sm:$0xf]  ;;  %v12571_v21 = vor.u32 %v10952_v18, %v9085_v19  ;;  %v9149_v22 = vld [vmem:[#allocation2 + $0xe8] sm:$0xf0]  ;;  %v9075_v23 = vld [vmem:[#allocation2 + $0x50] sm:$0xf] }
  0x6c   : > { %1182 = vmatpush.bf16.msra.mxu3 %v12562_v12  ;;  %v10951_v24 = vld [vmem:[#allocation2 + $0x54] sm:$0xf0]  ;;  %v12573_v25 = vor.u32 %v10968_v20, %v9149_v22  ;;  %v9139_v26 = vld [vmem:[#allocation2 + $0xd0] sm:$0xf]  ;;  %v10950_v28 = vld [vmem:[#allocation2 + $0x54] sm:$0xf] }
  0x6d   : > { %15298 = vst [vmem:[#allocation44_spill] sm:$0xff] %v12571_v21  ;;  %v10967_v27 = vld [vmem:[#allocation2 + $0xd4] sm:$0xf0]  ;;  %1144 = vmatpush.bf16.msra.mxu0 %v12566_v16  ;;  %v12576_v29 = vor.u32 %v10951_v24, %v9075_v23  ;;  %v9077_v30 = vld [vmem:[#allocation2 + $0x58] sm:$0xf0]  ;;  %p930_p6 = scmp.lt.s32.totalorder %s15297_s6, 1 }
  0x6e   : > { %15299 = vst [vmem:[#allocation45_spill] sm:$0xff] %v12573_v25  ;;  %v10966_v31 = vld [vmem:[#allocation2 + $0xd4] sm:$0xf]  ;;  %v9141_v32 = vld [vmem:[#allocation2 + $0xd8] sm:$0xf0]  ;;  %1157 = vmatpush.bf16.msra.mxu1 %v12568_v17  ;;  %v12580_v33 = vor.u32 %v10967_v27, %v9139_v26  ;;  %v12582_v34 = vor.u32 %v10950_v28, %v9077_v30  ;;  %s15308_s28 = sld [smem:[#allocation316_spill]] }
  0x6f   : > { %1170 = vmatpush.bf16.msra.mxu2 %v12571_v21  ;;  %v9067_v35 = vld [vmem:[#allocation2 + $0x40] sm:$0xf]  ;;  %v10949_v36 = vld [vmem:[#allocation2 + $0x44] sm:$0xf0]  ;;  %v12585_v38 = vor.u32 %v10966_v31, %v9141_v32  ;;  %v10948_v40 = vld [vmem:[#allocation2 + $0x44] sm:$0xf] }
  0x70   : > { %15300 = vst [vmem:[#allocation46_spill] sm:$0xff] %v12582_v34  ;;  %v9131_v37 = vld [vmem:[#allocation2 + $0xc0] sm:$0xf]  ;;  %1183 = vmatpush.bf16.msra.mxu3 %v12573_v25  ;;  %v10965_v39 = vld [vmem:[#allocation2 + $0xc4] sm:$0xf0]  ;;  %v12589_v44 = vor.u32 %v10949_v36, %v9067_v35  ;;  %s15846_s6 = smov (!%p930_p6, %s15297_s6), 1 }
  0x71   : > { %15301 = vst [vmem:[#allocation47_spill] sm:$0xff] %v12585_v38  ;;  %v9069_v41 = vld [vmem:[#allocation2 + $0x48] sm:$0xf0]  ;;  %v10964_v42 = vld [vmem:[#allocation2 + $0xc4] sm:$0xf]  ;;  %1145 = vmatpush.bf16.msra.mxu0 %v12576_v29  ;;  %v12593_v45 = vor.u32 %v10965_v39, %v9131_v37  ;;  %s10938_s0 = sshll.u32 %s15846_s6, 3 }
  0x72   : > { %v9133_v43 = vld [vmem:[#allocation2 + $0xc8] sm:$0xf0]  ;;  %1158 = vmatpush.bf16.msra.mxu1 %v12580_v33  ;;  %v12595_v46 = vor.u32 %v10948_v40, %v9069_v41  ;;  %v9059_v47 = vld [vmem:[#allocation2 + $0x30] sm:$0xf]  ;;  %v10947_v48 = vld [vmem:[#allocation2 + $0x34] sm:$0xf0] }
  0x73   : > { %1171 = vmatpush.bf16.msra.mxu2 %v12582_v34  ;;  %v9123_v49 = vld [vmem:[#allocation2 + $0xb0] sm:$0xf]  ;;  %v12598_v50 = vor.u32 %v10964_v42, %v9133_v43  ;;  %v10963_v51 = vld [vmem:[#allocation2 + $0xb4] sm:$0xf0]  ;;  %v10946_v52 = vld [vmem:[#allocation2 + $0x34] sm:$0xf]  ;;  %v12606_v56 = vor.u32 %v10947_v48, %v9059_v47 }
  0x74   : > { %15302 = vst [vmem:[#allocation48_spill] sm:$0xff] %v12595_v46  ;;  %1184 = vmatpush.bf16.msra.mxu3 %v12585_v38  ;;  %v9061_v53 = vld [vmem:[#allocation2 + $0x38] sm:$0xf0]  ;;  %v10962_v54 = vld [vmem:[#allocation2 + $0xb4] sm:$0xf]  ;;  %v12610_v57 = vor.u32 %v10963_v51, %v9123_v49  ;;  %s934_s4 = scalar_lea.vmem %s15308_s28, %s10938_s0  ;;  %vm1447_vm0 = vcmask 1043456  }
  0x75   : > { %15303 = vst [vmem:[#allocation49_spill] sm:$0xff] %v12598_v50  ;;  %v9125_v55 = vld [vmem:[#allocation2 + $0xb8] sm:$0xf0]  ;;  %1146 = vmatpush.bf16.msra.mxu0 %v12589_v44  ;;  %v12612_v58 = vor.u32 %v10946_v52, %v9061_v53  ;;  %v9051_v59 = vld [vmem:[#allocation2 + $0x20] sm:$0xf]  ;;  %vm1443_vm1 = vcmask 31744  }
  0x76   : > { %1159 = vmatpush.bf16.msra.mxu1 %v12593_v45  ;;  %v10945_v60 = vld [vmem:[#allocation2 + $0x24] sm:$0xf0]  ;;  %v9115_v61 = vld [vmem:[#allocation2 + $0xa0] sm:$0xf]  ;;  %v12615_v62 = vor.u32 %v10962_v54, %v9125_v55  ;;  %v10944_v0 = vld [vmem:[#allocation2 + $0x24] sm:$0xf] }
  0x77   : > { %1172 = vmatpush.bf16.msra.mxu2 %v12595_v46  ;;  %15304 = vst [vmem:[#allocation50_spill] sm:$0xff] %v12612_v58  ;;  %v10961_v63 = vld [vmem:[#allocation2 + $0xa4] sm:$0xf0]  ;;  %v9053_v1 = vld [vmem:[#allocation2 + $0x28] sm:$0xf0]  ;;  %v12619_v5 = vor.u32 %v10945_v60, %v9051_v59  ;;  %v941_v36 = vld [vmem:[%s934_s4] sm:$0xff] }
  0x78   : > { %1185 = vmatpush.bf16.msra.mxu3 %v12598_v50  ;;  %15305 = vst [vmem:[#allocation51_spill] sm:$0xff] %v12615_v62  ;;  %v10960_v2 = vld [vmem:[#allocation2 + $0xa4] sm:$0xf]  ;;  %v9117_v4 = vld [vmem:[#allocation2 + $0xa8] sm:$0xf0]  ;;  %v12623_v6 = vor.u32 %v10961_v63, %v9115_v61  ;;  %v12625_v9 = vor.u32 %v10944_v0, %v9053_v1  ;;  %vm4297_vm2 = vcmask 523264  }
  0x79   : > { %1147 = vmatpush.bf16.msra.mxu0 %v12606_v56  ;;  %v9043_v10 = vld [vmem:[#allocation2 + $0x10] sm:$0xf]  ;;  %v10943_v11 = vld [vmem:[#allocation2 + $0x14] sm:$0xf0]  ;;  %v12628_v14 = vor.u32 %v10960_v2, %v9117_v4  ;;  %v10942_v18 = vld [vmem:[#allocation2 + $0x14] sm:$0xf] }
  0x7a   : > { %1160 = vmatpush.bf16.msra.mxu1 %v12610_v57  ;;  %15306 = vst [vmem:[#allocation52_spill] sm:$0xff] %v12625_v9  ;;  %v9107_v13 = vld [vmem:[#allocation2 + $0x90] sm:$0xf]  ;;  %v10959_v15 = vld [vmem:[#allocation2 + $0x94] sm:$0xf0]  ;;  %v12634_v24 = vor.u32 %v10943_v11, %v9043_v10  ;;  %vm4365_vm3 = vcmask 64512  }
  0x7b   : > { %1173 = vmatpush.bf16.msra.mxu2 %v12612_v58  ;;  %15307 = vst [vmem:[#allocation53_spill] sm:$0xff] %v12628_v14  ;;  %v9045_v19 = vld [vmem:[#allocation2 + $0x18] sm:$0xf0]  ;;  %v10958_v20 = vld [vmem:[#allocation2 + $0x94] sm:$0xf]  ;;  %v12638_v30 = vor.u32 %v10959_v15, %v9107_v13  ;;  %vm5208_vm4 = vcmask 130048  }
  0x7c   : > { %1186 = vmatpush.bf16.msra.mxu3 %v12615_v62  ;;  %v9109_v22 = vld [vmem:[#allocation2 + $0x98] sm:$0xf0]  ;;  %v9035_v23 = vld [vmem:[#allocation2] sm:$0xf]  ;;  %v10941_v26 = vld [vmem:[#allocation2 + $0x4] sm:$0xf0]  ;;  %v12640_v31 = vor.u32 %v10942_v18, %v9045_v19 }
  0x7d   : > { %1148 = vmatpush.bf16.msra.mxu0 %v12619_v5  ;;  %v9099_v27 = vld [vmem:[#allocation2 + $0x80] sm:$0xf]  ;;  %v10957_v28 = vld [vmem:[#allocation2 + $0x84] sm:$0xf0]  ;;  %v10940_v32 = vld [vmem:[#allocation2 + $0x4] sm:$0xf]  ;;  %v12643_v37 = vor.u32 %v10958_v20, %v9109_v22  ;;  %v12646_v47 = vor.u32 %v10941_v26, %v9035_v23 }
  0x7e   : > { %1161 = vmatpush.bf16.msra.mxu1 %v12623_v6  ;;  %15309 = vst [vmem:[#allocation54_spill] sm:$0xff] %v12640_v31  ;;  %v9037_v35 = vld [vmem:[#allocation2 + $0x8] sm:$0xf0]  ;;  %v10956_v39 = vld [vmem:[#allocation2 + $0x84] sm:$0xf]  ;;  %v12650_v52 = vor.u32 %v10957_v28, %v9099_v27  ;;  %vm5990_vm5 = vcmask 261120  }
  0x7f   : > { %1174 = vmatpush.bf16.msra.mxu2 %v12625_v9  ;;  %15310 = vst [vmem:[#allocation55_spill] sm:$0xff] %v12643_v37  ;;  %v9101_v40 = vld [vmem:[#allocation2 + $0x88] sm:$0xf0]  ;;  %v9219_v41 = vld [vmem:[#allocation2 + $0x170] sm:$0xf]  ;;  %v12652_v53 = vor.u32 %v10940_v32, %v9037_v35  ;;  %s10939_s30 = sshll.u32 %s15846_s6, 4 }
  0x80   : > { %1187 = vmatpush.bf16.msra.mxu3 %v12628_v14  ;;  %944 = vst [vmem:[#allocation1] ss:$2 sm:$0xff] %v941_v36  ;;  %v10987_v42 = vld [vmem:[#allocation2 + $0x174] sm:$0xf0]  ;;  %v9283_v43 = vld [vmem:[#allocation2 + $0x1f0] sm:$0xf]  ;;  %v12655_v59 = vor.u32 %v10956_v39, %v9101_v40 }
  0x81   : > { %1149 = vmatpush.bf16.msra.mxu0 %v12634_v24  ;;  %v11003_v48 = vld [vmem:[#allocation2 + $0x1f4] sm:$0xf0]  ;;  %v10986_v49 = vld [vmem:[#allocation2 + $0x174] sm:$0xf]  ;;  %v9221_v51 = vld [vmem:[#allocation2 + $0x178] sm:$0xf0]  ;;  %v12657_v60 = vor.u32 %v10987_v42, %v9219_v41 }
  0x82   : > { %1162 = vmatpush.bf16.msra.mxu1 %v12638_v30  ;;  %15311 = vst [vmem:[#allocation56_spill] sm:$0xff] %v12652_v53  ;;  %v11002_v54 = vld [vmem:[#allocation2 + $0x1f4] sm:$0xf]  ;;  %v9285_v55 = vld [vmem:[#allocation2 + $0x1f8] sm:$0xf0]  ;;  %v12659_v0 = vor.u32 %v11003_v48, %v9283_v43  ;;  %v12661_v1 = vor.u32 %v10986_v49, %v9221_v51  ;;  %s15843_s27 = sld [smem:[#allocation322_spill]] }
  0x83   : > { %1175 = vmatpush.bf16.msra.mxu2 %v12640_v31  ;;  %15312 = vst [vmem:[#allocation57_spill] sm:$0xff] %v12655_v59  ;;  %v9211_v61 = vld [vmem:[#allocation2 + $0x160] sm:$0xf]  ;;  %v10985_v63 = vld [vmem:[#allocation2 + $0x164] sm:$0xf0]  ;;  %v12664_v11 = vor.u32 %v11002_v54, %v9285_v55 }
  0x84   : > { %1188 = vmatpush.bf16.msra.mxu3 %v12643_v37  ;;  %15313 = vst [vmem:[#allocation58_spill] sm:$0xff] %v12657_v60  ;;  %v9275_v2 = vld [vmem:[#allocation2 + $0x1e0] sm:$0xf]  ;;  %v11001_v4 = vld [vmem:[#allocation2 + $0x1e4] sm:$0xf0]  ;;  %v12674_v26 = vor.u32 %v10985_v63, %v9211_v61 }
  0x85   : > { %15314 = vst [vmem:[#allocation59_spill] sm:$0xff] %v12659_v0  ;;  %v10984_v10 = vld [vmem:[#allocation2 + $0x164] sm:$0xf]  ;;  %1150 = vmatpush.bf16.msra.mxu0 %v12646_v47  ;;  %v9213_v13 = vld [vmem:[#allocation2 + $0x168] sm:$0xf0]  ;;  %v12678_v27 = vor.u32 %v11001_v4, %v9275_v2 }
  0x86   : > { %15315 = vst [vmem:[#allocation60_spill] sm:$0xff] %v12661_v1  ;;  %v11000_v15 = vld [vmem:[#allocation2 + $0x1e4] sm:$0xf]  ;;  %v9277_v18 = vld [vmem:[#allocation2 + $0x1e8] sm:$0xf0]  ;;  %1163 = vmatpush.bf16.msra.mxu1 %v12650_v52  ;;  %v12680_v28 = vor.u32 %v10984_v10, %v9213_v13 }
  0x87   : > { %15316 = vst [vmem:[#allocation61_spill] sm:$0xff] %v12664_v11  ;;  %1176 = vmatpush.bf16.msra.mxu2 %v12652_v53  ;;  %v945_v19 = vld.sshfl [vmem:[#allocation1] sm:$0xff pattern:$0x75316420]  ;;  %v9203_v32 = vld [vmem:[#allocation2 + $0x150] sm:$0xf]  ;;  %v12684_v39 = vor.u32 %v11000_v15, %v9277_v18 }
  0x88   : > { %v946_v20 = vld.sshfl [vmem:[#allocation1 + $0x8] sm:$0xff pattern:$0x75316420]  ;;  %1189 = vmatpush.bf16.msra.mxu3 %v12655_v59  ;;  %v12670_v22 = vpack.c.bf16 %v945_v19, %v945_v19  ;;  %15317 = vst [vmem:[#allocation62_spill] sm:$0xff] %v12674_v26  ;;  %v10983_v35 = vld [vmem:[#allocation2 + $0x154] sm:$0xf0]  ;;  %s939_s25 = scalar_lea.vmem %s15843_s27, %s10939_s30 }
  0x89   : > { %1389 = vmatpush.bf16.msrb.mxu0 %v12657_v60  ;;  %v12672_v23 = vpack.c.bf16 %v946_v20, %v946_v20  ;;  %15318 = vst [vmem:[#allocation63_spill] sm:$0xff] %v12678_v27  ;;  %v9267_v36 = vld [vmem:[#allocation2 + $0x1d0] sm:$0xf]  ;;  %v10999_v40 = vld [vmem:[#allocation2 + $0x1d4] sm:$0xf0]  ;;  %v12690_v49 = vor.u32 %v10983_v35, %v9203_v32 }
  0x8a   : > { %1402 = vmatpush.bf16.msrb.mxu1 %v12659_v0  ;;  %15319 = vst [vmem:[#allocation64_spill] sm:$0xff] %v12680_v28  ;;  %1177 = vmatmul.bf16.vlgmr.msra.gmra.mxu2 %v12670_v22  ;;  %v10982_v41 = vld [vmem:[#allocation2 + $0x154] sm:$0xf]  ;;  %v9205_v42 = vld [vmem:[#allocation2 + $0x158] sm:$0xf0]  ;;  %v12694_v51 = vor.u32 %v10999_v40, %v9267_v36 }
  0x8b   : > { %1415 = vmatpush.bf16.msrb.mxu2 %v12661_v1  ;;  %15320 = vst [vmem:[#allocation65_spill] sm:$0xff] %v12684_v39  ;;  %1190 = vmatmul.bf16.vlgmr.msra.gmra.mxu3 %v12672_v23  ;;  %v10998_v43 = vld [vmem:[#allocation2 + $0x1d4] sm:$0xf]  ;;  %v9269_v48 = vld [vmem:[#allocation2 + $0x1d8] sm:$0xf0]  ;;  %v12696_v54 = vor.u32 %v10982_v41, %v9205_v42 }
  0x8c   : > { %1428 = vmatpush.bf16.msrb.mxu3 %v12664_v11  ;;  %1151 = vmatmul.bf16.vlgmr.msra.gmra.mxu0 %v12670_v22  ;;  %15321 = vst [vmem:[#allocation66_spill] sm:$0xff] %v12690_v49  ;;  %v9195_v55 = vld [vmem:[#allocation2 + $0x140] sm:$0xf]  ;;  %v10981_v61 = vld [vmem:[#allocation2 + $0x144] sm:$0xf0]  ;;  %v12699_v2 = vor.u32 %v10998_v43, %v9269_v48  ;;  %v11333_v60 = vld [vmem:[#allocation13 + $0x28] sm:$0xff] }
  0x8d   : > { %1390 = vmatpush.bf16.msrb.mxu0 %v12674_v26  ;;  %1164 = vmatmul.bf16.vlgmr.msra.gmra.mxu1 %v12672_v23  ;;  %15322 = vst [vmem:[#allocation67_spill] sm:$0xff] %v12694_v51  ;;  %v9259_v63 = vld [vmem:[#allocation2 + $0x1c0] sm:$0xf]  ;;  %v10997_v4 = vld [vmem:[#allocation2 + $0x1c4] sm:$0xf0]  ;;  %v12702_v19 = vor.u32 %v10981_v61, %v9195_v55  ;;  %v11337_v59 = vld [vmem:[#allocation13 + $0x48] sm:$0xff] }
  0x8e   : > { %1403 = vmatpush.bf16.msrb.mxu1 %v12678_v27  ;;  %15323 = vst [vmem:[#allocation68_spill] sm:$0xff] %v12696_v54  ;;  %v10980_v10 = vld [vmem:[#allocation2 + $0x144] sm:$0xf]  ;;  %v9197_v13 = vld [vmem:[#allocation2 + $0x148] sm:$0xf0]  ;;  %v12706_v20 = vor.u32 %v10997_v4, %v9259_v63  ;;  %v11341_v53 = vld [vmem:[#allocation13 + $0x68] sm:$0xff] }
  0x8f   : > { %1416 = vmatpush.bf16.msrb.mxu2 %v12680_v28  ;;  %15324 = vst [vmem:[#allocation69_spill] sm:$0xff] %v12699_v2  ;;  %v10996_v15 = vld [vmem:[#allocation2 + $0x1c4] sm:$0xf]  ;;  %v9261_v18 = vld [vmem:[#allocation2 + $0x1c8] sm:$0xf0]  ;;  %v12708_v32 = vor.u32 %v10980_v10, %v9197_v13 }
  0x90   : > { %1429 = vmatpush.bf16.msrb.mxu3 %v12684_v39  ;;  %15325 = vst [vmem:[#allocation70_spill] sm:$0xff] %v12702_v19  ;;  %v9187_v35 = vld [vmem:[#allocation2 + $0x130] sm:$0xf]  ;;  %v10979_v36 = vld [vmem:[#allocation2 + $0x134] sm:$0xf0]  ;;  %v12711_v41 = vor.u32 %v10996_v15, %v9261_v18 }
  0x91   : > { %1391 = vmatpush.bf16.msrb.mxu0 %v12690_v49  ;;  %15326 = vst [vmem:[#allocation71_spill] sm:$0xff] %v12706_v20  ;;  %v9251_v40 = vld [vmem:[#allocation2 + $0x1b0] sm:$0xf]  ;;  %v10995_v42 = vld [vmem:[#allocation2 + $0x1b4] sm:$0xf0]  ;;  %v12714_v39 = vor.u32 %v10979_v36, %v9187_v35 }
  0x92   : > { %1404 = vmatpush.bf16.msrb.mxu1 %v12694_v51  ;;  %15327 = vst [vmem:[#allocation72_spill] sm:$0xff] %v12708_v32  ;;  %v10978_v43 = vld [vmem:[#allocation2 + $0x134] sm:$0xf]  ;;  %v9189_v48 = vld [vmem:[#allocation2 + $0x138] sm:$0xf0]  ;;  %v12718_v63 = vor.u32 %v10995_v42, %v9251_v40 }
  0x93   : > { %1417 = vmatpush.bf16.msrb.mxu2 %v12696_v54  ;;  %15328 = vst [vmem:[#allocation73_spill] sm:$0xff] %v12711_v41  ;;  %v10994_v55 = vld [vmem:[#allocation2 + $0x1b4] sm:$0xf]  ;;  %v9253_v61 = vld [vmem:[#allocation2 + $0x1b8] sm:$0xf0]  ;;  %v12720_v4 = vor.u32 %v10978_v43, %v9189_v48 }
  0x94   : > { %1430 = vmatpush.bf16.msrb.mxu3 %v12699_v2  ;;  %15329 = vst [vmem:[#allocation74_spill] sm:$0xff] %v12714_v39  ;;  %v9179_v10 = vld [vmem:[#allocation2 + $0x120] sm:$0xf]  ;;  %v10977_v13 = vld [vmem:[#allocation2 + $0x124] sm:$0xf0]  ;;  %v12723_v18 = vor.u32 %v10994_v55, %v9253_v61 }
  0x95   : > { %1392 = vmatpush.bf16.msrb.mxu0 %v12702_v19  ;;  %15330 = vst [vmem:[#allocation75_spill] sm:$0xff] %v12718_v63  ;;  %v9243_v15 = vld [vmem:[#allocation2 + $0x1a0] sm:$0xf]  ;;  %v10993_v2 = vld [vmem:[#allocation2 + $0x1a4] sm:$0xf0]  ;;  %v12726_v28 = vor.u32 %v10977_v13, %v9179_v10 }
  0x96   : > { %1405 = vmatpush.bf16.msrb.mxu1 %v12706_v20  ;;  %15331 = vst [vmem:[#allocation76_spill] sm:$0xff] %v12720_v4  ;;  %v10976_v11 = vld [vmem:[#allocation2 + $0x124] sm:$0xf]  ;;  %v9181_v54 = vld [vmem:[#allocation2 + $0x128] sm:$0xf0]  ;;  %v12730_v40 = vor.u32 %v10993_v2, %v9243_v15 }
  0x97   : > { %1418 = vmatpush.bf16.msrb.mxu2 %v12708_v32  ;;  %15332 = vst [vmem:[#allocation77_spill] sm:$0xff] %v12723_v18  ;;  %v10992_v35 = vld [vmem:[#allocation2 + $0x1a4] sm:$0xf]  ;;  %v9245_v36 = vld [vmem:[#allocation2 + $0x1a8] sm:$0xf0]  ;;  %v12732_v42 = vor.u32 %v10976_v11, %v9181_v54 }
  0x98   : > { %1431 = vmatpush.bf16.msrb.mxu3 %v12711_v41  ;;  %15333 = vst [vmem:[#allocation78_spill] sm:$0xff] %v12726_v28  ;;  %v9171_v43 = vld [vmem:[#allocation2 + $0x110] sm:$0xf]  ;;  %v10975_v48 = vld [vmem:[#allocation2 + $0x114] sm:$0xf0]  ;;  %v12735_v61 = vor.u32 %v10992_v35, %v9245_v36 }
  0x99   : > { %1393 = vmatpush.bf16.msrb.mxu0 %v12714_v39  ;;  %15334 = vst [vmem:[#allocation79_spill] sm:$0xff] %v12730_v40  ;;  %v9235_v55 = vld [vmem:[#allocation2 + $0x190] sm:$0xf]  ;;  %v10991_v41 = vld [vmem:[#allocation2 + $0x194] sm:$0xf0] }
  0x9a   : > { %1406 = vmatpush.bf16.msrb.mxu1 %v12718_v63  ;;  %15335 = vst [vmem:[#allocation80_spill] sm:$0xff] %v12732_v42  ;;  %v10974_v32 = vld [vmem:[#allocation2 + $0x114] sm:$0xf]  ;;  %v9173_v1 = vld [vmem:[#allocation2 + $0x118] sm:$0xf0]  ;;  %v12738_v63 = vor.u32 %v10975_v48, %v9171_v43  ;;  %v12742_v11 = vor.u32 %v10991_v41, %v9235_v55 }
  0x9b   : > { %1419 = vmatpush.bf16.msrb.mxu2 %v12720_v4  ;;  %15336 = vst [vmem:[#allocation81_spill] sm:$0xff] %v12735_v61  ;;  %v10990_v10 = vld [vmem:[#allocation2 + $0x194] sm:$0xf]  ;;  %v9237_v13 = vld [vmem:[#allocation2 + $0x198] sm:$0xf0]  ;;  %v12744_v54 = vor.u32 %v10974_v32, %v9173_v1 }
  0x9c   : > { %1432 = vmatpush.bf16.msrb.mxu3 %v12723_v18  ;;  %15337 = vst [vmem:[#allocation82_spill] sm:$0xff] %v12738_v63  ;;  %v9163_v2 = vld [vmem:[#allocation2 + $0x100] sm:$0xf]  ;;  %v10973_v15 = vld [vmem:[#allocation2 + $0x104] sm:$0xf0]  ;;  %v12747_v36 = vor.u32 %v10990_v10, %v9237_v13 }
  0x9d   : > { %1394 = vmatpush.bf16.msrb.mxu0 %v12726_v28  ;;  %15338 = vst [vmem:[#allocation83_spill] sm:$0xff] %v12742_v11  ;;  %v9227_v35 = vld [vmem:[#allocation2 + $0x180] sm:$0xf]  ;;  %v10989_v18 = vld [vmem:[#allocation2 + $0x184] sm:$0xf0] }
  0x9e   : > { %1407 = vmatpush.bf16.msrb.mxu1 %v12730_v40  ;;  %15339 = vst [vmem:[#allocation84_spill] sm:$0xff] %v12744_v54  ;;  %v10972_v4 = vld [vmem:[#allocation2 + $0x104] sm:$0xf]  ;;  %v9165_v28 = vld [vmem:[#allocation2 + $0x108] sm:$0xf0]  ;;  %v12750_v40 = vor.u32 %v10973_v15, %v9163_v2  ;;  %v12754_v1 = vor.u32 %v10989_v18, %v9227_v35 }
  0x9f   : > { %1420 = vmatpush.bf16.msrb.mxu2 %v12732_v42  ;;  %15340 = vst [vmem:[#allocation85_spill] sm:$0xff] %v12747_v36  ;;  %v10988_v43 = vld [vmem:[#allocation2 + $0x184] sm:$0xf]  ;;  %v9229_v48 = vld [vmem:[#allocation2 + $0x188] sm:$0xf0]  ;;  %v12756_v32 = vor.u32 %v10972_v4, %v9165_v28 }
  0xa0   : > { %1433 = vmatpush.bf16.msrb.mxu3 %v12735_v61  ;;  %15341 = vst [vmem:[#allocation86_spill] sm:$0xff] %v12750_v40  ;;  %v12759_v41 = vor.u32 %v10988_v43, %v9229_v48  ;;  %v11018_v28 = vld [vmem:[#allocation2 + $0x274] sm:$0xf]  ;;  %v9357_v4 = vld [vmem:[#allocation2 + $0x278] sm:$0xf0]  ;;  %v1195_v48 = vld [vmem:[#allocation4] sm:$0xff] }
  0xa1   : > { %1395 = vmatpush.bf16.msrb.mxu0 %v12738_v63  ;;  %15342 = vst [vmem:[#allocation87_spill] sm:$0xff] %v12754_v1  ;;  %v12769_v10 = vor.u32 %v11018_v28, %v9357_v4  ;;  %v11016_v2 = vld [vmem:[#allocation2 + $0x264] sm:$0xf]  ;;  %v9349_v15 = vld [vmem:[#allocation2 + $0x268] sm:$0xf0] }
  0xa2   : > { %1408 = vmatpush.bf16.msrb.mxu1 %v12742_v11  ;;  %15343 = vst [vmem:[#allocation88_spill] sm:$0xff] %v12756_v32  ;;  %v11034_v35 = vld [vmem:[#allocation2 + $0x2f4] sm:$0xf]  ;;  %v9421_v43 = vld [vmem:[#allocation2 + $0x2f8] sm:$0xf0] }
  0xa3   : > { %1421 = vmatpush.bf16.msrb.mxu2 %v12744_v54  ;;  %15344 = vst [vmem:[#allocation89_spill] sm:$0xff] %v12759_v41  ;;  %v11014_v54 = vld [vmem:[#allocation2 + $0x254] sm:$0xf]  ;;  %v9341_v28 = vld [vmem:[#allocation2 + $0x258] sm:$0xf0] }
  0xa4   : > { %1434 = vmatpush.bf16.msrb.mxu3 %v12747_v36  ;;  %15345 = vst [vmem:[#allocation90_spill] sm:$0xff] %v12769_v10  ;;  %v12773_v36 = vor.u32 %v11016_v2, %v9349_v15  ;;  %v11012_v15 = vld [vmem:[#allocation2 + $0x244] sm:$0xf]  ;;  %v9365_v63 = vld [vmem:[#allocation2 + $0x288] sm:$0xf0] }
  0xa5   : > { %1396 = vmatpush.bf16.msrb.mxu0 %v12750_v40  ;;  %v9479_v39 = vld [vmem:[#allocation2 + $0x360] sm:$0xf]  ;;  %v11049_v20 = vld [vmem:[#allocation2 + $0x364] sm:$0xf0] }
  0xa6   : > { %1409 = vmatpush.bf16.msrb.mxu1 %v12754_v1  ;;  %15346 = vst [vmem:[#allocation91_spill] sm:$0xff] %v12773_v36  ;;  %v9405_v1 = vld [vmem:[#allocation2 + $0x2d8] sm:$0xf0]  ;;  %v11097_v19 = vld [vmem:[#allocation2 + $0x4e4] sm:$0xf0] }
  0xa7   : > { %1422 = vmatpush.bf16.msrb.mxu2 %v12756_v32  ;;  %v12775_v32 = vor.u32 %v11034_v35, %v9421_v43  ;;  %v9333_v35 = vld [vmem:[#allocation2 + $0x248] sm:$0xf0]  ;;  %v11030_v43 = vld [vmem:[#allocation2 + $0x2d4] sm:$0xf] }
  0xa8   : > { %1435 = vmatpush.bf16.msrb.mxu3 %v12759_v41  ;;  %1397 = vmatmul.bf16.vlgmr.msrb.gmra.mxu0 %v12670_v22 }
  0xa9   : > { %1410 = vmatmul.bf16.vlgmr.msrb.gmra.mxu1 %v12672_v23  ;;  %15347 = vst [vmem:[#allocation92_spill] sm:$0xff] %v12775_v32 }
  0xaa   : > { %1423 = vmatmul.bf16.vlgmr.msrb.gmra.mxu2 %v12670_v22 }
  0xab   : > { %1436 = vmatmul.bf16.vlgmr.msrb.gmra.mxu3 %v12672_v23 }
 0x109   : > { %v1152_v18 = vpop.f32.mrf.mxu0 }
 0x10a   : > { %v1165_v55 = vpop.f32.mrf.mxu1 }
 0x10b   : > { %v1166_v13 = vadd.f32 %v1165_v55, %v1152_v18  ;;  %v11032_v18 = vld [vmem:[#allocation2 + $0x2e4] sm:$0xf]  ;;  %v9413_v55 = vld [vmem:[#allocation2 + $0x2e8] sm:$0xf0] }
 0x10c   : > { %v12783_v2 = vor.u32 %v11032_v18, %v9413_v55  ;;  %v9397_v18 = vld [vmem:[#allocation2 + $0x2c8] sm:$0xf0] }
 0x10d   : > { %9293 = vmatpush.msk.msra.mxu2 %vm1447_vm0, %v1166_v13  ;;  %v1178_v41 = vpop.f32.mrf.mxu2  ;;  %v12780_v13 = vor.u32 %v11014_v54, %v9341_v28  ;;  %v12790_v54 = vor.u32 %v11030_v43, %v9405_v1  ;;  %v9325_v28 = vld [vmem:[#allocation2 + $0x238] sm:$0xf0] }
 0x10e   : > { %v1191_v61 = vpop.f32.mrf.mxu3  ;;  %9294 = vmatmul.msk.f32.vlgmr.msra.gmra.mxu2 %vm1443_vm1, %v1195_v48  ;;  %15349 = vst [vmem:[#allocation94_spill] sm:$0xff] %v12783_v2 }
 0x10f   : > { %1762 = vmatpush.bf16.msrb.mxu2 %v12769_v10  ;;  %v1192_v4 = vadd.f32 %v1191_v61, %v1178_v41  ;;  %15348 = vst [vmem:[#allocation93_spill] sm:$0xff] %v12780_v13  ;;  %v12787_v61 = vor.u32 %v11012_v15, %v9333_v35  ;;  %v9317_v15 = vld [vmem:[#allocation2 + $0x228] sm:$0xf0]  ;;  %v11026_v35 = vld [vmem:[#allocation2 + $0x2b4] sm:$0xf] }
 0x110   : > { %15351 = vst [vmem:[#allocation96_spill] sm:$0xff] %v12790_v54 }
 0x111   : > { %v1154_v42 = vpop.f32.mrf.mxu0  ;;  %9295 = vmatpush.msk.msra.mxu3 %vm1447_vm0, %v1192_v4  ;;  %15350 = vst [vmem:[#allocation95_spill] sm:$0xff] %v12787_v61  ;;  %v11028_v4 = vld [vmem:[#allocation2 + $0x2c4] sm:$0xf] }
 0x112   : > { %v1167_v10 = vpop.f32.mrf.mxu1  ;;  %9296 = vmatmul.msk.f32.vlgmr.msra.gmra.mxu3 %vm1443_vm1, %v1195_v48  ;;  %v12796_v48 = vor.u32 %v11028_v4, %v9397_v18  ;;  %v9355_v4 = vld [vmem:[#allocation2 + $0x270] sm:$0xf]  ;;  %v11019_v18 = vld [vmem:[#allocation2 + $0x274] sm:$0xf0] }
 0x113   : > { %1763 = vmatpush.bf16.msrb.mxu2 %v12773_v36  ;;  %1775 = vmatpush.bf16.msrb.mxu3 %v12775_v32  ;;  %v11010_v10 = vld [vmem:[#allocation2 + $0x234] sm:$0xf]  ;;  %v9389_v32 = vld [vmem:[#allocation2 + $0x2b8] sm:$0xf0]  ;;  %v12810_v40 = vor.u32 %v11019_v18, %v9355_v4  ;;  %v9551_v4 = vld [vmem:[#allocation2 + $0x3f0] sm:$0xf] }
 0x114   : > { %v12793_v55 = vor.u32 %v11010_v10, %v9325_v28  ;;  %15353 = vst [vmem:[#allocation98_spill] sm:$0xff] %v12796_v48  ;;  %v12802_v43 = vor.u32 %v11026_v35, %v9389_v32  ;;  %v11024_v10 = vld [vmem:[#allocation2 + $0x2a4] sm:$0xf]  ;;  %v9381_v28 = vld [vmem:[#allocation2 + $0x2a8] sm:$0xf0] }
 0x115   : > { %v1180_v42 = vpop.f32.mrf.mxu2  ;;  %v9487_v32 = vld [vmem:[#allocation2 + $0x370] sm:$0xf]  ;;  %v11051_v35 = vld [vmem:[#allocation2 + $0x374] sm:$0xf0]  ;;  %15358 = vst [vmem:[#allocation103_spill] sm:$0xff] %v12810_v40 }
 0x116   : > { %v1193_v41 = vpop.f32.mrf.mxu3  ;;  %15352 = vst [vmem:[#allocation97_spill] sm:$0xff] %v12793_v55  ;;  %v11008_v42 = vld [vmem:[#allocation2 + $0x224] sm:$0xf]  ;;  %v12818_v11 = vor.u32 %v11051_v35, %v9487_v32  ;;  %v11067_v18 = vld [vmem:[#allocation2 + $0x3f4] sm:$0xf0]  ;;  %v12829_v32 = vor.u32 %v11049_v20, %v9479_v39 }
 0x117   : > { %1764 = vmatpush.bf16.msrb.mxu2 %v12780_v13  ;;  %1776 = vmatpush.bf16.msrb.mxu3 %v12783_v2  ;;  %v12799_v1 = vor.u32 %v11008_v42, %v9317_v15  ;;  %15355 = vst [vmem:[#allocation100_spill] sm:$0xff] %v12802_v43  ;;  %v11006_v41 = vld [vmem:[#allocation2 + $0x214] sm:$0xf]  ;;  %v9309_v2 = vld [vmem:[#allocation2 + $0x218] sm:$0xf0] }
 0x118   : > { %v11022_v42 = vld [vmem:[#allocation2 + $0x294] sm:$0xf]  ;;  %v11004_v15 = vld [vmem:[#allocation2 + $0x204] sm:$0xf]  ;;  %15361 = vst [vmem:[#allocation106_spill] sm:$0xff] %v12818_v11 }
 0x119   : > { %15354 = vst [vmem:[#allocation99_spill] sm:$0xff] %v12799_v1  ;;  %v9411_v20 = vld [vmem:[#allocation2 + $0x2e0] sm:$0xf] }
 0x11a   : > { %15364 = vst [vmem:[#allocation109_spill] sm:$0xff] %v12829_v32 }
 0x11b   : > { %1765 = vmatpush.bf16.msrb.mxu2 %v12787_v61  ;;  %1777 = vmatpush.bf16.msrb.mxu3 %v12790_v54  ;;  %v12805_v54 = vor.u32 %v11006_v41, %v9309_v2  ;;  %v12808_v61 = vor.u32 %v11024_v10, %v9381_v28  ;;  %v9347_v10 = vld [vmem:[#allocation2 + $0x260] sm:$0xf]  ;;  %v11017_v28 = vld [vmem:[#allocation2 + $0x264] sm:$0xf0] }
 0x11d   : > { %15356 = vst [vmem:[#allocation101_spill] sm:$0xff] %v12805_v54 }
 0x11e   : > { %15357 = vst [vmem:[#allocation102_spill] sm:$0xff] %v12808_v61 }
 0x11f   : > { %1766 = vmatpush.bf16.msrb.mxu2 %v12793_v55  ;;  %1778 = vmatpush.bf16.msrb.mxu3 %v12796_v48  ;;  %v9301_v55 = vld [vmem:[#allocation2 + $0x208] sm:$0xf0]  ;;  %v9373_v48 = vld [vmem:[#allocation2 + $0x298] sm:$0xf0] }
 0x120   : > { %v12816_v41 = vor.u32 %v11022_v42, %v9373_v48  ;;  %v9339_v42 = vld [vmem:[#allocation2 + $0x250] sm:$0xf] }
 0x122   : > { %15360 = vst [vmem:[#allocation105_spill] sm:$0xff] %v12816_v41 }
 0x123   : > { %1767 = vmatpush.bf16.msrb.mxu2 %v12799_v1  ;;  %1779 = vmatpush.bf16.msrb.mxu3 %v12802_v43  ;;  %v12813_v1 = vor.u32 %v11004_v15, %v9301_v55  ;;  %v11020_v43 = vld [vmem:[#allocation2 + $0x284] sm:$0xf]  ;;  %v11035_v55 = vld [vmem:[#allocation2 + $0x2f4] sm:$0xf0] }
 0x124   : > { %v12826_v48 = vor.u32 %v11020_v43, %v9365_v63  ;;  %v11015_v15 = vld [vmem:[#allocation2 + $0x254] sm:$0xf0]  ;;  %v9543_v63 = vld [vmem:[#allocation2 + $0x3e0] sm:$0xf]  ;;  %v11065_v43 = vld [vmem:[#allocation2 + $0x3e4] sm:$0xf0] }
 0x125   : > { %v1398_v13 = vpop.f32.mrf.mxu0  ;;  %15359 = vst [vmem:[#allocation104_spill] sm:$0xff] %v12813_v1  ;;  %v12838_v39 = vor.u32 %v11015_v15, %v9339_v42  ;;  %v9535_v15 = vld [vmem:[#allocation2 + $0x3d0] sm:$0xf] }
 0x126   : > { %v1411_v36 = vpop.f32.mrf.mxu1  ;;  %15363 = vst [vmem:[#allocation108_spill] sm:$0xff] %v12826_v48 }
 0x127   : > { %1768 = vmatpush.bf16.msrb.mxu2 %v12805_v54  ;;  %v1412_v2 = vadd.f32 %v1411_v36, %v1398_v13  ;;  %1780 = vmatpush.bf16.msrb.mxu3 %v12808_v61  ;;  %v1442_v54 = vld [vmem:[#allocation4 + $0x8] sm:$0xff]  ;;  %v12822_v36 = vor.u32 %v11017_v28, %v9347_v10  ;;  %v9419_v13 = vld [vmem:[#allocation2 + $0x2f0] sm:$0xf]  ;;  %v11047_v10 = vld [vmem:[#allocation2 + $0x354] sm:$0xf0]  ;;  %15367 = vst [vmem:[#allocation112_spill] sm:$0xff] %v12838_v39 }
 0x128   : > { %v9471_v61 = vld [vmem:[#allocation2 + $0x350] sm:$0xf] }
 0x129   : > { %9289 = vmatpush.msk.msra.mxu0 %vm1447_vm0, %v1412_v2  ;;  %15362 = vst [vmem:[#allocation107_spill] sm:$0xff] %v12822_v36  ;;  %v12831_v2 = vor.u32 %v11067_v18, %v9551_v4  ;;  %v11033_v4 = vld [vmem:[#allocation2 + $0x2e4] sm:$0xf0]  ;;  %v9331_v18 = vld [vmem:[#allocation2 + $0x240] sm:$0xf] }
 0x12a   : > { %9290 = vmatmul.msk.f32.vlgmr.msra.gmra.mxu0 %vm1443_vm1, %v1442_v54  ;;  %v12849_v42 = vor.u32 %v11033_v4, %v9411_v20 }
 0x12b   : > { %1736 = vmatpush.bf16.msrb.mxu0 %v12810_v40  ;;  %1769 = vmatpush.bf16.msrb.mxu2 %v12813_v1  ;;  %15365 = vst [vmem:[#allocation110_spill] sm:$0xff] %v12831_v2  ;;  %v12834_v40 = vor.u32 %v11035_v55, %v9419_v13  ;;  %v12842_v13 = vor.u32 %v11047_v10, %v9471_v61  ;;  %v9403_v10 = vld [vmem:[#allocation2 + $0x2d0] sm:$0xf] }
 0x12c   : > { %1781 = vmatpush.bf16.msrb.mxu3 %v12816_v41  ;;  %v12846_v55 = vor.u32 %v11065_v43, %v9543_v63  ;;  %15370 = vst [vmem:[#allocation115_spill] sm:$0xff] %v12849_v42  ;;  %v9323_v63 = vld [vmem:[#allocation2 + $0x230] sm:$0xf]  ;;  %v11011_v43 = vld [vmem:[#allocation2 + $0x234] sm:$0xf0] }
 0x12d   : > { %v1424_v35 = vpop.f32.mrf.mxu2  ;;  %v1400_v1 = vpop.f32.mrf.mxu0  ;;  %15366 = vst [vmem:[#allocation111_spill] sm:$0xff] %v12834_v40 }
 0x12e   : > { %v1437_v28 = vpop.f32.mrf.mxu3  ;;  %1770 = vmatmul.bf16.vlgmr.msrb.gmra.mxu2 %v12670_v22  ;;  %v1413_v41 = vpop.f32.mrf.mxu1  ;;  %v11013_v1 = vld [vmem:[#allocation2 + $0x244] sm:$0xf0]  ;;  %15368 = vst [vmem:[#allocation113_spill] sm:$0xff] %v12842_v13 }
 0x12f   : > { %2034 = vmatpush.bf16.msra.mxu2 %v12818_v11  ;;  %v1438_v11 = vadd.f32 %v1437_v28, %v1424_v35  ;;  %1737 = vmatpush.bf16.msrb.mxu0 %v12822_v36  ;;  %15369 = vst [vmem:[#allocation114_spill] sm:$0xff] %v12846_v55  ;;  %v9463_v41 = vld [vmem:[#allocation2 + $0x340] sm:$0xf]  ;;  %v11045_v35 = vld [vmem:[#allocation2 + $0x344] sm:$0xf0]  ;;  %v12853_v61 = vor.u32 %v11013_v1, %v9331_v18 }
 0x130   : > { %1782 = vmatpush.bf16.msrb.mxu3 %v12826_v48  ;;  %v11063_v28 = vld [vmem:[#allocation2 + $0x3d4] sm:$0xf0]  ;;  %v9527_v1 = vld [vmem:[#allocation2 + $0x3c0] sm:$0xf] }
 0x131   : > { %9291 = vmatpush.msk.msra.mxu1 %vm1447_vm0, %v1438_v11  ;;  %15371 = vst [vmem:[#allocation116_spill] sm:$0xff] %v12853_v61  ;;  %v11031_v11 = vld [vmem:[#allocation2 + $0x2d4] sm:$0xf0]  ;;  %v12860_v4 = vor.u32 %v11063_v28, %v9535_v15  ;;  %v11009_v15 = vld [vmem:[#allocation2 + $0x224] sm:$0xf0] }
 0x132   : > { %9292 = vmatmul.msk.f32.vlgmr.msra.gmra.mxu1 %vm1443_vm1, %v1442_v54  ;;  %v11043_v48 = vld [vmem:[#allocation2 + $0x334] sm:$0xf0]  ;;  %v12863_v18 = vor.u32 %v11031_v11, %v9403_v10  ;;  %v11029_v54 = vld [vmem:[#allocation2 + $0x2c4] sm:$0xf0]  ;;  %v9447_v10 = vld [vmem:[#allocation2 + $0x320] sm:$0xf] }
 0x133   : > { %2035 = vmatpush.bf16.msra.mxu2 %v12829_v32  ;;  %1749 = vmatpush.bf16.msrb.mxu1 %v12834_v40  ;;  %15373 = vst [vmem:[#allocation118_spill] sm:$0xff] %v12860_v4  ;;  %v9455_v32 = vld [vmem:[#allocation2 + $0x330] sm:$0xf]  ;;  %v11041_v11 = vld [vmem:[#allocation2 + $0x324] sm:$0xf0] }
 0x134   : > { %2047 = vmatpush.bf16.msra.mxu3 %v12831_v2  ;;  %1738 = vmatpush.bf16.msrb.mxu0 %v12838_v39  ;;  %v12856_v2 = vor.u32 %v11045_v35, %v9463_v41  ;;  %15374 = vst [vmem:[#allocation119_spill] sm:$0xff] %v12863_v18  ;;  %v12866_v41 = vor.u32 %v11011_v43, %v9323_v63  ;;  %v9395_v35 = vld [vmem:[#allocation2 + $0x2c0] sm:$0xf]  ;;  %v9519_v63 = vld [vmem:[#allocation2 + $0x3b0] sm:$0xf] }
 0x135   : > { %1783 = vmatmul.bf16.vlgmr.msrb.gmra.mxu3 %v12672_v23  ;;  %v1426_v20 = vpop.f32.mrf.mxu2  ;;  %v12869_v28 = vor.u32 %v11043_v48, %v9455_v32  ;;  %v11059_v43 = vld [vmem:[#allocation2 + $0x3b4] sm:$0xf0]  ;;  %v9307_v48 = vld [vmem:[#allocation2 + $0x210] sm:$0xf] }
 0x136   : > { %15372 = vst [vmem:[#allocation117_spill] sm:$0xff] %v12856_v2  ;;  %v1439_v40 = vpop.f32.mrf.mxu3  ;;  %v9315_v20 = vld [vmem:[#allocation2 + $0x220] sm:$0xf]  ;;  %v11007_v32 = vld [vmem:[#allocation2 + $0x214] sm:$0xf0] }
 0x137   : > { %2036 = vmatpush.bf16.msra.mxu2 %v12842_v13  ;;  %1750 = vmatpush.bf16.msrb.mxu1 %v12849_v42  ;;  %v11061_v13 = vld [vmem:[#allocation2 + $0x3c4] sm:$0xf0]  ;;  %15375 = vst [vmem:[#allocation120_spill] sm:$0xff] %v12866_v41  ;;  %v12878_v42 = vor.u32 %v11009_v15, %v9315_v20  ;;  %v9511_v20 = vld [vmem:[#allocation2 + $0x3a0] sm:$0xf] }
 0x138   : > { %2048 = vmatpush.bf16.msra.mxu3 %v12846_v55  ;;  %1739 = vmatpush.bf16.msrb.mxu0 %v12853_v61  ;;  %15376 = vst [vmem:[#allocation121_spill] sm:$0xff] %v12869_v28  ;;  %v12872_v40 = vor.u32 %v11061_v13, %v9527_v1  ;;  %v12875_v55 = vor.u32 %v11029_v54, %v9395_v35  ;;  %v11027_v61 = vld [vmem:[#allocation2 + $0x2b4] sm:$0xf0]  ;;  %v9439_v35 = vld [vmem:[#allocation2 + $0x310] sm:$0xf] }
 0x139   : > { %15379 = vst [vmem:[#allocation124_spill] sm:$0xff] %v12878_v42  ;;  %v12881_v13 = vor.u32 %v11041_v11, %v9447_v10  ;;  %v12884_v1 = vor.u32 %v11059_v43, %v9519_v63  ;;  %v11039_v54 = vld [vmem:[#allocation2 + $0x314] sm:$0xf0]  ;;  %v11057_v15 = vld [vmem:[#allocation2 + $0x3a4] sm:$0xf0] }
 0x13a   : > { %15377 = vst [vmem:[#allocation122_spill] sm:$0xff] %v12872_v40  ;;  %v9299_v10 = vld [vmem:[#allocation2 + $0x200] sm:$0xf]  ;;  %v11005_v11 = vld [vmem:[#allocation2 + $0x204] sm:$0xf0]  ;;  %v12893_v63 = vor.u32 %v11039_v54, %v9439_v35  ;;  %v12896_v43 = vor.u32 %v11057_v15, %v9511_v20 }
 0x13b   : > { %2037 = vmatpush.bf16.msra.mxu2 %v12856_v2  ;;  %1751 = vmatpush.bf16.msrb.mxu1 %v12863_v18  ;;  %15378 = vst [vmem:[#allocation123_spill] sm:$0xff] %v12875_v55  ;;  %v9387_v2 = vld [vmem:[#allocation2 + $0x2b0] sm:$0xf]  ;;  %v12890_v18 = vor.u32 %v11007_v32, %v9307_v48  ;;  %v11055_v32 = vld [vmem:[#allocation2 + $0x394] sm:$0xf0] }
 0x13c   : > { %2049 = vmatpush.bf16.msra.mxu3 %v12860_v4  ;;  %1740 = vmatpush.bf16.msrb.mxu0 %v12866_v41  ;;  %15380 = vst [vmem:[#allocation125_spill] sm:$0xff] %v12881_v13  ;;  %v12887_v4 = vor.u32 %v11027_v61, %v9387_v2  ;;  %v11025_v41 = vld [vmem:[#allocation2 + $0x2a4] sm:$0xf0]  ;;  %v9431_v2 = vld [vmem:[#allocation2 + $0x300] sm:$0xf] }
 0x13d   : > { %15381 = vst [vmem:[#allocation126_spill] sm:$0xff] %v12884_v1  ;;  %v11037_v61 = vld [vmem:[#allocation2 + $0x304] sm:$0xf0]  ;;  %v9503_v48 = vld [vmem:[#allocation2 + $0x390] sm:$0xf] }
 0x13e   : > { %15382 = vst [vmem:[#allocation127_spill] sm:$0xff] %v12887_v4  ;;  %v12905_v35 = vor.u32 %v11037_v61, %v9431_v2  ;;  %v12908_v54 = vor.u32 %v11055_v32, %v9503_v48  ;;  %v11053_v20 = vld [vmem:[#allocation2 + $0x384] sm:$0xf0]  ;;  %v9363_v15 = vld [vmem:[#allocation2 + $0x280] sm:$0xf] }
 0x13f   : > { %2038 = vmatpush.bf16.msra.mxu2 %v12869_v28  ;;  %1752 = vmatpush.bf16.msrb.mxu1 %v12875_v55  ;;  %15383 = vst [vmem:[#allocation128_spill] sm:$0xff] %v12890_v18  ;;  %v9379_v28 = vld [vmem:[#allocation2 + $0x2a0] sm:$0xf]  ;;  %v12902_v55 = vor.u32 %v11005_v11, %v9299_v10  ;;  %v11021_v10 = vld [vmem:[#allocation2 + $0x284] sm:$0xf0] }
 0x140   : > { %2050 = vmatpush.bf16.msra.mxu3 %v12872_v40  ;;  %1741 = vmatpush.bf16.msrb.mxu0 %v12878_v42  ;;  %15384 = vst [vmem:[#allocation129_spill] sm:$0xff] %v12893_v63  ;;  %v12899_v40 = vor.u32 %v11025_v41, %v9379_v28  ;;  %v11023_v42 = vld [vmem:[#allocation2 + $0x294] sm:$0xf0]  ;;  %v9495_v28 = vld [vmem:[#allocation2 + $0x380] sm:$0xf]  ;;  %v12920_v2 = vor.u32 %v11021_v10, %v9363_v15  ;;  %v1789_v15 = vld [vmem:[#allocation4 + $0x10] sm:$0xff] }
 0x141   : > { %15385 = vst [vmem:[#allocation130_spill] sm:$0xff] %v12896_v43  ;;  %v12916_v11 = vor.u32 %v11053_v20, %v9495_v28  ;;  %v11066_v48 = vld [vmem:[#allocation2 + $0x3f4] sm:$0xf]  ;;  %v9553_v32 = vld [vmem:[#allocation2 + $0x3f8] sm:$0xf0] }
 0x142   : > { %15386 = vst [vmem:[#allocation131_spill] sm:$0xff] %v12899_v40  ;;  %v12931_v10 = vor.u32 %v11066_v48, %v9553_v32  ;;  %v11060_v48 = vld [vmem:[#allocation2 + $0x3c4] sm:$0xf]  ;;  %v9529_v32 = vld [vmem:[#allocation2 + $0x3c8] sm:$0xf0] }
 0x143   : > { %2039 = vmatpush.bf16.msra.mxu2 %v12881_v13  ;;  %1753 = vmatpush.bf16.msrb.mxu1 %v12887_v4  ;;  %15387 = vst [vmem:[#allocation132_spill] sm:$0xff] %v12902_v55  ;;  %v9371_v13 = vld [vmem:[#allocation2 + $0x290] sm:$0xf]  ;;  %v11099_v36 = vld [vmem:[#allocation2 + $0x4f4] sm:$0xf0] }
 0x144   : > { %2051 = vmatpush.bf16.msra.mxu3 %v12884_v1  ;;  %1742 = vmatpush.bf16.msrb.mxu0 %v12890_v18  ;;  %15388 = vst [vmem:[#allocation133_spill] sm:$0xff] %v12905_v35  ;;  %v12911_v41 = vor.u32 %v11023_v42, %v9371_v13 }
 0x145   : > { %15389 = vst [vmem:[#allocation134_spill] sm:$0xff] %v12908_v54 }
 0x146   : > { %15390 = vst [vmem:[#allocation135_spill] sm:$0xff] %v12911_v41 }
 0x147   : > { %2040 = vmatpush.bf16.msra.mxu2 %v12893_v63  ;;  %1754 = vmatpush.bf16.msrb.mxu1 %v12899_v40  ;;  %15391 = vst [vmem:[#allocation136_spill] sm:$0xff] %v12916_v11  ;;  %v9537_v63 = vld [vmem:[#allocation2 + $0x3d8] sm:$0xf0]  ;;  %v9513_v40 = vld [vmem:[#allocation2 + $0x3a8] sm:$0xf0] }
 0x148   : > { %2052 = vmatpush.bf16.msra.mxu3 %v12896_v43  ;;  %1743 = vmatpush.bf16.msrb.mxu0 %v12902_v55  ;;  %15392 = vst [vmem:[#allocation137_spill] sm:$0xff] %v12920_v2 }
 0x149   : > { %15393 = vst [vmem:[#allocation138_spill] sm:$0xff] %v12931_v10 }
 0x14b   : > { %2041 = vmatpush.bf16.msra.mxu2 %v12905_v35  ;;  %1755 = vmatpush.bf16.msrb.mxu1 %v12911_v41  ;;  %v11062_v35 = vld [vmem:[#allocation2 + $0x3d4] sm:$0xf] }
 0x14c   : > { %2053 = vmatpush.bf16.msra.mxu3 %v12908_v54  ;;  %1744 = vmatmul.bf16.vlgmr.msrb.gmra.mxu0 %v12670_v22  ;;  %v11064_v54 = vld [vmem:[#allocation2 + $0x3e4] sm:$0xf] }
 0x14e   : > { %2042 = vmatmul.bf16.vlgmr.msra.gmra.mxu2 %v12670_v22 }
 0x14f   : > { %1756 = vmatpush.bf16.msrb.mxu1 %v12920_v2 }
 0x150   : > { %2054 = vmatpush.bf16.msra.mxu3 %v12916_v11  ;;  %v9545_v11 = vld [vmem:[#allocation2 + $0x3e8] sm:$0xf0] }
 0x151   : > { %v12936_v1 = vor.u32 %v11064_v54, %v9545_v11  ;;  %v9521_v54 = vld [vmem:[#allocation2 + $0x3b8] sm:$0xf0] }
 0x152   : > { %1757 = vmatmul.bf16.vlgmr.msrb.gmra.mxu1 %v12672_v23 }
 0x153   : > { %2055 = vmatmul.bf16.vlgmr.msra.gmra.mxu3 %v12672_v23  ;;  %15394 = vst [vmem:[#allocation139_spill] sm:$0xff] %v12936_v1 }
 0x191   : > { %v12927_v42 = vpop.f32.mrf.mxu2 }
 0x195   : > { %v12929_v13 = vpop.f32.mrf.mxu3 }
 0x1a7   : > { %v12938_v2 = vpop.f32.mrf.mxu0 }
 0x1b1   : > { %v1771_v61 = vpop.f32.mrf.mxu2 }
 0x1b8   : > { %v1784_v28 = vpop.f32.mrf.mxu3 }
 0x1b9   : > { %v1785_v20 = vadd.f32 %v1784_v28, %v1771_v61  ;;  %v1773_v43 = vpop.f32.mrf.mxu2  ;;  %v12941_v61 = vor.u32 %v11062_v35, %v9537_v63  ;;  %v12946_v28 = vpop.f32.mrf.mxu1  ;;  %v9489_v35 = vld [vmem:[#allocation2 + $0x378] sm:$0xf0] }
 0x1ba   : > { %v12944_v43 = vor.u32 %v11060_v48, %v9529_v32  ;;  %v9505_v48 = vld [vmem:[#allocation2 + $0x398] sm:$0xf0] }
 0x1bb   : > { %9427 = vmatpush.msk.msra.mxu1 %vm1447_vm0, %v1785_v20  ;;  %15395 = vst [vmem:[#allocation140_spill] sm:$0xff] %v12941_v61  ;;  %v11058_v20 = vld [vmem:[#allocation2 + $0x3b4] sm:$0xf] }
 0x1bc   : > { %9428 = vmatmul.msk.f32.vlgmr.msra.gmra.mxu1 %vm1443_vm1, %v1789_v15  ;;  %15396 = vst [vmem:[#allocation141_spill] sm:$0xff] %v12944_v43 }
 0x1bd   : > { %2073 = vmatpush.bf16.msrb.mxu1 %v12931_v10  ;;  %v12949_v10 = vor.u32 %v11058_v20, %v9521_v54  ;;  %v11048_v54 = vld [vmem:[#allocation2 + $0x364] sm:$0xf] }
 0x1bf   : > { %15397 = vst [vmem:[#allocation142_spill] sm:$0xff] %v12949_v10 }
 0x1c0   : > { %v1786_v41 = vpop.f32.mrf.mxu3 }
 0x1c1   : > { %2074 = vmatpush.bf16.msrb.mxu1 %v12936_v1  ;;  %v11056_v41 = vld [vmem:[#allocation2 + $0x3a4] sm:$0xf]  ;;  %v11050_v1 = vld [vmem:[#allocation2 + $0x374] sm:$0xf] }
 0x1c2   : > { %v12952_v63 = vor.u32 %v11056_v41, %v9513_v40  ;;  %v12954_v39 = vor.u32 %v11050_v1, %v9489_v35  ;;  %v9497_v40 = vld [vmem:[#allocation2 + $0x388] sm:$0xf0]  ;;  %v9683_v41 = vld [vmem:[#allocation2 + $0x4f0] sm:$0xf]  ;;  %v11046_v35 = vld [vmem:[#allocation2 + $0x354] sm:$0xf] }
 0x1c4   : > { %15398 = vst [vmem:[#allocation143_spill] sm:$0xff] %v12952_v63 }
 0x1c5   : > { %2075 = vmatpush.bf16.msrb.mxu1 %v12941_v61  ;;  %v11054_v61 = vld [vmem:[#allocation2 + $0x394] sm:$0xf]  ;;  %15399 = vst [vmem:[#allocation144_spill] sm:$0xff] %v12954_v39 }
 0x1c6   : > { %v12957_v20 = vor.u32 %v11054_v61, %v9505_v48  ;;  %v12965_v61 = vld [vmem:[#allocation4 + $0x18] sm:$0xff] }
 0x1c7   : > { %v9473_v48 = vld [vmem:[#allocation2 + $0x358] sm:$0xf0] }
 0x1c8   : > { %15400 = vst [vmem:[#allocation145_spill] sm:$0xff] %v12957_v20 }
 0x1c9   : > { %v1745_v11 = vpop.f32.mrf.mxu0  ;;  %2076 = vmatpush.bf16.msrb.mxu1 %v12944_v43  ;;  %v9481_v43 = vld [vmem:[#allocation2 + $0x368] sm:$0xf0] }
 0x1cd   : > { %2077 = vmatpush.bf16.msrb.mxu1 %v12949_v10  ;;  %v11052_v10 = vld [vmem:[#allocation2 + $0x384] sm:$0xf] }
 0x1cf   : > { %v1758_v32 = vpop.f32.mrf.mxu1 }
 0x1d0   : > { %v1759_v55 = vadd.f32 %v1758_v32, %v1745_v11  ;;  %v12967_v32 = vor.u32 %v11052_v10, %v9497_v40  ;;  %v9667_v10 = vld [vmem:[#allocation2 + $0x4d0] sm:$0xf] }
 0x1d1   : > { %v2043_v4 = vpop.f32.mrf.mxu2  ;;  %v1747_v18 = vpop.f32.mrf.mxu0  ;;  %2078 = vmatpush.bf16.msrb.mxu1 %v12952_v63 }
 0x1d2   : > { %9425 = vmatpush.msk.msra.mxu0 %vm1447_vm0, %v1759_v55  ;;  %v12962_v18 = vor.u32 %v11048_v54, %v9481_v43  ;;  %15402 = vst [vmem:[#allocation147_spill] sm:$0xff] %v12967_v32  ;;  %v12969_v55 = vor.u32 %v11099_v36, %v9683_v41  ;;  %v11044_v43 = vld [vmem:[#allocation2 + $0x344] sm:$0xf]  ;;  %v9465_v54 = vld [vmem:[#allocation2 + $0x348] sm:$0xf0] }
 0x1d3   : > { %9426 = vmatmul.msk.f32.vlgmr.msra.gmra.mxu0 %vm1443_vm1, %v1789_v15  ;;  %v9675_v15 = vld [vmem:[#allocation2 + $0x4e0] sm:$0xf]  ;;  %v11042_v41 = vld [vmem:[#allocation2 + $0x334] sm:$0xf] }
 0x1d4   : > { %2060 = vmatpush.bf16.msrb.mxu0 %v12954_v39  ;;  %15401 = vst [vmem:[#allocation146_spill] sm:$0xff] %v12962_v18  ;;  %v12979_v36 = vor.u32 %v11097_v19, %v9675_v15  ;;  %v11040_v15 = vld [vmem:[#allocation2 + $0x324] sm:$0xf] }
 0x1d5   : > { %2079 = vmatpush.bf16.msrb.mxu1 %v12957_v20  ;;  %15403 = vst [vmem:[#allocation148_spill] sm:$0xff] %v12969_v55 }
 0x1d6   : > { %v2056_v11 = vpop.f32.mrf.mxu3  ;;  %15405 = vst [vmem:[#allocation150_spill] sm:$0xff] %v12979_v36 }
 0x1d7   : > { %v2057_v1 = vadd.f32 %v2056_v11, %v2043_v4  ;;  %v1760_v63 = vpop.f32.mrf.mxu1  ;;  %v12975_v4 = vor.u32 %v11046_v35, %v9473_v48  ;;  %v9457_v11 = vld [vmem:[#allocation2 + $0x338] sm:$0xf0]  ;;  %v9659_v35 = vld [vmem:[#allocation2 + $0x4c0] sm:$0xf]  ;;  %v11093_v48 = vld [vmem:[#allocation2 + $0x4c4] sm:$0xf0] }
 0x1d8   : > { %2061 = vmatpush.bf16.msrb.mxu0 %v12962_v18  ;;  %v11095_v63 = vld [vmem:[#allocation2 + $0x4d4] sm:$0xf0]  ;;  %v12989_v19 = vor.u32 %v11042_v41, %v9457_v11  ;;  %v9643_v41 = vld [vmem:[#allocation2 + $0x4a0] sm:$0xf]  ;;  %v11089_v11 = vld [vmem:[#allocation2 + $0x4a4] sm:$0xf0] }
 0x1d9   : > { %9557 = vmatpush.msk.msrb.mxu2 %vm1447_vm0, %v2057_v1  ;;  %v2045_v39 = vpop.f32.mrf.mxu2  ;;  %15404 = vst [vmem:[#allocation149_spill] sm:$0xff] %v12975_v4  ;;  %2080 = vmatpush.bf16.msrb.mxu1 %v12967_v32  ;;  %v12986_v1 = vor.u32 %v11095_v63, %v9667_v10  ;;  %v11038_v10 = vld [vmem:[#allocation2 + $0x314] sm:$0xf]  ;;  %v9441_v63 = vld [vmem:[#allocation2 + $0x318] sm:$0xf0] }
 0x1da   : > { %9558 = vmatmul.msk.f32.vlgmr.msrb.gmra.mxu2 %vm1443_vm1, %v12965_v61  ;;  %v12982_v39 = vor.u32 %v11044_v43, %v9465_v54  ;;  %15408 = vst [vmem:[#allocation153_spill] sm:$0xff] %v12989_v19  ;;  %v12992_v43 = vor.u32 %v11093_v48, %v9659_v35  ;;  %v9651_v54 = vld [vmem:[#allocation2 + $0x4b0] sm:$0xf]  ;;  %v13001_v20 = vor.u32 %v11038_v10, %v9441_v63  ;;  %v11036_v35 = vld [vmem:[#allocation2 + $0x304] sm:$0xf] }
 0x1db   : > { %15407 = vst [vmem:[#allocation152_spill] sm:$0xff] %v12986_v1  ;;  %v9433_v48 = vld [vmem:[#allocation2 + $0x308] sm:$0xf0]  ;;  %v9627_v63 = vld [vmem:[#allocation2 + $0x480] sm:$0xf] }
 0x1dc   : > { %2062 = vmatpush.bf16.msrb.mxu0 %v12975_v4  ;;  %15406 = vst [vmem:[#allocation151_spill] sm:$0xff] %v12982_v39  ;;  %2081 = vmatmul.bf16.vlgmr.msrb.gmra.mxu1 %v12672_v23  ;;  %v11085_v4 = vld [vmem:[#allocation2 + $0x484] sm:$0xf0] }
 0x1dd   : > { %2345 = vmatpush.bf16.msra.mxu1 %v12969_v55  ;;  %v9449_v55 = vld [vmem:[#allocation2 + $0x328] sm:$0xf0]  ;;  %15409 = vst [vmem:[#allocation154_spill] sm:$0xff] %v12992_v43 }
 0x1de   : > { %v2058_v40 = vpop.f32.mrf.mxu3  ;;  %v12995_v32 = vor.u32 %v11040_v15, %v9449_v55  ;;  %15412 = vst [vmem:[#allocation157_spill] sm:$0xff] %v13001_v20  ;;  %v13004_v55 = vor.u32 %v11089_v11, %v9643_v41  ;;  %v9635_v15 = vld [vmem:[#allocation2 + $0x490] sm:$0xf] }
 0x1df   : > { %v11091_v40 = vld [vmem:[#allocation2 + $0x4b4] sm:$0xf0]  ;;  %v9603_v11 = vld [vmem:[#allocation2 + $0x450] sm:$0xf] }
 0x1e0   : > { %2063 = vmatpush.bf16.msrb.mxu0 %v12982_v39  ;;  %15410 = vst [vmem:[#allocation155_spill] sm:$0xff] %v12995_v32  ;;  %v11083_v39 = vld [vmem:[#allocation2 + $0x474] sm:$0xf0] }
 0x1e1   : > { %2346 = vmatpush.bf16.msra.mxu1 %v12979_v36  ;;  %v12998_v36 = vor.u32 %v11091_v40, %v9651_v54  ;;  %15413 = vst [vmem:[#allocation158_spill] sm:$0xff] %v13004_v55  ;;  %v13007_v54 = vor.u32 %v11036_v35, %v9433_v48  ;;  %v11077_v35 = vld [vmem:[#allocation2 + $0x444] sm:$0xf0]  ;;  %v11075_v48 = vld [vmem:[#allocation2 + $0x434] sm:$0xf0] }
 0x1e3   : > { %15411 = vst [vmem:[#allocation156_spill] sm:$0xff] %v12998_v36 }
 0x1e4   : > { %2064 = vmatpush.bf16.msrb.mxu0 %v12989_v19  ;;  %v11087_v19 = vld [vmem:[#allocation2 + $0x494] sm:$0xf0]  ;;  %15414 = vst [vmem:[#allocation159_spill] sm:$0xff] %v13007_v54 }
 0x1e5   : > { %2347 = vmatpush.bf16.msra.mxu1 %v12986_v1  ;;  %v9619_v1 = vld [vmem:[#allocation2 + $0x470] sm:$0xf]  ;;  %v13012_v10 = vor.u32 %v11087_v19, %v9635_v15  ;;  %v9595_v19 = vld [vmem:[#allocation2 + $0x440] sm:$0xf] }
 0x1e6   : > { %v13009_v40 = vor.u32 %v11083_v39, %v9619_v1  ;;  %v13019_v39 = vor.u32 %v11085_v4, %v9627_v63  ;;  %v9579_v15 = vld [vmem:[#allocation2 + $0x420] sm:$0xf]  ;;  %v11073_v63 = vld [vmem:[#allocation2 + $0x424] sm:$0xf0] }
 0x1e7   : > { %15416 = vst [vmem:[#allocation161_spill] sm:$0xff] %v13012_v10 }
 0x1e8   : > { %2065 = vmatpush.bf16.msrb.mxu0 %v12995_v32  ;;  %15415 = vst [vmem:[#allocation160_spill] sm:$0xff] %v13009_v40  ;;  %v11081_v32 = vld [vmem:[#allocation2 + $0x464] sm:$0xf0] }
 0x1e9   : > { %2348 = vmatpush.bf16.msra.mxu1 %v12992_v43  ;;  %v9611_v43 = vld [vmem:[#allocation2 + $0x460] sm:$0xf]  ;;  %15418 = vst [vmem:[#allocation163_spill] sm:$0xff] %v13019_v39 }
 0x1ea   : > { %v13016_v41 = vor.u32 %v11081_v32, %v9611_v43  ;;  %v13027_v32 = vor.u32 %v11077_v35, %v9595_v19  ;;  %v9587_v43 = vld [vmem:[#allocation2 + $0x430] sm:$0xf]  ;;  %v9563_v35 = vld [vmem:[#allocation2 + $0x400] sm:$0xf] }
 0x1eb   : > { %v13031_v4 = vor.u32 %v11075_v48, %v9587_v43  ;;  %v11082_v43 = vld [vmem:[#allocation2 + $0x474] sm:$0xf]  ;;  %v9621_v48 = vld [vmem:[#allocation2 + $0x478] sm:$0xf0] }
 0x1ec   : > { %2066 = vmatpush.bf16.msrb.mxu0 %v13001_v20  ;;  %15417 = vst [vmem:[#allocation162_spill] sm:$0xff] %v13016_v41 }
 0x1ed   : > { %2349 = vmatpush.bf16.msra.mxu1 %v12998_v36  ;;  %v11079_v36 = vld [vmem:[#allocation2 + $0x454] sm:$0xf0]  ;;  %15420 = vst [vmem:[#allocation165_spill] sm:$0xff] %v13027_v32 }
 0x1ee   : > { %v13023_v1 = vor.u32 %v11079_v36, %v9603_v11  ;;  %15421 = vst [vmem:[#allocation166_spill] sm:$0xff] %v13031_v4  ;;  %v13034_v36 = vor.u32 %v11073_v63, %v9579_v15  ;;  %v9571_v11 = vld [vmem:[#allocation2 + $0x410] sm:$0xf]  ;;  %v13044_v15 = vor.u32 %v11082_v43, %v9621_v48  ;;  %v11080_v63 = vld [vmem:[#allocation2 + $0x464] sm:$0xf] }
 0x1ef   : > { %v11076_v48 = vld [vmem:[#allocation2 + $0x444] sm:$0xf] }
 0x1f0   : > { %2067 = vmatpush.bf16.msrb.mxu0 %v13007_v54  ;;  %15419 = vst [vmem:[#allocation164_spill] sm:$0xff] %v13023_v1  ;;  %2358 = vmatpush.bf16.msra.mxu2 %v13044_v15 }
 0x1f1   : > { %2350 = vmatpush.bf16.msra.mxu1 %v13004_v55  ;;  %15422 = vst [vmem:[#allocation167_spill] sm:$0xff] %v13034_v36 }
 0x1f2   : > { %15425 = vst [vmem:[#allocation170_spill] sm:$0xff] %v13044_v15  ;;  %v9597_v15 = vld [vmem:[#allocation2 + $0x448] sm:$0xf0] }
 0x1f3   : > { %2068 = vmatmul.bf16.vlgmr.msrb.gmra.mxu0 %v12670_v22 }
 0x1f4   : > { %2332 = vmatpush.bf16.msra.mxu0 %v13009_v40 }
 0x1f5   : > { %2351 = vmatpush.bf16.msra.mxu1 %v13012_v10  ;;  %v11069_v10 = vld [vmem:[#allocation2 + $0x404] sm:$0xf0] }
 0x1f6   : > { %v13040_v55 = vor.u32 %v11069_v10, %v9563_v35 }
 0x1f8   : > { %2333 = vmatpush.bf16.msra.mxu0 %v13016_v41  ;;  %15424 = vst [vmem:[#allocation169_spill] sm:$0xff] %v13040_v55 }
 0x1f9   : > { %2352 = vmatpush.bf16.msra.mxu1 %v13019_v39  ;;  %v11071_v39 = vld [vmem:[#allocation2 + $0x414] sm:$0xf0] }
 0x1fa   : > { %v13037_v19 = vor.u32 %v11071_v39, %v9571_v11  ;;  %v1521_v11 = vadd.f32 %v12927_v42, %v12938_v2  ;;  %v11074_v2 = vld [vmem:[#allocation2 + $0x434] sm:$0xf]  ;;  %v9589_v42 = vld [vmem:[#allocation2 + $0x438] sm:$0xf0] }
 0x1fc   : > { %2334 = vmatpush.bf16.msra.mxu0 %v13023_v1  ;;  %2353 = vmatmul.bf16.vlgmr.msra.gmra.mxu1 %v12672_v23  ;;  %15423 = vst [vmem:[#allocation168_spill] sm:$0xff] %v13037_v19 }
 0x200   : > { %2335 = vmatpush.bf16.msra.mxu0 %v13027_v32 }
 0x204   : > { %2336 = vmatpush.bf16.msra.mxu0 %v13031_v4  ;;  %v9605_v4 = vld [vmem:[#allocation2 + $0x458] sm:$0xf0] }
 0x208   : > { %2337 = vmatpush.bf16.msra.mxu0 %v13034_v36  ;;  %v9613_v36 = vld [vmem:[#allocation2 + $0x468] sm:$0xf0] }
 0x209   : > { %v13047_v39 = vor.u32 %v11080_v63, %v9613_v36  ;;  %v13059_v36 = vor.u32 %v11076_v48, %v9597_v15  ;;  %v11068_v48 = vld [vmem:[#allocation2 + $0x404] sm:$0xf] }
 0x20b   : > { %15426 = vst [vmem:[#allocation171_spill] sm:$0xff] %v13047_v39  ;;  %2359 = vmatpush.bf16.msra.mxu2 %v13047_v39  ;;  %v13062_v39 = vor.u32 %v11074_v2, %v9589_v42  ;;  %v11098_v2 = vld [vmem:[#allocation2 + $0x4f4] sm:$0xf]  ;;  %v9685_v42 = vld [vmem:[#allocation2 + $0x4f8] sm:$0xf0] }
 0x20c   : > { %2338 = vmatpush.bf16.msra.mxu0 %v13037_v19  ;;  %15428 = vst [vmem:[#allocation173_spill] sm:$0xff] %v13059_v36 }
 0x20d   : > { %15429 = vst [vmem:[#allocation174_spill] sm:$0xff] %v13062_v39 }
 0x210   : > { %2339 = vmatpush.bf16.msra.mxu0 %v13040_v55  ;;  %v11078_v55 = vld [vmem:[#allocation2 + $0x454] sm:$0xf] }
 0x211   : > { %v13056_v43 = vor.u32 %v11078_v55, %v9605_v4  ;;  %v11070_v4 = vld [vmem:[#allocation2 + $0x414] sm:$0xf] }
 0x213   : > { %2340 = vmatmul.bf16.vlgmr.msra.gmra.mxu0 %v12670_v22  ;;  %15427 = vst [vmem:[#allocation172_spill] sm:$0xff] %v13056_v43  ;;  %2360 = vmatpush.bf16.msra.mxu2 %v13056_v43  ;;  %v9573_v43 = vld [vmem:[#allocation2 + $0x418] sm:$0xf0] }
 0x214   : > { %v13068_v15 = vor.u32 %v11070_v4, %v9573_v43  ;;  %v13077_v43 = vor.u32 %v11098_v2, %v9685_v42  ;;  %v11096_v4 = vld [vmem:[#allocation2 + $0x4e4] sm:$0xf]  ;;  %v9669_v2 = vld [vmem:[#allocation2 + $0x4d8] sm:$0xf0] }
 0x216   : > { %15431 = vst [vmem:[#allocation176_spill] sm:$0xff] %v13068_v15 }
 0x217   : > { %2361 = vmatpush.bf16.msra.mxu2 %v13059_v36  ;;  %v9565_v36 = vld [vmem:[#allocation2 + $0x408] sm:$0xf0]  ;;  %15434 = vst [vmem:[#allocation179_spill] sm:$0xff] %v13077_v43 }
 0x218   : > { %v13071_v1 = vor.u32 %v11068_v48, %v9565_v36  ;;  %v9743_v36 = vld [vmem:[#allocation2 + $0x560] sm:$0xf]  ;;  %v11113_v48 = vld [vmem:[#allocation2 + $0x564] sm:$0xf0] }
 0x21a   : > { %15432 = vst [vmem:[#allocation177_spill] sm:$0xff] %v13071_v1 }
 0x21b   : > { %2362 = vmatpush.bf16.msra.mxu2 %v13062_v39 }
 0x239   : > { %v13052_v10 = vpop.f32.mrf.mxu1 }
 0x250   : > { %v1816_v19 = vpop.f32.mrf.mxu0 }
 0x251   : > { %v13054_v35 = vadd.f32 %v1816_v19, %v1521_v11  ;;  %v11072_v19 = vld [vmem:[#allocation2 + $0x424] sm:$0xf]  ;;  %v9581_v11 = vld [vmem:[#allocation2 + $0x428] sm:$0xf0] }
 0x252   : > { %v13065_v32 = vor.u32 %v11072_v19, %v9581_v11  ;;  %v9751_v19 = vld [vmem:[#allocation2 + $0x570] sm:$0xf]  ;;  %v11115_v11 = vld [vmem:[#allocation2 + $0x574] sm:$0xf0] }
 0x254   : > { %15430 = vst [vmem:[#allocation175_spill] sm:$0xff] %v13065_v32  ;;  %2363 = vmatpush.bf16.msra.mxu2 %v13065_v32  ;;  %v13075_v32 = vor.u32 %v11115_v11, %v9751_v19  ;;  %v9735_v11 = vld [vmem:[#allocation2 + $0x550] sm:$0xf] }
 0x256   : > { %15433 = vst [vmem:[#allocation178_spill] sm:$0xff] %v13075_v32 }
 0x258   : > { %2364 = vmatpush.bf16.msra.mxu2 %v13068_v15  ;;  %v9677_v15 = vld [vmem:[#allocation2 + $0x4e8] sm:$0xf0] }
 0x259   : > { %v2082_v63 = vpop.f32.mrf.mxu1  ;;  %v13086_v19 = vor.u32 %v11096_v4, %v9677_v15  ;;  %v9727_v15 = vld [vmem:[#allocation2 + $0x540] sm:$0xf]  ;;  %v11109_v4 = vld [vmem:[#allocation2 + $0x544] sm:$0xf0] }
 0x25b   : > { %15436 = vst [vmem:[#allocation181_spill] sm:$0xff] %v13086_v19 }
 0x25c   : > { %2365 = vmatpush.bf16.msra.mxu2 %v13071_v1  ;;  %v13083_v1 = vor.u32 %v11113_v48, %v9743_v36  ;;  %v9661_v36 = vld [vmem:[#allocation2 + $0x4c8] sm:$0xf0]  ;;  %v13095_v48 = vor.u32 %v11109_v4, %v9727_v15  ;;  %v9711_v4 = vld [vmem:[#allocation2 + $0x520] sm:$0xf] }
 0x25d   : > { %v9645_v15 = vld [vmem:[#allocation2 + $0x4a8] sm:$0xf0] }
 0x25e   : > { %15435 = vst [vmem:[#allocation180_spill] sm:$0xff] %v13083_v1 }
 0x25f   : > { %2366 = vmatmul.bf16.vlgmr.msra.gmra.mxu2 %v12670_v22  ;;  %15439 = vst [vmem:[#allocation184_spill] sm:$0xff] %v13095_v48 }
 0x260   : > { %2630 = vmatpush.bf16.msrb.mxu2 %v13075_v32 }
 0x261   : > { %v2084_v55 = vpop.f32.mrf.mxu1 }
 0x264   : > { %2631 = vmatpush.bf16.msrb.mxu2 %v13083_v1 }
 0x270   : > { %v2069_v55 = vpop.f32.mrf.mxu0 }
 0x271   : > { %v2083_v39 = vadd.f32 %v2082_v63, %v2069_v55  ;;  %v11094_v63 = vld [vmem:[#allocation2 + $0x4d4] sm:$0xf]  ;;  %v11111_v55 = vld [vmem:[#allocation2 + $0x554] sm:$0xf0] }
 0x272   : > { %v13089_v32 = vor.u32 %v11111_v55, %v9735_v11  ;;  %v13092_v41 = vor.u32 %v11094_v63, %v9669_v2  ;;  %v9653_v11 = vld [vmem:[#allocation2 + $0x4b8] sm:$0xf0]  ;;  %v9719_v55 = vld [vmem:[#allocation2 + $0x530] sm:$0xf] }
 0x273   : > { %9559 = vmatpush.msk.msrb.mxu3 %vm1447_vm0, %v2083_v39 }
 0x274   : > { %9560 = vmatmul.msk.f32.vlgmr.msrb.gmra.mxu3 %vm1443_vm1, %v12965_v61  ;;  %15437 = vst [vmem:[#allocation182_spill] sm:$0xff] %v13089_v32  ;;  %v11092_v61 = vld [vmem:[#allocation2 + $0x4c4] sm:$0xf]  ;;  %2632 = vmatpush.bf16.msrb.mxu2 %v13089_v32 }
 0x275   : > { %2371 = vmatpush.bf16.msra.mxu3 %v13077_v43  ;;  %15438 = vst [vmem:[#allocation183_spill] sm:$0xff] %v13092_v41  ;;  %v13098_v1 = vor.u32 %v11092_v61, %v9661_v36  ;;  %v11090_v43 = vld [vmem:[#allocation2 + $0x4b4] sm:$0xf]  ;;  %v11105_v61 = vld [vmem:[#allocation2 + $0x524] sm:$0xf0] }
 0x276   : > { %v13104_v32 = vor.u32 %v11090_v43, %v9653_v11  ;;  %v13107_v36 = vor.u32 %v11105_v61, %v9711_v4  ;;  %v9695_v4 = vld [vmem:[#allocation2 + $0x500] sm:$0xf]  ;;  %v11101_v61 = vld [vmem:[#allocation2 + $0x504] sm:$0xf0] }
 0x277   : > { %15440 = vst [vmem:[#allocation185_spill] sm:$0xff] %v13098_v1 }
 0x278   : > { %v2071_v39 = vpop.f32.mrf.mxu0  ;;  %2633 = vmatpush.bf16.msrb.mxu2 %v13095_v48  ;;  %15442 = vst [vmem:[#allocation187_spill] sm:$0xff] %v13104_v32 }
 0x279   : > { %v2354_v42 = vpop.f32.mrf.mxu1  ;;  %2372 = vmatpush.bf16.msra.mxu3 %v13086_v19  ;;  %v11107_v39 = vld [vmem:[#allocation2 + $0x534] sm:$0xf0]  ;;  %v11088_v19 = vld [vmem:[#allocation2 + $0x4a4] sm:$0xf]  ;;  %15443 = vst [vmem:[#allocation188_spill] sm:$0xff] %v13107_v36 }
 0x27a   : > { %v13101_v2 = vor.u32 %v11107_v39, %v9719_v55  ;;  %v13110_v48 = vor.u32 %v11088_v19, %v9645_v15  ;;  %v9703_v55 = vld [vmem:[#allocation2 + $0x510] sm:$0xf]  ;;  %v11103_v39 = vld [vmem:[#allocation2 + $0x514] sm:$0xf0] }
 0x27b   : > { %v13113_v43 = vor.u32 %v11103_v39, %v9703_v55  ;;  %v9815_v19 = vld [vmem:[#allocation2 + $0x5f0] sm:$0xf]  ;;  %v11131_v15 = vld [vmem:[#allocation2 + $0x5f4] sm:$0xf0]  ;;  %v13124_v39 = vld [vmem:[#allocation4 + $0x20] sm:$0xff] }
 0x27c   : > { %15441 = vst [vmem:[#allocation186_spill] sm:$0xff] %v13101_v2  ;;  %2634 = vmatpush.bf16.msrb.mxu2 %v13101_v2  ;;  %v11084_v2 = vld [vmem:[#allocation2 + $0x484] sm:$0xf] }
 0x27d   : > { %2373 = vmatpush.bf16.msra.mxu3 %v13092_v41  ;;  %15444 = vst [vmem:[#allocation189_spill] sm:$0xff] %v13110_v48  ;;  %v11086_v41 = vld [vmem:[#allocation2 + $0x494] sm:$0xf] }
 0x27e   : > { %15445 = vst [vmem:[#allocation190_spill] sm:$0xff] %v13113_v43 }
 0x280   : > { %2635 = vmatpush.bf16.msrb.mxu2 %v13107_v36 }
 0x281   : > { %v2356_v63 = vpop.f32.mrf.mxu1  ;;  %2374 = vmatpush.bf16.msra.mxu3 %v13098_v1  ;;  %v9629_v1 = vld [vmem:[#allocation2 + $0x488] sm:$0xf0] }
 0x282   : > { %v9637_v63 = vld [vmem:[#allocation2 + $0x498] sm:$0xf0]  ;;  %v13122_v40 = vor.u32 %v11084_v2, %v9629_v1  ;;  %v11127_v2 = vld [vmem:[#allocation2 + $0x5d4] sm:$0xf0] }
 0x283   : > { %v13116_v11 = vor.u32 %v11086_v41, %v9637_v63  ;;  %v13126_v41 = vor.u32 %v11131_v15, %v9815_v19  ;;  %v9807_v63 = vld [vmem:[#allocation2 + $0x5e0] sm:$0xf]  ;;  %v11125_v19 = vld [vmem:[#allocation2 + $0x5c4] sm:$0xf0] }
 0x284   : > { %2636 = vmatpush.bf16.msrb.mxu2 %v13113_v43  ;;  %15448 = vst [vmem:[#allocation193_spill] sm:$0xff] %v13122_v40  ;;  %v11129_v43 = vld [vmem:[#allocation2 + $0x5e4] sm:$0xf0] }
 0x285   : > { %2375 = vmatpush.bf16.msra.mxu3 %v13104_v32  ;;  %15446 = vst [vmem:[#allocation191_spill] sm:$0xff] %v13116_v11  ;;  %v13119_v32 = vor.u32 %v11101_v61, %v9695_v4  ;;  %v13134_v1 = vor.u32 %v11129_v43, %v9807_v63  ;;  %v9791_v61 = vld [vmem:[#allocation2 + $0x5c0] sm:$0xf]  ;;  %v11123_v43 = vld [vmem:[#allocation2 + $0x5b4] sm:$0xf0] }
 0x286   : > { %15449 = vst [vmem:[#allocation194_spill] sm:$0xff] %v13126_v41  ;;  %v13142_v15 = vor.u32 %v11125_v19, %v9791_v61  ;;  %v9759_v61 = vld [vmem:[#allocation2 + $0x580] sm:$0xf]  ;;  %v11117_v19 = vld [vmem:[#allocation2 + $0x584] sm:$0xf0] }
 0x287   : > { %15447 = vst [vmem:[#allocation192_spill] sm:$0xff] %v13119_v32 }
 0x288   : > { %2637 = vmatpush.bf16.msrb.mxu2 %v13119_v32  ;;  %15450 = vst [vmem:[#allocation195_spill] sm:$0xff] %v13134_v1  ;;  %v11121_v32 = vld [vmem:[#allocation2 + $0x5a4] sm:$0xf0] }
 0x289   : > { %2376 = vmatpush.bf16.msra.mxu3 %v13110_v48  ;;  %15452 = vst [vmem:[#allocation197_spill] sm:$0xff] %v13142_v15  ;;  %v11145_v48 = vld [vmem:[#allocation2 + $0x664] sm:$0xf0] }
 0x28b   : > { %2638 = vmatmul.bf16.vlgmr.msrb.gmra.mxu2 %v12670_v22 }
 0x28d   : > { %2377 = vmatpush.bf16.msra.mxu3 %v13116_v11 }
 0x290   : > { %v2341_v36 = vpop.f32.mrf.mxu0 }
 0x291   : > { %v2355_v55 = vadd.f32 %v2354_v42, %v2341_v36  ;;  %2378 = vmatpush.bf16.msra.mxu3 %v13122_v40  ;;  %v9799_v42 = vld [vmem:[#allocation2 + $0x5d0] sm:$0xf]  ;;  %v9729_v40 = vld [vmem:[#allocation2 + $0x548] sm:$0xf0] }
 0x292   : > { %v13139_v4 = vor.u32 %v11127_v2, %v9799_v42  ;;  %v9767_v42 = vld [vmem:[#allocation2 + $0x590] sm:$0xf]  ;;  %v11119_v2 = vld [vmem:[#allocation2 + $0x594] sm:$0xf0] }
 0x293   : > { %9689 = vmatpush.msk.msrb.mxu0 %vm1447_vm0, %v2355_v55  ;;  %v9783_v55 = vld [vmem:[#allocation2 + $0x5b0] sm:$0xf] }
 0x294   : > { %9690 = vmatmul.msk.f32.vlgmr.msrb.gmra.mxu0 %vm1443_vm1, %v13124_v39  ;;  %2379 = vmatmul.bf16.vlgmr.msra.gmra.mxu3 %v12672_v23  ;;  %15451 = vst [vmem:[#allocation196_spill] sm:$0xff] %v13139_v4  ;;  %v13145_v63 = vor.u32 %v11123_v43, %v9783_v55  ;;  %v13158_v55 = vpop.f32.mrf.mxu2  ;;  %v9753_v43 = vld [vmem:[#allocation2 + $0x578] sm:$0xf0] }
 0x295   : > { %2643 = vmatpush.bf16.msrb.mxu3 %v13126_v41  ;;  %v9775_v41 = vld [vmem:[#allocation2 + $0x5a0] sm:$0xf] }
 0x296   : > { %15453 = vst [vmem:[#allocation198_spill] sm:$0xff] %v13145_v63 }
 0x298   : > { %v2343_v36 = vpop.f32.mrf.mxu0 }
 0x299   : > { %2644 = vmatpush.bf16.msrb.mxu3 %v13134_v1  ;;  %v13148_v36 = vor.u32 %v11121_v32, %v9775_v41  ;;  %v13151_v1 = vor.u32 %v11119_v2, %v9767_v42  ;;  %v11114_v41 = vld [vmem:[#allocation2 + $0x574] sm:$0xf]  ;;  %v11112_v42 = vld [vmem:[#allocation2 + $0x564] sm:$0xf]  ;;  %v9745_v2 = vld [vmem:[#allocation2 + $0x568] sm:$0xf0] }
 0x29b   : > { %15454 = vst [vmem:[#allocation199_spill] sm:$0xff] %v13148_v36 }
 0x29c   : > { %15455 = vst [vmem:[#allocation200_spill] sm:$0xff] %v13151_v1 }
 0x29d   : > { %2645 = vmatpush.bf16.msrb.mxu3 %v13139_v4  ;;  %v13154_v4 = vor.u32 %v11117_v19, %v9759_v61  ;;  %v11110_v61 = vld [vmem:[#allocation2 + $0x554] sm:$0xf]  ;;  %v9737_v19 = vld [vmem:[#allocation2 + $0x558] sm:$0xf0] }
 0x29f   : > { %15456 = vst [vmem:[#allocation201_spill] sm:$0xff] %v13154_v4 }
 0x2a1   : > { %2646 = vmatpush.bf16.msrb.mxu3 %v13142_v15  ;;  %v11108_v15 = vld [vmem:[#allocation2 + $0x544] sm:$0xf] }
 0x2a2   : > { %v13169_v11 = vor.u32 %v11108_v15, %v9729_v40  ;;  %v11100_v40 = vld [vmem:[#allocation2 + $0x504] sm:$0xf]  ;;  %v9697_v15 = vld [vmem:[#allocation2 + $0x508] sm:$0xf0] }
 0x2a4   : > { %15460 = vst [vmem:[#allocation205_spill] sm:$0xff] %v13169_v11 }
 0x2a5   : > { %2647 = vmatpush.bf16.msrb.mxu3 %v13145_v63  ;;  %v13160_v63 = vor.u32 %v11114_v41, %v9753_v43  ;;  %v11106_v41 = vld [vmem:[#allocation2 + $0x534] sm:$0xf]  ;;  %v9721_v43 = vld [vmem:[#allocation2 + $0x538] sm:$0xf0] }
 0x2a7   : > { %15457 = vst [vmem:[#allocation202_spill] sm:$0xff] %v13160_v63  ;;  %2656 = vmatpush.bf16.msra.mxu0 %v13160_v63  ;;  %v13172_v63 = vor.u32 %v11106_v41, %v9721_v43  ;;  %v11130_v43 = vld [vmem:[#allocation2 + $0x5f4] sm:$0xf] }
 0x2a9   : > { %2648 = vmatpush.bf16.msrb.mxu3 %v13148_v36  ;;  %v13163_v36 = vor.u32 %v11112_v42, %v9745_v2  ;;  %15461 = vst [vmem:[#allocation206_spill] sm:$0xff] %v13172_v63  ;;  %v9713_v42 = vld [vmem:[#allocation2 + $0x528] sm:$0xf0] }
 0x2ab   : > { %15458 = vst [vmem:[#allocation203_spill] sm:$0xff] %v13163_v36  ;;  %2657 = vmatpush.bf16.msra.mxu0 %v13163_v36 }
 0x2ad   : > { %2649 = vmatpush.bf16.msrb.mxu3 %v13151_v1 }
 0x2b1   : > { %2650 = vmatpush.bf16.msrb.mxu3 %v13154_v4  ;;  %v13166_v4 = vor.u32 %v11110_v61, %v9737_v19  ;;  %v11102_v61 = vld [vmem:[#allocation2 + $0x514] sm:$0xf]  ;;  %v9705_v19 = vld [vmem:[#allocation2 + $0x518] sm:$0xf0] }
 0x2b3   : > { %15459 = vst [vmem:[#allocation204_spill] sm:$0xff] %v13166_v4  ;;  %2658 = vmatpush.bf16.msra.mxu0 %v13166_v4  ;;  %v13178_v4 = vor.u32 %v11102_v61, %v9705_v19 }
 0x2b4   : > { %2651 = vmatmul.bf16.vlgmr.msrb.gmra.mxu3 %v12672_v23 }
 0x2b5   : > { %15463 = vst [vmem:[#allocation208_spill] sm:$0xff] %v13178_v4 }
 0x2b7   : > { %2659 = vmatpush.bf16.msra.mxu0 %v13169_v11  ;;  %v13181_v11 = vor.u32 %v11100_v40, %v9697_v15  ;;  %v11128_v40 = vld [vmem:[#allocation2 + $0x5e4] sm:$0xf]  ;;  %v9809_v15 = vld [vmem:[#allocation2 + $0x5e8] sm:$0xf0] }
 0x2b9   : > { %15464 = vst [vmem:[#allocation209_spill] sm:$0xff] %v13181_v11 }
 0x2bb   : > { %2660 = vmatpush.bf16.msra.mxu0 %v13172_v63  ;;  %v11147_v63 = vld [vmem:[#allocation2 + $0x674] sm:$0xf0] }
 0x2e2   : > { %v2367_v32 = vpop.f32.mrf.mxu2 }
 0x2ea   : > { %v2369_v1 = vpop.f32.mrf.mxu2 }
 0x2eb   : > { %v11104_v1 = vld [vmem:[#allocation2 + $0x524] sm:$0xf] }
 0x2ec   : > { %v13175_v2 = vor.u32 %v11104_v1, %v9713_v42  ;;  %v9817_v1 = vld [vmem:[#allocation2 + $0x5f8] sm:$0xf0] }
 0x2ed   : > { %v13191_v36 = vor.u32 %v11130_v43, %v9817_v1  ;;  %v9867_v43 = vld [vmem:[#allocation2 + $0x650] sm:$0xf]  ;;  %v11143_v1 = vld [vmem:[#allocation2 + $0x654] sm:$0xf0] }
 0x2ee   : > { %15462 = vst [vmem:[#allocation207_spill] sm:$0xff] %v13175_v2  ;;  %2661 = vmatpush.bf16.msra.mxu0 %v13175_v2  ;;  %v9883_v2 = vld [vmem:[#allocation2 + $0x670] sm:$0xf] }
 0x2ef   : > { %v13189_v19 = vor.u32 %v11147_v63, %v9883_v2  ;;  %15466 = vst [vmem:[#allocation211_spill] sm:$0xff] %v13191_v36  ;;  %v13200_v63 = vor.u32 %v11128_v40, %v9809_v15  ;;  %v9801_v2 = vld [vmem:[#allocation2 + $0x5d8] sm:$0xf0]  ;;  %v11141_v40 = vld [vmem:[#allocation2 + $0x644] sm:$0xf0] }
 0x2f1   : > { %15465 = vst [vmem:[#allocation210_spill] sm:$0xff] %v13189_v19 }
 0x2f2   : > { %2662 = vmatpush.bf16.msra.mxu0 %v13178_v4  ;;  %15468 = vst [vmem:[#allocation213_spill] sm:$0xff] %v13200_v63 }
 0x2f6   : > { %2663 = vmatpush.bf16.msra.mxu0 %v13181_v11  ;;  %v9875_v11 = vld [vmem:[#allocation2 + $0x660] sm:$0xf] }
 0x2f7   : > { %v13183_v41 = vpop.f32.mrf.mxu3  ;;  %v13197_v54 = vor.u32 %v11145_v48, %v9875_v11  ;;  %v11124_v48 = vld [vmem:[#allocation2 + $0x5c4] sm:$0xf]  ;;  %v9793_v11 = vld [vmem:[#allocation2 + $0x5c8] sm:$0xf0] }
 0x2f9   : > { %2664 = vmatmul.bf16.vlgmr.msra.gmra.mxu0 %v12670_v22  ;;  %15467 = vst [vmem:[#allocation212_spill] sm:$0xff] %v13197_v54 }
 0x2fa   : > { %2928 = vmatpush.bf16.msrb.mxu0 %v13189_v19  ;;  %v13203_v19 = vor.u32 %v11143_v1, %v9867_v43  ;;  %v9785_v43 = vld [vmem:[#allocation2 + $0x5b8] sm:$0xf0]  ;;  %v9851_v1 = vld [vmem:[#allocation2 + $0x630] sm:$0xf] }
 0x2fc   : > { %15469 = vst [vmem:[#allocation214_spill] sm:$0xff] %v13203_v19 }
 0x2fe   : > { %2929 = vmatpush.bf16.msrb.mxu0 %v13197_v54  ;;  %v13212_v54 = vor.u32 %v11124_v48, %v9793_v11 }
 0x300   : > { %15472 = vst [vmem:[#allocation217_spill] sm:$0xff] %v13212_v54 }
 0x302   : > { %2930 = vmatpush.bf16.msrb.mxu0 %v13203_v19  ;;  %v11120_v19 = vld [vmem:[#allocation2 + $0x5a4] sm:$0xf] }
 0x30e   : > { %v13187_v42 = vpop.f32.mrf.mxu2 }
 0x317   : > { %v2380_v61 = vpop.f32.mrf.mxu3 }
 0x318   : > { %v2381_v4 = vadd.f32 %v2380_v61, %v2367_v32  ;;  %v11126_v32 = vld [vmem:[#allocation2 + $0x5d4] sm:$0xf]  ;;  %v2641_v61 = vpop.f32.mrf.mxu2 }
 0x319   : > { %v13206_v20 = vor.u32 %v11126_v32, %v9801_v2  ;;  %v11122_v61 = vld [vmem:[#allocation2 + $0x5b4] sm:$0xf] }
 0x31a   : > { %9691 = vmatpush.msk.msrb.mxu1 %vm1447_vm0, %v2381_v4  ;;  %v13218_v2 = vor.u32 %v11122_v61, %v9785_v43 }
 0x31b   : > { %9692 = vmatmul.msk.f32.vlgmr.msrb.gmra.mxu1 %vm1443_vm1, %v13124_v39  ;;  %15470 = vst [vmem:[#allocation215_spill] sm:$0xff] %v13206_v20  ;;  %v9859_v39 = vld [vmem:[#allocation2 + $0x640] sm:$0xf] }
 0x31c   : > { %2669 = vmatpush.bf16.msra.mxu1 %v13191_v36  ;;  %v13209_v15 = vor.u32 %v11141_v40, %v9859_v39  ;;  %15474 = vst [vmem:[#allocation219_spill] sm:$0xff] %v13218_v2  ;;  %v9843_v39 = vld [vmem:[#allocation2 + $0x620] sm:$0xf]  ;;  %v11137_v40 = vld [vmem:[#allocation2 + $0x624] sm:$0xf0] }
 0x31d   : > { %v13221_v48 = vor.u32 %v11137_v40, %v9843_v39  ;;  %v9827_v39 = vld [vmem:[#allocation2 + $0x600] sm:$0xf]  ;;  %v11133_v40 = vld [vmem:[#allocation2 + $0x604] sm:$0xf0] }
 0x31e   : > { %15471 = vst [vmem:[#allocation216_spill] sm:$0xff] %v13209_v15  ;;  %2931 = vmatpush.bf16.msrb.mxu0 %v13209_v15  ;;  %v11118_v15 = vld [vmem:[#allocation2 + $0x594] sm:$0xf] }
 0x31f   : > { %v2382_v4 = vpop.f32.mrf.mxu3  ;;  %15475 = vst [vmem:[#allocation220_spill] sm:$0xff] %v13221_v48 }
 0x320   : > { %2670 = vmatpush.bf16.msra.mxu1 %v13200_v63  ;;  %v11139_v4 = vld [vmem:[#allocation2 + $0x634] sm:$0xf0]  ;;  %v9777_v63 = vld [vmem:[#allocation2 + $0x5a8] sm:$0xf0] }
 0x321   : > { %v13215_v32 = vor.u32 %v11139_v4, %v9851_v1  ;;  %v13224_v11 = vor.u32 %v11120_v19, %v9777_v63  ;;  %v9835_v1 = vld [vmem:[#allocation2 + $0x610] sm:$0xf]  ;;  %v11135_v4 = vld [vmem:[#allocation2 + $0x614] sm:$0xf0] }
 0x322   : > { %v13227_v61 = vor.u32 %v11135_v4, %v9835_v1  ;;  %v9947_v19 = vld [vmem:[#allocation2 + $0x6f0] sm:$0xf]  ;;  %v11163_v63 = vld [vmem:[#allocation2 + $0x6f4] sm:$0xf0]  ;;  %v13239_v4 = vld [vmem:[#allocation4 + $0x28] sm:$0xff] }
 0x323   : > { %15473 = vst [vmem:[#allocation218_spill] sm:$0xff] %v13215_v32  ;;  %2932 = vmatpush.bf16.msrb.mxu0 %v13215_v32  ;;  %v11116_v32 = vld [vmem:[#allocation2 + $0x584] sm:$0xf] }
 0x324   : > { %2671 = vmatpush.bf16.msra.mxu1 %v13206_v20  ;;  %15476 = vst [vmem:[#allocation221_spill] sm:$0xff] %v13224_v11  ;;  %v9769_v20 = vld [vmem:[#allocation2 + $0x598] sm:$0xf0] }
 0x325   : > { %15477 = vst [vmem:[#allocation222_spill] sm:$0xff] %v13227_v61  ;;  %v13230_v43 = vor.u32 %v11118_v15, %v9769_v20  ;;  %v13241_v20 = vor.u32 %v11163_v63, %v9947_v19  ;;  %v9939_v15 = vld [vmem:[#allocation2 + $0x6e0] sm:$0xf]  ;;  %v11157_v19 = vld [vmem:[#allocation2 + $0x6c4] sm:$0xf0] }
 0x327   : > { %2933 = vmatpush.bf16.msrb.mxu0 %v13221_v48  ;;  %15478 = vst [vmem:[#allocation223_spill] sm:$0xff] %v13230_v43 }
 0x328   : > { %2672 = vmatpush.bf16.msra.mxu1 %v13212_v54  ;;  %v9761_v54 = vld [vmem:[#allocation2 + $0x588] sm:$0xf0]  ;;  %15481 = vst [vmem:[#allocation226_spill] sm:$0xff] %v13241_v20 }
 0x329   : > { %v13236_v36 = vor.u32 %v11116_v32, %v9761_v54  ;;  %v11159_v32 = vld [vmem:[#allocation2 + $0x6d4] sm:$0xf0] }
 0x32b   : > { %2934 = vmatpush.bf16.msrb.mxu0 %v13227_v61  ;;  %15480 = vst [vmem:[#allocation225_spill] sm:$0xff] %v13236_v36  ;;  %v11161_v61 = vld [vmem:[#allocation2 + $0x6e4] sm:$0xf0] }
 0x32c   : > { %2673 = vmatpush.bf16.msra.mxu1 %v13218_v2  ;;  %v13233_v2 = vor.u32 %v11133_v40, %v9827_v39  ;;  %v13249_v54 = vor.u32 %v11161_v61, %v9939_v15  ;;  %v9923_v40 = vld [vmem:[#allocation2 + $0x6c0] sm:$0xf]  ;;  %v11155_v61 = vld [vmem:[#allocation2 + $0x6b4] sm:$0xf0] }
 0x32d   : > { %v13257_v63 = vor.u32 %v11157_v19, %v9923_v40  ;;  %v9891_v40 = vld [vmem:[#allocation2 + $0x680] sm:$0xf]  ;;  %v11149_v19 = vld [vmem:[#allocation2 + $0x684] sm:$0xf0] }
 0x32e   : > { %15479 = vst [vmem:[#allocation224_spill] sm:$0xff] %v13233_v2 }
 0x32f   : > { %2935 = vmatpush.bf16.msrb.mxu0 %v13233_v2  ;;  %15482 = vst [vmem:[#allocation227_spill] sm:$0xff] %v13249_v54  ;;  %v11153_v2 = vld [vmem:[#allocation2 + $0x6a4] sm:$0xf0] }
 0x330   : > { %2674 = vmatpush.bf16.msra.mxu1 %v13224_v11  ;;  %15484 = vst [vmem:[#allocation229_spill] sm:$0xff] %v13257_v63  ;;  %v11177_v11 = vld [vmem:[#allocation2 + $0x764] sm:$0xf0] }
 0x332   : > { %2936 = vmatmul.bf16.vlgmr.msrb.gmra.mxu0 %v12670_v22 }
 0x334   : > { %2675 = vmatpush.bf16.msra.mxu1 %v13230_v43 }
 0x337   : > { %v2652_v48 = vpop.f32.mrf.mxu3 }
 0x338   : > { %v2653_v1 = vadd.f32 %v2652_v48, %v13187_v42  ;;  %2676 = vmatpush.bf16.msra.mxu1 %v13236_v36  ;;  %v9931_v42 = vld [vmem:[#allocation2 + $0x6d0] sm:$0xf]  ;;  %v9853_v36 = vld [vmem:[#allocation2 + $0x638] sm:$0xf0] }
 0x339   : > { %v13254_v39 = vor.u32 %v11159_v32, %v9931_v42  ;;  %v9899_v42 = vld [vmem:[#allocation2 + $0x690] sm:$0xf]  ;;  %v11151_v32 = vld [vmem:[#allocation2 + $0x694] sm:$0xf0] }
 0x33a   : > { %9821 = vmatpush.msk.msra.mxu2 %vm1447_vm0, %v2653_v1  ;;  %v9915_v1 = vld [vmem:[#allocation2 + $0x6b0] sm:$0xf] }
 0x33b   : > { %9822 = vmatmul.msk.f32.vlgmr.msra.gmra.mxu2 %vm1443_vm1, %v13239_v4  ;;  %2677 = vmatmul.bf16.vlgmr.msra.gmra.mxu1 %v12672_v23  ;;  %15483 = vst [vmem:[#allocation228_spill] sm:$0xff] %v13254_v39  ;;  %v13260_v15 = vor.u32 %v11155_v61, %v9915_v1  ;;  %v11146_v1 = vld [vmem:[#allocation2 + $0x674] sm:$0xf]  ;;  %v9885_v61 = vld [vmem:[#allocation2 + $0x678] sm:$0xf0] }
 0x33c   : > { %2941 = vmatpush.bf16.msrb.mxu1 %v13241_v20  ;;  %v9907_v20 = vld [vmem:[#allocation2 + $0x6a0] sm:$0xf] }
 0x33d   : > { %15485 = vst [vmem:[#allocation230_spill] sm:$0xff] %v13260_v15 }
 0x33f   : > { %v2654_v48 = vpop.f32.mrf.mxu3 }
 0x340   : > { %2942 = vmatpush.bf16.msrb.mxu1 %v13249_v54  ;;  %v13263_v48 = vor.u32 %v11153_v2, %v9907_v20  ;;  %v13266_v54 = vor.u32 %v11151_v32, %v9899_v42  ;;  %v13273_v2 = vor.u32 %v11146_v1, %v9885_v61  ;;  %v13276_v20 = vpop.f32.mrf.mxu0  ;;  %v11144_v32 = vld [vmem:[#allocation2 + $0x664] sm:$0xf]  ;;  %v9861_v61 = vld [vmem:[#allocation2 + $0x648] sm:$0xf0] }
 0x341   : > { %v11140_v1 = vld [vmem:[#allocation2 + $0x644] sm:$0xf] }
 0x342   : > { %15486 = vst [vmem:[#allocation231_spill] sm:$0xff] %v13263_v48  ;;  %2954 = vmatpush.bf16.msrb.mxu2 %v13273_v2 }
 0x343   : > { %15487 = vst [vmem:[#allocation232_spill] sm:$0xff] %v13266_v54 }
 0x344   : > { %2943 = vmatpush.bf16.msrb.mxu1 %v13254_v39  ;;  %v13269_v39 = vor.u32 %v11149_v19, %v9891_v40  ;;  %15489 = vst [vmem:[#allocation234_spill] sm:$0xff] %v13273_v2  ;;  %v11142_v40 = vld [vmem:[#allocation2 + $0x654] sm:$0xf]  ;;  %v9869_v19 = vld [vmem:[#allocation2 + $0x658] sm:$0xf0] }
 0x345   : > { %v11138_v2 = vld [vmem:[#allocation2 + $0x634] sm:$0xf] }
 0x346   : > { %15488 = vst [vmem:[#allocation233_spill] sm:$0xff] %v13269_v39  ;;  %v13287_v43 = vor.u32 %v11138_v2, %v9853_v36  ;;  %v11162_v2 = vld [vmem:[#allocation2 + $0x6f4] sm:$0xf] }
 0x348   : > { %2944 = vmatpush.bf16.msrb.mxu1 %v13257_v63  ;;  %v13284_v63 = vor.u32 %v11140_v1, %v9861_v61  ;;  %15493 = vst [vmem:[#allocation238_spill] sm:$0xff] %v13287_v43  ;;  %v11132_v1 = vld [vmem:[#allocation2 + $0x604] sm:$0xf]  ;;  %v9829_v61 = vld [vmem:[#allocation2 + $0x608] sm:$0xf0] }
 0x34a   : > { %15492 = vst [vmem:[#allocation237_spill] sm:$0xff] %v13284_v63 }
 0x34c   : > { %2945 = vmatpush.bf16.msrb.mxu1 %v13260_v15 }
 0x350   : > { %2946 = vmatpush.bf16.msrb.mxu1 %v13263_v48  ;;  %v9877_v48 = vld [vmem:[#allocation2 + $0x668] sm:$0xf0] }
 0x351   : > { %v13278_v15 = vor.u32 %v11144_v32, %v9877_v48  ;;  %v9845_v48 = vld [vmem:[#allocation2 + $0x628] sm:$0xf0] }
 0x353   : > { %15490 = vst [vmem:[#allocation235_spill] sm:$0xff] %v13278_v15  ;;  %2955 = vmatpush.bf16.msrb.mxu2 %v13278_v15 }
 0x354   : > { %2947 = vmatpush.bf16.msrb.mxu1 %v13266_v54 }
 0x358   : > { %2948 = vmatpush.bf16.msrb.mxu1 %v13269_v39  ;;  %v13281_v39 = vor.u32 %v11142_v40, %v9869_v19  ;;  %v11134_v40 = vld [vmem:[#allocation2 + $0x614] sm:$0xf]  ;;  %v9837_v19 = vld [vmem:[#allocation2 + $0x618] sm:$0xf0] }
 0x35a   : > { %15491 = vst [vmem:[#allocation236_spill] sm:$0xff] %v13281_v39  ;;  %2956 = vmatpush.bf16.msrb.mxu2 %v13281_v39  ;;  %v13293_v39 = vor.u32 %v11134_v40, %v9837_v19 }
 0x35b   : > { %2949 = vmatmul.bf16.vlgmr.msrb.gmra.mxu1 %v12672_v23 }
 0x35c   : > { %15495 = vst [vmem:[#allocation240_spill] sm:$0xff] %v13293_v39 }
 0x35e   : > { %2957 = vmatpush.bf16.msrb.mxu2 %v13284_v63  ;;  %v13296_v63 = vor.u32 %v11132_v1, %v9829_v61  ;;  %v11160_v1 = vld [vmem:[#allocation2 + $0x6e4] sm:$0xf]  ;;  %v9941_v61 = vld [vmem:[#allocation2 + $0x6e8] sm:$0xf0] }
 0x360   : > { %15496 = vst [vmem:[#allocation241_spill] sm:$0xff] %v13296_v63 }
 0x362   : > { %2958 = vmatpush.bf16.msrb.mxu2 %v13287_v43  ;;  %v11179_v43 = vld [vmem:[#allocation2 + $0x774] sm:$0xf0] }
 0x376   : > { %v2665_v42 = vpop.f32.mrf.mxu0 }
 0x37e   : > { %v2667_v54 = vpop.f32.mrf.mxu0 }
 0x37f   : > { %v11136_v54 = vld [vmem:[#allocation2 + $0x624] sm:$0xf] }
 0x380   : > { %v13290_v32 = vor.u32 %v11136_v54, %v9845_v48  ;;  %v9949_v54 = vld [vmem:[#allocation2 + $0x6f8] sm:$0xf0] }
 0x381   : > { %v13306_v15 = vor.u32 %v11162_v2, %v9949_v54  ;;  %v9999_v2 = vld [vmem:[#allocation2 + $0x750] sm:$0xf]  ;;  %v11175_v54 = vld [vmem:[#allocation2 + $0x754] sm:$0xf0] }
 0x382   : > { %15494 = vst [vmem:[#allocation239_spill] sm:$0xff] %v13290_v32  ;;  %2959 = vmatpush.bf16.msrb.mxu2 %v13290_v32  ;;  %v10015_v32 = vld [vmem:[#allocation2 + $0x770] sm:$0xf] }
 0x383   : > { %v13304_v19 = vor.u32 %v11179_v43, %v10015_v32  ;;  %15498 = vst [vmem:[#allocation243_spill] sm:$0xff] %v13306_v15  ;;  %v13315_v43 = vor.u32 %v11160_v1, %v9941_v61  ;;  %v9933_v32 = vld [vmem:[#allocation2 + $0x6d8] sm:$0xf0]  ;;  %v11173_v1 = vld [vmem:[#allocation2 + $0x744] sm:$0xf0] }
 0x385   : > { %15497 = vst [vmem:[#allocation242_spill] sm:$0xff] %v13304_v19 }
 0x386   : > { %2960 = vmatpush.bf16.msrb.mxu2 %v13293_v39  ;;  %15500 = vst [vmem:[#allocation245_spill] sm:$0xff] %v13315_v43 }
 0x38a   : > { %2961 = vmatpush.bf16.msrb.mxu2 %v13296_v63  ;;  %v10007_v63 = vld [vmem:[#allocation2 + $0x760] sm:$0xf] }
 0x38b   : > { %v13312_v18 = vor.u32 %v11177_v11, %v10007_v63  ;;  %v11156_v11 = vld [vmem:[#allocation2 + $0x6c4] sm:$0xf]  ;;  %v9991_v63 = vld [vmem:[#allocation2 + $0x740] sm:$0xf] }
 0x38c   : > { %v13324_v61 = vor.u32 %v11173_v1, %v9991_v63  ;;  %v9975_v63 = vld [vmem:[#allocation2 + $0x720] sm:$0xf]  ;;  %v11169_v1 = vld [vmem:[#allocation2 + $0x724] sm:$0xf0] }
 0x38d   : > { %2962 = vmatmul.bf16.vlgmr.msrb.gmra.mxu2 %v12670_v22  ;;  %15499 = vst [vmem:[#allocation244_spill] sm:$0xff] %v13312_v18 }
 0x38e   : > { %3226 = vmatpush.bf16.msra.mxu2 %v13304_v19  ;;  %v13318_v19 = vor.u32 %v11175_v54, %v9999_v2  ;;  %15503 = vst [vmem:[#allocation248_spill] sm:$0xff] %v13324_v61  ;;  %v9917_v2 = vld [vmem:[#allocation2 + $0x6b8] sm:$0xf0]  ;;  %v9983_v54 = vld [vmem:[#allocation2 + $0x730] sm:$0xf] }
 0x390   : > { %15501 = vst [vmem:[#allocation246_spill] sm:$0xff] %v13318_v19 }
 0x392   : > { %3227 = vmatpush.bf16.msra.mxu2 %v13312_v18 }
 0x396   : > { %3228 = vmatpush.bf16.msra.mxu2 %v13318_v19  ;;  %v11152_v19 = vld [vmem:[#allocation2 + $0x6a4] sm:$0xf] }
 0x398   : > { %v13298_v36 = vpop.f32.mrf.mxu1 }
 0x39a   : > { %3229 = vmatpush.bf16.msra.mxu2 %v13324_v61  ;;  %v11150_v61 = vld [vmem:[#allocation2 + $0x694] sm:$0xf] }
 0x3af   : > { %v13302_v48 = vpop.f32.mrf.mxu0 }
 0x3b8   : > { %v2678_v40 = vpop.f32.mrf.mxu1 }
 0x3b9   : > { %v2679_v39 = vadd.f32 %v2678_v40, %v2665_v42  ;;  %v11158_v42 = vld [vmem:[#allocation2 + $0x6d4] sm:$0xf]  ;;  %v2939_v40 = vpop.f32.mrf.mxu0 }
 0x3ba   : > { %v13321_v51 = vor.u32 %v11158_v42, %v9933_v32  ;;  %v11154_v40 = vld [vmem:[#allocation2 + $0x6b4] sm:$0xf] }
 0x3bb   : > { %9823 = vmatpush.msk.msra.mxu3 %vm1447_vm0, %v2679_v39  ;;  %v13333_v32 = vor.u32 %v11154_v40, %v9917_v2 }
 0x3bc   : > { %9824 = vmatmul.msk.f32.vlgmr.msra.gmra.mxu3 %vm1443_vm1, %v13239_v4  ;;  %15502 = vst [vmem:[#allocation247_spill] sm:$0xff] %v13321_v51  ;;  %v9925_v4 = vld [vmem:[#allocation2 + $0x6c8] sm:$0xf0] }
 0x3bd   : > { %2967 = vmatpush.bf16.msrb.mxu3 %v13306_v15  ;;  %v13327_v18 = vor.u32 %v11156_v11, %v9925_v4  ;;  %15506 = vst [vmem:[#allocation251_spill] sm:$0xff] %v13333_v32  ;;  %v13336_v11 = vor.u32 %v11169_v1, %v9975_v63  ;;  %v9959_v63 = vld [vmem:[#allocation2 + $0x700] sm:$0xf]  ;;  %v11165_v1 = vld [vmem:[#allocation2 + $0x704] sm:$0xf0] }
 0x3bf   : > { %15504 = vst [vmem:[#allocation249_spill] sm:$0xff] %v13327_v18 }
 0x3c0   : > { %v2680_v39 = vpop.f32.mrf.mxu1  ;;  %15507 = vst [vmem:[#allocation252_spill] sm:$0xff] %v13336_v11 }
 0x3c1   : > { %2968 = vmatpush.bf16.msrb.mxu3 %v13315_v43  ;;  %v11171_v39 = vld [vmem:[#allocation2 + $0x734] sm:$0xf0]  ;;  %v9909_v43 = vld [vmem:[#allocation2 + $0x6a8] sm:$0xf0] }
 0x3c2   : > { %v13330_v42 = vor.u32 %v11171_v39, %v9983_v54  ;;  %v13339_v4 = vor.u32 %v11152_v19, %v9909_v43  ;;  %v9967_v54 = vld [vmem:[#allocation2 + $0x710] sm:$0xf]  ;;  %v11167_v39 = vld [vmem:[#allocation2 + $0x714] sm:$0xf0] }
 0x3c3   : > { %v13342_v40 = vor.u32 %v11167_v39, %v9967_v54  ;;  %v10079_v19 = vld [vmem:[#allocation2 + $0x7f0] sm:$0xf]  ;;  %v11195_v43 = vld [vmem:[#allocation2 + $0x7f4] sm:$0xf0] }
 0x3c4   : > { %15505 = vst [vmem:[#allocation250_spill] sm:$0xff] %v13330_v42  ;;  %3230 = vmatpush.bf16.msra.mxu2 %v13330_v42  ;;  %v11148_v42 = vld [vmem:[#allocation2 + $0x684] sm:$0xf]  ;;  %v13354_v39 = vld [vmem:[#allocation4 + $0x30] sm:$0xff] }
 0x3c5   : > { %2969 = vmatpush.bf16.msrb.mxu3 %v13321_v51  ;;  %15508 = vst [vmem:[#allocation253_spill] sm:$0xff] %v13339_v4  ;;  %v9901_v51 = vld [vmem:[#allocation2 + $0x698] sm:$0xf0] }
 0x3c6   : > { %15509 = vst [vmem:[#allocation254_spill] sm:$0xff] %v13342_v40  ;;  %v13345_v2 = vor.u32 %v11150_v61, %v9901_v51  ;;  %v13356_v51 = vor.u32 %v11195_v43, %v10079_v19  ;;  %v10071_v61 = vld [vmem:[#allocation2 + $0x7e0] sm:$0xf]  ;;  %v11189_v19 = vld [vmem:[#allocation2 + $0x7c4] sm:$0xf0] }
 0x3c8   : > { %3231 = vmatpush.bf16.msra.mxu2 %v13336_v11  ;;  %15510 = vst [vmem:[#allocation255_spill] sm:$0xff] %v13345_v2 }
 0x3c9   : > { %2970 = vmatpush.bf16.msrb.mxu3 %v13327_v18  ;;  %v9893_v18 = vld [vmem:[#allocation2 + $0x688] sm:$0xf0]  ;;  %15513 = vst [vmem:[#allocation258_spill] sm:$0xff] %v13356_v51 }
 0x3ca   : > { %v13351_v15 = vor.u32 %v11148_v42, %v9893_v18  ;;  %v11191_v42 = vld [vmem:[#allocation2 + $0x7d4] sm:$0xf0] }
 0x3cc   : > { %3232 = vmatpush.bf16.msra.mxu2 %v13342_v40  ;;  %15512 = vst [vmem:[#allocation257_spill] sm:$0xff] %v13351_v15  ;;  %v11193_v40 = vld [vmem:[#allocation2 + $0x7e4] sm:$0xf0] }
 0x3cd   : > { %2971 = vmatpush.bf16.msrb.mxu3 %v13333_v32  ;;  %v13348_v32 = vor.u32 %v11165_v1, %v9959_v63  ;;  %v13364_v18 = vor.u32 %v11193_v40, %v10071_v61  ;;  %v10055_v1 = vld [vmem:[#allocation2 + $0x7c0] sm:$0xf]  ;;  %v11187_v40 = vld [vmem:[#allocation2 + $0x7b4] sm:$0xf0] }
 0x3ce   : > { %v13372_v43 = vor.u32 %v11189_v19, %v10055_v1  ;;  %v10023_v1 = vld [vmem:[#allocation2 + $0x780] sm:$0xf]  ;;  %v11181_v19 = vld [vmem:[#allocation2 + $0x784] sm:$0xf0] }
 0x3cf   : > { %15511 = vst [vmem:[#allocation256_spill] sm:$0xff] %v13348_v32 }
 0x3d0   : > { %3233 = vmatpush.bf16.msra.mxu2 %v13348_v32  ;;  %15514 = vst [vmem:[#allocation259_spill] sm:$0xff] %v13364_v18  ;;  %v11185_v32 = vld [vmem:[#allocation2 + $0x7a4] sm:$0xf0] }
 0x3d1   : > { %2972 = vmatpush.bf16.msrb.mxu3 %v13339_v4  ;;  %15516 = vst [vmem:[#allocation261_spill] sm:$0xff] %v13372_v43  ;;  %v11209_v4 = vld [vmem:[#allocation2 + $0x864] sm:$0xf0] }
 0x3d3   : > { %3234 = vmatmul.bf16.vlgmr.msra.gmra.mxu2 %v12670_v22 }
 0x3d5   : > { %2973 = vmatpush.bf16.msrb.mxu3 %v13345_v2 }
 0x3d8   : > { %v2950_v11 = vpop.f32.mrf.mxu1 }
 0x3d9   : > { %v2951_v54 = vadd.f32 %v2950_v11, %v13302_v48  ;;  %2974 = vmatpush.bf16.msrb.mxu3 %v13351_v15  ;;  %v10063_v48 = vld [vmem:[#allocation2 + $0x7d0] sm:$0xf]  ;;  %v9993_v15 = vld [vmem:[#allocation2 + $0x748] sm:$0xf0] }
 0x3da   : > { %v13369_v63 = vor.u32 %v11191_v42, %v10063_v48  ;;  %v10031_v48 = vld [vmem:[#allocation2 + $0x790] sm:$0xf]  ;;  %v11183_v42 = vld [vmem:[#allocation2 + $0x794] sm:$0xf0] }
 0x3db   : > { %9953 = vmatpush.msk.msra.mxu0 %vm1447_vm0, %v2951_v54  ;;  %v10047_v54 = vld [vmem:[#allocation2 + $0x7b0] sm:$0xf] }
 0x3dc   : > { %9954 = vmatmul.msk.f32.vlgmr.msra.gmra.mxu0 %vm1443_vm1, %v13354_v39  ;;  %2975 = vmatmul.bf16.vlgmr.msrb.gmra.mxu3 %v12672_v23  ;;  %15515 = vst [vmem:[#allocation260_spill] sm:$0xff] %v13369_v63  ;;  %v13375_v61 = vor.u32 %v11187_v40, %v10047_v54  ;;  %v13388_v54 = vpop.f32.mrf.mxu2  ;;  %v10017_v40 = vld [vmem:[#allocation2 + $0x778] sm:$0xf0] }
 0x3dd   : > { %3239 = vmatpush.bf16.msra.mxu3 %v13356_v51  ;;  %v10039_v51 = vld [vmem:[#allocation2 + $0x7a0] sm:$0xf] }
 0x3de   : > { %15517 = vst [vmem:[#allocation262_spill] sm:$0xff] %v13375_v61 }
 0x3e0   : > { %v2952_v11 = vpop.f32.mrf.mxu1 }
 0x3e1   : > { %3240 = vmatpush.bf16.msra.mxu3 %v13364_v18  ;;  %v13378_v11 = vor.u32 %v11185_v32, %v10039_v51  ;;  %v13381_v18 = vor.u32 %v11183_v42, %v10031_v48  ;;  %v11178_v51 = vld [vmem:[#allocation2 + $0x774] sm:$0xf]  ;;  %v11176_v48 = vld [vmem:[#allocation2 + $0x764] sm:$0xf]  ;;  %v10009_v42 = vld [vmem:[#allocation2 + $0x768] sm:$0xf0] }
 0x3e3   : > { %15518 = vst [vmem:[#allocation263_spill] sm:$0xff] %v13378_v11 }
 0x3e4   : > { %15519 = vst [vmem:[#allocation264_spill] sm:$0xff] %v13381_v18 }
 0x3e5   : > { %3241 = vmatpush.bf16.msra.mxu3 %v13369_v63  ;;  %v13384_v63 = vor.u32 %v11181_v19, %v10023_v1  ;;  %v11174_v1 = vld [vmem:[#allocation2 + $0x754] sm:$0xf]  ;;  %v10001_v19 = vld [vmem:[#allocation2 + $0x758] sm:$0xf0] }
 0x3e7   : > { %15520 = vst [vmem:[#allocation265_spill] sm:$0xff] %v13384_v63 }
 0x3e9   : > { %3242 = vmatpush.bf16.msra.mxu3 %v13372_v43  ;;  %v11172_v43 = vld [vmem:[#allocation2 + $0x744] sm:$0xf] }
 0x3ea   : > { %v13399_v2 = vor.u32 %v11172_v43, %v9993_v15  ;;  %v11164_v15 = vld [vmem:[#allocation2 + $0x704] sm:$0xf]  ;;  %v9961_v43 = vld [vmem:[#allocation2 + $0x708] sm:$0xf0] }
 0x3ec   : > { %15524 = vst [vmem:[#allocation269_spill] sm:$0xff] %v13399_v2 }
 0x3ed   : > { %3243 = vmatpush.bf16.msra.mxu3 %v13375_v61  ;;  %v13390_v61 = vor.u32 %v11178_v51, %v10017_v40  ;;  %v11170_v51 = vld [vmem:[#allocation2 + $0x734] sm:$0xf]  ;;  %v9985_v40 = vld [vmem:[#allocation2 + $0x738] sm:$0xf0] }
 0x3ef   : > { %15521 = vst [vmem:[#allocation266_spill] sm:$0xff] %v13390_v61  ;;  %3252 = vmatpush.bf16.msrb.mxu0 %v13390_v61  ;;  %v13402_v61 = vor.u32 %v11170_v51, %v9985_v40  ;;  %v11194_v40 = vld [vmem:[#allocation2 + $0x7f4] sm:$0xf] }
 0x3f1   : > { %3244 = vmatpush.bf16.msra.mxu3 %v13378_v11  ;;  %v13393_v11 = vor.u32 %v11176_v48, %v10009_v42  ;;  %15525 = vst [vmem:[#allocation270_spill] sm:$0xff] %v13402_v61  ;;  %v9977_v48 = vld [vmem:[#allocation2 + $0x728] sm:$0xf0] }
 0x3f3   : > { %15522 = vst [vmem:[#allocation267_spill] sm:$0xff] %v13393_v11  ;;  %3253 = vmatpush.bf16.msrb.mxu0 %v13393_v11 }
 0x3f5   : > { %3245 = vmatpush.bf16.msra.mxu3 %v13381_v18 }
 0x3f9   : > { %3246 = vmatpush.bf16.msra.mxu3 %v13384_v63  ;;  %v13396_v63 = vor.u32 %v11174_v1, %v10001_v19  ;;  %v11166_v1 = vld [vmem:[#allocation2 + $0x714] sm:$0xf]  ;;  %v9969_v19 = vld [vmem:[#allocation2 + $0x718] sm:$0xf0] }
 0x3fb   : > { %15523 = vst [vmem:[#allocation268_spill] sm:$0xff] %v13396_v63  ;;  %3254 = vmatpush.bf16.msrb.mxu0 %v13396_v63  ;;  %v13408_v63 = vor.u32 %v11166_v1, %v9969_v19 }
 0x3fc   : > { %3247 = vmatmul.bf16.vlgmr.msra.gmra.mxu3 %v12672_v23 }
 0x3fd   : > { %15527 = vst [vmem:[#allocation272_spill] sm:$0xff] %v13408_v63 }
 0x3ff   : > { %3255 = vmatpush.bf16.msrb.mxu0 %v13399_v2  ;;  %v13411_v2 = vor.u32 %v11164_v15, %v9961_v43  ;;  %v11192_v15 = vld [vmem:[#allocation2 + $0x7e4] sm:$0xf]  ;;  %v10073_v43 = vld [vmem:[#allocation2 + $0x7e8] sm:$0xf0] }
 0x401   : > { %15528 = vst [vmem:[#allocation273_spill] sm:$0xff] %v13411_v2 }
 0x403   : > { %3256 = vmatpush.bf16.msrb.mxu0 %v13402_v61  ;;  %v11211_v61 = vld [vmem:[#allocation2 + $0x874] sm:$0xf0] }
 0x410   : > { %v2963_v32 = vpop.f32.mrf.mxu2 }
 0x418   : > { %v2965_v18 = vpop.f32.mrf.mxu2 }
 0x419   : > { %v11168_v18 = vld [vmem:[#allocation2 + $0x724] sm:$0xf] }
 0x41a   : > { %v13405_v42 = vor.u32 %v11168_v18, %v9977_v48  ;;  %v10081_v18 = vld [vmem:[#allocation2 + $0x7f8] sm:$0xf0] }
 0x41b   : > { %v13421_v11 = vor.u32 %v11194_v40, %v10081_v18  ;;  %v10131_v40 = vld [vmem:[#allocation2 + $0x850] sm:$0xf]  ;;  %v11207_v18 = vld [vmem:[#allocation2 + $0x854] sm:$0xf0] }
 0x41c   : > { %15526 = vst [vmem:[#allocation271_spill] sm:$0xff] %v13405_v42  ;;  %3257 = vmatpush.bf16.msrb.mxu0 %v13405_v42  ;;  %v10147_v42 = vld [vmem:[#allocation2 + $0x870] sm:$0xf] }
 0x41d   : > { %v13419_v19 = vor.u32 %v11211_v61, %v10147_v42  ;;  %15530 = vst [vmem:[#allocation275_spill] sm:$0xff] %v13421_v11  ;;  %v13430_v61 = vor.u32 %v11192_v15, %v10073_v43  ;;  %v10065_v42 = vld [vmem:[#allocation2 + $0x7d8] sm:$0xf0]  ;;  %v11205_v15 = vld [vmem:[#allocation2 + $0x844] sm:$0xf0] }
 0x41f   : > { %15529 = vst [vmem:[#allocation274_spill] sm:$0xff] %v13419_v19 }
 0x420   : > { %3258 = vmatpush.bf16.msrb.mxu0 %v13408_v63  ;;  %15532 = vst [vmem:[#allocation277_spill] sm:$0xff] %v13430_v61 }
 0x424   : > { %3259 = vmatpush.bf16.msrb.mxu0 %v13411_v2  ;;  %v10139_v2 = vld [vmem:[#allocation2 + $0x860] sm:$0xf] }
 0x425   : > { %v13427_v49 = vor.u32 %v11209_v4, %v10139_v2  ;;  %v11188_v4 = vld [vmem:[#allocation2 + $0x7c4] sm:$0xf]  ;;  %v10057_v2 = vld [vmem:[#allocation2 + $0x7c8] sm:$0xf0] }
 0x427   : > { %3260 = vmatmul.bf16.vlgmr.msrb.gmra.mxu0 %v12670_v22  ;;  %15531 = vst [vmem:[#allocation276_spill] sm:$0xff] %v13427_v49 }
 0x428   : > { %3524 = vmatpush.bf16.msra.mxu0 %v13419_v19  ;;  %v13433_v19 = vor.u32 %v11207_v18, %v10131_v40  ;;  %v10049_v40 = vld [vmem:[#allocation2 + $0x7b8] sm:$0xf0]  ;;  %v10115_v18 = vld [vmem:[#allocation2 + $0x830] sm:$0xf] }
 0x42a   : > { %15533 = vst [vmem:[#allocation278_spill] sm:$0xff] %v13433_v19 }
 0x42c   : > { %3525 = vmatpush.bf16.msra.mxu0 %v13427_v49  ;;  %v13442_v49 = vor.u32 %v11188_v4, %v10057_v2 }
 0x42e   : > { %15536 = vst [vmem:[#allocation281_spill] sm:$0xff] %v13442_v49 }
 0x430   : > { %3526 = vmatpush.bf16.msra.mxu0 %v13433_v19  ;;  %v11184_v19 = vld [vmem:[#allocation2 + $0x7a4] sm:$0xf] }
 0x43f   : > { %v13413_v51 = vpop.f32.mrf.mxu3 }
 0x456   : > { %v13417_v48 = vpop.f32.mrf.mxu2 }
 0x45f   : > { %v2976_v1 = vpop.f32.mrf.mxu3 }
 0x460   : > { %v2977_v63 = vadd.f32 %v2976_v1, %v2963_v32  ;;  %v11190_v32 = vld [vmem:[#allocation2 + $0x7d4] sm:$0xf]  ;;  %v3237_v1 = vpop.f32.mrf.mxu2 }
 0x461   : > { %v13436_v27 = vor.u32 %v11190_v32, %v10065_v42  ;;  %v11186_v1 = vld [vmem:[#allocation2 + $0x7b4] sm:$0xf] }
 0x462   : > { %9955 = vmatpush.msk.msra.mxu1 %vm1447_vm0, %v2977_v63  ;;  %v13448_v42 = vor.u32 %v11186_v1, %v10049_v40 }
 0x463   : > { %9956 = vmatmul.msk.f32.vlgmr.msra.gmra.mxu1 %vm1443_vm1, %v13354_v39  ;;  %15534 = vst [vmem:[#allocation279_spill] sm:$0xff] %v13436_v27  ;;  %v10123_v39 = vld [vmem:[#allocation2 + $0x840] sm:$0xf] }
 0x464   : > { %3265 = vmatpush.bf16.msrb.mxu1 %v13421_v11  ;;  %v13439_v43 = vor.u32 %v11205_v15, %v10123_v39  ;;  %15538 = vst [vmem:[#allocation283_spill] sm:$0xff] %v13448_v42  ;;  %v10107_v39 = vld [vmem:[#allocation2 + $0x820] sm:$0xf]  ;;  %v11201_v15 = vld [vmem:[#allocation2 + $0x824] sm:$0xf0] }
 0x465   : > { %v13451_v4 = vor.u32 %v11201_v15, %v10107_v39  ;;  %v10091_v39 = vld [vmem:[#allocation2 + $0x800] sm:$0xf]  ;;  %v11197_v15 = vld [vmem:[#allocation2 + $0x804] sm:$0xf0] }
 0x466   : > { %15535 = vst [vmem:[#allocation280_spill] sm:$0xff] %v13439_v43  ;;  %3527 = vmatpush.bf16.msra.mxu0 %v13439_v43  ;;  %v11182_v43 = vld [vmem:[#allocation2 + $0x794] sm:$0xf] }
 0x467   : > { %v2978_v63 = vpop.f32.mrf.mxu3  ;;  %15539 = vst [vmem:[#allocation284_spill] sm:$0xff] %v13451_v4 }
 0x468   : > { %3266 = vmatpush.bf16.msrb.mxu1 %v13430_v61  ;;  %v11203_v63 = vld [vmem:[#allocation2 + $0x834] sm:$0xf0]  ;;  %v10041_v61 = vld [vmem:[#allocation2 + $0x7a8] sm:$0xf0] }
 0x469   : > { %v13445_v32 = vor.u32 %v11203_v63, %v10115_v18  ;;  %v13454_v2 = vor.u32 %v11184_v19, %v10041_v61  ;;  %v10099_v18 = vld [vmem:[#allocation2 + $0x810] sm:$0xf]  ;;  %v11199_v63 = vld [vmem:[#allocation2 + $0x814] sm:$0xf0] }
 0x46a   : > { %v13457_v1 = vor.u32 %v11199_v63, %v10099_v18  ;;  %v10211_v19 = vld [vmem:[#allocation2 + $0x8f0] sm:$0xf]  ;;  %v11227_v61 = vld [vmem:[#allocation2 + $0x8f4] sm:$0xf0] }
 0x46b   : > { %15537 = vst [vmem:[#allocation282_spill] sm:$0xff] %v13445_v32  ;;  %3528 = vmatpush.bf16.msra.mxu0 %v13445_v32  ;;  %v11180_v32 = vld [vmem:[#allocation2 + $0x784] sm:$0xf]  ;;  %v13469_v63 = vld [vmem:[#allocation4 + $0x38] sm:$0xff] }
 0x46c   : > { %3267 = vmatpush.bf16.msrb.mxu1 %v13436_v27  ;;  %15540 = vst [vmem:[#allocation285_spill] sm:$0xff] %v13454_v2  ;;  %v10033_v27 = vld [vmem:[#allocation2 + $0x798] sm:$0xf0] }
 0x46d   : > { %15541 = vst [vmem:[#allocation286_spill] sm:$0xff] %v13457_v1  ;;  %v13460_v40 = vor.u32 %v11182_v43, %v10033_v27  ;;  %v13471_v27 = vor.u32 %v11227_v61, %v10211_v19  ;;  %v10203_v43 = vld [vmem:[#allocation2 + $0x8e0] sm:$0xf]  ;;  %v11221_v19 = vld [vmem:[#allocation2 + $0x8c4] sm:$0xf0] }
 0x46f   : > { %3529 = vmatpush.bf16.msra.mxu0 %v13451_v4  ;;  %15542 = vst [vmem:[#allocation287_spill] sm:$0xff] %v13460_v40 }
 0x470   : > { %3268 = vmatpush.bf16.msrb.mxu1 %v13442_v49  ;;  %v10025_v49 = vld [vmem:[#allocation2 + $0x788] sm:$0xf0]  ;;  %15545 = vst [vmem:[#allocation290_spill] sm:$0xff] %v13471_v27 }
 0x471   : > { %v13466_v11 = vor.u32 %v11180_v32, %v10025_v49  ;;  %v11223_v32 = vld [vmem:[#allocation2 + $0x8d4] sm:$0xf0] }
 0x473   : > { %3530 = vmatpush.bf16.msra.mxu0 %v13457_v1  ;;  %15544 = vst [vmem:[#allocation289_spill] sm:$0xff] %v13466_v11  ;;  %v11225_v1 = vld [vmem:[#allocation2 + $0x8e4] sm:$0xf0] }
 0x474   : > { %3269 = vmatpush.bf16.msrb.mxu1 %v13448_v42  ;;  %v13463_v42 = vor.u32 %v11197_v15, %v10091_v39  ;;  %v13479_v49 = vor.u32 %v11225_v1, %v10203_v43  ;;  %v10187_v15 = vld [vmem:[#allocation2 + $0x8c0] sm:$0xf]  ;;  %v11219_v1 = vld [vmem:[#allocation2 + $0x8b4] sm:$0xf0] }
 0x475   : > { %v13487_v61 = vor.u32 %v11221_v19, %v10187_v15  ;;  %v10155_v15 = vld [vmem:[#allocation2 + $0x880] sm:$0xf]  ;;  %v11213_v19 = vld [vmem:[#allocation2 + $0x884] sm:$0xf0] }
 0x476   : > { %15543 = vst [vmem:[#allocation288_spill] sm:$0xff] %v13463_v42 }
 0x477   : > { %3531 = vmatpush.bf16.msra.mxu0 %v13463_v42  ;;  %15546 = vst [vmem:[#allocation291_spill] sm:$0xff] %v13479_v49  ;;  %v11217_v42 = vld [vmem:[#allocation2 + $0x8a4] sm:$0xf0] }
 0x478   : > { %3270 = vmatpush.bf16.msrb.mxu1 %v13454_v2  ;;  %15548 = vst [vmem:[#allocation293_spill] sm:$0xff] %v13487_v61  ;;  %v10197_v2 = vld [vmem:[#allocation2 + $0x8d8] sm:$0xf0] }
 0x47a   : > { %3532 = vmatmul.bf16.vlgmr.msra.gmra.mxu0 %v12670_v22 }
 0x47c   : > { %3271 = vmatpush.bf16.msrb.mxu1 %v13460_v40 }
 0x47f   : > { %v3248_v4 = vpop.f32.mrf.mxu3 }
 0x480   : > { %v3249_v18 = vadd.f32 %v3248_v4, %v13417_v48  ;;  %3272 = vmatpush.bf16.msrb.mxu1 %v13466_v11  ;;  %v10195_v48 = vld [vmem:[#allocation2 + $0x8d0] sm:$0xf]  ;;  %v10117_v11 = vld [vmem:[#allocation2 + $0x838] sm:$0xf0] }
 0x481   : > { %v13484_v39 = vor.u32 %v11223_v32, %v10195_v48  ;;  %v10163_v48 = vld [vmem:[#allocation2 + $0x890] sm:$0xf]  ;;  %v11215_v32 = vld [vmem:[#allocation2 + $0x894] sm:$0xf0] }
 0x482   : > { %10085 = vmatpush.msk.msrb.mxu2 %vm1447_vm0, %v3249_v18  ;;  %v10179_v18 = vld [vmem:[#allocation2 + $0x8b0] sm:$0xf] }
 0x483   : > { %10086 = vmatmul.msk.f32.vlgmr.msrb.gmra.mxu2 %vm1443_vm1, %v13469_v63  ;;  %3273 = vmatmul.bf16.vlgmr.msrb.gmra.mxu1 %v12672_v23  ;;  %15547 = vst [vmem:[#allocation292_spill] sm:$0xff] %v13484_v39  ;;  %v13490_v43 = vor.u32 %v11219_v1, %v10179_v18  ;;  %v11210_v18 = vld [vmem:[#allocation2 + $0x874] sm:$0xf]  ;;  %v10149_v1 = vld [vmem:[#allocation2 + $0x878] sm:$0xf0] }
 0x484   : > { %3537 = vmatpush.bf16.msra.mxu1 %v13471_v27  ;;  %v10171_v27 = vld [vmem:[#allocation2 + $0x8a0] sm:$0xf] }
 0x485   : > { %15549 = vst [vmem:[#allocation294_spill] sm:$0xff] %v13490_v43 }
 0x487   : > { %v3250_v4 = vpop.f32.mrf.mxu3 }
 0x488   : > { %3538 = vmatpush.bf16.msra.mxu1 %v13479_v49  ;;  %v13493_v4 = vor.u32 %v11217_v42, %v10171_v27  ;;  %v13496_v49 = vor.u32 %v11215_v32, %v10163_v48  ;;  %v13503_v42 = vor.u32 %v11210_v18, %v10149_v1  ;;  %v13506_v27 = vpop.f32.mrf.mxu0  ;;  %v11208_v32 = vld [vmem:[#allocation2 + $0x864] sm:$0xf]  ;;  %v10125_v1 = vld [vmem:[#allocation2 + $0x848] sm:$0xf0] }
 0x489   : > { %v11204_v18 = vld [vmem:[#allocation2 + $0x844] sm:$0xf] }
 0x48a   : > { %15550 = vst [vmem:[#allocation295_spill] sm:$0xff] %v13493_v4  ;;  %3550 = vmatpush.bf16.msra.mxu2 %v13503_v42 }
 0x48b   : > { %15551 = vst [vmem:[#allocation296_spill] sm:$0xff] %v13496_v49 }
 0x48c   : > { %3539 = vmatpush.bf16.msra.mxu1 %v13484_v39  ;;  %v13499_v39 = vor.u32 %v11213_v19, %v10155_v15  ;;  %15553 = vst [vmem:[#allocation298_spill] sm:$0xff] %v13503_v42  ;;  %v11206_v15 = vld [vmem:[#allocation2 + $0x854] sm:$0xf]  ;;  %v10133_v19 = vld [vmem:[#allocation2 + $0x858] sm:$0xf0] }
 0x48d   : > { %v11202_v42 = vld [vmem:[#allocation2 + $0x834] sm:$0xf] }
 0x48e   : > { %15552 = vst [vmem:[#allocation297_spill] sm:$0xff] %v13499_v39  ;;  %v13517_v40 = vor.u32 %v11202_v42, %v10117_v11  ;;  %v11226_v42 = vld [vmem:[#allocation2 + $0x8f4] sm:$0xf] }
 0x490   : > { %3540 = vmatpush.bf16.msra.mxu1 %v13487_v61  ;;  %v13514_v61 = vor.u32 %v11204_v18, %v10125_v1  ;;  %15557 = vst [vmem:[#allocation302_spill] sm:$0xff] %v13517_v40  ;;  %v11196_v18 = vld [vmem:[#allocation2 + $0x804] sm:$0xf]  ;;  %v10093_v1 = vld [vmem:[#allocation2 + $0x808] sm:$0xf0] }
 0x492   : > { %15556 = vst [vmem:[#allocation301_spill] sm:$0xff] %v13514_v61 }
 0x494   : > { %3541 = vmatpush.bf16.msra.mxu1 %v13490_v43 }
 0x498   : > { %3542 = vmatpush.bf16.msra.mxu1 %v13493_v4  ;;  %v10141_v4 = vld [vmem:[#allocation2 + $0x868] sm:$0xf0] }
 0x499   : > { %v13508_v43 = vor.u32 %v11208_v32, %v10141_v4  ;;  %v10109_v4 = vld [vmem:[#allocation2 + $0x828] sm:$0xf0] }
 0x49b   : > { %15554 = vst [vmem:[#allocation299_spill] sm:$0xff] %v13508_v43  ;;  %3551 = vmatpush.bf16.msra.mxu2 %v13508_v43 }
 0x49c   : > { %3543 = vmatpush.bf16.msra.mxu1 %v13496_v49 }
 0x4a0   : > { %3544 = vmatpush.bf16.msra.mxu1 %v13499_v39  ;;  %v13511_v39 = vor.u32 %v11206_v15, %v10133_v19  ;;  %v11198_v15 = vld [vmem:[#allocation2 + $0x814] sm:$0xf]  ;;  %v10101_v19 = vld [vmem:[#allocation2 + $0x818] sm:$0xf0] }
 0x4a2   : > { %15555 = vst [vmem:[#allocation300_spill] sm:$0xff] %v13511_v39  ;;  %3552 = vmatpush.bf16.msra.mxu2 %v13511_v39  ;;  %v13523_v39 = vor.u32 %v11198_v15, %v10101_v19  ;;  %v11224_v15 = vld [vmem:[#allocation2 + $0x8e4] sm:$0xf]  ;;  %v10205_v19 = vld [vmem:[#allocation2 + $0x8e8] sm:$0xf0] }
 0x4a3   : > { %3545 = vmatmul.bf16.vlgmr.msra.gmra.mxu1 %v12672_v23 }
 0x4a4   : > { %v3261_v48 = vpop.f32.mrf.mxu0  ;;  %15559 = vst [vmem:[#allocation304_spill] sm:$0xff] %v13523_v39 }
 0x4a6   : > { %3553 = vmatpush.bf16.msra.mxu2 %v13514_v61  ;;  %v13526_v61 = vor.u32 %v11196_v18, %v10093_v1  ;;  %v942_v18 = vld [vmem:[#allocation6] sm:$0xff] }
 0x4a7   : > { %v11235_v1 = vld [vmem:[#allocation7 + $0x38] sm:$0xff] }
 0x4a8   : > { %15560 = vst [vmem:[#allocation305_spill] sm:$0xff] %v13526_v61 }
 0x4aa   : > { %3554 = vmatpush.bf16.msra.mxu2 %v13517_v40 }
 0x4ac   : > { %v3263_v49 = vpop.f32.mrf.mxu0 }
 0x4ad   : > { %v11200_v49 = vld [vmem:[#allocation2 + $0x824] sm:$0xf] }
 0x4ae   : > { %v13520_v32 = vor.u32 %v11200_v49, %v10109_v4  ;;  %v10213_v49 = vld [vmem:[#allocation2 + $0x8f8] sm:$0xf0] }
 0x4af   : > { %v13532_v43 = vor.u32 %v11226_v42, %v10213_v49  ;;  %v11220_v42 = vld [vmem:[#allocation2 + $0x8c4] sm:$0xf]  ;;  %v10189_v49 = vld [vmem:[#allocation2 + $0x8c8] sm:$0xf0] }
 0x4b0   : > { %15558 = vst [vmem:[#allocation303_spill] sm:$0xff] %v13520_v32  ;;  %3555 = vmatpush.bf16.msra.mxu2 %v13520_v32 }
 0x4b1   : > { %15561 = vst [vmem:[#allocation306_spill] sm:$0xff] %v13532_v43 }
 0x4b4   : > { %3556 = vmatpush.bf16.msra.mxu2 %v13523_v39  ;;  %v11222_v39 = vld [vmem:[#allocation2 + $0x8d4] sm:$0xf] }
 0x4b8   : > { %3557 = vmatpush.bf16.msra.mxu2 %v13526_v61  ;;  %v13538_v61 = vor.u32 %v11224_v15, %v10205_v19  ;;  %v11233_v15 = vld [vmem:[#allocation7 + $0x28] sm:$0xff]  ;;  %v13544_v19 = vor.u32 %v11220_v42, %v10189_v49  ;;  %v11212_v42 = vld [vmem:[#allocation2 + $0x884] sm:$0xf]  ;;  %v10157_v49 = vld [vmem:[#allocation2 + $0x888] sm:$0xf0] }
 0x4ba   : > { %15562 = vst [vmem:[#allocation307_spill] sm:$0xff] %v13538_v61 }
 0x4bb   : > { %3558 = vmatmul.bf16.vlgmr.msra.gmra.mxu2 %v12670_v22  ;;  %v12238_v22 = vmov 0   ;;  %15564 = vst [vmem:[#allocation309_spill] sm:$0xff] %v13544_v19 }
 0x4bc   : > { %11566 = vset.pattern.permute.xlu0 %v12238_v22  ;;  %3768 = vmatpush.bf16.msrb.mxu2 %v11235_v1 }
 0x4bd   : > { %3631 = vperm.xlu0 %11566, %v942_v18   ;;  %11567 = vset.pattern.permute.xlu1 %v12238_v22  ;;  %v10181_v18 = vld [vmem:[#allocation2 + $0x8b8] sm:$0xf0] }
 0x4be   : > { %11568 = vset.pattern.permute.xlu2 %v12238_v22  ;;  %v11216_v22 = vld [vmem:[#allocation2 + $0x8a4] sm:$0xf] }
 0x4e0   : > { %v13528_v11 = vpop.f32.mrf.mxu1 }
 0x4f7   : > { %v3533_v4 = vpop.f32.mrf.mxu0 }
 0x500   : > { %v3274_v32 = vpop.f32.mrf.mxu1 }
 0x501   : > { %v3275_v40 = vadd.f32 %v3274_v32, %v3261_v48  ;;  %v11234_v48 = vld [vmem:[#allocation7 + $0x30] sm:$0xff]  ;;  %v3535_v32 = vpop.f32.mrf.mxu0 }
 0x502   : > { %3769 = vmatpush.bf16.msrb.mxu2 %v11234_v48  ;;  %v10173_v32 = vld [vmem:[#allocation2 + $0x8a8] sm:$0xf0]  ;;  %v10165_v48 = vld [vmem:[#allocation2 + $0x898] sm:$0xf0] }
 0x503   : > { %10087 = vmatpush.msk.msrb.mxu3 %vm1447_vm0, %v3275_v40 }
 0x504   : > { %10088 = vmatmul.msk.f32.vlgmr.msrb.gmra.mxu3 %vm1443_vm1, %v13469_v63  ;;  %v13541_v63 = vor.u32 %v11222_v39, %v10197_v2  ;;  %v13550_v2 = vor.u32 %v11216_v22, %v10173_v32  ;;  %v11214_v39 = vld [vmem:[#allocation2 + $0x894] sm:$0xf]  ;;  %v11250_v22 = vld [vmem:[#allocation7 + $0xb0] sm:$0xff] }
 0x505   : > { %3563 = vmatpush.bf16.msra.mxu3 %v13532_v43  ;;  %v11218_v43 = vld [vmem:[#allocation2 + $0x8b4] sm:$0xf] }
 0x506   : > { %15563 = vst [vmem:[#allocation308_spill] sm:$0xff] %v13541_v63  ;;  %3770 = vmatpush.bf16.msrb.mxu2 %v11233_v15  ;;  %v13547_v1 = vor.u32 %v11218_v43, %v10181_v18  ;;  %v13558_v18 = vld [vmem:[#allocation4 + $0x40] sm:$0xff] }
 0x507   : > { %15566 = vst [vmem:[#allocation311_spill] sm:$0xff] %v13550_v2 }
 0x508   : > { %v3276_v40 = vpop.f32.mrf.mxu1  ;;  %15565 = vst [vmem:[#allocation310_spill] sm:$0xff] %v13547_v1 }
 0x509   : > { %3564 = vmatpush.bf16.msra.mxu3 %v13538_v61  ;;  %v13553_v40 = vor.u32 %v11214_v39, %v10165_v48  ;;  %v11249_v39 = vld [vmem:[#allocation7 + $0xa8] sm:$0xff]  ;;  %v11232_v48 = vld [vmem:[#allocation7 + $0x20] sm:$0xff] }
 0x50a   : > { %3771 = vmatpush.bf16.msrb.mxu2 %v11232_v48  ;;  %v11266_v48 = vld [vmem:[#allocation7 + $0x130] sm:$0xff] }
 0x50b   : > { %15567 = vst [vmem:[#allocation312_spill] sm:$0xff] %v13553_v40 }
 0x50d   : > { %3565 = vmatpush.bf16.msra.mxu3 %v13541_v63  ;;  %v11251_v63 = vld [vmem:[#allocation7 + $0xb8] sm:$0xff] }
 0x511   : > { %3566 = vmatpush.bf16.msra.mxu3 %v13544_v19  ;;  %v13556_v19 = vor.u32 %v11212_v42, %v10157_v49  ;;  %v11231_v42 = vld [vmem:[#allocation7 + $0x18] sm:$0xff] }
 0x512   : > { %v11247_v49 = vld [vmem:[#allocation7 + $0x98] sm:$0xff]  ;;  %3772 = vmatpush.bf16.msrb.mxu2 %v11231_v42 }
 0x513   : > { %15568 = vst [vmem:[#allocation313_spill] sm:$0xff] %v13556_v19 }
 0x515   : > { %3567 = vmatpush.bf16.msra.mxu3 %v13547_v1  ;;  %v11263_v1 = vld [vmem:[#allocation7 + $0x118] sm:$0xff] }
 0x519   : > { %3568 = vmatpush.bf16.msra.mxu3 %v13550_v2  ;;  %v4262_v2 = vld [vmem:[#allocation12] sm:$0xff] }
 0x51a   : > { %4986 = vperm.xlu0 %11566, %v4262_v2   ;;  %v6922_v2 = vld [vmem:[#allocation30] sm:$0xff] }
 0x51d   : > { %3569 = vmatpush.bf16.msra.mxu3 %v13553_v40  ;;  %v3306_v40 = vpop.f32.mrf.mxu2 }
 0x520   : > { %v3546_v15 = vpop.f32.mrf.mxu1 }
 0x521   : > { %v3547_v43 = vadd.f32 %v3546_v15, %v3533_v4  ;;  %3570 = vmatpush.bf16.msra.mxu3 %v13556_v19  ;;  %v11248_v4 = vld [vmem:[#allocation7 + $0xa0] sm:$0xff]  ;;  %v11230_v15 = vld [vmem:[#allocation7 + $0x10] sm:$0xff]  ;;  %v11245_v19 = vld [vmem:[#allocation7 + $0x88] sm:$0xff] }
 0x522   : > { %3773 = vmatpush.bf16.msrb.mxu2 %v11230_v15  ;;  %v11281_v15 = vld [vmem:[#allocation7 + $0x1a8] sm:$0xff] }
 0x523   : > { %10217 = vmatpush.msk.msrb.mxu0 %vm1447_vm0, %v3547_v43  ;;  %v11246_v43 = vld [vmem:[#allocation7 + $0x90] sm:$0xff] }
 0x524   : > { %10218 = vmatmul.msk.f32.vlgmr.msrb.gmra.mxu0 %vm1443_vm1, %v13558_v18  ;;  %3571 = vmatmul.bf16.vlgmr.msra.gmra.mxu3 %v12672_v23  ;;  %v11228_v23 = vld [vmem:[#allocation7] sm:$0xff] }
 0x525   : > { %3923 = vmatpush.bf16.msra.mxu0 %v11251_v63  ;;  %v11229_v63 = vld [vmem:[#allocation7 + $0x8] sm:$0xff] }
 0x526   : > { %3774 = vmatpush.bf16.msrb.mxu2 %v11229_v63 }
 0x528   : > { %v3548_v32 = vpop.f32.mrf.mxu1 }
 0x529   : > { %3924 = vmatpush.bf16.msra.mxu0 %v11250_v22  ;;  %v11244_v22 = vld [vmem:[#allocation7 + $0x80] sm:$0xff]  ;;  %v11267_v32 = vld [vmem:[#allocation7 + $0x138] sm:$0xff] }
 0x52a   : > { %3775 = vmatpush.bf16.msrb.mxu2 %v11228_v23  ;;  %v11279_v23 = vld [vmem:[#allocation7 + $0x198] sm:$0xff] }
 0x52d   : > { %3925 = vmatpush.bf16.msra.mxu0 %v11249_v39  ;;  %v11283_v39 = vld [vmem:[#allocation7 + $0x1b8] sm:$0xff] }
 0x52e   : > { %4079 = vmatpush.bf16.msra.mxu2 %v11267_v32  ;;  %v11278_v32 = vld [vmem:[#allocation7 + $0x190] sm:$0xff] }
 0x531   : > { %3926 = vmatpush.bf16.msra.mxu0 %v11248_v4  ;;  %v11282_v4 = vld [vmem:[#allocation7 + $0x1b0] sm:$0xff] }
 0x532   : > { %4080 = vmatpush.bf16.msra.mxu2 %v11266_v48  ;;  %v11261_v48 = vld [vmem:[#allocation7 + $0x108] sm:$0xff] }
 0x535   : > { %3927 = vmatpush.bf16.msra.mxu0 %v11247_v49  ;;  %v11265_v49 = vld [vmem:[#allocation7 + $0x128] sm:$0xff] }
 0x536   : > { %4081 = vmatpush.bf16.msra.mxu2 %v11265_v49  ;;  %v11260_v49 = vld [vmem:[#allocation7 + $0x100] sm:$0xff] }
 0x539   : > { %3928 = vmatpush.bf16.msra.mxu0 %v11246_v43  ;;  %v11264_v43 = vld [vmem:[#allocation7 + $0x120] sm:$0xff] }
 0x53a   : > { %4082 = vmatpush.bf16.msra.mxu2 %v11264_v43  ;;  %v2137_v43 = vadd.f32 %v13158_v55, %v13054_v35 }
 0x53d   : > { %3929 = vmatpush.bf16.msra.mxu0 %v11245_v19  ;;  %v11280_v19 = vld [vmem:[#allocation7 + $0x1a0] sm:$0xff] }
 0x53e   : > { %v3559_v42 = vpop.f32.mrf.mxu2  ;;  %4083 = vmatpush.bf16.msra.mxu2 %v11263_v1  ;;  %v2435_v1 = vadd.f32 %v13276_v20, %v2137_v43  ;;  %v11240_v20 = vld [vmem:[#allocation7 + $0x60] sm:$0xff] }
 0x541   : > { %3930 = vmatpush.bf16.msra.mxu0 %v11244_v22  ;;  %v11262_v22 = vld [vmem:[#allocation7 + $0x110] sm:$0xff] }
 0x542   : > { %4084 = vmatpush.bf16.msra.mxu2 %v11262_v22 }
 0x545   : > { %4235 = vmatpush.bf16.msrb.mxu0 %v11283_v39  ;;  %v5198_v39 = vld [vmem:[#allocation18 + $0x18] sm:$0xff] }
 0x546   : > { %v3561_v63 = vpop.f32.mrf.mxu2  ;;  %5868 = vperm.xlu0 %11566, %v5198_v39   ;;  %4085 = vmatpush.bf16.msra.mxu2 %v11261_v48  ;;  %v11241_v39 = vld [vmem:[#allocation7 + $0x68] sm:$0xff] }
 0x547   : > { %v2733_v63 = vadd.f32 %v13388_v54, %v2435_v1  ;;  %v11239_v54 = vld [vmem:[#allocation7 + $0x58] sm:$0xff]  ;;  %v11238_v1 = vld [vmem:[#allocation7 + $0x50] sm:$0xff] }
 0x549   : > { %4236 = vmatpush.bf16.msrb.mxu0 %v11282_v4  ;;  %v11277_v4 = vld [vmem:[#allocation7 + $0x188] sm:$0xff]  ;;  %v3031_v22 = vadd.f32 %v13506_v27, %v2733_v63 }
 0x54a   : > { %4086 = vmatpush.bf16.msra.mxu2 %v11260_v49 }
 0x54d   : > { %4237 = vmatpush.bf16.msrb.mxu0 %v11281_v15  ;;  %v11276_v15 = vld [vmem:[#allocation7 + $0x180] sm:$0xff] }
 0x54e   : > { %8739 = vperm.xlu0 %11566, %v6922_v2  }
 0x551   : > { %4238 = vmatpush.bf16.msrb.mxu0 %v11280_v19  ;;  %v11243_v19 = vld [vmem:[#allocation7 + $0x78] sm:$0xff] }
 0x552   : > { %3781 = vmatpush.bf16.msrb.mxu3 %v11243_v19  ;;  %v11258_v19 = vld [vmem:[#allocation7 + $0xf0] sm:$0xff] }
 0x555   : > { %4239 = vmatpush.bf16.msrb.mxu0 %v11279_v23  ;;  %v11242_v23 = vld [vmem:[#allocation7 + $0x70] sm:$0xff] }
 0x556   : > { %3782 = vmatpush.bf16.msrb.mxu3 %v11242_v23  ;;  %v11257_v23 = vld [vmem:[#allocation7 + $0xe8] sm:$0xff] }
 0x559   : > { %4240 = vmatpush.bf16.msrb.mxu0 %v11278_v32  ;;  %v3329_v32 = vadd.f32 %v3306_v40, %v3031_v22  ;;  %v11259_v40 = vld [vmem:[#allocation7 + $0xf8] sm:$0xff]  ;;  %v11256_v22 = vld [vmem:[#allocation7 + $0xe0] sm:$0xff] }
 0x55a   : > { %3783 = vmatpush.bf16.msrb.mxu3 %v11241_v39  ;;  %v11237_v39 = vld [vmem:[#allocation7 + $0x48] sm:$0xff] }
 0x55d   : > { %4241 = vmatpush.bf16.msrb.mxu0 %v11277_v4  ;;  %v13570_v4 = vpop.permute.xlu0 %3631 }
 0x55e   : > { %3784 = vmatpush.bf16.msrb.mxu3 %v11240_v20  ;;  %v11291_v20 = vld [vmem:[#allocation7 + $0x1f8] sm:$0xff] }
 0x561   : > { %4242 = vmatpush.bf16.msrb.mxu0 %v11276_v15 }
 0x562   : > { %3785 = vmatpush.bf16.msrb.mxu3 %v11239_v54  ;;  %v11290_v54 = vld [vmem:[#allocation7 + $0x1f0] sm:$0xff] }
 0x566   : > { %3786 = vmatpush.bf16.msrb.mxu3 %v11238_v1  ;;  %v11288_v1 = vld [vmem:[#allocation7 + $0x1e0] sm:$0xff] }
 0x56a   : > { %3787 = vmatpush.bf16.msrb.mxu3 %v11237_v39  ;;  %v1541_v39 = vadd.f32 %v12929_v13, %v12946_v28 }
 0x587   : > { %v13572_v35 = vpop.f32.mrf.mxu3 }
 0x5a1   : > { %v3604_v48 = vpop.f32.mrf.mxu0 }
 0x5a2   : > { %v3627_v55 = vadd.f32 %v3604_v48, %v3329_v32  ;;  %v11254_v32 = vld [vmem:[#allocation7 + $0xd0] sm:$0xff]  ;;  %v11253_v48 = vld [vmem:[#allocation7 + $0xc8] sm:$0xff] }
 0x5a4   : > { %v3634_v49 = vadd.f32 %v13570_v4, %v3627_v55  ;;  %v11252_v55 = vld [vmem:[#allocation7 + $0xc0] sm:$0xff] }
 0x5a6   : > { %v3636_v15 = vmax.f32 %v3634_v49, 0.0  ;;  %v11275_v49 = vld [vmem:[#allocation7 + $0x178] sm:$0xff] }
 0x5a7   : > { %v3572_v2 = vpop.f32.mrf.mxu3 }
 0x5a8   : > { %v13575_v43 = vpack.c.bf16 %v3636_v15, %v3636_v15  ;;  %v3573_v27 = vadd.f32 %v3572_v2, %v3559_v42  ;;  %v11255_v42 = vld [vmem:[#allocation7 + $0xd8] sm:$0xff]  ;;  %v11274_v15 = vld [vmem:[#allocation7 + $0x170] sm:$0xff]  ;;  %v11273_v2 = vld [vmem:[#allocation7 + $0x168] sm:$0xff] }
 0x5aa   : > { %15569 = vst [vmem:[#allocation314_spill] sm:$0xff] %v13575_v43  ;;  %3776 = vmatmul.bf16.vlgmr.msrb.gmra.mxu2 %v13575_v43  ;;  %3931 = vmatmul.bf16.vlgmr.msra.gmra.mxu0 %v13575_v43 }
 0x5ab   : > { %10219 = vmatpush.msk.msrb.mxu1 %vm1447_vm0, %v3573_v27  ;;  %v11289_v27 = vld [vmem:[#allocation7 + $0x1e8] sm:$0xff] }
 0x5ac   : > { %10220 = vmatmul.msk.f32.vlgmr.msrb.gmra.mxu1 %vm1443_vm1, %v13558_v18  ;;  %v11236_v18 = vld [vmem:[#allocation7 + $0x40] sm:$0xff] }
 0x5ad   : > { %3936 = vmatpush.bf16.msra.mxu1 %v11259_v40  ;;  %3788 = vmatpush.bf16.msrb.mxu3 %v11236_v18  ;;  %v11272_v40 = vld [vmem:[#allocation7 + $0x160] sm:$0xff] }
 0x5ae   : > { %v11284_v18 = vld [vmem:[#allocation7 + $0x1c0] sm:$0xff] }
 0x5af   : > { %v3574_v63 = vpop.f32.mrf.mxu3 }
 0x5b0   : > { %v11287_v63 = vld [vmem:[#allocation7 + $0x1d8] sm:$0xff] }
 0x5b1   : > { %3937 = vmatpush.bf16.msra.mxu1 %v11258_v19  ;;  %4092 = vmatpush.bf16.msra.mxu3 %v11275_v49  ;;  %v11271_v19 = vld [vmem:[#allocation7 + $0x158] sm:$0xff] }
 0x5b5   : > { %3938 = vmatpush.bf16.msra.mxu1 %v11257_v23  ;;  %4093 = vmatpush.bf16.msra.mxu3 %v11274_v15  ;;  %v11270_v23 = vld [vmem:[#allocation7 + $0x150] sm:$0xff] }
 0x5b9   : > { %3939 = vmatpush.bf16.msra.mxu1 %v11256_v22  ;;  %4094 = vmatpush.bf16.msra.mxu3 %v11273_v2  ;;  %v11286_v22 = vld [vmem:[#allocation7 + $0x1d0] sm:$0xff] }
 0x5ba   : > { %4087 = vmatmul.bf16.vlgmr.msra.gmra.mxu2 %v13575_v43  ;;  %4243 = vmatmul.bf16.vlgmr.msrb.gmra.mxu0 %v13575_v43 }
 0x5bd   : > { %3940 = vmatpush.bf16.msra.mxu1 %v11255_v42  ;;  %4095 = vmatpush.bf16.msra.mxu3 %v11272_v40  ;;  %v11269_v42 = vld [vmem:[#allocation7 + $0x148] sm:$0xff] }
 0x5c1   : > { %3941 = vmatpush.bf16.msra.mxu1 %v11254_v32  ;;  %4096 = vmatpush.bf16.msra.mxu3 %v11271_v19  ;;  %v11285_v32 = vld [vmem:[#allocation7 + $0x1c8] sm:$0xff] }
 0x5c5   : > { %3942 = vmatpush.bf16.msra.mxu1 %v11253_v48  ;;  %4097 = vmatpush.bf16.msra.mxu3 %v11270_v23  ;;  %v11268_v48 = vld [vmem:[#allocation7 + $0x140] sm:$0xff] }
 0x5c9   : > { %3943 = vmatpush.bf16.msra.mxu1 %v11252_v55  ;;  %4098 = vmatpush.bf16.msra.mxu3 %v11269_v42  ;;  %v1840_v55 = vadd.f32 %v13052_v10, %v1541_v39  ;;  %v13607_v42 = vld [vmem:[#allocation9 + $0x30] sm:$0xff]  ;;  %v13613_v39 = vld [vmem:[#allocation9 + $0x28] sm:$0xff] }
 0x5cb   : > { %v2138_v49 = vadd.f32 %v13183_v41, %v1840_v55  ;;  %v11303_v55 = vld [vmem:[#allocation9 + $0x58] sm:$0xff] }
 0x5cd   : > { %4248 = vmatpush.bf16.msrb.mxu1 %v11291_v20  ;;  %4099 = vmatpush.bf16.msra.mxu3 %v11268_v48  ;;  %v2436_v20 = vadd.f32 %v13298_v36, %v2138_v49  ;;  %v13617_v48 = vld [vmem:[#allocation9] sm:$0xff] }
 0x5cf   : > { %v2734_v15 = vadd.f32 %v13413_v51, %v2436_v20  ;;  %v11302_v20 = vld [vmem:[#allocation9 + $0x50] sm:$0xff] }
 0x5d1   : > { %4249 = vmatpush.bf16.msrb.mxu1 %v11290_v54  ;;  %v3032_v2 = vadd.f32 %v13528_v11, %v2734_v15  ;;  %v11301_v15 = vld [vmem:[#allocation9 + $0x48] sm:$0xff] }
 0x5d5   : > { %4250 = vmatpush.bf16.msrb.mxu1 %v11289_v27  ;;  %v3330_v27 = vadd.f32 %v13572_v35, %v3032_v2  ;;  %v13599_v35 = vld [vmem:[#allocation9 + $0x18] sm:$0xff] }
 0x5d6   : > { %4305 = vmatpush.bf16.msrb.mxu2 %v13599_v35 }
 0x5d9   : > { %4251 = vmatpush.bf16.msrb.mxu1 %v11288_v1 }
 0x5dd   : > { %4252 = vmatpush.bf16.msrb.mxu1 %v11287_v63 }
 0x5e1   : > { %4253 = vmatpush.bf16.msrb.mxu1 %v11286_v22  ;;  %v13605_v22 = vld [vmem:[#allocation9 + $0x10] sm:$0xff] }
 0x5e2   : > { %4306 = vmatpush.bf16.msrb.mxu2 %v13605_v22 }
 0x5e5   : > { %4254 = vmatpush.bf16.msrb.mxu1 %v11285_v32  ;;  %v13611_v32 = vld [vmem:[#allocation9 + $0x8] sm:$0xff] }
 0x5e6   : > { %4307 = vmatpush.bf16.msrb.mxu2 %v13611_v32 }
 0x5e9   : > { %4255 = vmatpush.bf16.msrb.mxu1 %v11284_v18  ;;  %v13619_v18 = vld [vmem:[#allocation9 + $0x20] sm:$0xff] }
 0x5ea   : > { %4308 = vmatpush.bf16.msrb.mxu2 %v13617_v48 }
 0x5ee   : > { %4461 = vmatpush.bf16.msra.mxu2 %v11303_v55  ;;  %v11311_v55 = vld [vmem:[#allocation9 + $0x98] sm:$0xff] }
 0x5f2   : > { %4462 = vmatpush.bf16.msra.mxu2 %v11302_v20 }
 0x5f6   : > { %4463 = vmatpush.bf16.msra.mxu2 %v11301_v15  ;;  %v11324_v15 = vld [vmem:[#allocation9 + $0x100] sm:$0xff] }
 0x627   : > { %v3932_v54 = vpop.f32.mrf.mxu0 }
 0x629   : > { %v3624_v40 = vpop.f32.mrf.mxu1 }
 0x62a   : > { %v3628_v1 = vadd.f32 %v3624_v40, %v3330_v27  ;;  %v11300_v40 = vld [vmem:[#allocation9 + $0x40] sm:$0xff] }
 0x62b   : > { %4464 = vmatpush.bf16.msra.mxu2 %v11300_v40  ;;  %v11307_v40 = vld [vmem:[#allocation9 + $0x78] sm:$0xff] }
 0x62c   : > { %v3635_v28 = vadd.f32 %v13570_v4, %v3628_v1  ;;  %v13601_v4 = vld [vmem:[#allocation9 + $0x38] sm:$0xff] }
 0x62d   : > { %v3777_v13 = vpop.f32.mrf.mxu2 }
 0x62e   : > { %v3637_v10 = vmax.f32 %v3635_v28, 0.0 }
 0x62f   : > { %v3934_v19 = vpop.f32.mrf.mxu0 }
 0x630   : > { %v13593_v63 = vpack.c.bf16 %v3637_v10, %v3637_v10 }
 0x632   : > { %15570 = vst [vmem:[#allocation315_spill] sm:$0xff] %v13593_v63  ;;  %3789 = vmatmul.bf16.vlgmr.msrb.gmra.mxu3 %v13593_v63  ;;  %3944 = vmatmul.bf16.vlgmr.msra.gmra.mxu1 %v13593_v63 }
 0x633   : > { %4353 = vmatpush.bf16.msrb.mxu3 %v13601_v4 }
 0x635   : > { %v3779_v41 = vpop.f32.mrf.mxu2 }
 0x637   : > { %v4244_v36 = vpop.f32.mrf.mxu0  ;;  %4354 = vmatpush.bf16.msrb.mxu3 %v13607_v42 }
 0x63b   : > { %4355 = vmatpush.bf16.msrb.mxu3 %v13613_v39 }
 0x63d   : > { %v4088_v51 = vpop.f32.mrf.mxu2 }
 0x63f   : > { %v4246_v23 = vpop.f32.mrf.mxu0  ;;  %4356 = vmatpush.bf16.msrb.mxu3 %v13619_v18 }
 0x642   : > { %4100 = vmatmul.bf16.vlgmr.msra.gmra.mxu3 %v13593_v63  ;;  %4256 = vmatmul.bf16.vlgmr.msrb.gmra.mxu1 %v13593_v63 }
 0x645   : > { %v4090_v11 = vpop.f32.mrf.mxu2 }
 0x6af   : > { %v3945_v49 = vpop.f32.mrf.mxu1 }
 0x6b0   : > { %v3946_v10 = vadd.f32 %v3945_v49, %v3932_v54  ;;  %v11310_v54 = vld [vmem:[#allocation9 + $0x90] sm:$0xff]  ;;  %v11325_v49 = vld [vmem:[#allocation9 + $0x108] sm:$0xff] }
 0x6b5   : > { %v3790_v2 = vpop.f32.mrf.mxu3 }
 0x6b6   : > { %v3791_v19 = vadd.f32 %v3790_v2, %v3777_v13  ;;  %v11309_v13 = vld [vmem:[#allocation9 + $0x88] sm:$0xff]  ;;  %v4363_v2 = vld [vmem:[#allocation10 + $0x10] sm:$0xff] }
 0x6b7   : > { %v3947_v27 = vpop.f32.mrf.mxu1 }
 0x6b8   : > { %v3949_v23 = vmax.f32 %v3791_v19, %v3946_v10  ;;  %v4314_v27 = vld [vmem:[#allocation10] sm:$0xff]  ;;  %v13639_v19 = vld [vmem:[#allocation9 + $0x70] sm:$0xff]  ;;  %v4364_v10 = vld [vmem:[#allocation10 + $0x18] sm:$0xff] }
 0x6bd   : > { %v3792_v1 = vpop.f32.mrf.mxu3 }
 0x6bf   : > { %v4257_v28 = vpop.f32.mrf.mxu1 }
 0x6c0   : > { %v4258_v63 = vadd.f32 %v4257_v28, %v4244_v36  ;;  %v11319_v36 = vld [vmem:[#allocation9 + $0xd8] sm:$0xff] }
 0x6c5   : > { %v4101_v41 = vpop.f32.mrf.mxu3 }
 0x6c6   : > { %v4102_v11 = vadd.f32 %v4101_v41, %v4088_v51  ;;  %v11326_v51 = vld [vmem:[#allocation9 + $0x110] sm:$0xff]  ;;  %v4315_v41 = vld [vmem:[#allocation10 + $0x8] sm:$0xff] }
 0x6c7   : > { %v4259_v61 = vpop.f32.mrf.mxu1 }
 0x6c8   : > { %v4105_v43 = vmax.f32 %v3949_v23, %v4102_v11  ;;  %v11308_v61 = vld [vmem:[#allocation9 + $0x80] sm:$0xff]  ;;  %v13642_v23 = vld [vmem:[#allocation9 + $0x68] sm:$0xff] }
 0x6ca   : > { %v4261_v26 = vmax.f32 %v4105_v43, %v4258_v63  ;;  %v11316_v43 = vld [vmem:[#allocation9 + $0xc0] sm:$0xff]  ;;  %v11327_v63 = vld [vmem:[#allocation9 + $0x118] sm:$0xff] }
 0x6cc   : > { %v13623_v20 = vpack.c.bf16 %v4261_v26, %v4261_v26  ;;  %v11318_v26 = vld [vmem:[#allocation9 + $0xd0] sm:$0xff] }
 0x6cd   : > { %v4103_v0 = vpop.f32.mrf.mxu3 }
 0x6ce   : > { %10493 = vmatmul.msk.bf16.vlgmr.msrb.gmra.mxu2 %vm4297_vm2, %v13623_v20  ;;  %10510 = vmatmul.msk.bf16.vlgmr.msrb.gmra.mxu3 %vm4297_vm2, %v13623_v20  ;;  %v11317_v0 = vld [vmem:[#allocation9 + $0xc8] sm:$0xff] }
 0x6cf   : > { %4621 = vmatpush.bf16.msrb.mxu2 %v11311_v55 }
 0x6d3   : > { %4622 = vmatpush.bf16.msrb.mxu2 %v11310_v54  ;;  %v13647_v54 = vld [vmem:[#allocation9 + $0x60] sm:$0xff] }
 0x6d7   : > { %4623 = vmatpush.bf16.msrb.mxu2 %v11309_v13  ;;  %v11315_v13 = vld [vmem:[#allocation9 + $0xb8] sm:$0xff] }
 0x6db   : > { %4624 = vmatpush.bf16.msrb.mxu2 %v11308_v61  ;;  %v4471_v61 = vld [vmem:[#allocation10 + $0x20] sm:$0xff] }
 0x6de   : > { %10531 = vmatmul.msk.bf16.vlgmr.msra.gmra.mxu2 %vm4297_vm2, %v13623_v20 }
 0x6df   : > { %4781 = vmatpush.bf16.msra.mxu2 %v11319_v36 }
 0x6e3   : > { %4782 = vmatpush.bf16.msra.mxu2 %v11318_v26  ;;  %v11314_v26 = vld [vmem:[#allocation9 + $0xb0] sm:$0xff] }
 0x6e7   : > { %4783 = vmatpush.bf16.msra.mxu2 %v11317_v0  ;;  %v11313_v0 = vld [vmem:[#allocation9 + $0xa8] sm:$0xff] }
 0x6eb   : > { %4784 = vmatpush.bf16.msra.mxu2 %v11316_v43  ;;  %v4472_v43 = vld [vmem:[#allocation10 + $0x28] sm:$0xff] }
 0x6ee   : > { %10569 = vmatmul.msk.bf16.vlgmr.msrb.gmra.mxu2 %vm4297_vm2, %v13623_v20 }
 0x6ef   : > { %4941 = vmatpush.bf16.msrb.mxu2 %v11327_v63 }
 0x6f3   : > { %4942 = vmatpush.bf16.msrb.mxu2 %v11326_v51  ;;  %v11312_v51 = vld [vmem:[#allocation9 + $0xa0] sm:$0xff] }
 0x6f7   : > { %4943 = vmatpush.bf16.msrb.mxu2 %v11325_v49  ;;  %v11323_v49 = vld [vmem:[#allocation9 + $0xf8] sm:$0xff] }
 0x6fb   : > { %4944 = vmatpush.bf16.msrb.mxu2 %v11324_v15  ;;  %v11322_v15 = vld [vmem:[#allocation9 + $0xf0] sm:$0xff] }
 0x6fe   : > { %10607 = vmatmul.msk.bf16.vlgmr.msra.gmra.mxu2 %vm4297_vm2, %v13623_v20 }
 0x70e   : > { %10645 = vmatmul.msk.bf16.vlgmr.msrb.gmra.mxu2 %vm4297_vm2, %v13623_v20 }
 0x751   : > { %v4310_v1 = vpop.f32.mrf.mxu2  ;;  %v4358_v28 = vpop.f32.mrf.mxu3 }
 0x752   : > { %4387 = vmatpush.msra.mxu0 %v4358_v28  ;;  %4416 = vmatpush.msra.mxu1 %v4310_v1  ;;  %v11320_v1 = vld [vmem:[#allocation9 + $0xe0] sm:$0xff] }
 0x753   : > { %10511 = vmatmul.msk.f32.vlgmr.msra.gmra.mxu0 %vm4365_vm3, %v4363_v2  ;;  %10513 = vmatmul.msk.f32.vlgmr.msra.gmra.mxu1 %vm4365_vm3, %v4314_v27  ;;  %v4631_v27 = vld [vmem:[#allocation10 + $0x40] sm:$0xff] }
 0x754   : > { %4541 = vmatpush.bf16.msrb.mxu0 %v11307_v40  ;;  %v11321_v40 = vld [vmem:[#allocation9 + $0xe8] sm:$0xff] }
 0x758   : > { %4542 = vmatpush.bf16.msrb.mxu0 %v13639_v19 }
 0x759   : > { %v4312_v11 = vpop.f32.mrf.mxu2  ;;  %v4360_v55 = vpop.f32.mrf.mxu3 }
 0x75b   : > { %10512 = vmatmul.msk.f32.gmra.mxu0 %vm4365_vm3, %v4364_v10  ;;  %10514 = vmatmul.msk.f32.gmra.mxu1 %vm4365_vm3, %v4315_v41 }
 0x75c   : > { %4543 = vmatpush.bf16.msrb.mxu0 %v13642_v23 }
 0x760   : > { %4544 = vmatpush.bf16.msrb.mxu0 %v13647_v54 }
 0x761   : > { %v4466_v36 = vpop.f32.mrf.mxu2 }
 0x762   : > { %4494 = vmatpush.msra.mxu3 %v4466_v36 }
 0x763   : > { %10532 = vmatmul.msk.f32.vlgmr.msra.gmra.mxu3 %vm4365_vm3, %v4471_v61  ;;  %10550 = vmatmul.msk.bf16.vlgmr.msrb.gmra.mxu0 %vm4297_vm2, %v13623_v20  ;;  %v4791_v61 = vld [vmem:[#allocation10 + $0x60] sm:$0xff] }
 0x764   : > { %4701 = vmatpush.bf16.msra.mxu0 %v11315_v13  ;;  %v4632_v13 = vld [vmem:[#allocation10 + $0x48] sm:$0xff] }
 0x768   : > { %4702 = vmatpush.bf16.msra.mxu0 %v11314_v26  ;;  %v4792_v26 = vld [vmem:[#allocation10 + $0x68] sm:$0xff] }
 0x769   : > { %v4468_v63 = vpop.f32.mrf.mxu2 }
 0x76b   : > { %10533 = vmatmul.msk.f32.gmra.mxu3 %vm4365_vm3, %v4472_v43  ;;  %v4951_v43 = vld [vmem:[#allocation10 + $0x80] sm:$0xff] }
 0x76c   : > { %4703 = vmatpush.bf16.msra.mxu0 %v11313_v0 }
 0x770   : > { %4704 = vmatpush.bf16.msra.mxu0 %v11312_v51  ;;  %v4952_v51 = vld [vmem:[#allocation10 + $0x88] sm:$0xff] }
 0x771   : > { %v4626_v2 = vpop.f32.mrf.mxu2 }
 0x772   : > { %4654 = vmatpush.msrb.mxu3 %v4626_v2  ;;  %v4263_v2 = vld [vmem:[#allocation12 + $0x8] sm:$0xff] }
 0x773   : > { %10588 = vmatmul.msk.bf16.vlgmr.msra.gmra.mxu0 %vm4297_vm2, %v13623_v20  ;;  %10570 = vmatmul.msk.f32.vlgmr.msrb.gmra.mxu3 %vm4365_vm3, %v4631_v27  ;;  %v5195_v27 = vld [vmem:[#allocation18] sm:$0xff] }
 0x774   : > { %4861 = vmatpush.bf16.msrb.mxu0 %v11323_v49  ;;  %v4552_v49 = vld [vmem:[#allocation10 + $0x38] sm:$0xff]  ;;  %4991 = vperm.xlu1 %11567, %v4263_v2  }
 0x775   : > { %v11331_v2 = vld [vmem:[#allocation13 + $0x18] sm:$0xff] }
 0x778   : > { %4862 = vmatpush.bf16.msrb.mxu0 %v11322_v15 }
 0x779   : > { %v4628_v28 = vpop.f32.mrf.mxu2 }
 0x77a   : > { %v5914_v28 = vld [vmem:[#allocation24] sm:$0xff] }
 0x77b   : > { %10571 = vmatmul.msk.f32.gmra.mxu3 %vm4365_vm3, %v4632_v13  ;;  %v4872_v13 = vld [vmem:[#allocation10 + $0x78] sm:$0xff] }
 0x77c   : > { %4863 = vmatpush.bf16.msrb.mxu0 %v11321_v40  ;;  %v4711_v40 = vld [vmem:[#allocation10 + $0x50] sm:$0xff]  ;;  %5853 = vperm.xlu1 %11567, %v5195_v27   ;;  %v11335_v27 = vld [vmem:[#allocation13 + $0x38] sm:$0xff] }
 0x780   : > { %4864 = vmatpush.bf16.msrb.mxu0 %v11320_v1 }
 0x781   : > { %v4786_v10 = vpop.f32.mrf.mxu2 }
 0x782   : > { %4814 = vmatpush.msra.mxu3 %v4786_v10  ;;  %v4712_v10 = vld [vmem:[#allocation10 + $0x58] sm:$0xff] }
 0x783   : > { %10626 = vmatmul.msk.bf16.vlgmr.msrb.gmra.mxu0 %vm4297_vm2, %v13623_v20  ;;  %10608 = vmatmul.msk.f32.vlgmr.msra.gmra.mxu3 %vm4365_vm3, %v4791_v61  ;;  %v4551_v20 = vld [vmem:[#allocation10 + $0x30] sm:$0xff] }
 0x784   : > { %6830 = vperm.xlu1 %11567, %v5914_v28   ;;  %5038 = vmatpush.bf16.msra.mxu0 %v11331_v2  ;;  %v11330_v28 = vld [vmem:[#allocation13 + $0x10] sm:$0xff]  ;;  %v11328_v2 = vld [vmem:[#allocation13] sm:$0xff] }
 0x788   : > { %5039 = vmatpush.bf16.msra.mxu0 %v11330_v28 }
 0x789   : > { %v4788_v41 = vpop.f32.mrf.mxu2 }
 0x78b   : > { %10609 = vmatmul.msk.f32.gmra.mxu3 %vm4365_vm3, %v4792_v26 }
 0x791   : > { %v4946_v11 = vpop.f32.mrf.mxu2 }
 0x792   : > { %4974 = vmatpush.msrb.mxu3 %v4946_v11  ;;  %v4871_v11 = vld [vmem:[#allocation10 + $0x70] sm:$0xff] }
 0x793   : > { %10646 = vmatmul.msk.f32.vlgmr.msrb.gmra.mxu3 %vm4365_vm3, %v4951_v43 }
 0x799   : > { %v4948_v55 = vpop.f32.mrf.mxu2 }
 0x79b   : > { %10647 = vmatmul.msk.f32.gmra.mxu3 %vm4365_vm3, %v4952_v51 }
 0x7d0   : > { %v13661_v36 = vpop.f32.mrf.mxu0  ;;  %v4418_v43 = vpop.f32.mrf.mxu1 }
 0x7d1   : > { %v4419_v28 = vadd.f32 %v4418_v43, %v13661_v36 }
 0x7d8   : > { %v13664_v0 = vpop.f32.mrf.mxu0  ;;  %v4421_v51 = vpop.f32.mrf.mxu1 }
 0x7e0   : > { %v4546_v63 = vpop.f32.mrf.mxu0 }
 0x7e1   : > { %4574 = vmatpush.msrb.mxu1 %v4546_v63 }
 0x7e2   : > { %10551 = vmatmul.msk.f32.vlgmr.msrb.gmra.mxu1 %vm4365_vm3, %v4551_v20 }
 0x7e6   : > { %v4496_v26 = vpop.f32.mrf.mxu3 }
 0x7e8   : > { %v4548_v15 = vpop.f32.mrf.mxu0 }
 0x7ea   : > { %10552 = vmatmul.msk.f32.gmra.mxu1 %vm4365_vm3, %v4552_v49 }
 0x7ee   : > { %v4499_v20 = vpop.f32.mrf.mxu3 }
 0x7f0   : > { %v4706_v1 = vpop.f32.mrf.mxu0 }
 0x7f1   : > { %4734 = vmatpush.msra.mxu1 %v4706_v1  ;;  %v11343_v1 = vld [vmem:[#allocation13 + $0x78] sm:$0xff] }
 0x7f2   : > { %10589 = vmatmul.msk.f32.vlgmr.msra.gmra.mxu1 %vm4365_vm3, %v4711_v40  ;;  %v11339_v40 = vld [vmem:[#allocation13 + $0x58] sm:$0xff]  ;;  %5183 = vmatpush.bf16.msra.mxu3 %v11343_v1  ;;  %v11340_v1 = vld [vmem:[#allocation13 + $0x60] sm:$0xff] }
 0x7f3   : > { %5134 = vmatpush.bf16.msra.mxu2 %v11339_v40  ;;  %v11336_v40 = vld [vmem:[#allocation13 + $0x40] sm:$0xff] }
 0x7f6   : > { %v4656_v63 = vpop.f32.mrf.mxu3 }
 0x7f8   : > { %v4708_v41 = vpop.f32.mrf.mxu0 }
 0x7f9   : > { %v11338_v41 = vld [vmem:[#allocation13 + $0x50] sm:$0xff] }
 0x7fa   : > { %10590 = vmatmul.msk.f32.gmra.mxu1 %vm4365_vm3, %v4712_v10  ;;  %v11334_v10 = vld [vmem:[#allocation13 + $0x30] sm:$0xff]  ;;  %5135 = vmatpush.bf16.msra.mxu2 %v11338_v41  ;;  %v4502_v41 = vadd.f32 %v4496_v26, %v4419_v28  ;;  %v4987_v26 = vpop.permute.xlu0 %4986 }
 0x7fe   : > { %v4659_v15 = vpop.f32.mrf.mxu3  ;;  %5136 = vmatpush.bf16.msra.mxu2 %v11337_v59 }
 0x800   : > { %v4866_v55 = vpop.f32.mrf.mxu0 }
 0x801   : > { %4894 = vmatpush.msrb.mxu1 %v4866_v55 }
 0x802   : > { %10627 = vmatmul.msk.f32.vlgmr.msrb.gmra.mxu1 %vm4365_vm3, %v4871_v11  ;;  %v11342_v11 = vld [vmem:[#allocation13 + $0x70] sm:$0xff]  ;;  %5137 = vmatpush.bf16.msra.mxu2 %v11336_v40 }
 0x803   : > { %5085 = vmatpush.bf16.msra.mxu1 %v11335_v27  ;;  %5184 = vmatpush.bf16.msra.mxu3 %v11342_v11  ;;  %v11332_v27 = vld [vmem:[#allocation13 + $0x20] sm:$0xff] }
 0x807   : > { %5086 = vmatpush.bf16.msra.mxu1 %v11334_v10  ;;  %5185 = vmatpush.bf16.msra.mxu3 %v11341_v53 }
 0x808   : > { %v4868_v61 = vpop.f32.mrf.mxu0 }
 0x809   : > { %v11329_v61 = vld [vmem:[#allocation13 + $0x8] sm:$0xff] }
 0x80a   : > { %10628 = vmatmul.msk.f32.gmra.mxu1 %vm4365_vm3, %v4872_v13  ;;  %v4816_v13 = vpop.f32.mrf.mxu3  ;;  %5040 = vmatpush.bf16.msra.mxu0 %v11329_v61  ;;  %v4422_v61 = vadd.f32 %v4421_v51, %v13664_v0 }
 0x80b   : > { %5087 = vmatpush.bf16.msra.mxu1 %v11333_v60  ;;  %5186 = vmatpush.bf16.msra.mxu3 %v11340_v1 }
 0x80c   : > { %v4503_v60 = vadd.f32 %v4499_v20, %v4422_v61 }
 0x80e   : > { %5041 = vmatpush.bf16.msra.mxu0 %v11328_v2 }
 0x80f   : > { %5088 = vmatpush.bf16.msra.mxu1 %v11332_v27 }
 0x812   : > { %v4819_v10 = vpop.f32.mrf.mxu3 }
 0x81a   : > { %v4976_v9 = vpop.f32.mrf.mxu3 }
 0x822   : > { %v4979_v36 = vpop.f32.mrf.mxu3 }
 0x85f   : > { %v4576_v49 = vpop.f32.mrf.mxu1 }
 0x860   : > { %v4582_v11 = vadd.f32 %v4576_v49, %v4502_v41  ;;  %v4992_v41 = vpop.permute.xlu1 %4991 }
 0x862   : > { %v4662_v59 = vadd.f32 %v4656_v63, %v4582_v11 }
 0x867   : > { %v4579_v55 = vpop.f32.mrf.mxu1 }
 0x868   : > { %v4583_v53 = vadd.f32 %v4579_v55, %v4503_v60  ;;  %v5854_v34 = vpop.permute.xlu1 %5853 }
 0x86a   : > { %v4663_v58 = vadd.f32 %v4659_v15, %v4583_v53 }
 0x86f   : > { %v4736_v37 = vpop.f32.mrf.mxu1 }
 0x870   : > { %v4742_v14 = vadd.f32 %v4736_v37, %v4662_v59 }
 0x872   : > { %v4822_v50 = vadd.f32 %v4816_v13, %v4742_v14 }
 0x877   : > { %v4739_v31 = vpop.f32.mrf.mxu1 }
 0x878   : > { %v4743_v2 = vadd.f32 %v4739_v31, %v4663_v58  ;;  %v11346_v58 = vld [vmem:[#allocation15 + $0x10] sm:$0xff] }
 0x87a   : > { %v4823_v40 = vadd.f32 %v4819_v10, %v4743_v2  ;;  %v11347_v2 = vld [vmem:[#allocation15 + $0x18] sm:$0xff] }
 0x87f   : > { %v4896_v62 = vpop.f32.mrf.mxu1 }
 0x880   : > { %v4902_v27 = vadd.f32 %v4896_v62, %v4822_v50  ;;  %v11345_v50 = vld [vmem:[#allocation15 + $0x8] sm:$0xff] }
 0x881   : > { %5246 = vmatpush.bf16.msrb.mxu1 %v11345_v50  ;;  %v5228_v50 = vld [vmem:[#allocation16 + $0x10] sm:$0xff] }
 0x882   : > { %v4982_v1 = vadd.f32 %v4976_v9, %v4902_v27 }
 0x884   : > { %v4994_v49 = vadd.f32 %v4987_v26, %v4982_v1  ;;  %v5254_v26 = vld [vmem:[#allocation16 + $0x20] sm:$0xff] }
 0x886   : > { %v4996_v20 = vmax.f32 %v4994_v49, 0.0  ;;  %v5226_v49 = vld [vmem:[#allocation16] sm:$0xff] }
 0x887   : > { %v4899_v46 = vpop.f32.mrf.mxu1 }
 0x888   : > { %v4903_v43 = vadd.f32 %v4899_v46, %v4823_v40  ;;  %v11344_v46 = vld [vmem:[#allocation15] sm:$0xff] }
 0x889   : > { %5219 = vmatpush.bf16.msrb.mxu0 %v11344_v46  ;;  %v5256_v46 = vld [vmem:[#allocation16 + $0x30] sm:$0xff] }
 0x88a   : > { %v4983_v28 = vadd.f32 %v4979_v36, %v4903_v43 }
 0x88c   : > { %v4995_v0 = vadd.f32 %v4992_v41, %v4983_v28  ;;  %v11348_v28 = vld [vmem:[#allocation15 + $0x20] sm:$0xff] }
 0x88e   : > { %v4997_v63 = vmax.f32 %v4995_v0, 0.0  ;;  %v5255_v0 = vld [vmem:[#allocation16 + $0x28] sm:$0xff] }
 0x890   : > { %v13676_v51 = vpack.c.bf16 %v4997_v63, %v4996_v20  ;;  %v5227_v20 = vld [vmem:[#allocation16 + $0x8] sm:$0xff] }
 0x892   : > { %10664 = vmatmul.msk.bf16.vlgmr.msra.gmra.mxu0 %vm4297_vm2, %v13676_v51  ;;  %10681 = vmatmul.msk.bf16.vlgmr.msra.gmra.mxu1 %vm4297_vm2, %v13676_v51 }
 0x893   : > { %10698 = vmatmul.msk.bf16.vlgmr.msra.gmra.mxu2 %vm4297_vm2, %v13676_v51  ;;  %10715 = vmatmul.msk.bf16.vlgmr.msra.gmra.mxu3 %vm4297_vm2, %v13676_v51 }
 0x894   : > { %5356 = vmatpush.bf16.msra.mxu0 %v11346_v58  ;;  %v5364_v58 = vld [vmem:[#allocation16 + $0x40] sm:$0xff] }
 0x90f   : > { %v5043_v62 = vpop.f32.mrf.mxu0  ;;  %v5090_v9 = vpop.f32.mrf.mxu1 }
 0x910   : > { %v5095_v55 = vmax.f32 %v5043_v62, %v5090_v9  ;;  %v11349_v62 = vld [vmem:[#allocation15 + $0x28] sm:$0xff] }
 0x916   : > { %v5139_v14 = vpop.f32.mrf.mxu2  ;;  %v5188_v31 = vpop.f32.mrf.mxu3 }
 0x917   : > { %v5045_v37 = vpop.f32.mrf.mxu0  ;;  %v5092_v15 = vpop.f32.mrf.mxu1  ;;  %v5144_v13 = vmax.f32 %v5095_v55, %v5139_v14  ;;  %v5257_v14 = vld [vmem:[#allocation16 + $0x38] sm:$0xff] }
 0x918   : > { %v5096_v10 = vmax.f32 %v5045_v37, %v5092_v15  ;;  %v5365_v37 = vld [vmem:[#allocation16 + $0x48] sm:$0xff] }
 0x919   : > { %v5193_v59 = vmax.f32 %v5144_v13, %v5188_v31  ;;  %v5229_v31 = vld [vmem:[#allocation16 + $0x18] sm:$0xff]  ;;  %v11350_v15 = vld [vmem:[#allocation15 + $0x30] sm:$0xff]  ;;  %v5437_v13 = vld [vmem:[#allocation16 + $0x60] sm:$0xff] }
 0x91e   : > { %v5141_v11 = vpop.f32.mrf.mxu2  ;;  %v5190_v60 = vpop.f32.mrf.mxu3 }
 0x91f   : > { %v5145_v61 = vmax.f32 %v5096_v10, %v5141_v11  ;;  %v5366_v10 = vld [vmem:[#allocation16 + $0x50] sm:$0xff]  ;;  %v5438_v11 = vld [vmem:[#allocation16 + $0x68] sm:$0xff] }
 0x921   : > { %v5194_v53 = vmax.f32 %v5145_v61, %v5190_v60  ;;  %v5367_v61 = vld [vmem:[#allocation16 + $0x58] sm:$0xff]  ;;  %v5439_v60 = vld [vmem:[#allocation16 + $0x70] sm:$0xff] }
 0x923   : > { %v13686_v27 = vpack.c.bf16 %v5194_v53, %v5193_v59  ;;  %v5440_v59 = vld [vmem:[#allocation16 + $0x78] sm:$0xff] }
 0x925   : > { %10720 = vmatmul.msk.bf16.vlgmr.msrb.gmra.mxu0 %vm5208_vm4, %v13686_v27  ;;  %10725 = vmatmul.msk.bf16.vlgmr.msrb.gmra.mxu1 %vm5208_vm4, %v13686_v27 }
 0x926   : > { %5429 = vmatpush.bf16.msrb.mxu0 %v11347_v2 }
 0x935   : > { %10738 = vmatmul.msk.bf16.vlgmr.msra.gmra.mxu0 %vm5208_vm4, %v13686_v27 }
 0x945   : > { %10747 = vmatmul.msk.bf16.vlgmr.msrb.gmra.mxu0 %vm5208_vm4, %v13686_v27 }
 0x9a2   : > { %v5221_v40 = vpop.f32.mrf.mxu0  ;;  %v5248_v1 = vpop.f32.mrf.mxu1 }
 0x9aa   : > { %v5223_v36 = vpop.f32.mrf.mxu0  ;;  %v5250_v43 = vpop.f32.mrf.mxu1 }
 0x9ab   : > { %5284 = vmatpush.msrb.mxu2 %v5250_v43  ;;  %5325 = vmatpush.msrb.mxu3 %v5223_v36 }
 0x9ad   : > { %5285 = vmatpush.msrb.mxu2 %v5248_v1  ;;  %5326 = vmatpush.msrb.mxu3 %v5221_v40 }
 0x9ae   : > { %10726 = vmatmul.msk.f32.vlgmr.msrb.gmra.mxu2 %vm5208_vm4, %v5254_v26  ;;  %10730 = vmatmul.msk.f32.vlgmr.msrb.gmra.mxu3 %vm5208_vm4, %v5226_v49 }
 0x9af   : > { %5502 = vmatpush.bf16.msra.mxu3 %v11348_v28 }
 0x9b2   : > { %v5358_v41 = vpop.f32.mrf.mxu0 }
 0x9b6   : > { %10727 = vmatmul.msk.f32.gmra.mxu2 %vm5208_vm4, %v5255_v0  ;;  %10731 = vmatmul.msk.f32.gmra.mxu3 %vm5208_vm4, %v5227_v20 }
 0x9ba   : > { %v5360_v63 = vpop.f32.mrf.mxu0 }
 0x9bb   : > { %5394 = vmatpush.msra.mxu1 %v5360_v63 }
 0x9bd   : > { %5395 = vmatpush.msra.mxu1 %v5358_v41 }
 0x9be   : > { %10728 = vmatmul.msk.f32.gmra.mxu2 %vm5208_vm4, %v5256_v46  ;;  %10732 = vmatmul.msk.f32.gmra.mxu3 %vm5208_vm4, %v5228_v50  ;;  %v5510_v46 = vld [vmem:[#allocation16 + $0x80] sm:$0xff]  ;;  %v11351_v50 = vld [vmem:[#allocation15 + $0x38] sm:$0xff] }
 0x9bf   : > { %10739 = vmatmul.msk.f32.vlgmr.msra.gmra.mxu1 %vm5208_vm4, %v5364_v58 }
 0x9c0   : > { %5575 = vmatpush.bf16.msrb.mxu1 %v11349_v62  ;;  %v5511_v62 = vld [vmem:[#allocation16 + $0x88] sm:$0xff] }
 0x9c2   : > { %v5431_v9 = vpop.f32.mrf.mxu0 }
 0x9c4   : > { %5648 = vmatpush.bf16.msra.mxu1 %v11350_v15 }
 0x9c6   : > { %10729 = vmatmul.msk.f32.gmra.mxu2 %vm5208_vm4, %v5257_v14  ;;  %10733 = vmatmul.msk.f32.gmra.mxu3 %vm5208_vm4, %v5229_v31  ;;  %v5583_v14 = vld [vmem:[#allocation16 + $0xa0] sm:$0xff]  ;;  %v11352_v31 = vld [vmem:[#allocation15 + $0x40] sm:$0xff] }
 0x9c7   : > { %10740 = vmatmul.msk.f32.gmra.mxu1 %vm5208_vm4, %v5365_v37  ;;  %v5512_v37 = vld [vmem:[#allocation16 + $0x90] sm:$0xff] }
 0x9ca   : > { %v5433_v55 = vpop.f32.mrf.mxu0 }
 0x9cb   : > { %5467 = vmatpush.msra.mxu2 %v5433_v55  ;;  %v5584_v55 = vld [vmem:[#allocation16 + $0xa8] sm:$0xff] }
 0x9cd   : > { %5468 = vmatpush.msra.mxu2 %v5431_v9 }
 0x9ce   : > { %10748 = vmatmul.msk.f32.vlgmr.msra.gmra.mxu2 %vm5208_vm4, %v5437_v13  ;;  %10756 = vmatmul.msk.bf16.vlgmr.msra.gmra.mxu3 %vm5208_vm4, %v13686_v27  ;;  %v5513_v13 = vld [vmem:[#allocation16 + $0x98] sm:$0xff] }
 0x9cf   : > { %10741 = vmatmul.msk.f32.gmra.mxu1 %vm5208_vm4, %v5366_v10 }
 0x9d6   : > { %10749 = vmatmul.msk.f32.gmra.mxu2 %vm5208_vm4, %v5438_v11  ;;  %v5585_v11 = vld [vmem:[#allocation16 + $0xb0] sm:$0xff] }
 0x9d7   : > { %10742 = vmatmul.msk.f32.gmra.mxu1 %vm5208_vm4, %v5367_v61  ;;  %v5656_v61 = vld [vmem:[#allocation16 + $0xc0] sm:$0xff] }
 0x9de   : > { %10750 = vmatmul.msk.f32.gmra.mxu2 %vm5208_vm4, %v5439_v60  ;;  %v5586_v60 = vld [vmem:[#allocation16 + $0xb8] sm:$0xff] }
 0x9df   : > { %10765 = vmatmul.msk.bf16.vlgmr.msrb.gmra.mxu1 %vm5208_vm4, %v13686_v27 }
 0x9e6   : > { %10751 = vmatmul.msk.f32.gmra.mxu2 %vm5208_vm4, %v5440_v59  ;;  %v5657_v59 = vld [vmem:[#allocation16 + $0xc8] sm:$0xff] }
 0x9ef   : > { %10774 = vmatmul.msk.bf16.vlgmr.msra.gmra.mxu1 %vm5208_vm4, %v13686_v27 }
 0xa31   : > { %v5328_v53 = vpop.f32.mrf.mxu3  ;;  %v5287_v2 = vpop.f32.mrf.mxu2 }
 0xa32   : > { %v5329_v40 = vadd.f32 %v5328_v53, %v5287_v2  ;;  %v5658_v53 = vld [vmem:[#allocation16 + $0xd0] sm:$0xff]  ;;  %v5659_v2 = vld [vmem:[#allocation16 + $0xd8] sm:$0xff] }
 0xa39   : > { %v13718_v1 = vpop.f32.mrf.mxu3 }
 0xa3c   : > { %v5397_v36 = vpop.f32.mrf.mxu1 }
 0xa3d   : > { %v5409_v43 = vadd.f32 %v5397_v36, %v5329_v40  ;;  %v5290_v40 = vpop.f32.mrf.mxu2 }
 0xa41   : > { %v13720_v26 = vpop.f32.mrf.mxu3 }
 0xa44   : > { %v13722_v49 = vpop.f32.mrf.mxu1 }
 0xa45   : > { %v13750_v36 = vpop.f32.mrf.mxu2 }
 0xa49   : > { %v13724_v28 = vpop.f32.mrf.mxu3 }
 0xa4c   : > { %v13726_v41 = vpop.f32.mrf.mxu1 }
 0xa51   : > { %v5504_v0 = vpop.f32.mrf.mxu3 }
 0xa54   : > { %v13728_v20 = vpop.f32.mrf.mxu1 }
 0xa59   : > { %v5506_v63 = vpop.f32.mrf.mxu3 }
 0xa5a   : > { %5540 = vmatpush.msra.mxu0 %v5506_v63  ;;  %v13752_v63 = vpop.f32.mrf.mxu2 }
 0xa5c   : > { %v5577_v58 = vpop.f32.mrf.mxu1  ;;  %5541 = vmatpush.msra.mxu0 %v5504_v0 }
 0xa5d   : > { %10757 = vmatmul.msk.f32.vlgmr.msra.gmra.mxu0 %vm5208_vm4, %v5510_v46 }
 0xa5e   : > { %5721 = vmatpush.bf16.msrb.mxu0 %v11351_v50 }
 0xa62   : > { %v5470_v50 = vpop.f32.mrf.mxu2 }
 0xa64   : > { %v5579_v9 = vpop.f32.mrf.mxu1 }
 0xa65   : > { %5613 = vmatpush.msrb.mxu3 %v5579_v9  ;;  %10758 = vmatmul.msk.f32.gmra.mxu0 %vm5208_vm4, %v5511_v62 }
 0xa67   : > { %5614 = vmatpush.msrb.mxu3 %v5577_v58  ;;  %v5482_v58 = vadd.f32 %v5470_v50, %v5409_v43  ;;  %v5915_v50 = vld [vmem:[#allocation24 + $0x8] sm:$0xff] }
 0xa68   : > { %10766 = vmatmul.msk.f32.vlgmr.msrb.gmra.mxu3 %vm5208_vm4, %v5583_v14 }
 0xa69   : > { %5794 = vmatpush.bf16.msra.mxu3 %v11352_v31 }
 0xa6c   : > { %v5650_v15 = vpop.f32.mrf.mxu1 }
 0xa6d   : > { %5928 = vmatpush.bf16.msrb.mxu3 %v13599_v35  ;;  %10759 = vmatmul.msk.f32.gmra.mxu0 %vm5208_vm4, %v5512_v37 }
 0xa70   : > { %10767 = vmatmul.msk.f32.gmra.mxu3 %vm5208_vm4, %v5584_v55 }
 0xa71   : > { %5929 = vmatpush.bf16.msrb.mxu3 %v13605_v22 }
 0xa74   : > { %v5652_v10 = vpop.f32.mrf.mxu1 }
 0xa75   : > { %5930 = vmatpush.bf16.msrb.mxu3 %v13611_v32  ;;  %5686 = vmatpush.msrb.mxu2 %v5652_v10 }
 0xa76   : > { %10760 = vmatmul.msk.f32.gmra.mxu0 %vm5208_vm4, %v5513_v13 }
 0xa77   : > { %5687 = vmatpush.msrb.mxu2 %v5650_v15 }
 0xa78   : > { %10768 = vmatmul.msk.f32.gmra.mxu3 %vm5208_vm4, %v5585_v11  ;;  %10775 = vmatmul.msk.f32.vlgmr.msrb.gmra.mxu2 %vm5208_vm4, %v5656_v61  ;;  %v5729_v11 = vld [vmem:[#allocation16 + $0xe0] sm:$0xff]  ;;  %v5730_v61 = vld [vmem:[#allocation16 + $0xe8] sm:$0xff] }
 0xa79   : > { %5931 = vmatpush.bf16.msrb.mxu3 %v13617_v48 }
 0xa7e   : > { %10783 = vmatmul.msk.bf16.vlgmr.msrb.gmra.mxu0 %vm5208_vm4, %v13686_v27 }
 0xa80   : > { %10769 = vmatmul.msk.f32.gmra.mxu3 %vm5208_vm4, %v5586_v60  ;;  %10776 = vmatmul.msk.f32.gmra.mxu2 %vm5208_vm4, %v5657_v59  ;;  %v5196_v60 = vld [vmem:[#allocation18 + $0x8] sm:$0xff] }
 0xa81   : > { %5858 = vperm.xlu2 %11568, %v5196_v60  }
 0xa88   : > { %10777 = vmatmul.msk.f32.gmra.mxu2 %vm5208_vm4, %v5658_v53  ;;  %10792 = vmatmul.msk.bf16.vlgmr.msra.gmra.mxu3 %vm5208_vm4, %v13686_v27  ;;  %v5731_v53 = vld [vmem:[#allocation16 + $0xf0] sm:$0xff] }
 0xa90   : > { %10778 = vmatmul.msk.f32.gmra.mxu2 %vm5208_vm4, %v5659_v2  ;;  %v5802_v2 = vld [vmem:[#allocation16 + $0x100] sm:$0xff] }
 0xada   : > { %v5543_v0 = vpop.f32.mrf.mxu0 }
 0xadb   : > { %v5555_v62 = vadd.f32 %v5543_v0, %v5482_v58  ;;  %v5197_v0 = vld [vmem:[#allocation18 + $0x10] sm:$0xff]  ;;  %v5473_v58 = vpop.f32.mrf.mxu2 }
 0xadc   : > { %5863 = vperm.xlu2 %11568, %v5197_v0  }
 0xae2   : > { %v13754_v46 = vpop.f32.mrf.mxu0 }
 0xae4   : > { %6835 = vperm.xlu2 %11568, %v5915_v50  }
 0xaea   : > { %v13756_v9 = vpop.f32.mrf.mxu0 }
 0xaeb   : > { %v5616_v14 = vpop.f32.mrf.mxu3 }
 0xaec   : > { %v5628_v31 = vadd.f32 %v5616_v14, %v5555_v62  ;;  %v5476_v62 = vpop.f32.mrf.mxu2 }
 0xaf3   : > { %v13758_v37 = vpop.f32.mrf.mxu0  ;;  %v5619_v27 = vpop.f32.mrf.mxu3 }
 0xaf4   : > { %v5479_v14 = vpop.f32.mrf.mxu2 }
 0xafb   : > { %v5723_v15 = vpop.f32.mrf.mxu0  ;;  %v13760_v55 = vpop.f32.mrf.mxu3 }
 0xb03   : > { %v5725_v13 = vpop.f32.mrf.mxu0  ;;  %v13762_v10 = vpop.f32.mrf.mxu3 }
 0xb04   : > { %5759 = vmatpush.msrb.mxu1 %v5725_v13 }
 0xb06   : > { %5760 = vmatpush.msrb.mxu1 %v5723_v15  ;;  %v11353_v15 = vld [vmem:[#allocation19] sm:$0xff] }
 0xb07   : > { %10784 = vmatmul.msk.f32.vlgmr.msrb.gmra.mxu1 %vm5208_vm4, %v5729_v11  ;;  %5902 = vmatpush.bf16.msra.mxu2 %v11353_v15  ;;  %v5689_v11 = vpop.f32.mrf.mxu2 }
 0xb08   : > { %5949 = vmatpush.bf16.msra.mxu1 %v13599_v35  ;;  %v5732_v35 = vld [vmem:[#allocation16 + $0xf8] sm:$0xff] }
 0xb0b   : > { %v5796_v43 = vpop.f32.mrf.mxu3  ;;  %6024 = vmatpush.bf16.msrb.mxu2 %v13601_v4 }
 0xb0c   : > { %5950 = vmatpush.bf16.msra.mxu1 %v13605_v22  ;;  %v5803_v22 = vld [vmem:[#allocation16 + $0x108] sm:$0xff] }
 0xb0f   : > { %10785 = vmatmul.msk.f32.gmra.mxu1 %vm5208_vm4, %v5730_v61  ;;  %6025 = vmatpush.bf16.msrb.mxu2 %v13607_v42  ;;  %v5332_v61 = vadd.f32 %v13718_v1, %v5290_v40 }
 0xb10   : > { %5951 = vmatpush.bf16.msra.mxu1 %v13611_v32  ;;  %v5804_v32 = vld [vmem:[#allocation16 + $0x110] sm:$0xff] }
 0xb11   : > { %v5410_v60 = vadd.f32 %v13722_v49, %v5332_v61  ;;  %v5338_v49 = vadd.f32 %v13724_v28, %v13752_v63 }
 0xb13   : > { %v5798_v59 = vpop.f32.mrf.mxu3  ;;  %6026 = vmatpush.bf16.msrb.mxu2 %v13613_v39 }
 0xb14   : > { %5952 = vmatpush.bf16.msra.mxu1 %v13617_v48  ;;  %5832 = vmatpush.msra.mxu0 %v5798_v59  ;;  %v5805_v48 = vld [vmem:[#allocation16 + $0x118] sm:$0xff]  ;;  %v5692_v59 = vpop.f32.mrf.mxu2 }
 0xb16   : > { %5833 = vmatpush.msra.mxu0 %v5796_v43 }
 0xb17   : > { %10786 = vmatmul.msk.f32.gmra.mxu1 %vm5208_vm4, %v5731_v53  ;;  %10793 = vmatmul.msk.f32.vlgmr.msra.gmra.mxu0 %vm5208_vm4, %v5802_v2  ;;  %v5483_v53 = vadd.f32 %v5473_v58, %v5410_v60 }
 0xb18   : > { %6027 = vmatpush.bf16.msrb.mxu2 %v13619_v18 }
 0xb1c   : > { %v5695_v25 = vpop.f32.mrf.mxu2 }
 0xb1f   : > { %10787 = vmatmul.msk.f32.gmra.mxu1 %vm5208_vm4, %v5732_v35  ;;  %10794 = vmatmul.msk.f32.gmra.mxu0 %vm5208_vm4, %v5803_v22  ;;  %v5556_v35 = vadd.f32 %v13754_v46, %v5483_v53  ;;  %v5701_v22 = vadd.f32 %v5689_v11, %v5628_v31  ;;  %v5859_v31 = vpop.permute.xlu2 %5858  ;;  %v5412_v11 = vadd.f32 %v13728_v20, %v5338_v49 }
 0xb21   : > { %v5629_v50 = vadd.f32 %v5619_v27, %v5556_v35 }
 0xb23   : > { %v5702_v15 = vadd.f32 %v5692_v59, %v5629_v50 }
 0xb27   : > { %10805 = vmatmul.msk.bf16.vlgmr.msra.gmra.mxu1 %vm4297_vm2, %v13676_v51  ;;  %10795 = vmatmul.msk.f32.gmra.mxu0 %vm5208_vm4, %v5804_v32 }
 0xb2f   : > { %10796 = vmatmul.msk.f32.gmra.mxu0 %vm5208_vm4, %v5805_v48  ;;  %v5335_v48 = vadd.f32 %v13720_v26, %v13750_v36 }
 0xb31   : > { %v5411_v58 = vadd.f32 %v13726_v41, %v5335_v48  ;;  %v5869_v48 = vpop.permute.xlu0 %5868 }
 0xb33   : > { %v5484_v27 = vadd.f32 %v5476_v62, %v5411_v58 }
 0xb35   : > { %v5557_v26 = vadd.f32 %v13756_v9, %v5484_v27 }
 0xb37   : > { %v5630_v59 = vadd.f32 %v13760_v55, %v5557_v26  ;;  %v5959_v55 = vld [vmem:[#allocation22] sm:$0xff] }
 0xb39   : > { %v5703_v41 = vadd.f32 %v5695_v25, %v5630_v59  ;;  %v6040_v59 = vld [vmem:[#allocation21 + $0x10] sm:$0xff] }
 0xb84   : > { %v5762_v13 = vpop.f32.mrf.mxu1 }
 0xb85   : > { %v5774_v32 = vadd.f32 %v5762_v13, %v5701_v22  ;;  %v5864_v22 = vpop.permute.xlu2 %5863 }
 0xb8c   : > { %v5765_v43 = vpop.f32.mrf.mxu1 }
 0xb8d   : > { %v5775_v1 = vadd.f32 %v5765_v43, %v5702_v15  ;;  %v5485_v43 = vadd.f32 %v5479_v14, %v5412_v11  ;;  %v5960_v15 = vld [vmem:[#allocation22 + $0x8] sm:$0xff] }
 0xb8f   : > { %v5558_v28 = vadd.f32 %v13758_v37, %v5485_v43  ;;  %v5943_v43 = vld [vmem:[#allocation21] sm:$0xff] }
 0xb94   : > { %v5768_v2 = vpop.f32.mrf.mxu1  ;;  %v5835_v0 = vpop.f32.mrf.mxu0 }
 0xb95   : > { %v5847_v38 = vadd.f32 %v5835_v0, %v5774_v32 }
 0xb97   : > { %v5871_v61 = vadd.f32 %v5854_v34, %v5847_v38  ;;  %v5631_v34 = vadd.f32 %v13762_v10, %v5558_v28  ;;  %v5776_v38 = vadd.f32 %v5768_v2, %v5703_v41  ;;  %v5944_v28 = vld [vmem:[#allocation21 + $0x8] sm:$0xff]  ;;  %v6041_v41 = vld [vmem:[#allocation21 + $0x18] sm:$0xff] }
 0xb99   : > { %v5875_v36 = vmax.f32 %v5871_v61, 0.0 }
 0xb9c   : > { %v5771_v40 = vpop.f32.mrf.mxu1  ;;  %v5838_v21 = vpop.f32.mrf.mxu0 }
 0xb9d   : > { %v5848_v46 = vadd.f32 %v5838_v21, %v5775_v1  ;;  %v5698_v21 = vpop.f32.mrf.mxu2 }
 0xb9e   : > { %v5704_v20 = vadd.f32 %v5698_v21, %v5631_v34  ;;  %v11571_v21 = vld [vmem:[#allocation9 + $0x48] sm:$0xff]  ;;  %v11572_v34 = vld [vmem:[#allocation9 + $0x40] sm:$0xff] }
 0xb9f   : > { %v5872_v13 = vadd.f32 %v5859_v31, %v5848_v46 }
 0xba0   : > { %v5777_v9 = vadd.f32 %v5771_v40, %v5704_v20  ;;  %v6089_v20 = vld [vmem:[#allocation22 + $0x18] sm:$0xff] }
 0xba1   : > { %v5876_v60 = vmax.f32 %v5872_v13, 0.0 }
 0xba3   : > { %v5879_v53 = vpack.c.bf16 %v5876_v60, %v5875_v36 }
 0xba4   : > { %v5954_v0 = vpop.f32.mrf.mxu1  ;;  %v5841_v35 = vpop.f32.mrf.mxu0 }
 0xba5   : > { %10801 = vmatmul.msk.bf16.vlgmr.msra.gmra.mxu2 %vm5208_vm4, %v5879_v53  ;;  %v5849_v63 = vadd.f32 %v5841_v35, %v5776_v38  ;;  %v11570_v35 = vld [vmem:[#allocation9 + $0x50] sm:$0xff] }
 0xba6   : > { %v6088_v38 = vld [vmem:[#allocation22 + $0x10] sm:$0xff] }
 0xba7   : > { %v5873_v50 = vadd.f32 %v5864_v22, %v5849_v63 }
 0xba9   : > { %v5877_v25 = vmax.f32 %v5873_v50, 0.0 }
 0xbac   : > { %v5956_v62 = vpop.f32.mrf.mxu1  ;;  %v5844_v14 = vpop.f32.mrf.mxu0 }
 0xbad   : > { %5981 = vmatpush.msrb.mxu0 %v5956_v62  ;;  %v5850_v32 = vadd.f32 %v5844_v14, %v5777_v9 }
 0xbaf   : > { %5982 = vmatpush.msrb.mxu0 %v5954_v0  ;;  %v5874_v37 = vadd.f32 %v5869_v48, %v5850_v32  ;;  %v11569_v0 = vld [vmem:[#allocation9 + $0x58] sm:$0xff] }
 0xbb0   : > { %10806 = vmatmul.msk.f32.vlgmr.msrb.gmra.mxu0 %vm5208_vm4, %v5959_v55 }
 0xbb1   : > { %6077 = vmatpush.bf16.msra.mxu0 %v13601_v4  ;;  %v5878_v10 = vmax.f32 %v5874_v37, 0.0 }
 0xbb3   : > { %v5880_v2 = vpack.c.bf16 %v5878_v10, %v5877_v25 }
 0xbb5   : > { %6078 = vmatpush.bf16.msra.mxu0 %v13607_v42  ;;  %10802 = vmatmul.msk.bf16.gmra.mxu2 %vm5208_vm4, %v5880_v2 }
 0xbb8   : > { %10807 = vmatmul.msk.f32.gmra.mxu0 %vm5208_vm4, %v5960_v15  ;;  %v6189_v15 = vld [vmem:[#allocation22 + $0x20] sm:$0xff] }
 0xbb9   : > { %6079 = vmatpush.bf16.msra.mxu0 %v13613_v39 }
 0xbbd   : > { %6080 = vmatpush.bf16.msra.mxu0 %v13619_v18 }
 0xbc0   : > { %10814 = vmatmul.msk.bf16.vlgmr.msra.gmra.mxu0 %vm4297_vm2, %v13676_v51 }
 0xc28   : > { %v5904_v1 = vpop.f32.mrf.mxu2 }
 0xc2d   : > { %v5984_v61 = vpop.f32.mrf.mxu0 }
 0xc30   : > { %v5906_v40 = vpop.f32.mrf.mxu2 }
 0xc31   : > { %v13805_v4 = vpack.c.bf16 %v5906_v40, %v5904_v1  ;;  %v11573_v1 = vld [vmem:[#allocation9 + $0x78] sm:$0xff] }
 0xc33   : > { %10803 = vmatmul.msk.bf16.vlgmr.msrb.gmra.mxu3 %vm4297_vm2, %v13805_v4  ;;  %10810 = vmatmul.msk.bf16.vlgmr.msrb.gmra.mxu2 %vm4297_vm2, %v13805_v4 }
 0xc35   : > { %v13817_v27 = vpop.f32.mrf.mxu0 }
 0xc38   : > { %v5909_v42 = vpop.f32.mrf.mxu2 }
 0xc3d   : > { %v6082_v26 = vpop.f32.mrf.mxu0 }
 0xc40   : > { %v5911_v49 = vpop.f32.mrf.mxu2 }
 0xc41   : > { %v13811_v58 = vpack.c.bf16 %v5911_v49, %v5909_v42  ;;  %v6190_v42 = vld [vmem:[#allocation22 + $0x28] sm:$0xff]  ;;  %v6141_v49 = vld [vmem:[#allocation21 + $0x20] sm:$0xff] }
 0xc43   : > { %10804 = vmatmul.msk.bf16.gmra.mxu3 %vm4297_vm2, %v13811_v58  ;;  %10811 = vmatmul.msk.bf16.gmra.mxu2 %vm4297_vm2, %v13811_v58 }
 0xc45   : > { %v6084_v53 = vpop.f32.mrf.mxu0 }
 0xcb6   : > { %v5933_v39 = vpop.f32.mrf.mxu3  ;;  %v6029_v18 = vpop.f32.mrf.mxu2 }
 0xcbe   : > { %v5935_v46 = vpop.f32.mrf.mxu3  ;;  %v6031_v31 = vpop.f32.mrf.mxu2 }
 0xcc6   : > { %v5938_v13 = vpop.f32.mrf.mxu3  ;;  %v6034_v11 = vpop.f32.mrf.mxu2 }
 0xcce   : > { %v5940_v36 = vpop.f32.mrf.mxu3  ;;  %v6036_v60 = vpop.f32.mrf.mxu2 }
 0xccf   : > { %6009 = vmatpush.msrb.mxu1 %v5940_v36  ;;  %6060 = vmatpush.msra.mxu3 %v6036_v60 }
 0xcd1   : > { %6010 = vmatpush.msrb.mxu1 %v5938_v13  ;;  %6061 = vmatpush.msra.mxu3 %v6034_v11 }
 0xcd3   : > { %6011 = vmatpush.msrb.mxu1 %v5935_v46  ;;  %6062 = vmatpush.msra.mxu3 %v6031_v31 }
 0xcd5   : > { %6012 = vmatpush.msrb.mxu1 %v5933_v39  ;;  %6063 = vmatpush.msra.mxu3 %v6029_v18  ;;  %v11574_v39 = vld [vmem:[#allocation9 + $0x70] sm:$0xff]  ;;  %v6142_v18 = vld [vmem:[#allocation21 + $0x28] sm:$0xff] }
 0xcd6   : > { %10808 = vmatmul.msk.f32.vlgmr.msrb.gmra.mxu1 %vm5990_vm5, %v5943_v43  ;;  %10812 = vmatmul.msk.f32.vlgmr.msra.gmra.mxu3 %vm5990_vm5, %v6040_v59 }
 0xcd7   : > { %6110 = vmatpush.msra.mxu1 %v6084_v53  ;;  %6125 = vmatpush.bf16.msrb.mxu3 %v11569_v0 }
 0xcd9   : > { %6111 = vmatpush.msra.mxu1 %v6082_v26 }
 0xcdb   : > { %6178 = vmatpush.bf16.msrb.mxu1 %v11569_v0  ;;  %6126 = vmatpush.bf16.msrb.mxu3 %v11570_v35  ;;  %v6290_v0 = vld [vmem:[#allocation22 + $0x30] sm:$0xff] }
 0xcde   : > { %10809 = vmatmul.msk.f32.gmra.mxu1 %vm5990_vm5, %v5944_v28  ;;  %10813 = vmatmul.msk.f32.gmra.mxu3 %vm5990_vm5, %v6041_v41  ;;  %v11577_v28 = vld [vmem:[#allocation9 + $0x98] sm:$0xff]  ;;  %v11578_v41 = vld [vmem:[#allocation9 + $0x90] sm:$0xff] }
 0xcdf   : > { %6127 = vmatpush.bf16.msrb.mxu3 %v11571_v21  ;;  %6179 = vmatpush.bf16.msrb.mxu1 %v11570_v35 }
 0xce3   : > { %6128 = vmatpush.bf16.msrb.mxu3 %v11572_v34  ;;  %6180 = vmatpush.bf16.msrb.mxu1 %v11571_v21 }
 0xce6   : > { %10815 = vmatmul.msk.f32.vlgmr.msra.gmra.mxu1 %vm5208_vm4, %v6088_v38  ;;  %10817 = vmatmul.msk.bf16.vlgmr.msrb.gmra.mxu3 %vm4297_vm2, %v13805_v4  ;;  %v11580_v38 = vld [vmem:[#allocation9 + $0x80] sm:$0xff] }
 0xce7   : > { %6181 = vmatpush.bf16.msrb.mxu1 %v11572_v34  ;;  %v11579_v34 = vld [vmem:[#allocation9 + $0x88] sm:$0xff] }
 0xcee   : > { %10816 = vmatmul.msk.f32.gmra.mxu1 %vm5208_vm4, %v6089_v20 }
 0xcf6   : > { %10818 = vmatmul.msk.bf16.gmra.mxu3 %vm4297_vm2, %v13811_v58  ;;  %10821 = vmatmul.msk.bf16.vlgmr.msrb.gmra.mxu1 %vm4297_vm2, %v13676_v51 }
 0xd53   : > { %v6014_v63 = vpop.f32.mrf.mxu1 }
 0xd54   : > { %v6015_v9 = vadd.f32 %v6014_v63, %v5984_v61  ;;  %v11576_v61 = vld [vmem:[#allocation9 + $0x60] sm:$0xff] }
 0xd55   : > { %v6242_v63 = vld [vmem:[#allocation21 + $0x30] sm:$0xff] }
 0xd59   : > { %v6065_v62 = vpop.f32.mrf.mxu3 }
 0xd5a   : > { %v13831_v22 = vadd.f32 %v6065_v62, %v6015_v9  ;;  %v6243_v9 = vld [vmem:[#allocation21 + $0x38] sm:$0xff] }
 0xd5b   : > { %v6017_v14 = vpop.f32.mrf.mxu1 }
 0xd5c   : > { %v6018_v46 = vadd.f32 %v6017_v14, %v13817_v27  ;;  %v6291_v27 = vld [vmem:[#allocation22 + $0x38] sm:$0xff] }
 0xd61   : > { %v6068_v55 = vpop.f32.mrf.mxu3 }
 0xd62   : > { %v6072_v13 = vadd.f32 %v6068_v55, %v6018_v46  ;;  %v6343_v46 = vld [vmem:[#allocation21 + $0x40] sm:$0xff] }
 0xd63   : > { %v13833_v50 = vpop.f32.mrf.mxu1 }
 0xd69   : > { %v6130_v32 = vpop.f32.mrf.mxu3 }
 0xd6b   : > { %v6116_v48 = vpop.f32.mrf.mxu1 }
 0xd6c   : > { %v6120_v11 = vadd.f32 %v6116_v48, %v6072_v13 }
 0xd71   : > { %v6132_v37 = vpop.f32.mrf.mxu3 }
 0xd73   : > { %v6183_v25 = vpop.f32.mrf.mxu1 }
 0xd79   : > { %v6135_v10 = vpop.f32.mrf.mxu3 }
 0xd7b   : > { %v6185_v2 = vpop.f32.mrf.mxu1 }
 0xd7c   : > { %6211 = vmatpush.msra.mxu2 %v6185_v2 }
 0xd7e   : > { %6212 = vmatpush.msra.mxu2 %v6183_v25 }
 0xd7f   : > { %10822 = vmatmul.msk.f32.vlgmr.msra.gmra.mxu2 %vm5208_vm4, %v6189_v15  ;;  %v11581_v15 = vld [vmem:[#allocation9 + $0xb8] sm:$0xff] }
 0xd80   : > { %6279 = vmatpush.bf16.msrb.mxu2 %v11573_v1 }
 0xd81   : > { %v6137_v40 = vpop.f32.mrf.mxu3 }
 0xd82   : > { %6161 = vmatpush.msrb.mxu0 %v6137_v40  ;;  %v6392_v40 = vld [vmem:[#allocation22 + $0x48] sm:$0xff] }
 0xd84   : > { %6162 = vmatpush.msrb.mxu0 %v6135_v10  ;;  %6280 = vmatpush.bf16.msrb.mxu2 %v13639_v19  ;;  %v11575_v19 = vld [vmem:[#allocation9 + $0x68] sm:$0xff] }
 0xd86   : > { %6163 = vmatpush.msrb.mxu0 %v6132_v37  ;;  %v6391_v37 = vld [vmem:[#allocation22 + $0x40] sm:$0xff] }
 0xd87   : > { %10823 = vmatmul.msk.f32.gmra.mxu2 %vm5208_vm4, %v6190_v42 }
 0xd88   : > { %6164 = vmatpush.msrb.mxu0 %v6130_v32  ;;  %6281 = vmatpush.bf16.msrb.mxu2 %v13642_v23 }
 0xd89   : > { %10819 = vmatmul.msk.f32.vlgmr.msrb.gmra.mxu0 %vm5990_vm5, %v6141_v49  ;;  %v11583_v49 = vld [vmem:[#allocation9 + $0xa8] sm:$0xff] }
 0xd8a   : > { %6226 = vmatpush.bf16.msra.mxu0 %v11573_v1  ;;  %v11582_v1 = vld [vmem:[#allocation9 + $0xb0] sm:$0xff] }
 0xd8c   : > { %6282 = vmatpush.bf16.msrb.mxu2 %v13647_v54 }
 0xd8e   : > { %6227 = vmatpush.bf16.msra.mxu0 %v11574_v39  ;;  %v11584_v39 = vld [vmem:[#allocation9 + $0xa0] sm:$0xff] }
 0xd8f   : > { %10828 = vmatmul.msk.bf16.vlgmr.msrb.gmra.mxu2 %vm4297_vm2, %v13676_v51 }
 0xd91   : > { %10820 = vmatmul.msk.f32.gmra.mxu0 %vm5990_vm5, %v6142_v18 }
 0xd92   : > { %6228 = vmatpush.bf16.msra.mxu0 %v11575_v19 }
 0xd96   : > { %6229 = vmatpush.bf16.msra.mxu0 %v11576_v61 }
 0xd99   : > { %10824 = vmatmul.msk.bf16.vlgmr.msra.gmra.mxu0 %vm4297_vm2, %v13805_v4 }
 0xda9   : > { %10825 = vmatmul.msk.bf16.gmra.mxu0 %vm4297_vm2, %v13811_v58 }
 0xe02   : > { %v13848_v23 = vpop.f32.mrf.mxu2 }
 0xe06   : > { %v13850_v54 = vpop.f32.mrf.mxu0 }
 0xe0a   : > { %v6217_v31 = vpop.f32.mrf.mxu2 }
 0xe0e   : > { %v6169_v26 = vpop.f32.mrf.mxu0 }
 0xe0f   : > { %v6173_v36 = vadd.f32 %v6169_v26, %v6120_v11 }
 0xe11   : > { %v6221_v60 = vadd.f32 %v6217_v31, %v6173_v36  ;;  %v6344_v31 = vld [vmem:[#allocation21 + $0x48] sm:$0xff] }
 0xe12   : > { %v6284_v43 = vpop.f32.mrf.mxu2 }
 0xe16   : > { %v6231_v59 = vpop.f32.mrf.mxu0 }
 0xe1a   : > { %v6286_v53 = vpop.f32.mrf.mxu2 }
 0xe1b   : > { %6312 = vmatpush.msra.mxu3 %v6286_v53 }
 0xe1d   : > { %6313 = vmatpush.msra.mxu3 %v6284_v43  ;;  %v11585_v43 = vld [vmem:[#allocation9 + $0xd8] sm:$0xff] }
 0xe1e   : > { %v6233_v35 = vpop.f32.mrf.mxu0  ;;  %10829 = vmatmul.msk.f32.vlgmr.msra.gmra.mxu3 %vm5208_vm4, %v6290_v0  ;;  %v11586_v0 = vld [vmem:[#allocation9 + $0xd0] sm:$0xff] }
 0xe1f   : > { %6380 = vmatpush.bf16.msrb.mxu3 %v11577_v28 }
 0xe23   : > { %6381 = vmatpush.bf16.msrb.mxu3 %v11578_v41 }
 0xe26   : > { %v6236_v21 = vpop.f32.mrf.mxu0  ;;  %10830 = vmatmul.msk.f32.gmra.mxu3 %vm5208_vm4, %v6291_v27 }
 0xe27   : > { %6382 = vmatpush.bf16.msrb.mxu3 %v11579_v34 }
 0xe2b   : > { %6383 = vmatpush.bf16.msrb.mxu3 %v11580_v38 }
 0xe2e   : > { %v6238_v20 = vpop.f32.mrf.mxu0  ;;  %10835 = vmatmul.msk.bf16.vlgmr.msrb.gmra.mxu3 %vm4297_vm2, %v13676_v51 }
 0xe2f   : > { %6262 = vmatpush.msra.mxu1 %v6238_v20 }
 0xe31   : > { %6263 = vmatpush.msra.mxu1 %v6236_v21  ;;  %v11588_v21 = vld [vmem:[#allocation9 + $0xc0] sm:$0xff] }
 0xe33   : > { %6264 = vmatpush.msra.mxu1 %v6233_v35  ;;  %v6493_v35 = vld [vmem:[#allocation22 + $0x58] sm:$0xff] }
 0xe35   : > { %6265 = vmatpush.msra.mxu1 %v6231_v59  ;;  %v6119_v59 = vadd.f32 %v13833_v50, %v13831_v22 }
 0xe36   : > { %10826 = vmatmul.msk.f32.vlgmr.msra.gmra.mxu1 %vm5990_vm5, %v6242_v63 }
 0xe37   : > { %6327 = vmatpush.bf16.msrb.mxu1 %v11577_v28  ;;  %v6172_v53 = vadd.f32 %v13850_v54, %v6119_v59 }
 0xe39   : > { %v6220_v28 = vadd.f32 %v13848_v23, %v6172_v53  ;;  %v6444_v23 = vld [vmem:[#allocation21 + $0x50] sm:$0xff]  ;;  %v6694_v53 = vld [vmem:[#allocation22 + $0x70] sm:$0xff] }
 0xe3b   : > { %6328 = vmatpush.bf16.msrb.mxu1 %v11578_v41  ;;  %v11587_v41 = vld [vmem:[#allocation9 + $0xc8] sm:$0xff] }
 0xe3e   : > { %10827 = vmatmul.msk.f32.gmra.mxu1 %vm5990_vm5, %v6243_v9 }
 0xe3f   : > { %6329 = vmatpush.bf16.msrb.mxu1 %v11579_v34 }
 0xe43   : > { %6330 = vmatpush.bf16.msrb.mxu1 %v11580_v38 }
 0xe46   : > { %10831 = vmatmul.msk.bf16.vlgmr.msrb.gmra.mxu1 %vm4297_vm2, %v13805_v4 }
 0xe56   : > { %10832 = vmatmul.msk.bf16.gmra.mxu1 %vm4297_vm2, %v13811_v58 }
 0xea1   : > { %v13863_v62 = vpop.f32.mrf.mxu3 }
 0xea9   : > { %v6318_v14 = vpop.f32.mrf.mxu3 }
 0xeb1   : > { %v6385_v55 = vpop.f32.mrf.mxu3 }
 0xeb3   : > { %v6267_v32 = vpop.f32.mrf.mxu1 }
 0xeb4   : > { %v6273_v27 = vadd.f32 %v6267_v32, %v6220_v28  ;;  %v6695_v28 = vld [vmem:[#allocation22 + $0x78] sm:$0xff] }
 0xeb6   : > { %v6321_v34 = vadd.f32 %v13863_v62, %v6273_v27  ;;  %v6445_v62 = vld [vmem:[#allocation21 + $0x58] sm:$0xff]  ;;  %v11596_v27 = vld [vmem:[#allocation9 + $0x100] sm:$0xff] }
 0xeb9   : > { %v6387_v48 = vpop.f32.mrf.mxu3 }
 0xeba   : > { %6413 = vmatpush.msrb.mxu0 %v6387_v48 }
 0xebb   : > { %v6270_v25 = vpop.f32.mrf.mxu1 }
 0xebc   : > { %v6274_v10 = vadd.f32 %v6270_v25, %v6221_v60  ;;  %6414 = vmatpush.msrb.mxu0 %v6385_v55  ;;  %v6492_v60 = vld [vmem:[#allocation22 + $0x50] sm:$0xff]  ;;  %v6593_v25 = vld [vmem:[#allocation22 + $0x60] sm:$0xff] }
 0xebd   : > { %10836 = vmatmul.msk.f32.vlgmr.msrb.gmra.mxu0 %vm5208_vm4, %v6391_v37 }
 0xebe   : > { %v13866_v2 = vadd.f32 %v6318_v14, %v6274_v10  ;;  %6481 = vmatpush.bf16.msra.mxu0 %v11581_v15  ;;  %v11589_v10 = vld [vmem:[#allocation9 + $0xf8] sm:$0xff] }
 0xec2   : > { %6482 = vmatpush.bf16.msra.mxu0 %v11582_v1 }
 0xec3   : > { %v6332_v42 = vpop.f32.mrf.mxu1 }
 0xec5   : > { %10837 = vmatmul.msk.f32.gmra.mxu0 %vm5208_vm4, %v6392_v40  ;;  %v11591_v40 = vld [vmem:[#allocation9 + $0xe8] sm:$0xff] }
 0xec6   : > { %6483 = vmatpush.bf16.msra.mxu0 %v11583_v49 }
 0xeca   : > { %6484 = vmatpush.bf16.msra.mxu0 %v11584_v39 }
 0xecb   : > { %v6334_v18 = vpop.f32.mrf.mxu1 }
 0xecd   : > { %10842 = vmatmul.msk.bf16.vlgmr.msra.gmra.mxu0 %vm4297_vm2, %v13676_v51 }
 0xed3   : > { %v6337_v19 = vpop.f32.mrf.mxu1 }
 0xedb   : > { %v6339_v61 = vpop.f32.mrf.mxu1 }
 0xedc   : > { %6363 = vmatpush.msra.mxu2 %v6339_v61 }
 0xede   : > { %6364 = vmatpush.msra.mxu2 %v6337_v19 }
 0xee0   : > { %6365 = vmatpush.msra.mxu2 %v6334_v18 }
 0xee2   : > { %6366 = vmatpush.msra.mxu2 %v6332_v42  ;;  %v11592_v42 = vld [vmem:[#allocation9 + $0xe0] sm:$0xff] }
 0xee3   : > { %10833 = vmatmul.msk.f32.vlgmr.msra.gmra.mxu2 %vm5990_vm5, %v6343_v46 }
 0xee4   : > { %6428 = vmatpush.bf16.msrb.mxu2 %v11581_v15  ;;  %v11590_v15 = vld [vmem:[#allocation9 + $0xf0] sm:$0xff] }
 0xee8   : > { %6429 = vmatpush.bf16.msrb.mxu2 %v11582_v1  ;;  %v6594_v1 = vld [vmem:[#allocation22 + $0x68] sm:$0xff] }
 0xeeb   : > { %10834 = vmatmul.msk.f32.gmra.mxu2 %vm5990_vm5, %v6344_v31 }
 0xeec   : > { %6430 = vmatpush.bf16.msrb.mxu2 %v11583_v49 }
 0xef0   : > { %6431 = vmatpush.bf16.msrb.mxu2 %v11584_v39 }
 0xef3   : > { %10838 = vmatmul.msk.bf16.vlgmr.msrb.gmra.mxu2 %vm4297_vm2, %v13805_v4 }
 0xf03   : > { %10839 = vmatmul.msk.bf16.gmra.mxu2 %vm4297_vm2, %v13811_v58 }
 0xf3a   : > { %v6416_v13 = vpop.f32.mrf.mxu0 }
 0xf42   : > { %v13877_v11 = vpop.f32.mrf.mxu0 }
 0xf4a   : > { %v6486_v26 = vpop.f32.mrf.mxu0 }
 0xf52   : > { %v6488_v36 = vpop.f32.mrf.mxu0 }
 0xf53   : > { %6514 = vmatpush.msra.mxu1 %v6488_v36 }
 0xf55   : > { %6515 = vmatpush.msra.mxu1 %v6486_v26  ;;  %v6546_v26 = vld [vmem:[#allocation21 + $0x68] sm:$0xff] }
 0xf56   : > { %10843 = vmatmul.msk.f32.vlgmr.msra.gmra.mxu1 %vm5208_vm4, %v6492_v60 }
 0xf57   : > { %6582 = vmatpush.bf16.msrb.mxu1 %v11585_v43 }
 0xf5b   : > { %6583 = vmatpush.bf16.msrb.mxu1 %v11586_v0 }
 0xf5e   : > { %10844 = vmatmul.msk.f32.gmra.mxu1 %vm5208_vm4, %v6493_v35  ;;  %v11594_v35 = vld [vmem:[#allocation9 + $0x110] sm:$0xff] }
 0xf5f   : > { %6584 = vmatpush.bf16.msrb.mxu1 %v11587_v41 }
 0xf63   : > { %6585 = vmatpush.bf16.msrb.mxu1 %v11588_v21 }
 0xf66   : > { %v6368_v38 = vpop.f32.mrf.mxu2  ;;  %10849 = vmatmul.msk.bf16.vlgmr.msrb.gmra.mxu1 %vm4297_vm2, %v13676_v51 }
 0xf67   : > { %v6374_v22 = vadd.f32 %v6368_v38, %v6321_v34 }
 0xf69   : > { %v6422_v50 = vadd.f32 %v6416_v13, %v6374_v22  ;;  %v6545_v13 = vld [vmem:[#allocation21 + $0x60] sm:$0xff] }
 0xf6e   : > { %v13888_v54 = vpop.f32.mrf.mxu2 }
 0xf76   : > { %v6433_v20 = vpop.f32.mrf.mxu2 }
 0xf7e   : > { %v6435_v63 = vpop.f32.mrf.mxu2 }
 0xf86   : > { %v6438_v9 = vpop.f32.mrf.mxu2 }
 0xf8e   : > { %v6440_v14 = vpop.f32.mrf.mxu2 }
 0xf8f   : > { %6464 = vmatpush.msra.mxu3 %v6440_v14 }
 0xf91   : > { %6465 = vmatpush.msra.mxu3 %v6438_v9 }
 0xf93   : > { %6466 = vmatpush.msra.mxu3 %v6435_v63 }
 0xf95   : > { %6467 = vmatpush.msra.mxu3 %v6433_v20 }
 0xf96   : > { %10840 = vmatmul.msk.f32.vlgmr.msra.gmra.mxu3 %vm5990_vm5, %v6444_v23 }
 0xf97   : > { %6529 = vmatpush.bf16.msrb.mxu3 %v11585_v43 }
 0xf9b   : > { %6530 = vmatpush.bf16.msrb.mxu3 %v11586_v0  ;;  %v11593_v0 = vld [vmem:[#allocation9 + $0x118] sm:$0xff] }
 0xf9e   : > { %10841 = vmatmul.msk.f32.gmra.mxu3 %vm5990_vm5, %v6445_v62 }
 0xf9f   : > { %6531 = vmatpush.bf16.msrb.mxu3 %v11587_v41  ;;  %v11595_v41 = vld [vmem:[#allocation9 + $0x108] sm:$0xff] }
 0xfa3   : > { %6532 = vmatpush.bf16.msrb.mxu3 %v11588_v21  ;;  %v6375_v21 = vadd.f32 %v13888_v54, %v13866_v2 }
 0xfa5   : > { %v6423_v38 = vadd.f32 %v13877_v11, %v6375_v21  ;;  %v15574_v21 = vld [vmem:[#allocation47_spill] sm:$0xff] }
 0xfa6   : > { %10845 = vmatmul.msk.bf16.vlgmr.msrb.gmra.mxu3 %vm4297_vm2, %v13805_v4 }
 0xfb6   : > { %10846 = vmatmul.msk.bf16.gmra.mxu3 %vm4297_vm2, %v13811_v58 }
 0xfd3   : > { %v13896_v55 = vpop.f32.mrf.mxu1 }
 0xfdb   : > { %v6520_v32 = vpop.f32.mrf.mxu1 }
 0xfe3   : > { %v6587_v48 = vpop.f32.mrf.mxu1 }
 0xfeb   : > { %v6589_v37 = vpop.f32.mrf.mxu1 }
 0xfec   : > { %6615 = vmatpush.msra.mxu2 %v6589_v37  ;;  %v6747_v37 = vld [vmem:[#allocation21 + $0x80] sm:$0xff] }
 0xfee   : > { %6616 = vmatpush.msra.mxu2 %v6587_v48  ;;  %v6646_v48 = vld [vmem:[#allocation21 + $0x70] sm:$0xff] }
 0xfef   : > { %10850 = vmatmul.msk.f32.vlgmr.msra.gmra.mxu2 %vm5208_vm4, %v6593_v25 }
 0xff0   : > { %6683 = vmatpush.bf16.msrb.mxu2 %v11589_v10 }
 0xff4   : > { %6684 = vmatpush.bf16.msrb.mxu2 %v11590_v15 }
 0xff7   : > { %10851 = vmatmul.msk.f32.gmra.mxu2 %vm5208_vm4, %v6594_v1  ;;  %v11358_v1 = vld [vmem:[#allocation25 + $0x24] sm:$0xf] }
 0xff8   : > { %6685 = vmatpush.bf16.msrb.mxu2 %v11591_v40 }
 0xffc   : > { %6686 = vmatpush.bf16.msrb.mxu2 %v11592_v42 }
 0xfff   : > { %10856 = vmatmul.msk.bf16.vlgmr.msrb.gmra.mxu2 %vm4297_vm2, %v13676_v51 }
0x1019   : > { %v6469_v49 = vpop.f32.mrf.mxu3 }
0x101a   : > { %v13902_v39 = vadd.f32 %v6469_v49, %v6422_v50 }
0x1021   : > { %v6472_v18 = vpop.f32.mrf.mxu3 }
0x1022   : > { %v6476_v22 = vadd.f32 %v6472_v18, %v6423_v38  ;;  %v11356_v18 = vld [vmem:[#allocation25 + $0x14] sm:$0xf] }
0x1024   : > { %v6524_v50 = vadd.f32 %v6520_v32, %v6476_v22 }
0x1029   : > { %v6534_v19 = vpop.f32.mrf.mxu3 }
0x1031   : > { %v6536_v61 = vpop.f32.mrf.mxu3 }
0x1039   : > { %v6539_v46 = vpop.f32.mrf.mxu3 }
0x1041   : > { %v6541_v31 = vpop.f32.mrf.mxu3 }
0x1042   : > { %6565 = vmatpush.msrb.mxu0 %v6541_v31  ;;  %v10868_v31 = vld [vmem:[#allocation25] sm:$0xf] }
0x1044   : > { %6566 = vmatpush.msrb.mxu0 %v6539_v46 }
0x1046   : > { %6567 = vmatpush.msrb.mxu0 %v6536_v61  ;;  %v10878_v61 = vld [vmem:[#allocation25 + $0x18] sm:$0xf0] }
0x1047   : > { %v10881_v46 = vor.u32 %v11356_v18, %v10878_v61  ;;  %v15598_v18 = vld [vmem:[#allocation79_spill] sm:$0xff] }
0x1048   : > { %6568 = vmatpush.msrb.mxu0 %v6534_v19  ;;  %v15600_v61 = vld [vmem:[#allocation83_spill] sm:$0xff] }
0x1049   : > { %10847 = vmatmul.msk.f32.vlgmr.msrb.gmra.mxu0 %vm5990_vm5, %v6545_v13  ;;  %v11355_v13 = vld [vmem:[#allocation25 + $0x4] sm:$0xf0] }
0x104a   : > { %6630 = vmatpush.bf16.msra.mxu0 %v11589_v10 }
0x104e   : > { %6631 = vmatpush.bf16.msra.mxu0 %v11590_v15  ;;  %v10884_v15 = vld [vmem:[#allocation25 + $0x20] sm:$0xf] }
0x1051   : > { %10848 = vmatmul.msk.f32.gmra.mxu0 %vm5990_vm5, %v6546_v26  ;;  %v11354_v26 = vld [vmem:[#allocation25 + $0x4] sm:$0xf] }
0x1052   : > { %6632 = vmatpush.bf16.msra.mxu0 %v11591_v40 }
0x1056   : > { %6633 = vmatpush.bf16.msra.mxu0 %v11592_v42  ;;  %v10886_v42 = vld [vmem:[#allocation25 + $0x28] sm:$0xf0] }
0x1057   : > { %v10889_v49 = vor.u32 %v11358_v1, %v10886_v42  ;;  %v15592_v1 = vld [vmem:[#allocation71_spill] sm:$0xff] }
0x1058   : > { %v15594_v42 = vld [vmem:[#allocation315_spill] sm:$0xff] }
0x1059   : > { %10852 = vmatmul.msk.bf16.vlgmr.msra.gmra.mxu0 %vm4297_vm2, %v13805_v4 }
0x1069   : > { %10853 = vmatmul.msk.bf16.gmra.mxu0 %vm4297_vm2, %v13811_v58 }
0x1072   : > { %v13910_v36 = vpop.f32.mrf.mxu2 }
0x107a   : > { %v13912_v60 = vpop.f32.mrf.mxu2 }
0x1082   : > { %v6688_v43 = vpop.f32.mrf.mxu2 }
0x108a   : > { %v6690_v59 = vpop.f32.mrf.mxu2 }
0x108b   : > { %6716 = vmatpush.msra.mxu3 %v6690_v59 }
0x108d   : > { %6717 = vmatpush.msra.mxu3 %v6688_v43  ;;  %v10870_v43 = vld [vmem:[#allocation25 + $0x8] sm:$0xf0] }
0x108e   : > { %10857 = vmatmul.msk.f32.vlgmr.msra.gmra.mxu3 %vm5208_vm4, %v6694_v53  ;;  %v10873_v59 = vor.u32 %v11354_v26, %v10870_v43  ;;  %v6523_v53 = vadd.f32 %v13896_v55, %v13902_v39 }
0x108f   : > { %6784 = vmatpush.bf16.msrb.mxu3 %v11593_v0 }
0x1093   : > { %6785 = vmatpush.bf16.msrb.mxu3 %v11594_v35 }
0x1096   : > { %10858 = vmatmul.msk.f32.gmra.mxu3 %vm5208_vm4, %v6695_v28  ;;  %v15572_v28 = vld [vmem:[#allocation45_spill] sm:$0xff] }
0x1097   : > { %6786 = vmatpush.bf16.msrb.mxu3 %v11595_v41 }
0x109b   : > { %6787 = vmatpush.bf16.msrb.mxu3 %v11596_v27 }
0x109e   : > { %10863 = vmatmul.msk.bf16.vlgmr.msrb.gmra.mxu3 %vm4297_vm2, %v13676_v51  ;;  %v6647_v51 = vld [vmem:[#allocation21 + $0x78] sm:$0xff] }
0x10c6   : > { %v13920_v34 = vpop.f32.mrf.mxu0 }
0x10ce   : > { %v6573_v20 = vpop.f32.mrf.mxu0 }
0x10cf   : > { %v6577_v63 = vadd.f32 %v6573_v20, %v6524_v50  ;;  %v15575_v50 = vld [vmem:[#allocation48_spill] sm:$0xff]  ;;  %v15576_v20 = vld [vmem:[#allocation49_spill] sm:$0xff] }
0x10d6   : > { %v6635_v9 = vpop.f32.mrf.mxu0 }
0x10de   : > { %v6637_v14 = vpop.f32.mrf.mxu0 }
0x10e6   : > { %v6640_v23 = vpop.f32.mrf.mxu0 }
0x10ee   : > { %v6642_v62 = vpop.f32.mrf.mxu0 }
0x10ef   : > { %6666 = vmatpush.msra.mxu1 %v6642_v62  ;;  %v15580_v62 = vld [vmem:[#allocation53_spill] sm:$0xff] }
0x10f1   : > { %6667 = vmatpush.msra.mxu1 %v6640_v23 }
0x10f3   : > { %6668 = vmatpush.msra.mxu1 %v6637_v14  ;;  %v15579_v14 = vld [vmem:[#allocation52_spill] sm:$0xff] }
0x10f5   : > { %6669 = vmatpush.msra.mxu1 %v6635_v9  ;;  %v15578_v9 = vld [vmem:[#allocation51_spill] sm:$0xff] }
0x10f6   : > { %10854 = vmatmul.msk.f32.vlgmr.msra.gmra.mxu1 %vm5990_vm5, %v6646_v48 }
0x10f7   : > { %6731 = vmatpush.bf16.msrb.mxu1 %v11593_v0  ;;  %v15571_v0 = vld [vmem:[#allocation44_spill] sm:$0xff] }
0x10fb   : > { %6732 = vmatpush.bf16.msrb.mxu1 %v11594_v35  ;;  %v6576_v35 = vadd.f32 %v13920_v34, %v6523_v53 }
0x10fe   : > { %10855 = vmatmul.msk.f32.gmra.mxu1 %vm5990_vm5, %v6647_v51 }
0x10ff   : > { %6733 = vmatpush.bf16.msrb.mxu1 %v11595_v41  ;;  %v15573_v41 = vld [vmem:[#allocation46_spill] sm:$0xff] }
0x1103   : > { %6734 = vmatpush.bf16.msrb.mxu1 %v11596_v27  ;;  %v6624_v27 = vadd.f32 %v13910_v36, %v6576_v35 }
0x1106   : > { %10859 = vmatmul.msk.bf16.vlgmr.msrb.gmra.mxu1 %vm4297_vm2, %v13805_v4 }
0x1107   : > { %6925 = vmatpush.bf16.msra.mxu1 %v12555_v3 }
0x110b   : > { %6926 = vmatpush.bf16.msra.mxu1 %v12566_v16 }
0x110f   : > { %6927 = vmatpush.bf16.msra.mxu1 %v12576_v29 }
0x1111   : > { %v13931_v2 = vpop.f32.mrf.mxu3 }
0x1113   : > { %6928 = vmatpush.bf16.msra.mxu1 %v12589_v44 }
0x1116   : > { %10860 = vmatmul.msk.bf16.gmra.mxu1 %vm4297_vm2, %v13811_v58 }
0x1117   : > { %6929 = vmatpush.bf16.msra.mxu1 %v12606_v56 }
0x1119   : > { %v13937_v11 = vpop.f32.mrf.mxu3 }
0x111b   : > { %6930 = vmatpush.bf16.msra.mxu1 %v12619_v5 }
0x111f   : > { %6931 = vmatpush.bf16.msra.mxu1 %v12634_v24 }
0x1121   : > { %v6789_v4 = vpop.f32.mrf.mxu3 }
0x1123   : > { %6932 = vmatpush.bf16.msra.mxu1 %v12646_v47 }
0x1127   : > { %6982 = vmatpush.bf16.msrb.mxu1 %v12555_v3 }
0x1129   : > { %v6791_v54 = vpop.f32.mrf.mxu3 }
0x112a   : > { %6817 = vmatpush.msrb.mxu0 %v6791_v54  ;;  %v6831_v54 = vpop.permute.xlu1 %6830 }
0x112b   : > { %6983 = vmatpush.bf16.msrb.mxu1 %v12566_v16  ;;  %v6625_v16 = vadd.f32 %v13912_v60, %v6577_v63  ;;  %v10869_v60 = vor.u32 %v11355_v13, %v10868_v31  ;;  %v15577_v63 = vld [vmem:[#allocation50_spill] sm:$0xff]  ;;  %v15602_v31 = vld [vmem:[#allocation87_spill] sm:$0xff] }
0x112c   : > { %6818 = vmatpush.msrb.mxu0 %v6789_v4 }
0x112e   : > { %6939 = vmatpush.bf16.msra.mxu0 %v12557_v7 }
0x112f   : > { %6984 = vmatpush.bf16.msrb.mxu1 %v12576_v29 }
0x1132   : > { %6940 = vmatpush.bf16.msra.mxu0 %v12568_v17 }
0x1133   : > { %6985 = vmatpush.bf16.msrb.mxu1 %v12589_v44 }
0x1136   : > { %6941 = vmatpush.bf16.msra.mxu0 %v12580_v33 }
0x1137   : > { %6986 = vmatpush.bf16.msrb.mxu1 %v12606_v56 }
0x113a   : > { %6942 = vmatpush.bf16.msra.mxu0 %v12593_v45 }
0x113b   : > { %6987 = vmatpush.bf16.msrb.mxu1 %v12619_v5 }
0x113e   : > { %6943 = vmatpush.bf16.msra.mxu0 %v12610_v57 }
0x113f   : > { %6988 = vmatpush.bf16.msrb.mxu1 %v12634_v24  ;;  %v6795_v24 = vld [vmem:[#allocation22 + $0x80] sm:$0xff] }
0x1140   : > { %10864 = vmatmul.msk.f32.vlgmr.msrb.gmra.mxu0 %vm5208_vm4, %v6795_v24  ;;  %v15583_v24 = vld [vmem:[#allocation56_spill] sm:$0xff] }
0x1142   : > { %6944 = vmatpush.bf16.msra.mxu0 %v12623_v6 }
0x1143   : > { %6989 = vmatpush.bf16.msrb.mxu1 %v12646_v47  ;;  %v6796_v47 = vld [vmem:[#allocation22 + $0x88] sm:$0xff] }
0x1146   : > { %6945 = vmatpush.bf16.msra.mxu0 %v12638_v30 }
0x1148   : > { %10865 = vmatmul.msk.f32.gmra.mxu0 %vm5208_vm4, %v6796_v47 }
0x114a   : > { %6946 = vmatpush.bf16.msra.mxu0 %v12650_v52 }
0x114e   : > { %6995 = vmatpush.bf16.msrb.mxu0 %v12557_v7  ;;  %v6748_v7 = vld [vmem:[#allocation21 + $0x88] sm:$0xff] }
0x1152   : > { %6996 = vmatpush.bf16.msrb.mxu0 %v12568_v17  ;;  %v10892_v17 = vld [vmem:[#allocation25 + $0x30] sm:$0xf] }
0x1156   : > { %6997 = vmatpush.bf16.msrb.mxu0 %v12580_v33  ;;  %v11361_v33 = vld [vmem:[#allocation25 + $0x34] sm:$0xf0] }
0x1157   : > { %v10893_v25 = vor.u32 %v11361_v33, %v10892_v17  ;;  %v15585_v33 = vld [vmem:[#allocation58_spill] sm:$0xff] }
0x115a   : > { %6998 = vmatpush.bf16.msrb.mxu0 %v12593_v45  ;;  %v11360_v45 = vld [vmem:[#allocation25 + $0x34] sm:$0xf] }
0x115e   : > { %6999 = vmatpush.bf16.msrb.mxu0 %v12610_v57  ;;  %v10894_v57 = vld [vmem:[#allocation25 + $0x38] sm:$0xf0] }
0x115f   : > { %v10897_v10 = vor.u32 %v11360_v45, %v10894_v57  ;;  %v15586_v45 = vld [vmem:[#allocation59_spill] sm:$0xff] }
0x1160   : > { %v15588_v57 = vld [vmem:[#allocation63_spill] sm:$0xff] }
0x1161   : > { %6912 = vmatpush.bf16.msra.mxu3 %v10897_v10  ;;  %v15589_v10 = vld [vmem:[#allocation66_spill] sm:$0xff] }
0x1162   : > { %7000 = vmatpush.bf16.msrb.mxu0 %v12623_v6  ;;  %v11359_v6 = vld [vmem:[#allocation25 + $0x24] sm:$0xf0] }
0x1163   : > { %v10885_v40 = vor.u32 %v11359_v6, %v10884_v15  ;;  %v15590_v15 = vld [vmem:[#allocation67_spill] sm:$0xff]  ;;  %v15591_v6 = vld [vmem:[#allocation70_spill] sm:$0xff] }
0x1165   : > { %6913 = vmatpush.bf16.msra.mxu3 %v10889_v49  ;;  %v15595_v49 = vld [vmem:[#allocation74_spill] sm:$0xff] }
0x1166   : > { %7001 = vmatpush.bf16.msrb.mxu0 %v12638_v30  ;;  %v10876_v30 = vld [vmem:[#allocation25 + $0x10] sm:$0xf] }
0x1169   : > { %6914 = vmatpush.bf16.msra.mxu3 %v10881_v46  ;;  %v15601_v46 = vld [vmem:[#allocation86_spill] sm:$0xff] }
0x116a   : > { %7002 = vmatpush.bf16.msrb.mxu0 %v12650_v52  ;;  %v11357_v52 = vld [vmem:[#allocation25 + $0x14] sm:$0xf0] }
0x116b   : > { %v10877_v19 = vor.u32 %v11357_v52, %v10876_v30  ;;  %v15596_v30 = vld [vmem:[#allocation75_spill] sm:$0xff]  ;;  %v15597_v52 = vld [vmem:[#allocation78_spill] sm:$0xff] }
0x116d   : > { %6915 = vmatpush.bf16.msra.mxu3 %v10873_v59 }
0x1171   : > { %6967 = vmatpush.bf16.msrb.mxu3 %v12562_v12 }
0x1173   : > { %v13957_v3 = vpop.f32.mrf.mxu1 }
0x1174   : > { %v6677_v38 = vadd.f32 %v13957_v3, %v6624_v27  ;;  %v15581_v3 = vld [vmem:[#allocation54_spill] sm:$0xff] }
0x1175   : > { %6968 = vmatpush.bf16.msrb.mxu3 %v15572_v28 }
0x1176   : > { %v6725_v39 = vadd.f32 %v13931_v2, %v6677_v38 }
0x1179   : > { %6969 = vmatpush.bf16.msrb.mxu3 %v15574_v21 }
0x117b   : > { %v6674_v29 = vpop.f32.mrf.mxu1 }
0x117c   : > { %v13960_v44 = vadd.f32 %v6674_v29, %v6625_v16  ;;  %v15582_v29 = vld [vmem:[#allocation55_spill] sm:$0xff] }
0x117d   : > { %6970 = vmatpush.bf16.msrb.mxu3 %v15576_v20 }
0x117e   : > { %v6726_v36 = vadd.f32 %v13937_v11, %v13960_v44  ;;  %v15584_v11 = vld [vmem:[#allocation57_spill] sm:$0xff] }
0x1181   : > { %6971 = vmatpush.bf16.msrb.mxu3 %v15578_v9 }
0x1183   : > { %v6736_v56 = vpop.f32.mrf.mxu1 }
0x1185   : > { %6972 = vmatpush.bf16.msrb.mxu3 %v15580_v62 }
0x1189   : > { %6973 = vmatpush.bf16.msrb.mxu3 %v15582_v29 }
0x118b   : > { %v6738_v5 = vpop.f32.mrf.mxu1 }
0x118d   : > { %6974 = vmatpush.bf16.msrb.mxu3 %v15584_v11 }
0x1193   : > { %v6741_v58 = vpop.f32.mrf.mxu1 }
0x119b   : > { %v6743_v32 = vpop.f32.mrf.mxu1 }
0x119c   : > { %6767 = vmatpush.msra.mxu2 %v6743_v32 }
0x119e   : > { %6768 = vmatpush.msra.mxu2 %v6741_v58 }
0x11a0   : > { %6769 = vmatpush.msra.mxu2 %v6738_v5 }
0x11a2   : > { %6770 = vmatpush.msra.mxu2 %v6736_v56  ;;  %v6836_v56 = vpop.permute.xlu2 %6835 }
0x11a3   : > { %10861 = vmatmul.msk.f32.vlgmr.msra.gmra.mxu2 %vm5990_vm5, %v6747_v37 }
0x11a4   : > { %6898 = vmatpush.bf16.msrb.mxu2 %v10893_v25  ;;  %v15587_v25 = vld [vmem:[#allocation62_spill] sm:$0xff] }
0x11a8   : > { %6899 = vmatpush.bf16.msrb.mxu2 %v10885_v40  ;;  %v15593_v40 = vld [vmem:[#allocation314_spill] sm:$0xff] }
0x11ab   : > { %10862 = vmatmul.msk.f32.gmra.mxu2 %vm5990_vm5, %v6748_v7 }
0x11ac   : > { %6900 = vmatpush.bf16.msrb.mxu2 %v10877_v19  ;;  %v15599_v19 = vld [vmem:[#allocation82_spill] sm:$0xff] }
0x11b0   : > { %6901 = vmatpush.bf16.msrb.mxu2 %v10869_v60 }
0x11b4   : > { %6953 = vmatpush.bf16.msra.mxu2 %v12559_v8 }
0x11b8   : > { %6954 = vmatpush.bf16.msra.mxu2 %v15571_v0 }
0x11bc   : > { %6955 = vmatpush.bf16.msra.mxu2 %v15573_v41 }
0x11bd   : > { %v6820_v22 = vpop.f32.mrf.mxu0 }
0x11c0   : > { %6956 = vmatpush.bf16.msra.mxu2 %v15575_v50 }
0x11c4   : > { %6957 = vmatpush.bf16.msra.mxu2 %v15577_v63 }
0x11c5   : > { %v6823_v51 = vpop.f32.mrf.mxu0 }
0x11c8   : > { %6958 = vmatpush.bf16.msra.mxu2 %v15579_v14 }
0x11cc   : > { %6959 = vmatpush.bf16.msra.mxu2 %v15581_v3 }
0x11d0   : > { %6960 = vmatpush.bf16.msra.mxu2 %v15583_v24 }
0x1226   : > { %v6772_v55 = vpop.f32.mrf.mxu2 }
0x1227   : > { %v6778_v34 = vadd.f32 %v6772_v55, %v6725_v39  ;;  %v15604_v55 = vld [vmem:[#allocation64_spill] sm:$0xff] }
0x1228   : > { %v15605_v39 = vld [vmem:[#allocation68_spill] sm:$0xff] }
0x1229   : > { %v6826_v23 = vadd.f32 %v6820_v22, %v6778_v34 }
0x122b   : > { %v6838_v2 = vadd.f32 %v6831_v54, %v6826_v23 }
0x122d   : > { %v6840_v47 = vmax.f32 %v6838_v2, 0.0  ;;  %v15609_v2 = vld [vmem:[#allocation65_spill] sm:$0xff] }
0x122e   : > { %v6775_v48 = vpop.f32.mrf.mxu2 }
0x122f   : > { %v6779_v4 = vadd.f32 %v6775_v48, %v6726_v36 }
0x1231   : > { %v6827_v16 = vadd.f32 %v6823_v51, %v6779_v4  ;;  %v15607_v51 = vld [vmem:[#allocation61_spill] sm:$0xff]  ;;  %v15608_v4 = vld [vmem:[#allocation76_spill] sm:$0xff] }
0x1233   : > { %v6839_v5 = vadd.f32 %v6836_v56, %v6827_v16  ;;  %v15610_v16 = vld [vmem:[#allocation80_spill] sm:$0xff] }
0x1234   : > { %v15612_v56 = vld [vmem:[#allocation84_spill] sm:$0xff] }
0x1235   : > { %v6841_v58 = vmax.f32 %v6839_v5, 0.0 }
0x1237   : > { %v6842_v44 = vpack.c.bf16 %v6841_v58, %v6840_v47  ;;  %v15613_v47 = vld [vmem:[#allocation73_spill] sm:$0xff]  ;;  %v15614_v58 = vld [vmem:[#allocation88_spill] sm:$0xff] }
0x1239   : > { %10898 = vmatmul.msk.bf16.vlgmr.msrb.gmra.mxu2 %vm4297_vm2, %v6842_v44  ;;  %10899 = vmatmul.msk.bf16.vlgmr.msra.gmra.mxu3 %vm4297_vm2, %v6842_v44 }
0x123a   : > { %7008 = vmatpush.bf16.msrb.mxu2 %v12559_v8  ;;  %7021 = vmatpush.bf16.msra.mxu3 %v12562_v12 }
0x123e   : > { %7009 = vmatpush.bf16.msrb.mxu2 %v15571_v0  ;;  %7022 = vmatpush.bf16.msra.mxu3 %v15572_v28  ;;  %v6981_v28 = vld [vmem:[#allocation27] sm:$0xff] }
0x1242   : > { %7010 = vmatpush.bf16.msrb.mxu2 %v15573_v41  ;;  %7023 = vmatpush.bf16.msra.mxu3 %v15574_v21  ;;  %v15603_v41 = vld [vmem:[#allocation60_spill] sm:$0xff] }
0x1246   : > { %7011 = vmatpush.bf16.msrb.mxu2 %v15575_v50  ;;  %7024 = vmatpush.bf16.msra.mxu3 %v15576_v20  ;;  %v7034_v20 = vld [vmem:[#allocation28] sm:$0xff] }
0x124a   : > { %7012 = vmatpush.bf16.msrb.mxu2 %v15577_v63  ;;  %7025 = vmatpush.bf16.msra.mxu3 %v15578_v9 }
0x124e   : > { %7013 = vmatpush.bf16.msrb.mxu2 %v15579_v14  ;;  %7026 = vmatpush.bf16.msra.mxu3 %v15580_v62  ;;  %v15606_v62 = vld [vmem:[#allocation72_spill] sm:$0xff] }
0x1252   : > { %7014 = vmatpush.bf16.msrb.mxu2 %v15581_v3  ;;  %7027 = vmatpush.bf16.msra.mxu3 %v15582_v29  ;;  %v15611_v29 = vld [vmem:[#allocation69_spill] sm:$0xff] }
0x1256   : > { %7015 = vmatpush.bf16.msrb.mxu2 %v15583_v24  ;;  %7028 = vmatpush.bf16.msra.mxu3 %v15584_v11  ;;  %v15615_v11 = vld [vmem:[#allocation77_spill] sm:$0xff] }
0x12bc   : > { %v6903_v8 = vpop.f32.mrf.mxu2  ;;  %v6917_v12 = vpop.f32.mrf.mxu3 }
0x12c4   : > { %v6905_v32 = vpop.f32.mrf.mxu2  ;;  %v6919_v37 = vpop.f32.mrf.mxu3 }
0x12c5   : > { %v14016_v7 = vpack.c.bf16 %v6905_v32, %v6903_v8  ;;  %v14018_v17 = vpack.c.bf16 %v6919_v37, %v6917_v12  ;;  %v15616_v37 = vld [vmem:[#allocation81_spill] sm:$0xff] }
0x12c7   : > { %6933 = vmatmul.bf16.vlgmr.msra.gmra.mxu1 %v14016_v7  ;;  %6947 = vmatmul.bf16.vlgmr.msra.gmra.mxu0 %v14018_v17 }
0x12c8   : > { %6961 = vmatmul.bf16.vlgmr.msra.gmra.mxu2 %v14016_v7  ;;  %6975 = vmatmul.bf16.vlgmr.msrb.gmra.mxu3 %v14018_v17 }
0x12c9   : > { %7121 = vmatpush.bf16.msra.mxu2 %v15585_v33  ;;  %7135 = vmatpush.bf16.msrb.mxu3 %v15586_v45 }
0x12cd   : > { %7122 = vmatpush.bf16.msra.mxu2 %v15587_v25  ;;  %7136 = vmatpush.bf16.msrb.mxu3 %v15588_v57 }
0x12d1   : > { %7123 = vmatpush.bf16.msra.mxu2 %v15589_v10  ;;  %7137 = vmatpush.bf16.msrb.mxu3 %v15590_v15 }
0x12d5   : > { %7124 = vmatpush.bf16.msra.mxu2 %v15591_v6  ;;  %7138 = vmatpush.bf16.msrb.mxu3 %v15592_v1 }
0x12d7   : > { %6990 = vmatmul.bf16.vlgmr.msrb.gmra.mxu1 %v15593_v40  ;;  %7003 = vmatmul.bf16.vlgmr.msrb.gmra.mxu0 %v15594_v42 }
0x12d8   : > { %7016 = vmatmul.bf16.vlgmr.msrb.gmra.mxu2 %v15593_v40  ;;  %7029 = vmatmul.bf16.vlgmr.msra.gmra.mxu3 %v15594_v42 }
0x12d9   : > { %7125 = vmatpush.bf16.msra.mxu2 %v15595_v49  ;;  %7139 = vmatpush.bf16.msrb.mxu3 %v15596_v30 }
0x12dd   : > { %7126 = vmatpush.bf16.msra.mxu2 %v15597_v52  ;;  %7140 = vmatpush.bf16.msrb.mxu3 %v15598_v18 }
0x12e1   : > { %7127 = vmatpush.bf16.msra.mxu2 %v15599_v19  ;;  %7141 = vmatpush.bf16.msrb.mxu3 %v15600_v61 }
0x12e5   : > { %7128 = vmatpush.bf16.msra.mxu2 %v15601_v46  ;;  %7142 = vmatpush.bf16.msrb.mxu3 %v15602_v31 }
0x12e8   : > { %7129 = vmatmul.bf16.vlgmr.msra.gmra.mxu2 %v14016_v7  ;;  %7143 = vmatmul.bf16.vlgmr.msrb.gmra.mxu3 %v14018_v17 }
0x1344   : > { %v6934_v13 = vpop.f32.mrf.mxu1  ;;  %v6948_v26 = vpop.f32.mrf.mxu0 }
0x1345   : > { %v6949_v35 = vadd.f32 %v6948_v26, %v6934_v13  ;;  %v7178_v13 = vld [vmem:[#allocation27 + $0x8] sm:$0xff] }
0x134b   : > { %v6962_v60 = vpop.f32.mrf.mxu2  ;;  %v6976_v43 = vpop.f32.mrf.mxu3 }
0x134c   : > { %v6936_v59 = vpop.f32.mrf.mxu1  ;;  %v6950_v53 = vpop.f32.mrf.mxu0  ;;  %v6977_v48 = vadd.f32 %v6976_v43, %v6962_v60 }
0x134d   : > { %v6951_v0 = vadd.f32 %v6950_v53, %v6936_v59 }
0x134f   : > { %7095 = vmatpush.msra.mxu0 %v6951_v0 }
0x1351   : > { %7096 = vmatpush.msra.mxu0 %v6949_v35 }
0x1352   : > { %10902 = vmatmul.msk.f32.vlgmr.msra.gmra.mxu0 %vm5208_vm4, %v6981_v28 }
0x1353   : > { %7149 = vmatpush.bf16.msrb.mxu0 %v15603_v41  ;;  %v6964_v27 = vpop.f32.mrf.mxu2  ;;  %v6978_v21 = vpop.f32.mrf.mxu3 }
0x1354   : > { %v6991_v38 = vpop.f32.mrf.mxu1  ;;  %v7004_v22 = vpop.f32.mrf.mxu0  ;;  %v6979_v23 = vadd.f32 %v6978_v21, %v6964_v27  ;;  %v7277_v21 = vld [vmem:[#allocation28 + $0x8] sm:$0xff] }
0x1355   : > { %v7005_v50 = vadd.f32 %v7004_v22, %v6991_v38  ;;  %v15627_v38 = vld [vmem:[#allocation90_spill] sm:$0xff] }
0x1357   : > { %7150 = vmatpush.bf16.msrb.mxu0 %v15604_v55  ;;  %7053 = vmatpush.msra.mxu1 %v7005_v50 }
0x1358   : > { %10900 = vmatmul.msk.f32.vlgmr.msra.gmra.mxu1 %vm4365_vm3, %v7034_v20 }
0x135b   : > { %7151 = vmatpush.bf16.msrb.mxu0 %v15605_v39  ;;  %v7017_v63 = vpop.f32.mrf.mxu2  ;;  %v7030_v34 = vpop.f32.mrf.mxu3 }
0x135c   : > { %v7031_v9 = vadd.f32 %v7030_v34, %v7017_v63  ;;  %v6993_v14 = vpop.f32.mrf.mxu1  ;;  %v7006_v36 = vpop.f32.mrf.mxu0  ;;  %v15631_v63 = vld [vmem:[#allocation95_spill] sm:$0xff] }
0x135d   : > { %v15632_v34 = vld [vmem:[#allocation115_spill] sm:$0xff] }
0x135e   : > { %7073 = vmatpush.msrb.mxu1 %v7031_v9  ;;  %v15633_v9 = vld [vmem:[#allocation97_spill] sm:$0xff]  ;;  %v15634_v14 = vld [vmem:[#allocation119_spill] sm:$0xff] }
0x135f   : > { %7152 = vmatpush.bf16.msrb.mxu0 %v15606_v62  ;;  %v15635_v36 = vld [vmem:[#allocation99_spill] sm:$0xff] }
0x1360   : > { %7115 = vmatpush.msra.mxu1 %v6979_v23  ;;  %v15636_v23 = vld [vmem:[#allocation123_spill] sm:$0xff] }
0x1361   : > { %10901 = vmatmul.msk.f32.vlgmr.msrb.gmra.mxu1 %vm4365_vm3, %v7034_v20  ;;  %v15628_v20 = vld [vmem:[#allocation91_spill] sm:$0xff] }
0x1362   : > { %7116 = vmatpush.msra.mxu1 %v6977_v48  ;;  %v15638_v48 = vld [vmem:[#allocation127_spill] sm:$0xff] }
0x1363   : > { %7153 = vmatpush.bf16.msrb.mxu0 %v15608_v4  ;;  %v7019_v54 = vpop.f32.mrf.mxu2  ;;  %v7032_v3 = vpop.f32.mrf.mxu3 }
0x1364   : > { %7163 = vmatpush.bf16.msrb.mxu1 %v15607_v51  ;;  %v15641_v54 = vld [vmem:[#allocation135_spill] sm:$0xff]  ;;  %v15642_v3 = vld [vmem:[#allocation137_spill] sm:$0xff] }
0x1367   : > { %7154 = vmatpush.bf16.msrb.mxu0 %v15610_v16 }
0x1368   : > { %7164 = vmatpush.bf16.msrb.mxu1 %v15609_v2 }
0x1369   : > { %10903 = vmatmul.msk.f32.vlgmr.msra.gmra.mxu1 %vm5208_vm4, %v6981_v28 }
0x136b   : > { %7155 = vmatpush.bf16.msrb.mxu0 %v15612_v56  ;;  %v7130_v5 = vpop.f32.mrf.mxu2  ;;  %v7144_v24 = vpop.f32.mrf.mxu3 }
0x136c   : > { %7165 = vmatpush.bf16.msrb.mxu1 %v15611_v29  ;;  %v7145_v32 = vadd.f32 %v7144_v24, %v7130_v5  ;;  %v15644_v24 = vld [vmem:[#allocation94_spill] sm:$0xff] }
0x136f   : > { %7156 = vmatpush.bf16.msrb.mxu0 %v15614_v58 }
0x1370   : > { %7166 = vmatpush.bf16.msrb.mxu1 %v15613_v47 }
0x1372   : > { %7157 = vmatmul.bf16.vlgmr.msrb.gmra.mxu0 %v14016_v7 }
0x1373   : > { %7224 = vmatpush.bf16.msra.mxu0 %v15585_v33  ;;  %v7132_v44 = vpop.f32.mrf.mxu2  ;;  %v7146_v8 = vpop.f32.mrf.mxu3  ;;  %v15617_v33 = vld [vmem:[#allocation85_spill] sm:$0xff] }
0x1374   : > { %7167 = vmatpush.bf16.msrb.mxu1 %v15615_v11  ;;  %v7147_v12 = vadd.f32 %v7146_v8, %v7132_v44  ;;  %v15647_v44 = vld [vmem:[#allocation100_spill] sm:$0xff] }
0x1376   : > { %7196 = vmatpush.msrb.mxu2 %v7147_v12  ;;  %v15648_v12 = vld [vmem:[#allocation102_spill] sm:$0xff] }
0x1377   : > { %7225 = vmatpush.bf16.msra.mxu0 %v15587_v25  ;;  %v15618_v25 = vld [vmem:[#allocation89_spill] sm:$0xff] }
0x1378   : > { %7168 = vmatpush.bf16.msrb.mxu1 %v15616_v37  ;;  %7197 = vmatpush.msrb.mxu2 %v7145_v32 }
0x1379   : > { %10904 = vmatmul.msk.f32.vlgmr.msrb.gmra.mxu2 %vm5208_vm4, %v7178_v13 }
0x137a   : > { %7250 = vmatpush.bf16.msra.mxu2 %v15603_v41 }
0x137b   : > { %7226 = vmatpush.bf16.msra.mxu0 %v15589_v10  ;;  %v15621_v10 = vld [vmem:[#allocation112_spill] sm:$0xff] }
0x137c   : > { %7169 = vmatpush.bf16.msrb.mxu1 %v15617_v33 }
0x137e   : > { %7251 = vmatpush.bf16.msra.mxu2 %v15604_v55  ;;  %v15629_v55 = vld [vmem:[#allocation93_spill] sm:$0xff] }
0x137f   : > { %7227 = vmatpush.bf16.msra.mxu0 %v15591_v6  ;;  %v15623_v6 = vld [vmem:[#allocation120_spill] sm:$0xff] }
0x1380   : > { %7170 = vmatpush.bf16.msrb.mxu1 %v15618_v25 }
0x1382   : > { %7252 = vmatpush.bf16.msra.mxu2 %v15605_v39  ;;  %v15630_v39 = vld [vmem:[#allocation111_spill] sm:$0xff] }
0x1383   : > { %7228 = vmatpush.bf16.msra.mxu0 %v15595_v49  ;;  %7171 = vmatmul.bf16.vlgmr.msrb.gmra.mxu1 %v14018_v17  ;;  %v15625_v49 = vld [vmem:[#allocation128_spill] sm:$0xff] }
0x1384   : > { %7237 = vmatpush.bf16.msra.mxu1 %v15586_v45  ;;  %v15619_v45 = vld [vmem:[#allocation103_spill] sm:$0xff] }
0x1386   : > { %7253 = vmatpush.bf16.msra.mxu2 %v15606_v62  ;;  %v15637_v62 = vld [vmem:[#allocation101_spill] sm:$0xff] }
0x1387   : > { %7229 = vmatpush.bf16.msra.mxu0 %v15597_v52 }
0x1388   : > { %7238 = vmatpush.bf16.msra.mxu1 %v15588_v57  ;;  %v15620_v57 = vld [vmem:[#allocation107_spill] sm:$0xff] }
0x138a   : > { %7254 = vmatpush.bf16.msra.mxu2 %v15608_v4  ;;  %v15640_v4 = vld [vmem:[#allocation131_spill] sm:$0xff] }
0x138b   : > { %7230 = vmatpush.bf16.msra.mxu0 %v15599_v19 }
0x138c   : > { %7239 = vmatpush.bf16.msra.mxu1 %v15590_v15  ;;  %v15622_v15 = vld [vmem:[#allocation116_spill] sm:$0xff] }
0x138e   : > { %7255 = vmatpush.bf16.msra.mxu2 %v15610_v16 }
0x138f   : > { %7231 = vmatpush.bf16.msra.mxu0 %v15601_v46 }
0x1390   : > { %7240 = vmatpush.bf16.msra.mxu1 %v15592_v1  ;;  %v15624_v1 = vld [vmem:[#allocation124_spill] sm:$0xff] }
0x1392   : > { %7232 = vmatmul.bf16.vlgmr.msra.gmra.mxu0 %v15593_v40  ;;  %7256 = vmatpush.bf16.msra.mxu2 %v15612_v56  ;;  %v15643_v56 = vld [vmem:[#allocation92_spill] sm:$0xff] }
0x1394   : > { %7241 = vmatpush.bf16.msra.mxu1 %v15596_v30  ;;  %v15626_v30 = vld [vmem:[#allocation132_spill] sm:$0xff] }
0x1396   : > { %7257 = vmatpush.bf16.msra.mxu2 %v15614_v58 }
0x1398   : > { %7242 = vmatpush.bf16.msra.mxu1 %v15598_v18 }
0x1399   : > { %7258 = vmatmul.bf16.vlgmr.msra.gmra.mxu2 %v15593_v40 }
0x139a   : > { %7323 = vmatpush.bf16.msrb.mxu2 %v15619_v45 }
0x139c   : > { %7243 = vmatpush.bf16.msra.mxu1 %v15600_v61 }
0x139e   : > { %7324 = vmatpush.bf16.msrb.mxu2 %v15620_v57 }
0x13a0   : > { %7244 = vmatpush.bf16.msra.mxu1 %v15602_v31 }
0x13a2   : > { %7325 = vmatpush.bf16.msrb.mxu2 %v15621_v10 }
0x13a3   : > { %7245 = vmatmul.bf16.vlgmr.msra.gmra.mxu1 %v15594_v42 }
0x13a6   : > { %7326 = vmatpush.bf16.msrb.mxu2 %v15622_v15 }
0x13aa   : > { %7327 = vmatpush.bf16.msrb.mxu2 %v15623_v6 }
0x13ae   : > { %7328 = vmatpush.bf16.msrb.mxu2 %v15624_v1 }
0x13b2   : > { %7329 = vmatpush.bf16.msrb.mxu2 %v15625_v49 }
0x13b6   : > { %7330 = vmatpush.bf16.msrb.mxu2 %v15626_v30 }
0x13b9   : > { %7331 = vmatmul.bf16.vlgmr.msrb.gmra.mxu2 %v14016_v7 }
0x13cf   : > { %v14109_v19 = vpop.f32.mrf.mxu0 }
0x13d5   : > { %v14105_v52 = vpop.f32.mrf.mxu1 }
0x13de   : > { %v14107_v18 = vpop.f32.mrf.mxu1 }
0x13e6   : > { %v14111_v61 = vpop.f32.mrf.mxu1 }
0x13ef   : > { %v7158_v46 = vpop.f32.mrf.mxu0 }
0x13f7   : > { %v7160_v26 = vpop.f32.mrf.mxu0 }
0x13fc   : > { %v14116_v35 = vpop.f32.mrf.mxu2 }
0x1400   : > { %v7172_v31 = vpop.f32.mrf.mxu1 }
0x1401   : > { %v7173_v59 = vadd.f32 %v7172_v31, %v7158_v46  ;;  %v15652_v46 = vld [vmem:[#allocation109_spill] sm:$0xff] }
0x1402   : > { %v15653_v31 = vld [vmem:[#allocation113_spill] sm:$0xff] }
0x1408   : > { %v7174_v60 = vpop.f32.mrf.mxu1 }
0x1409   : > { %v7175_v43 = vadd.f32 %v7174_v60, %v7160_v26  ;;  %v15654_v26 = vld [vmem:[#allocation117_spill] sm:$0xff] }
0x140a   : > { %v15655_v60 = vld [vmem:[#allocation121_spill] sm:$0xff] }
0x140b   : > { %7216 = vmatpush.msra.mxu3 %v7175_v43  ;;  %v15656_v43 = vld [vmem:[#allocation125_spill] sm:$0xff] }
0x140d   : > { %7217 = vmatpush.msra.mxu3 %v7173_v59  ;;  %v15657_v59 = vld [vmem:[#allocation129_spill] sm:$0xff] }
0x140e   : > { %10905 = vmatmul.msk.f32.vlgmr.msra.gmra.mxu3 %vm5208_vm4, %v7178_v13 }
0x140f   : > { %v7233_v53 = vpop.f32.mrf.mxu0  ;;  %7263 = vmatpush.bf16.msrb.mxu3 %v15607_v51  ;;  %v15639_v51 = vld [vmem:[#allocation104_spill] sm:$0xff] }
0x1413   : > { %7264 = vmatpush.bf16.msrb.mxu3 %v15609_v2 }
0x1417   : > { %v7235_v0 = vpop.f32.mrf.mxu0  ;;  %7265 = vmatpush.bf16.msrb.mxu3 %v15611_v29 }
0x141b   : > { %7266 = vmatpush.bf16.msrb.mxu3 %v15613_v47  ;;  %v15645_v47 = vld [vmem:[#allocation96_spill] sm:$0xff] }
0x141c   : > { %v7259_v27 = vpop.f32.mrf.mxu2 }
0x141f   : > { %7267 = vmatpush.bf16.msrb.mxu3 %v15615_v11  ;;  %v15646_v11 = vld [vmem:[#allocation98_spill] sm:$0xff] }
0x1420   : > { %v7246_v28 = vpop.f32.mrf.mxu1 }
0x1421   : > { %v7247_v41 = vadd.f32 %v7246_v28, %v7233_v53  ;;  %v15658_v53 = vld [vmem:[#allocation133_spill] sm:$0xff] }
0x1423   : > { %7296 = vmatpush.msrb.mxu0 %v7247_v41  ;;  %7268 = vmatpush.bf16.msrb.mxu3 %v15616_v37  ;;  %v15649_v37 = vld [vmem:[#allocation105_spill] sm:$0xff] }
0x1424   : > { %10906 = vmatmul.msk.f32.vlgmr.msrb.gmra.mxu0 %vm4365_vm3, %v7277_v21  ;;  %v7261_v50 = vpop.f32.mrf.mxu2 }
0x1425   : > { %7351 = vmatpush.bf16.msra.mxu0 %v15627_v38  ;;  %v7479_v50 = vld [vmem:[#allocation28 + $0x10] sm:$0xff] }
0x1427   : > { %7269 = vmatpush.bf16.msrb.mxu3 %v15617_v33  ;;  %v15650_v33 = vld [vmem:[#allocation108_spill] sm:$0xff] }
0x1428   : > { %v7248_v22 = vpop.f32.mrf.mxu1 }
0x1429   : > { %7352 = vmatpush.bf16.msra.mxu0 %v15628_v20 }
0x142b   : > { %7270 = vmatpush.bf16.msrb.mxu3 %v15618_v25 }
0x142d   : > { %7353 = vmatpush.bf16.msra.mxu0 %v15629_v55 }
0x142e   : > { %7271 = vmatmul.bf16.vlgmr.msrb.gmra.mxu3 %v15594_v42 }
0x142f   : > { %7337 = vmatpush.bf16.msra.mxu3 %v15630_v39 }
0x1431   : > { %7354 = vmatpush.bf16.msra.mxu0 %v15631_v63 }
0x1433   : > { %7338 = vmatpush.bf16.msra.mxu3 %v15632_v34 }
0x1435   : > { %7355 = vmatpush.bf16.msra.mxu0 %v15633_v9 }
0x1437   : > { %7339 = vmatpush.bf16.msra.mxu3 %v15634_v14 }
0x1439   : > { %7356 = vmatpush.bf16.msra.mxu0 %v15635_v36 }
0x143b   : > { %7340 = vmatpush.bf16.msra.mxu3 %v15636_v23 }
0x143c   : > { %v7332_v32 = vpop.f32.mrf.mxu2 }
0x143d   : > { %7357 = vmatpush.bf16.msra.mxu0 %v15637_v62 }
0x143f   : > { %7341 = vmatpush.bf16.msra.mxu3 %v15638_v48 }
0x1441   : > { %7358 = vmatpush.bf16.msra.mxu0 %v15639_v51 }
0x1443   : > { %7342 = vmatpush.bf16.msra.mxu3 %v15640_v4 }
0x1444   : > { %7359 = vmatmul.bf16.vlgmr.msra.gmra.mxu0 %v14016_v7 }
0x1445   : > { %7426 = vmatpush.bf16.msrb.mxu0 %v15619_v45  ;;  %v7334_v45 = vpop.f32.mrf.mxu2 }
0x1447   : > { %7343 = vmatpush.bf16.msra.mxu3 %v15641_v54 }
0x1449   : > { %7427 = vmatpush.bf16.msrb.mxu0 %v15620_v57 }
0x144b   : > { %7344 = vmatpush.bf16.msra.mxu3 %v15642_v3 }
0x144d   : > { %7428 = vmatpush.bf16.msrb.mxu0 %v15621_v10 }
0x144e   : > { %7345 = vmatmul.bf16.vlgmr.msra.gmra.mxu3 %v14018_v17 }
0x1451   : > { %7429 = vmatpush.bf16.msrb.mxu0 %v15622_v15 }
0x1455   : > { %7430 = vmatpush.bf16.msrb.mxu0 %v15623_v6  ;;  %v7380_v6 = vld [vmem:[#allocation27 + $0x10] sm:$0xff] }
0x1459   : > { %7431 = vmatpush.bf16.msrb.mxu0 %v15624_v1 }
0x145d   : > { %7432 = vmatpush.bf16.msrb.mxu0 %v15625_v49 }
0x1461   : > { %7433 = vmatpush.bf16.msrb.mxu0 %v15626_v30  ;;  %v15651_v30 = vld [vmem:[#allocation106_spill] sm:$0xff] }
0x1464   : > { %7434 = vmatmul.bf16.vlgmr.msrb.gmra.mxu0 %v15593_v40 }
0x1491   : > { %v14153_v2 = vpop.f32.mrf.mxu3 }
0x14a1   : > { %v14159_v58 = vpop.f32.mrf.mxu0 }
0x14b1   : > { %v7272_v16 = vpop.f32.mrf.mxu3 }
0x14b2   : > { %v7273_v29 = vadd.f32 %v7272_v16, %v7259_v27  ;;  %v15670_v16 = vld [vmem:[#allocation126_spill] sm:$0xff] }
0x14b4   : > { %7316 = vmatpush.msrb.mxu1 %v7273_v29  ;;  %v15671_v29 = vld [vmem:[#allocation159_spill] sm:$0xff] }
0x14b5   : > { %10907 = vmatmul.msk.f32.vlgmr.msrb.gmra.mxu1 %vm4365_vm3, %v7277_v21 }
0x14b6   : > { %7365 = vmatpush.bf16.msra.mxu1 %v15643_v56 }
0x14b9   : > { %v7274_v5 = vpop.f32.mrf.mxu3 }
0x14ba   : > { %7366 = vmatpush.bf16.msra.mxu1 %v15644_v24  ;;  %v15673_v5 = vld [vmem:[#allocation134_spill] sm:$0xff] }
0x14be   : > { %7367 = vmatpush.bf16.msra.mxu1 %v15645_v47 }
0x14c1   : > { %v7360_v8 = vpop.f32.mrf.mxu0 }
0x14c2   : > { %7368 = vmatpush.bf16.msra.mxu1 %v15646_v11 }
0x14c6   : > { %7369 = vmatpush.bf16.msra.mxu1 %v15647_v44 }
0x14c9   : > { %v7362_v25 = vpop.f32.mrf.mxu0 }
0x14ca   : > { %7370 = vmatpush.bf16.msra.mxu1 %v15648_v12 }
0x14ce   : > { %7371 = vmatpush.bf16.msra.mxu1 %v15649_v37 }
0x14d1   : > { %v7346_v13 = vpop.f32.mrf.mxu3 }
0x14d2   : > { %7372 = vmatpush.bf16.msra.mxu1 %v15650_v33  ;;  %v7347_v15 = vadd.f32 %v7346_v13, %v7332_v32  ;;  %v15676_v32 = vld [vmem:[#allocation139_spill] sm:$0xff] }
0x14d5   : > { %7373 = vmatmul.bf16.vlgmr.msra.gmra.mxu1 %v14018_v17 }
0x14d6   : > { %7439 = vmatpush.bf16.msrb.mxu1 %v15630_v39 }
0x14d9   : > { %v7348_v57 = vpop.f32.mrf.mxu3 }
0x14da   : > { %v7349_v10 = vadd.f32 %v7348_v57, %v7334_v45  ;;  %7440 = vmatpush.bf16.msrb.mxu1 %v15632_v34  ;;  %v15661_v34 = vld [vmem:[#allocation149_spill] sm:$0xff]  ;;  %v15680_v57 = vld [vmem:[#allocation143_spill] sm:$0xff] }
0x14dc   : > { %7398 = vmatpush.msra.mxu2 %v7349_v10 }
0x14de   : > { %7441 = vmatpush.bf16.msrb.mxu1 %v15634_v14  ;;  %7399 = vmatpush.msra.mxu2 %v7347_v15  ;;  %v15681_v15 = vld [vmem:[#allocation145_spill] sm:$0xff] }
0x14df   : > { %10908 = vmatmul.msk.f32.vlgmr.msra.gmra.mxu2 %vm5208_vm4, %v7380_v6 }
0x14e0   : > { %7452 = vmatpush.bf16.msrb.mxu2 %v15627_v38 }
0x14e1   : > { %v7435_v1 = vpop.f32.mrf.mxu0 }
0x14e2   : > { %7442 = vmatpush.bf16.msrb.mxu1 %v15636_v23  ;;  %v15664_v23 = vld [vmem:[#allocation114_spill] sm:$0xff] }
0x14e4   : > { %7453 = vmatpush.bf16.msrb.mxu2 %v15628_v20  ;;  %v15659_v20 = vld [vmem:[#allocation144_spill] sm:$0xff] }
0x14e6   : > { %7443 = vmatpush.bf16.msrb.mxu1 %v15638_v48  ;;  %v15666_v48 = vld [vmem:[#allocation118_spill] sm:$0xff] }
0x14e8   : > { %7454 = vmatpush.bf16.msrb.mxu2 %v15629_v55 }
0x14e9   : > { %v7437_v49 = vpop.f32.mrf.mxu0 }
0x14ea   : > { %7444 = vmatpush.bf16.msrb.mxu1 %v15640_v4  ;;  %v15667_v4 = vld [vmem:[#allocation155_spill] sm:$0xff] }
0x14ec   : > { %7455 = vmatpush.bf16.msrb.mxu2 %v15631_v63  ;;  %v15660_v63 = vld [vmem:[#allocation146_spill] sm:$0xff] }
0x14ee   : > { %7445 = vmatpush.bf16.msrb.mxu1 %v15641_v54  ;;  %v15668_v54 = vld [vmem:[#allocation122_spill] sm:$0xff] }
0x14f0   : > { %7456 = vmatpush.bf16.msrb.mxu2 %v15633_v9  ;;  %v15662_v9 = vld [vmem:[#allocation110_spill] sm:$0xff] }
0x14f2   : > { %7446 = vmatpush.bf16.msrb.mxu1 %v15642_v3  ;;  %v15669_v3 = vld [vmem:[#allocation157_spill] sm:$0xff] }
0x14f4   : > { %7457 = vmatpush.bf16.msrb.mxu2 %v15635_v36  ;;  %v15663_v36 = vld [vmem:[#allocation151_spill] sm:$0xff] }
0x14f5   : > { %7447 = vmatmul.bf16.vlgmr.msrb.gmra.mxu1 %v15594_v42 }
0x14f8   : > { %7458 = vmatpush.bf16.msrb.mxu2 %v15637_v62  ;;  %v15665_v62 = vld [vmem:[#allocation153_spill] sm:$0xff] }
0x14fc   : > { %7459 = vmatpush.bf16.msrb.mxu2 %v15639_v51 }
0x14ff   : > { %7460 = vmatmul.bf16.vlgmr.msrb.gmra.mxu2 %v15593_v40 }
0x1500   : > { %7525 = vmatpush.bf16.msra.mxu2 %v15651_v30 }
0x1504   : > { %7526 = vmatpush.bf16.msra.mxu2 %v15652_v46 }
0x1508   : > { %7527 = vmatpush.bf16.msra.mxu2 %v15653_v31 }
0x150c   : > { %7528 = vmatpush.bf16.msra.mxu2 %v15654_v26 }
0x1510   : > { %7529 = vmatpush.bf16.msra.mxu2 %v15655_v60 }
0x1514   : > { %7530 = vmatpush.bf16.msra.mxu2 %v15656_v43 }
0x1518   : > { %7531 = vmatpush.bf16.msra.mxu2 %v15657_v59 }
0x151c   : > { %7532 = vmatpush.bf16.msra.mxu2 %v15658_v53 }
0x151f   : > { %7533 = vmatmul.bf16.vlgmr.msra.gmra.mxu2 %v14016_v7 }
0x1532   : > { %v14195_v0 = vpop.f32.mrf.mxu1 }
0x1552   : > { %v7374_v28 = vpop.f32.mrf.mxu1 }
0x1553   : > { %v7375_v21 = vadd.f32 %v7374_v28, %v7360_v8  ;;  %v15675_v8 = vld [vmem:[#allocation138_spill] sm:$0xff] }
0x1554   : > { %v15684_v28 = vld [vmem:[#allocation162_spill] sm:$0xff] }
0x155a   : > { %v7376_v41 = vpop.f32.mrf.mxu1 }
0x155b   : > { %v7377_v27 = vadd.f32 %v7376_v41, %v7362_v25  ;;  %v15679_v25 = vld [vmem:[#allocation142_spill] sm:$0xff]  ;;  %v15685_v41 = vld [vmem:[#allocation164_spill] sm:$0xff] }
0x155d   : > { %7418 = vmatpush.msrb.mxu3 %v7377_v27  ;;  %v15686_v27 = vld [vmem:[#allocation165_spill] sm:$0xff] }
0x155f   : > { %7419 = vmatpush.msrb.mxu3 %v7375_v21  ;;  %v15687_v21 = vld [vmem:[#allocation166_spill] sm:$0xff] }
0x1560   : > { %10909 = vmatmul.msk.f32.vlgmr.msrb.gmra.mxu3 %vm5208_vm4, %v7380_v6 }
0x1561   : > { %7465 = vmatpush.bf16.msra.mxu3 %v15643_v56  ;;  %v15672_v56 = vld [vmem:[#allocation130_spill] sm:$0xff] }
0x1562   : > { %v14206_v55 = vpop.f32.mrf.mxu2 }
0x1565   : > { %7466 = vmatpush.bf16.msra.mxu3 %v15644_v24  ;;  %v15674_v24 = vld [vmem:[#allocation136_spill] sm:$0xff] }
0x1569   : > { %7467 = vmatpush.bf16.msra.mxu3 %v15645_v47 }
0x156d   : > { %7468 = vmatpush.bf16.msra.mxu3 %v15646_v11 }
0x1571   : > { %7469 = vmatpush.bf16.msra.mxu3 %v15647_v44 }
0x1572   : > { %v7448_v38 = vpop.f32.mrf.mxu1 }
0x1573   : > { %v7449_v22 = vadd.f32 %v7448_v38, %v7435_v1  ;;  %v15682_v1 = vld [vmem:[#allocation147_spill] sm:$0xff] }
0x1574   : > { %v15688_v38 = vld [vmem:[#allocation167_spill] sm:$0xff] }
0x1575   : > { %7498 = vmatpush.msra.mxu0 %v7449_v22  ;;  %7470 = vmatpush.bf16.msra.mxu3 %v15648_v12  ;;  %v15689_v22 = vld [vmem:[#allocation168_spill] sm:$0xff] }
0x1576   : > { %10910 = vmatmul.msk.f32.vlgmr.msra.gmra.mxu0 %vm4365_vm3, %v7479_v50 }
0x1577   : > { %7553 = vmatpush.bf16.msrb.mxu0 %v15659_v20 }
0x1579   : > { %7471 = vmatpush.bf16.msra.mxu3 %v15649_v37  ;;  %v15677_v37 = vld [vmem:[#allocation140_spill] sm:$0xff] }
0x157a   : > { %v7450_v39 = vpop.f32.mrf.mxu1 }
0x157b   : > { %7554 = vmatpush.bf16.msrb.mxu0 %v15660_v63 }
0x157d   : > { %7472 = vmatpush.bf16.msra.mxu3 %v15650_v33  ;;  %v15678_v33 = vld [vmem:[#allocation141_spill] sm:$0xff] }
0x157f   : > { %7555 = vmatpush.bf16.msrb.mxu0 %v15661_v34 }
0x1580   : > { %7473 = vmatmul.bf16.vlgmr.msra.gmra.mxu3 %v15594_v42 }
0x1581   : > { %7539 = vmatpush.bf16.msrb.mxu3 %v15662_v9 }
0x1582   : > { %v7461_v14 = vpop.f32.mrf.mxu2 }
0x1583   : > { %7556 = vmatpush.bf16.msrb.mxu0 %v15663_v36 }
0x1585   : > { %7540 = vmatpush.bf16.msrb.mxu3 %v15664_v23 }
0x1587   : > { %7557 = vmatpush.bf16.msrb.mxu0 %v15665_v62 }
0x1589   : > { %7541 = vmatpush.bf16.msrb.mxu3 %v15666_v48 }
0x158a   : > { %v7463_v51 = vpop.f32.mrf.mxu2 }
0x158b   : > { %7558 = vmatpush.bf16.msrb.mxu0 %v15667_v4 }
0x158d   : > { %7542 = vmatpush.bf16.msrb.mxu3 %v15668_v54 }
0x158f   : > { %7559 = vmatpush.bf16.msrb.mxu0 %v15669_v3 }
0x1591   : > { %7543 = vmatpush.bf16.msrb.mxu3 %v15670_v16 }
0x1593   : > { %7560 = vmatpush.bf16.msrb.mxu0 %v15671_v29 }
0x1595   : > { %7544 = vmatpush.bf16.msrb.mxu3 %v15672_v56 }
0x1596   : > { %7561 = vmatmul.bf16.vlgmr.msrb.gmra.mxu0 %v14016_v7 }
0x1597   : > { %7628 = vmatpush.bf16.msra.mxu0 %v15651_v30 }
0x1599   : > { %7545 = vmatpush.bf16.msrb.mxu3 %v15673_v5 }
0x159b   : > { %7629 = vmatpush.bf16.msra.mxu0 %v15652_v46 }
0x159d   : > { %7546 = vmatpush.bf16.msrb.mxu3 %v15674_v24 }
0x159f   : > { %7630 = vmatpush.bf16.msra.mxu0 %v15653_v31 }
0x15a0   : > { %7547 = vmatmul.bf16.vlgmr.msrb.gmra.mxu3 %v14018_v17 }
0x15a2   : > { %v7534_v10 = vpop.f32.mrf.mxu2 }
0x15a3   : > { %7631 = vmatpush.bf16.msra.mxu0 %v15654_v26 }
0x15a7   : > { %7632 = vmatpush.bf16.msra.mxu0 %v15655_v60  ;;  %v7582_v60 = vld [vmem:[#allocation27 + $0x18] sm:$0xff] }
0x15aa   : > { %v7536_v30 = vpop.f32.mrf.mxu2 }
0x15ab   : > { %7633 = vmatpush.bf16.msra.mxu0 %v15656_v43 }
0x15af   : > { %7634 = vmatpush.bf16.msra.mxu0 %v15657_v59 }
0x15b3   : > { %7635 = vmatpush.bf16.msra.mxu0 %v15658_v53  ;;  %v15683_v53 = vld [vmem:[#allocation160_spill] sm:$0xff] }
0x15b6   : > { %7636 = vmatmul.bf16.vlgmr.msra.gmra.mxu0 %v15593_v40 }
0x15e3   : > { %v14237_v47 = vpop.f32.mrf.mxu3 }
0x15f3   : > { %v14243_v13 = vpop.f32.mrf.mxu0 }
0x1603   : > { %v7474_v11 = vpop.f32.mrf.mxu3 }
0x1604   : > { %v7475_v44 = vadd.f32 %v7474_v11, %v7461_v14 }
0x1606   : > { %7518 = vmatpush.msra.mxu1 %v7475_v44  ;;  %v15699_v44 = vld [vmem:[#allocation175_spill] sm:$0xff] }
0x1607   : > { %10911 = vmatmul.msk.f32.vlgmr.msra.gmra.mxu1 %vm4365_vm3, %v7479_v50  ;;  %v15690_v50 = vld [vmem:[#allocation169_spill] sm:$0xff] }
0x1608   : > { %7567 = vmatpush.bf16.msrb.mxu1 %v15675_v8 }
0x160b   : > { %v7476_v12 = vpop.f32.mrf.mxu3 }
0x160c   : > { %7568 = vmatpush.bf16.msrb.mxu1 %v15676_v32  ;;  %v15701_v12 = vld [vmem:[#allocation176_spill] sm:$0xff] }
0x1610   : > { %7569 = vmatpush.bf16.msrb.mxu1 %v15677_v37 }
0x1613   : > { %v7562_v45 = vpop.f32.mrf.mxu0 }
0x1614   : > { %7570 = vmatpush.bf16.msrb.mxu1 %v15678_v33 }
0x1618   : > { %7571 = vmatpush.bf16.msrb.mxu1 %v15679_v25 }
0x161b   : > { %v7564_v49 = vpop.f32.mrf.mxu0 }
0x161c   : > { %7572 = vmatpush.bf16.msrb.mxu1 %v15680_v57 }
0x1620   : > { %7573 = vmatpush.bf16.msrb.mxu1 %v15681_v15 }
0x1623   : > { %v7548_v6 = vpop.f32.mrf.mxu3 }
0x1624   : > { %7574 = vmatpush.bf16.msrb.mxu1 %v15682_v1  ;;  %v7549_v26 = vadd.f32 %v7548_v6, %v7534_v10  ;;  %v15707_v6 = vld [vmem:[#allocation179_spill] sm:$0xff] }
0x1627   : > { %7575 = vmatmul.bf16.vlgmr.msrb.gmra.mxu1 %v14018_v17 }
0x1628   : > { %7641 = vmatpush.bf16.msra.mxu1 %v15662_v9 }
0x162b   : > { %v7550_v46 = vpop.f32.mrf.mxu3 }
0x162c   : > { %v7551_v31 = vadd.f32 %v7550_v46, %v7536_v30  ;;  %7642 = vmatpush.bf16.msra.mxu1 %v15664_v23  ;;  %v7681_v23 = vld [vmem:[#allocation28 + $0x18] sm:$0xff]  ;;  %v15709_v30 = vld [vmem:[#allocation183_spill] sm:$0xff] }
0x162e   : > { %7600 = vmatpush.msrb.mxu2 %v7551_v31  ;;  %v15710_v31 = vld [vmem:[#allocation185_spill] sm:$0xff] }
0x1630   : > { %7643 = vmatpush.bf16.msra.mxu1 %v15666_v48  ;;  %7601 = vmatpush.msrb.mxu2 %v7549_v26  ;;  %v15711_v26 = vld [vmem:[#allocation187_spill] sm:$0xff] }
0x1631   : > { %10912 = vmatmul.msk.f32.vlgmr.msrb.gmra.mxu2 %vm5208_vm4, %v7582_v60 }
0x1632   : > { %7654 = vmatpush.bf16.msra.mxu2 %v15659_v20 }
0x1633   : > { %v7637_v43 = vpop.f32.mrf.mxu0 }
0x1634   : > { %7644 = vmatpush.bf16.msra.mxu1 %v15668_v54  ;;  %v15693_v54 = vld [vmem:[#allocation172_spill] sm:$0xff] }
0x1636   : > { %7655 = vmatpush.bf16.msra.mxu2 %v15660_v63 }
0x1638   : > { %7645 = vmatpush.bf16.msra.mxu1 %v15670_v16 }
0x163a   : > { %7656 = vmatpush.bf16.msra.mxu2 %v15661_v34 }
0x163b   : > { %v7639_v59 = vpop.f32.mrf.mxu0 }
0x163c   : > { %7646 = vmatpush.bf16.msra.mxu1 %v15672_v56  ;;  %v15696_v56 = vld [vmem:[#allocation150_spill] sm:$0xff] }
0x163e   : > { %7657 = vmatpush.bf16.msra.mxu2 %v15663_v36 }
0x1640   : > { %7647 = vmatpush.bf16.msra.mxu1 %v15673_v5  ;;  %v15697_v5 = vld [vmem:[#allocation174_spill] sm:$0xff] }
0x1642   : > { %7658 = vmatpush.bf16.msra.mxu2 %v15665_v62  ;;  %v15691_v62 = vld [vmem:[#allocation170_spill] sm:$0xff] }
0x1644   : > { %7648 = vmatpush.bf16.msra.mxu1 %v15674_v24  ;;  %v15698_v24 = vld [vmem:[#allocation152_spill] sm:$0xff] }
0x1646   : > { %7659 = vmatpush.bf16.msra.mxu2 %v15667_v4  ;;  %v15692_v4 = vld [vmem:[#allocation171_spill] sm:$0xff] }
0x1647   : > { %7649 = vmatmul.bf16.vlgmr.msra.gmra.mxu1 %v15594_v42 }
0x164a   : > { %7660 = vmatpush.bf16.msra.mxu2 %v15669_v3  ;;  %v15694_v3 = vld [vmem:[#allocation148_spill] sm:$0xff] }
0x164e   : > { %7661 = vmatpush.bf16.msra.mxu2 %v15671_v29  ;;  %v15695_v29 = vld [vmem:[#allocation173_spill] sm:$0xff] }
0x1651   : > { %7662 = vmatmul.bf16.vlgmr.msra.gmra.mxu2 %v15593_v40 }
0x1652   : > { %7727 = vmatpush.bf16.msrb.mxu2 %v15683_v53 }
0x1656   : > { %7728 = vmatpush.bf16.msrb.mxu2 %v15684_v28 }
0x165a   : > { %7729 = vmatpush.bf16.msrb.mxu2 %v15685_v41 }
0x165e   : > { %7730 = vmatpush.bf16.msrb.mxu2 %v15686_v27 }
0x1662   : > { %7731 = vmatpush.bf16.msrb.mxu2 %v15687_v21 }
0x1666   : > { %7732 = vmatpush.bf16.msrb.mxu2 %v15688_v38 }
0x166a   : > { %7733 = vmatpush.bf16.msrb.mxu2 %v15689_v22 }
0x166e   : > { %7734 = vmatpush.bf16.msrb.mxu2 %v15690_v50 }
0x1671   : > { %7735 = vmatmul.bf16.vlgmr.msrb.gmra.mxu2 %v14016_v7 }
0x1684   : > { %v14279_v20 = vpop.f32.mrf.mxu1 }
0x16a4   : > { %v7576_v39 = vpop.f32.mrf.mxu1 }
0x16a5   : > { %v7577_v9 = vadd.f32 %v7576_v39, %v7562_v45  ;;  %v15706_v45 = vld [vmem:[#allocation163_spill] sm:$0xff]  ;;  %v7784_v39 = vld [vmem:[#allocation27 + $0x20] sm:$0xff] }
0x16ac   : > { %v7578_v63 = vpop.f32.mrf.mxu1 }
0x16ad   : > { %v7579_v34 = vadd.f32 %v7578_v63, %v7564_v49  ;;  %v15708_v49 = vld [vmem:[#allocation181_spill] sm:$0xff] }
0x16af   : > { %7620 = vmatpush.msra.mxu3 %v7579_v34 }
0x16b1   : > { %7621 = vmatpush.msra.mxu3 %v7577_v9  ;;  %v15715_v9 = vld [vmem:[#allocation178_spill] sm:$0xff] }
0x16b2   : > { %10913 = vmatmul.msk.f32.vlgmr.msra.gmra.mxu3 %vm5208_vm4, %v7582_v60 }
0x16b3   : > { %7667 = vmatpush.bf16.msrb.mxu3 %v15675_v8  ;;  %v15700_v8 = vld [vmem:[#allocation154_spill] sm:$0xff] }
0x16b4   : > { %v14290_v48 = vpop.f32.mrf.mxu2 }
0x16b7   : > { %7668 = vmatpush.bf16.msrb.mxu3 %v15676_v32  ;;  %v15702_v32 = vld [vmem:[#allocation156_spill] sm:$0xff] }
0x16bb   : > { %7669 = vmatpush.bf16.msrb.mxu3 %v15677_v37  ;;  %v15703_v37 = vld [vmem:[#allocation177_spill] sm:$0xff] }
0x16bf   : > { %7670 = vmatpush.bf16.msrb.mxu3 %v15678_v33  ;;  %v15704_v33 = vld [vmem:[#allocation158_spill] sm:$0xff] }
0x16c3   : > { %7671 = vmatpush.bf16.msrb.mxu3 %v15679_v25  ;;  %v15705_v25 = vld [vmem:[#allocation161_spill] sm:$0xff] }
0x16c4   : > { %v7650_v14 = vpop.f32.mrf.mxu1 }
0x16c5   : > { %v7651_v36 = vadd.f32 %v7650_v14, %v7637_v43  ;;  %v15712_v43 = vld [vmem:[#allocation189_spill] sm:$0xff]  ;;  %v15716_v14 = vld [vmem:[#allocation180_spill] sm:$0xff] }
0x16c7   : > { %7700 = vmatpush.msrb.mxu0 %v7651_v36  ;;  %7672 = vmatpush.bf16.msrb.mxu3 %v15680_v57  ;;  %v15717_v36 = vld [vmem:[#allocation182_spill] sm:$0xff] }
0x16c8   : > { %10914 = vmatmul.msk.f32.vlgmr.msrb.gmra.mxu0 %vm4365_vm3, %v7681_v23 }
0x16c9   : > { %7755 = vmatpush.bf16.msra.mxu0 %v15691_v62 }
0x16cb   : > { %7673 = vmatpush.bf16.msrb.mxu3 %v15681_v15 }
0x16cc   : > { %v7652_v51 = vpop.f32.mrf.mxu1 }
0x16cd   : > { %7756 = vmatpush.bf16.msra.mxu0 %v15692_v4  ;;  %v15720_v51 = vld [vmem:[#allocation188_spill] sm:$0xff] }
0x16cf   : > { %7674 = vmatpush.bf16.msrb.mxu3 %v15682_v1 }
0x16d1   : > { %7757 = vmatpush.bf16.msra.mxu0 %v15693_v54 }
0x16d2   : > { %7675 = vmatmul.bf16.vlgmr.msrb.gmra.mxu3 %v15594_v42 }
0x16d3   : > { %7741 = vmatpush.bf16.msra.mxu3 %v15694_v3 }
0x16d4   : > { %v7663_v16 = vpop.f32.mrf.mxu2 }
0x16d5   : > { %7758 = vmatpush.bf16.msra.mxu0 %v15695_v29 }
0x16d7   : > { %7742 = vmatpush.bf16.msra.mxu3 %v15696_v56 }
0x16d9   : > { %7759 = vmatpush.bf16.msra.mxu0 %v15697_v5 }
0x16db   : > { %7743 = vmatpush.bf16.msra.mxu3 %v15698_v24 }
0x16dc   : > { %v7665_v11 = vpop.f32.mrf.mxu2 }
0x16dd   : > { %7760 = vmatpush.bf16.msra.mxu0 %v15699_v44 }
0x16df   : > { %7744 = vmatpush.bf16.msra.mxu3 %v15700_v8 }
0x16e1   : > { %7761 = vmatpush.bf16.msra.mxu0 %v15701_v12 }
0x16e3   : > { %7745 = vmatpush.bf16.msra.mxu3 %v15702_v32 }
0x16e5   : > { %7762 = vmatpush.bf16.msra.mxu0 %v15703_v37 }
0x16e7   : > { %7746 = vmatpush.bf16.msra.mxu3 %v15704_v33 }
0x16e8   : > { %7763 = vmatmul.bf16.vlgmr.msra.gmra.mxu0 %v14016_v7 }
0x16e9   : > { %7830 = vmatpush.bf16.msrb.mxu0 %v15683_v53  ;;  %v15713_v53 = vld [vmem:[#allocation191_spill] sm:$0xff] }
0x16eb   : > { %7747 = vmatpush.bf16.msra.mxu3 %v15705_v25 }
0x16ed   : > { %7831 = vmatpush.bf16.msrb.mxu0 %v15684_v28 }
0x16ef   : > { %7748 = vmatpush.bf16.msra.mxu3 %v15706_v45 }
0x16f1   : > { %7832 = vmatpush.bf16.msrb.mxu0 %v15685_v41  ;;  %v15714_v41 = vld [vmem:[#allocation193_spill] sm:$0xff] }
0x16f2   : > { %7749 = vmatmul.bf16.vlgmr.msra.gmra.mxu3 %v14018_v17 }
0x16f4   : > { %v7736_v59 = vpop.f32.mrf.mxu2 }
0x16f5   : > { %7833 = vmatpush.bf16.msrb.mxu0 %v15686_v27 }
0x16f9   : > { %7834 = vmatpush.bf16.msrb.mxu0 %v15687_v21 }
0x16fc   : > { %v7738_v21 = vpop.f32.mrf.mxu2 }
0x16fd   : > { %7835 = vmatpush.bf16.msrb.mxu0 %v15688_v38 }
0x1701   : > { %7836 = vmatpush.bf16.msrb.mxu0 %v15689_v22 }
0x1705   : > { %7837 = vmatpush.bf16.msrb.mxu0 %v15690_v50 }
0x1708   : > { %7838 = vmatmul.bf16.vlgmr.msrb.gmra.mxu0 %v15593_v40 }
0x1735   : > { %v14321_v57 = vpop.f32.mrf.mxu3 }
0x1745   : > { %v14327_v46 = vpop.f32.mrf.mxu0 }
0x1755   : > { %v7676_v10 = vpop.f32.mrf.mxu3 }
0x1756   : > { %v7677_v15 = vadd.f32 %v7676_v10, %v7663_v16  ;;  %v15727_v10 = vld [vmem:[#allocation205_spill] sm:$0xff] }
0x1758   : > { %7720 = vmatpush.msrb.mxu1 %v7677_v15  ;;  %v15728_v15 = vld [vmem:[#allocation195_spill] sm:$0xff] }
0x1759   : > { %10915 = vmatmul.msk.f32.vlgmr.msrb.gmra.mxu1 %vm4365_vm3, %v7681_v23  ;;  %v15718_v23 = vld [vmem:[#allocation184_spill] sm:$0xff] }
0x175a   : > { %7769 = vmatpush.bf16.msra.mxu1 %v15707_v6 }
0x175d   : > { %v7678_v1 = vpop.f32.mrf.mxu3 }
0x175e   : > { %7770 = vmatpush.bf16.msra.mxu1 %v15708_v49  ;;  %v15730_v1 = vld [vmem:[#allocation196_spill] sm:$0xff] }
0x1762   : > { %7771 = vmatpush.bf16.msra.mxu1 %v15709_v30 }
0x1765   : > { %v7764_v60 = vpop.f32.mrf.mxu0 }
0x1766   : > { %7772 = vmatpush.bf16.msra.mxu1 %v15710_v31 }
0x176a   : > { %7773 = vmatpush.bf16.msra.mxu1 %v15711_v26 }
0x176d   : > { %v7766_v27 = vpop.f32.mrf.mxu0 }
0x176e   : > { %7774 = vmatpush.bf16.msra.mxu1 %v15712_v43 }
0x1772   : > { %7775 = vmatpush.bf16.msra.mxu1 %v15713_v53 }
0x1775   : > { %v7750_v28 = vpop.f32.mrf.mxu3 }
0x1776   : > { %7776 = vmatpush.bf16.msra.mxu1 %v15714_v41  ;;  %v7751_v50 = vadd.f32 %v7750_v28, %v7736_v59  ;;  %v15736_v59 = vld [vmem:[#allocation199_spill] sm:$0xff]  ;;  %v15738_v28 = vld [vmem:[#allocation201_spill] sm:$0xff] }
0x1779   : > { %7777 = vmatmul.bf16.vlgmr.msra.gmra.mxu1 %v14018_v17 }
0x177a   : > { %7843 = vmatpush.bf16.msrb.mxu1 %v15694_v3 }
0x177d   : > { %v7752_v38 = vpop.f32.mrf.mxu3 }
0x177e   : > { %v7753_v22 = vadd.f32 %v7752_v38, %v7738_v21  ;;  %7844 = vmatpush.bf16.msrb.mxu1 %v15696_v56 }
0x1780   : > { %7802 = vmatpush.msra.mxu2 %v7753_v22 }
0x1782   : > { %7845 = vmatpush.bf16.msrb.mxu1 %v15698_v24  ;;  %7803 = vmatpush.msra.mxu2 %v7751_v50 }
0x1783   : > { %10916 = vmatmul.msk.f32.vlgmr.msra.gmra.mxu2 %vm5208_vm4, %v7784_v39 }
0x1784   : > { %7856 = vmatpush.bf16.msrb.mxu2 %v15691_v62  ;;  %v15719_v62 = vld [vmem:[#allocation186_spill] sm:$0xff] }
0x1785   : > { %v7839_v63 = vpop.f32.mrf.mxu0 }
0x1786   : > { %7846 = vmatpush.bf16.msrb.mxu1 %v15700_v8  ;;  %v15723_v8 = vld [vmem:[#allocation202_spill] sm:$0xff] }
0x1788   : > { %7857 = vmatpush.bf16.msrb.mxu2 %v15692_v4  ;;  %v15721_v4 = vld [vmem:[#allocation190_spill] sm:$0xff] }
0x178a   : > { %7847 = vmatpush.bf16.msrb.mxu1 %v15702_v32 }
0x178c   : > { %7858 = vmatpush.bf16.msrb.mxu2 %v15693_v54  ;;  %v15722_v54 = vld [vmem:[#allocation192_spill] sm:$0xff] }
0x178d   : > { %v7841_v34 = vpop.f32.mrf.mxu0 }
0x178e   : > { %7848 = vmatpush.bf16.msrb.mxu1 %v15704_v33  ;;  %v15725_v33 = vld [vmem:[#allocation204_spill] sm:$0xff] }
0x1790   : > { %7859 = vmatpush.bf16.msrb.mxu2 %v15695_v29 }
0x1792   : > { %7849 = vmatpush.bf16.msrb.mxu1 %v15705_v25  ;;  %v15726_v25 = vld [vmem:[#allocation194_spill] sm:$0xff] }
0x1794   : > { %7860 = vmatpush.bf16.msrb.mxu2 %v15697_v5 }
0x1796   : > { %7850 = vmatpush.bf16.msrb.mxu1 %v15706_v45 }
0x1798   : > { %7861 = vmatpush.bf16.msrb.mxu2 %v15699_v44  ;;  %v7883_v44 = vld [vmem:[#allocation28 + $0x20] sm:$0xff] }
0x1799   : > { %7851 = vmatmul.bf16.vlgmr.msrb.gmra.mxu1 %v15594_v42 }
0x179c   : > { %7862 = vmatpush.bf16.msrb.mxu2 %v15701_v12 }
0x17a0   : > { %7863 = vmatpush.bf16.msrb.mxu2 %v15703_v37  ;;  %v15724_v37 = vld [vmem:[#allocation203_spill] sm:$0xff] }
0x17a3   : > { %7864 = vmatmul.bf16.vlgmr.msrb.gmra.mxu2 %v15593_v40 }
0x17a4   : > { %7929 = vmatpush.bf16.msra.mxu2 %v15715_v9 }
0x17a8   : > { %7930 = vmatpush.bf16.msra.mxu2 %v15716_v14 }
0x17ac   : > { %7931 = vmatpush.bf16.msra.mxu2 %v15717_v36 }
0x17b0   : > { %7932 = vmatpush.bf16.msra.mxu2 %v15718_v23 }
0x17b4   : > { %7933 = vmatpush.bf16.msra.mxu2 %v15719_v62 }
0x17b8   : > { %7934 = vmatpush.bf16.msra.mxu2 %v15720_v51 }
0x17bc   : > { %7935 = vmatpush.bf16.msra.mxu2 %v15721_v4 }
0x17c0   : > { %7936 = vmatpush.bf16.msra.mxu2 %v15722_v54 }
0x17c3   : > { %7937 = vmatmul.bf16.vlgmr.msra.gmra.mxu2 %v14016_v7 }
0x17d6   : > { %v7722_v3 = vpop.f32.mrf.mxu1 }
0x17f6   : > { %v7778_v16 = vpop.f32.mrf.mxu1 }
0x17f7   : > { %v7779_v5 = vadd.f32 %v7778_v16, %v7764_v60  ;;  %v15734_v60 = vld [vmem:[#allocation198_spill] sm:$0xff] }
0x17fe   : > { %v7780_v29 = vpop.f32.mrf.mxu1 }
0x17ff   : > { %v7781_v56 = vadd.f32 %v7780_v29, %v7766_v27 }
0x1801   : > { %7822 = vmatpush.msrb.mxu3 %v7781_v56 }
0x1803   : > { %7823 = vmatpush.msrb.mxu3 %v7779_v5 }
0x1804   : > { %10917 = vmatmul.msk.f32.vlgmr.msrb.gmra.mxu3 %vm5208_vm4, %v7784_v39  ;;  %v7099_v39 = vadd.f32 %v14109_v19, %v14105_v52 }
0x1805   : > { %7869 = vmatpush.bf16.msra.mxu3 %v15707_v6  ;;  %v15729_v6 = vld [vmem:[#allocation206_spill] sm:$0xff] }
0x1806   : > { %v7805_v12 = vpop.f32.mrf.mxu2  ;;  %v7222_v34 = vadd.f32 %v14116_v35, %v7099_v39  ;;  %v15739_v35 = vld [vmem:[#allocation211_spill] sm:$0xff]  ;;  %v15759_v39 = vld [vmem:[#allocation237_spill] sm:$0xff] }
0x1809   : > { %7870 = vmatpush.bf16.msra.mxu3 %v15708_v49 }
0x180d   : > { %7871 = vmatpush.bf16.msra.mxu3 %v15709_v30  ;;  %v15731_v30 = vld [vmem:[#allocation207_spill] sm:$0xff] }
0x1811   : > { %7872 = vmatpush.bf16.msra.mxu3 %v15710_v31  ;;  %v15732_v31 = vld [vmem:[#allocation197_spill] sm:$0xff] }
0x1815   : > { %7873 = vmatpush.bf16.msra.mxu3 %v15711_v26  ;;  %v15733_v26 = vld [vmem:[#allocation208_spill] sm:$0xff] }
0x1816   : > { %v7852_v24 = vpop.f32.mrf.mxu1 }
0x1817   : > { %v7853_v11 = vadd.f32 %v7852_v24, %v7839_v63 }
0x1819   : > { %7902 = vmatpush.msra.mxu0 %v7853_v11  ;;  %7874 = vmatpush.bf16.msra.mxu3 %v15712_v43  ;;  %v15735_v43 = vld [vmem:[#allocation209_spill] sm:$0xff]  ;;  %v7986_v11 = vld [vmem:[#allocation27 + $0x28] sm:$0xff] }
0x181a   : > { %10918 = vmatmul.msk.f32.vlgmr.msra.gmra.mxu0 %vm4365_vm3, %v7883_v44 }
0x181b   : > { %7957 = vmatpush.bf16.msrb.mxu0 %v15723_v8 }
0x181d   : > { %7875 = vmatpush.bf16.msra.mxu3 %v15713_v53  ;;  %v15737_v53 = vld [vmem:[#allocation200_spill] sm:$0xff] }
0x181e   : > { %v7854_v32 = vpop.f32.mrf.mxu1 }
0x181f   : > { %7958 = vmatpush.bf16.msrb.mxu0 %v15724_v37  ;;  %v15748_v32 = vld [vmem:[#allocation212_spill] sm:$0xff] }
0x1821   : > { %7876 = vmatpush.bf16.msra.mxu3 %v15714_v41  ;;  %v7119_v41 = vadd.f32 %v14111_v61, %v14107_v18  ;;  %v7321_v18 = vadd.f32 %v14159_v58, %v7222_v34  ;;  %v15761_v34 = vld [vmem:[#allocation238_spill] sm:$0xff] }
0x1823   : > { %7959 = vmatpush.bf16.msrb.mxu0 %v15725_v33  ;;  %v7223_v27 = vadd.f32 %v14153_v2, %v7119_v41  ;;  %v7424_v61 = vadd.f32 %v14206_v55, %v7321_v18  ;;  %v15741_v55 = vld [vmem:[#allocation215_spill] sm:$0xff]  ;;  %v15755_v41 = vld [vmem:[#allocation234_spill] sm:$0xff] }
0x1824   : > { %7877 = vmatmul.bf16.vlgmr.msra.gmra.mxu3 %v15594_v42  ;;  %v15763_v18 = vld [vmem:[#allocation239_spill] sm:$0xff] }
0x1825   : > { %7943 = vmatpush.bf16.msrb.mxu3 %v15726_v25  ;;  %v7322_v21 = vadd.f32 %v14195_v0, %v7223_v27  ;;  %v7523_v2 = vadd.f32 %v14243_v13, %v7424_v61  ;;  %v15742_v13 = vld [vmem:[#allocation217_spill] sm:$0xff] }
0x1826   : > { %v7865_v45 = vpop.f32.mrf.mxu2  ;;  %v15764_v61 = vld [vmem:[#allocation229_spill] sm:$0xff] }
0x1827   : > { %7960 = vmatpush.bf16.msrb.mxu0 %v15727_v10  ;;  %v7425_v38 = vadd.f32 %v14237_v47, %v7322_v21  ;;  %v7626_v0 = vadd.f32 %v14290_v48, %v7523_v2  ;;  %v15743_v48 = vld [vmem:[#allocation219_spill] sm:$0xff]  ;;  %v15765_v2 = vld [vmem:[#allocation240_spill] sm:$0xff] }
0x1828   : > { %v15756_v21 = vld [vmem:[#allocation235_spill] sm:$0xff] }
0x1829   : > { %7944 = vmatpush.bf16.msrb.mxu3 %v15728_v15  ;;  %v7524_v22 = vadd.f32 %v14279_v20, %v7425_v38  ;;  %v7725_v47 = vadd.f32 %v14327_v46, %v7626_v0  ;;  %v15757_v38 = vld [vmem:[#allocation236_spill] sm:$0xff]  ;;  %v15766_v0 = vld [vmem:[#allocation230_spill] sm:$0xff] }
0x182b   : > { %7961 = vmatpush.bf16.msrb.mxu0 %v15729_v6  ;;  %v7627_v50 = vadd.f32 %v14321_v57, %v7524_v22  ;;  %v7828_v20 = vadd.f32 %v7805_v12, %v7725_v47  ;;  %v15758_v22 = vld [vmem:[#allocation226_spill] sm:$0xff]  ;;  %v15767_v47 = vld [vmem:[#allocation241_spill] sm:$0xff] }
0x182d   : > { %7945 = vmatpush.bf16.msrb.mxu3 %v15730_v1  ;;  %v7726_v63 = vadd.f32 %v7722_v3, %v7627_v50  ;;  %v15746_v3 = vld [vmem:[#allocation225_spill] sm:$0xff] }
0x182e   : > { %v7867_v49 = vpop.f32.mrf.mxu2 }
0x182f   : > { %7962 = vmatpush.bf16.msrb.mxu0 %v15731_v30 }
0x1831   : > { %7946 = vmatpush.bf16.msrb.mxu3 %v15732_v31 }
0x1833   : > { %7963 = vmatpush.bf16.msrb.mxu0 %v15733_v26 }
0x1835   : > { %7947 = vmatpush.bf16.msrb.mxu3 %v15734_v60 }
0x1837   : > { %7964 = vmatpush.bf16.msrb.mxu0 %v15735_v43 }
0x1839   : > { %7948 = vmatpush.bf16.msrb.mxu3 %v15736_v59 }
0x183a   : > { %7965 = vmatmul.bf16.vlgmr.msrb.gmra.mxu0 %v14016_v7 }
0x183b   : > { %8032 = vmatpush.bf16.msra.mxu0 %v15715_v9 }
0x183d   : > { %7949 = vmatpush.bf16.msrb.mxu3 %v15737_v53 }
0x183f   : > { %8033 = vmatpush.bf16.msra.mxu0 %v15716_v14 }
0x1841   : > { %7950 = vmatpush.bf16.msrb.mxu3 %v15738_v28 }
0x1843   : > { %8034 = vmatpush.bf16.msra.mxu0 %v15717_v36 }
0x1844   : > { %7951 = vmatmul.bf16.vlgmr.msrb.gmra.mxu3 %v14018_v17 }
0x1847   : > { %8035 = vmatpush.bf16.msra.mxu0 %v15718_v23  ;;  %v15740_v23 = vld [vmem:[#allocation213_spill] sm:$0xff] }
0x184b   : > { %8036 = vmatpush.bf16.msra.mxu0 %v15719_v62  ;;  %v15744_v62 = vld [vmem:[#allocation221_spill] sm:$0xff] }
0x184f   : > { %8037 = vmatpush.bf16.msra.mxu0 %v15720_v51  ;;  %v7938_v51 = vpop.f32.mrf.mxu2 }
0x1853   : > { %8038 = vmatpush.bf16.msra.mxu0 %v15721_v4  ;;  %v15745_v4 = vld [vmem:[#allocation223_spill] sm:$0xff] }
0x1857   : > { %8039 = vmatpush.bf16.msra.mxu0 %v15722_v54  ;;  %v7940_v29 = vpop.f32.mrf.mxu2 }
0x185a   : > { %8040 = vmatmul.bf16.vlgmr.msra.gmra.mxu0 %v15593_v40 }
0x1887   : > { %v7825_v9 = vpop.f32.mrf.mxu3 }
0x1888   : > { %v14411_v14 = vadd.f32 %v7825_v9, %v7726_v63  ;;  %v15760_v63 = vld [vmem:[#allocation227_spill] sm:$0xff]  ;;  %v15762_v9 = vld [vmem:[#allocation228_spill] sm:$0xff] }
0x1897   : > { %v7904_v57 = vpop.f32.mrf.mxu0 }
0x1898   : > { %v14418_v36 = vadd.f32 %v7904_v57, %v7828_v20  ;;  %v15768_v20 = vld [vmem:[#allocation231_spill] sm:$0xff]  ;;  %v15769_v57 = vld [vmem:[#allocation232_spill] sm:$0xff] }
0x18a7   : > { %v7878_v52 = vpop.f32.mrf.mxu3 }
0x18a8   : > { %v7879_v19 = vadd.f32 %v7878_v52, %v7865_v45  ;;  %v15752_v45 = vld [vmem:[#allocation220_spill] sm:$0xff] }
0x18aa   : > { %7922 = vmatpush.msra.mxu1 %v7879_v19 }
0x18ab   : > { %10919 = vmatmul.msk.f32.vlgmr.msra.gmra.mxu1 %vm4365_vm3, %v7883_v44 }
0x18ac   : > { %7971 = vmatpush.bf16.msrb.mxu1 %v15739_v35 }
0x18af   : > { %v7880_v58 = vpop.f32.mrf.mxu3 }
0x18b0   : > { %7972 = vmatpush.bf16.msrb.mxu1 %v15740_v23 }
0x18b4   : > { %7973 = vmatpush.bf16.msrb.mxu1 %v15741_v55 }
0x18b7   : > { %v7966_v46 = vpop.f32.mrf.mxu0 }
0x18b8   : > { %7974 = vmatpush.bf16.msrb.mxu1 %v15742_v13 }
0x18bc   : > { %7975 = vmatpush.bf16.msrb.mxu1 %v15743_v48 }
0x18bf   : > { %v7968_v16 = vpop.f32.mrf.mxu0 }
0x18c0   : > { %7976 = vmatpush.bf16.msrb.mxu1 %v15744_v62 }
0x18c4   : > { %7977 = vmatpush.bf16.msrb.mxu1 %v15745_v4 }
0x18c7   : > { %v7952_v54 = vpop.f32.mrf.mxu3 }
0x18c8   : > { %7978 = vmatpush.bf16.msrb.mxu1 %v15746_v3  ;;  %v7953_v24 = vadd.f32 %v7952_v54, %v7938_v51  ;;  %v15774_v51 = vld [vmem:[#allocation249_spill] sm:$0xff] }
0x18cb   : > { %7979 = vmatmul.bf16.vlgmr.msrb.gmra.mxu1 %v14018_v17 }
0x18cc   : > { %8045 = vmatpush.bf16.msra.mxu1 %v15726_v25  ;;  %v15751_v25 = vld [vmem:[#allocation218_spill] sm:$0xff] }
0x18cf   : > { %v7954_v56 = vpop.f32.mrf.mxu3 }
0x18d0   : > { %v7955_v5 = vadd.f32 %v7954_v56, %v7940_v29  ;;  %8046 = vmatpush.bf16.msra.mxu1 %v15728_v15  ;;  %v15754_v15 = vld [vmem:[#allocation224_spill] sm:$0xff]  ;;  %v15777_v29 = vld [vmem:[#allocation255_spill] sm:$0xff] }
0x18d2   : > { %8004 = vmatpush.msrb.mxu2 %v7955_v5  ;;  %v15778_v5 = vld [vmem:[#allocation257_spill] sm:$0xff] }
0x18d4   : > { %8047 = vmatpush.bf16.msra.mxu1 %v15730_v1  ;;  %8005 = vmatpush.msrb.mxu2 %v7953_v24 }
0x18d5   : > { %10920 = vmatmul.msk.f32.vlgmr.msrb.gmra.mxu2 %vm5208_vm4, %v7986_v11 }
0x18d6   : > { %8058 = vmatpush.bf16.msra.mxu2 %v15723_v8  ;;  %v15747_v8 = vld [vmem:[#allocation210_spill] sm:$0xff] }
0x18d7   : > { %v8041_v44 = vpop.f32.mrf.mxu0 }
0x18d8   : > { %8048 = vmatpush.bf16.msra.mxu1 %v15732_v31 }
0x18da   : > { %8059 = vmatpush.bf16.msra.mxu2 %v15724_v37  ;;  %v15749_v37 = vld [vmem:[#allocation214_spill] sm:$0xff] }
0x18dc   : > { %8049 = vmatpush.bf16.msra.mxu1 %v15734_v60 }
0x18de   : > { %8060 = vmatpush.bf16.msra.mxu2 %v15725_v33  ;;  %v15750_v33 = vld [vmem:[#allocation216_spill] sm:$0xff] }
0x18df   : > { %v8043_v12 = vpop.f32.mrf.mxu0 }
0x18e0   : > { %8050 = vmatpush.bf16.msra.mxu1 %v15736_v59 }
0x18e2   : > { %8061 = vmatpush.bf16.msra.mxu2 %v15727_v10  ;;  %v15753_v10 = vld [vmem:[#allocation222_spill] sm:$0xff] }
0x18e4   : > { %8051 = vmatpush.bf16.msra.mxu1 %v15737_v53 }
0x18e6   : > { %8062 = vmatpush.bf16.msra.mxu2 %v15729_v6 }
0x18e8   : > { %8052 = vmatpush.bf16.msra.mxu1 %v15738_v28  ;;  %v8085_v28 = vld [vmem:[#allocation28 + $0x28] sm:$0xff] }
0x18ea   : > { %8063 = vmatpush.bf16.msra.mxu2 %v15731_v30 }
0x18eb   : > { %8053 = vmatmul.bf16.vlgmr.msra.gmra.mxu1 %v15594_v42 }
0x18ee   : > { %8064 = vmatpush.bf16.msra.mxu2 %v15733_v26 }
0x18f2   : > { %8065 = vmatpush.bf16.msra.mxu2 %v15735_v43 }
0x18f5   : > { %8066 = vmatmul.bf16.vlgmr.msra.gmra.mxu2 %v15593_v40 }
0x18f6   : > { %8131 = vmatpush.bf16.msrb.mxu2 %v15747_v8 }
0x18fa   : > { %8132 = vmatpush.bf16.msrb.mxu2 %v15748_v32 }
0x18fe   : > { %8133 = vmatpush.bf16.msrb.mxu2 %v15749_v37 }
0x1902   : > { %8134 = vmatpush.bf16.msrb.mxu2 %v15750_v33 }
0x1906   : > { %8135 = vmatpush.bf16.msrb.mxu2 %v15751_v25 }
0x190a   : > { %8136 = vmatpush.bf16.msrb.mxu2 %v15752_v45 }
0x190e   : > { %8137 = vmatpush.bf16.msrb.mxu2 %v15753_v10 }
0x1912   : > { %8138 = vmatpush.bf16.msrb.mxu2 %v15754_v15 }
0x1915   : > { %8139 = vmatmul.bf16.vlgmr.msrb.gmra.mxu2 %v14016_v7 }
0x1928   : > { %v7924_v6 = vpop.f32.mrf.mxu1 }
0x1929   : > { %v7928_v1 = vadd.f32 %v7924_v6, %v14411_v14  ;;  %v15783_v6 = vld [vmem:[#allocation250_spill] sm:$0xff] }
0x1948   : > { %v7980_v49 = vpop.f32.mrf.mxu1 }
0x1949   : > { %v7981_v26 = vadd.f32 %v7980_v49, %v7966_v46  ;;  %v15772_v46 = vld [vmem:[#allocation245_spill] sm:$0xff]  ;;  %v15785_v49 = vld [vmem:[#allocation254_spill] sm:$0xff] }
0x1950   : > { %v7982_v30 = vpop.f32.mrf.mxu1 }
0x1951   : > { %v7983_v31 = vadd.f32 %v7982_v30, %v7968_v16  ;;  %v15786_v30 = vld [vmem:[#allocation256_spill] sm:$0xff] }
0x1953   : > { %8024 = vmatpush.msra.mxu3 %v7983_v31 }
0x1955   : > { %8025 = vmatpush.msra.mxu3 %v7981_v26 }
0x1956   : > { %10921 = vmatmul.msk.f32.vlgmr.msra.gmra.mxu3 %vm5208_vm4, %v7986_v11 }
0x1957   : > { %8071 = vmatpush.bf16.msrb.mxu3 %v15739_v35 }
0x1958   : > { %v8007_v60 = vpop.f32.mrf.mxu2 }
0x1959   : > { %v8030_v43 = vadd.f32 %v8007_v60, %v14418_v36  ;;  %v15770_v36 = vld [vmem:[#allocation233_spill] sm:$0xff] }
0x195b   : > { %8072 = vmatpush.bf16.msrb.mxu3 %v15740_v23 }
0x195f   : > { %8073 = vmatpush.bf16.msrb.mxu3 %v15741_v55 }
0x1963   : > { %8074 = vmatpush.bf16.msrb.mxu3 %v15742_v13  ;;  %v15771_v13 = vld [vmem:[#allocation243_spill] sm:$0xff] }
0x1967   : > { %8075 = vmatpush.bf16.msrb.mxu3 %v15743_v48 }
0x1968   : > { %v8054_v59 = vpop.f32.mrf.mxu1 }
0x1969   : > { %v8055_v53 = vadd.f32 %v8054_v59, %v8041_v44 }
0x196b   : > { %8104 = vmatpush.msrb.mxu0 %v8055_v53  ;;  %8076 = vmatpush.bf16.msrb.mxu3 %v15744_v62  ;;  %v15773_v62 = vld [vmem:[#allocation247_spill] sm:$0xff] }
0x196c   : > { %10922 = vmatmul.msk.f32.vlgmr.msrb.gmra.mxu0 %vm4365_vm3, %v8085_v28 }
0x196d   : > { %8159 = vmatpush.bf16.msra.mxu0 %v15755_v41 }
0x196f   : > { %8077 = vmatpush.bf16.msrb.mxu3 %v15745_v4  ;;  %v15775_v4 = vld [vmem:[#allocation251_spill] sm:$0xff] }
0x1970   : > { %v8056_v27 = vpop.f32.mrf.mxu1 }
0x1971   : > { %8160 = vmatpush.bf16.msra.mxu0 %v15756_v21 }
0x1973   : > { %8078 = vmatpush.bf16.msrb.mxu3 %v15746_v3  ;;  %v15776_v3 = vld [vmem:[#allocation253_spill] sm:$0xff] }
0x1975   : > { %8161 = vmatpush.bf16.msra.mxu0 %v15757_v38 }
0x1976   : > { %8079 = vmatmul.bf16.vlgmr.msrb.gmra.mxu3 %v15594_v42 }
0x1977   : > { %8145 = vmatpush.bf16.msra.mxu3 %v15758_v22 }
0x1978   : > { %v8067_v50 = vpop.f32.mrf.mxu2 }
0x1979   : > { %8162 = vmatpush.bf16.msra.mxu0 %v15759_v39 }
0x197b   : > { %8146 = vmatpush.bf16.msra.mxu3 %v15760_v63 }
0x197d   : > { %8163 = vmatpush.bf16.msra.mxu0 %v15761_v34 }
0x197f   : > { %8147 = vmatpush.bf16.msra.mxu3 %v15762_v9 }
0x1980   : > { %v8069_v14 = vpop.f32.mrf.mxu2 }
0x1981   : > { %8164 = vmatpush.bf16.msra.mxu0 %v15763_v18  ;;  %v15791_v14 = vld [vmem:[#allocation269_spill] sm:$0xff] }
0x1983   : > { %8148 = vmatpush.bf16.msra.mxu3 %v15764_v61 }
0x1985   : > { %8165 = vmatpush.bf16.msra.mxu0 %v15765_v2 }
0x1987   : > { %8149 = vmatpush.bf16.msra.mxu3 %v15766_v0 }
0x1989   : > { %8166 = vmatpush.bf16.msra.mxu0 %v15767_v47 }
0x198b   : > { %8150 = vmatpush.bf16.msra.mxu3 %v15768_v20 }
0x198c   : > { %8167 = vmatmul.bf16.vlgmr.msra.gmra.mxu0 %v14016_v7 }
0x198d   : > { %8234 = vmatpush.bf16.msrb.mxu0 %v15747_v8 }
0x198f   : > { %8151 = vmatpush.bf16.msra.mxu3 %v15769_v57 }
0x1991   : > { %8235 = vmatpush.bf16.msrb.mxu0 %v15748_v32  ;;  %v8188_v32 = vld [vmem:[#allocation27 + $0x30] sm:$0xff] }
0x1993   : > { %8152 = vmatpush.bf16.msra.mxu3 %v15770_v36 }
0x1995   : > { %8236 = vmatpush.bf16.msrb.mxu0 %v15749_v37 }
0x1996   : > { %8153 = vmatmul.bf16.vlgmr.msra.gmra.mxu3 %v14018_v17 }
0x1998   : > { %v8140_v16 = vpop.f32.mrf.mxu2 }
0x1999   : > { %8237 = vmatpush.bf16.msrb.mxu0 %v15750_v33 }
0x199d   : > { %8238 = vmatpush.bf16.msrb.mxu0 %v15751_v25  ;;  %v15779_v25 = vld [vmem:[#allocation242_spill] sm:$0xff] }
0x19a0   : > { %v8142_v11 = vpop.f32.mrf.mxu2 }
0x19a1   : > { %8239 = vmatpush.bf16.msrb.mxu0 %v15752_v45  ;;  %v15780_v45 = vld [vmem:[#allocation244_spill] sm:$0xff] }
0x19a5   : > { %8240 = vmatpush.bf16.msrb.mxu0 %v15753_v10  ;;  %v15781_v10 = vld [vmem:[#allocation246_spill] sm:$0xff] }
0x19a9   : > { %8241 = vmatpush.bf16.msrb.mxu0 %v15754_v15  ;;  %v15782_v15 = vld [vmem:[#allocation248_spill] sm:$0xff] }
0x19ac   : > { %8242 = vmatmul.bf16.vlgmr.msrb.gmra.mxu0 %v15593_v40 }
0x19d9   : > { %v8027_v52 = vpop.f32.mrf.mxu3 }
0x19da   : > { %v8031_v19 = vadd.f32 %v8027_v52, %v7928_v1  ;;  %v15784_v1 = vld [vmem:[#allocation252_spill] sm:$0xff]  ;;  %v15799_v52 = vld [vmem:[#allocation273_spill] sm:$0xff] }
0x19e9   : > { %v8106_v35 = vpop.f32.mrf.mxu0 }
0x19ea   : > { %v14498_v58 = vadd.f32 %v8106_v35, %v8030_v43  ;;  %v15801_v35 = vld [vmem:[#allocation264_spill] sm:$0xff] }
0x19f9   : > { %v8080_v23 = vpop.f32.mrf.mxu3 }
0x19fa   : > { %v8081_v55 = vadd.f32 %v8080_v23, %v8067_v50 }
0x19fc   : > { %8124 = vmatpush.msrb.mxu1 %v8081_v55 }
0x19fd   : > { %10923 = vmatmul.msk.f32.vlgmr.msrb.gmra.mxu1 %vm4365_vm3, %v8085_v28 }
0x19fe   : > { %8173 = vmatpush.bf16.msra.mxu1 %v15771_v13 }
0x1a01   : > { %v8082_v48 = vpop.f32.mrf.mxu3 }
0x1a02   : > { %8174 = vmatpush.bf16.msra.mxu1 %v15772_v46 }
0x1a06   : > { %8175 = vmatpush.bf16.msra.mxu1 %v15773_v62 }
0x1a09   : > { %v8168_v54 = vpop.f32.mrf.mxu0 }
0x1a0a   : > { %8176 = vmatpush.bf16.msra.mxu1 %v15774_v51 }
0x1a0e   : > { %8177 = vmatpush.bf16.msra.mxu1 %v15775_v4 }
0x1a11   : > { %v8170_v24 = vpop.f32.mrf.mxu0 }
0x1a12   : > { %8178 = vmatpush.bf16.msra.mxu1 %v15776_v3 }
0x1a16   : > { %8179 = vmatpush.bf16.msra.mxu1 %v15777_v29 }
0x1a19   : > { %v8154_v56 = vpop.f32.mrf.mxu3 }
0x1a1a   : > { %8180 = vmatpush.bf16.msra.mxu1 %v15778_v5  ;;  %v8155_v8 = vadd.f32 %v8154_v56, %v8140_v16  ;;  %v15806_v16 = vld [vmem:[#allocation281_spill] sm:$0xff] }
0x1a1d   : > { %8181 = vmatmul.bf16.vlgmr.msra.gmra.mxu1 %v14018_v17 }
0x1a1e   : > { %8247 = vmatpush.bf16.msrb.mxu1 %v15758_v22  ;;  %v15787_v22 = vld [vmem:[#allocation266_spill] sm:$0xff] }
0x1a21   : > { %v8156_v44 = vpop.f32.mrf.mxu3 }
0x1a22   : > { %v8157_v12 = vadd.f32 %v8156_v44, %v8142_v11  ;;  %8248 = vmatpush.bf16.msrb.mxu1 %v15760_v63  ;;  %v15789_v63 = vld [vmem:[#allocation268_spill] sm:$0xff]  ;;  %v15809_v11 = vld [vmem:[#allocation287_spill] sm:$0xff] }
0x1a24   : > { %8206 = vmatpush.msra.mxu2 %v8157_v12  ;;  %v15810_v12 = vld [vmem:[#allocation289_spill] sm:$0xff] }
0x1a26   : > { %8249 = vmatpush.bf16.msrb.mxu1 %v15762_v9  ;;  %8207 = vmatpush.msra.mxu2 %v8155_v8 }
0x1a27   : > { %10924 = vmatmul.msk.f32.vlgmr.msra.gmra.mxu2 %vm5208_vm4, %v8188_v32 }
0x1a28   : > { %8260 = vmatpush.bf16.msrb.mxu2 %v15755_v41 }
0x1a29   : > { %v8243_v37 = vpop.f32.mrf.mxu0 }
0x1a2a   : > { %8250 = vmatpush.bf16.msrb.mxu1 %v15764_v61  ;;  %v15793_v61 = vld [vmem:[#allocation270_spill] sm:$0xff] }
0x1a2c   : > { %8261 = vmatpush.bf16.msrb.mxu2 %v15756_v21 }
0x1a2e   : > { %8251 = vmatpush.bf16.msrb.mxu1 %v15766_v0 }
0x1a30   : > { %8262 = vmatpush.bf16.msrb.mxu2 %v15757_v38  ;;  %v8287_v38 = vld [vmem:[#allocation28 + $0x30] sm:$0xff] }
0x1a31   : > { %v8245_v33 = vpop.f32.mrf.mxu0 }
0x1a32   : > { %8252 = vmatpush.bf16.msrb.mxu1 %v15768_v20  ;;  %v15796_v20 = vld [vmem:[#allocation261_spill] sm:$0xff] }
0x1a34   : > { %8263 = vmatpush.bf16.msrb.mxu2 %v15759_v39  ;;  %v15788_v39 = vld [vmem:[#allocation267_spill] sm:$0xff] }
0x1a36   : > { %8253 = vmatpush.bf16.msrb.mxu1 %v15769_v57  ;;  %v15797_v57 = vld [vmem:[#allocation272_spill] sm:$0xff] }
0x1a38   : > { %8264 = vmatpush.bf16.msrb.mxu2 %v15761_v34  ;;  %v15790_v34 = vld [vmem:[#allocation258_spill] sm:$0xff] }
0x1a3a   : > { %8254 = vmatpush.bf16.msrb.mxu1 %v15770_v36  ;;  %v15798_v36 = vld [vmem:[#allocation262_spill] sm:$0xff] }
0x1a3c   : > { %8265 = vmatpush.bf16.msrb.mxu2 %v15763_v18  ;;  %v15792_v18 = vld [vmem:[#allocation259_spill] sm:$0xff] }
0x1a3d   : > { %8255 = vmatmul.bf16.vlgmr.msrb.gmra.mxu1 %v15594_v42 }
0x1a40   : > { %8266 = vmatpush.bf16.msrb.mxu2 %v15765_v2  ;;  %v15794_v2 = vld [vmem:[#allocation260_spill] sm:$0xff] }
0x1a44   : > { %8267 = vmatpush.bf16.msrb.mxu2 %v15767_v47  ;;  %v15795_v47 = vld [vmem:[#allocation271_spill] sm:$0xff] }
0x1a47   : > { %8268 = vmatmul.bf16.vlgmr.msrb.gmra.mxu2 %v15593_v40 }
0x1a48   : > { %8333 = vmatpush.bf16.msra.mxu2 %v15779_v25 }
0x1a4c   : > { %8334 = vmatpush.bf16.msra.mxu2 %v15780_v45 }
0x1a50   : > { %8335 = vmatpush.bf16.msra.mxu2 %v15781_v10 }
0x1a54   : > { %8336 = vmatpush.bf16.msra.mxu2 %v15782_v15 }
0x1a58   : > { %8337 = vmatpush.bf16.msra.mxu2 %v15783_v6 }
0x1a5c   : > { %8338 = vmatpush.bf16.msra.mxu2 %v15784_v1 }
0x1a60   : > { %8339 = vmatpush.bf16.msra.mxu2 %v15785_v49 }
0x1a64   : > { %8340 = vmatpush.bf16.msra.mxu2 %v15786_v30 }
0x1a67   : > { %8341 = vmatmul.bf16.vlgmr.msra.gmra.mxu2 %v14016_v7 }
0x1a7a   : > { %v8126_v31 = vpop.f32.mrf.mxu1 }
0x1a7b   : > { %v8130_v26 = vadd.f32 %v8126_v31, %v8031_v19  ;;  %v15800_v19 = vld [vmem:[#allocation263_spill] sm:$0xff]  ;;  %v15815_v31 = vld [vmem:[#allocation282_spill] sm:$0xff] }
0x1a9a   : > { %v8182_v60 = vpop.f32.mrf.mxu1 }
0x1a9b   : > { %v8183_v53 = vadd.f32 %v8182_v60, %v8168_v54  ;;  %v15804_v54 = vld [vmem:[#allocation277_spill] sm:$0xff]  ;;  %v15817_v60 = vld [vmem:[#allocation286_spill] sm:$0xff] }
0x1aa2   : > { %v8184_v43 = vpop.f32.mrf.mxu1 }
0x1aa3   : > { %v8185_v59 = vadd.f32 %v8184_v43, %v8170_v24  ;;  %v15818_v43 = vld [vmem:[#allocation288_spill] sm:$0xff] }
0x1aa5   : > { %8226 = vmatpush.msrb.mxu3 %v8185_v59 }
0x1aa7   : > { %8227 = vmatpush.msrb.mxu3 %v8183_v53 }
0x1aa8   : > { %10925 = vmatmul.msk.f32.vlgmr.msrb.gmra.mxu3 %vm5208_vm4, %v8188_v32 }
0x1aa9   : > { %8273 = vmatpush.bf16.msra.mxu3 %v15771_v13 }
0x1aaa   : > { %v8209_v28 = vpop.f32.mrf.mxu2 }
0x1aab   : > { %v8232_v41 = vadd.f32 %v8209_v28, %v14498_v58  ;;  %v15802_v58 = vld [vmem:[#allocation265_spill] sm:$0xff] }
0x1aad   : > { %8274 = vmatpush.bf16.msra.mxu3 %v15772_v46 }
0x1ab1   : > { %8275 = vmatpush.bf16.msra.mxu3 %v15773_v62 }
0x1ab5   : > { %8276 = vmatpush.bf16.msra.mxu3 %v15774_v51  ;;  %v15803_v51 = vld [vmem:[#allocation275_spill] sm:$0xff] }
0x1ab9   : > { %8277 = vmatpush.bf16.msra.mxu3 %v15775_v4 }
0x1aba   : > { %v8256_v27 = vpop.f32.mrf.mxu1 }
0x1abb   : > { %v8257_v21 = vadd.f32 %v8256_v27, %v8243_v37 }
0x1abd   : > { %8306 = vmatpush.msra.mxu0 %v8257_v21  ;;  %8278 = vmatpush.bf16.msra.mxu3 %v15776_v3  ;;  %v15805_v3 = vld [vmem:[#allocation279_spill] sm:$0xff] }
0x1abe   : > { %10926 = vmatmul.msk.f32.vlgmr.msra.gmra.mxu0 %vm4365_vm3, %v8287_v38 }
0x1abf   : > { %8361 = vmatpush.bf16.msrb.mxu0 %v15787_v22 }
0x1ac1   : > { %8279 = vmatpush.bf16.msra.mxu3 %v15777_v29  ;;  %v15807_v29 = vld [vmem:[#allocation283_spill] sm:$0xff] }
0x1ac2   : > { %v8258_v50 = vpop.f32.mrf.mxu1 }
0x1ac3   : > { %8362 = vmatpush.bf16.msrb.mxu0 %v15788_v39 }
0x1ac5   : > { %8280 = vmatpush.bf16.msra.mxu3 %v15778_v5  ;;  %v15808_v5 = vld [vmem:[#allocation285_spill] sm:$0xff] }
0x1ac7   : > { %8363 = vmatpush.bf16.msrb.mxu0 %v15789_v63 }
0x1ac8   : > { %8281 = vmatmul.bf16.vlgmr.msra.gmra.mxu3 %v15594_v42 }
0x1ac9   : > { %8347 = vmatpush.bf16.msrb.mxu3 %v15790_v34 }
0x1aca   : > { %v8269_v9 = vpop.f32.mrf.mxu2 }
0x1acb   : > { %8364 = vmatpush.bf16.msrb.mxu0 %v15791_v14 }
0x1acd   : > { %8348 = vmatpush.bf16.msrb.mxu3 %v15792_v18 }
0x1acf   : > { %8365 = vmatpush.bf16.msrb.mxu0 %v15793_v61 }
0x1ad1   : > { %8349 = vmatpush.bf16.msrb.mxu3 %v15794_v2 }
0x1ad2   : > { %v8271_v0 = vpop.f32.mrf.mxu2 }
0x1ad3   : > { %8366 = vmatpush.bf16.msrb.mxu0 %v15795_v47  ;;  %v15823_v0 = vld [vmem:[#allocation301_spill] sm:$0xff] }
0x1ad5   : > { %8350 = vmatpush.bf16.msrb.mxu3 %v15796_v20 }
0x1ad7   : > { %8367 = vmatpush.bf16.msrb.mxu0 %v15797_v57 }
0x1ad9   : > { %8351 = vmatpush.bf16.msrb.mxu3 %v15798_v36 }
0x1adb   : > { %8368 = vmatpush.bf16.msrb.mxu0 %v15799_v52 }
0x1add   : > { %8352 = vmatpush.bf16.msrb.mxu3 %v15800_v19 }
0x1ade   : > { %8369 = vmatmul.bf16.vlgmr.msrb.gmra.mxu0 %v14016_v7 }
0x1adf   : > { %8436 = vmatpush.bf16.msra.mxu0 %v15779_v25 }
0x1ae1   : > { %8353 = vmatpush.bf16.msrb.mxu3 %v15801_v35 }
0x1ae3   : > { %8437 = vmatpush.bf16.msra.mxu0 %v15780_v45  ;;  %v8390_v45 = vld [vmem:[#allocation27 + $0x38] sm:$0xff] }
0x1ae5   : > { %8354 = vmatpush.bf16.msrb.mxu3 %v15802_v58 }
0x1ae7   : > { %8438 = vmatpush.bf16.msra.mxu0 %v15781_v10 }
0x1ae8   : > { %8355 = vmatmul.bf16.vlgmr.msrb.gmra.mxu3 %v14018_v17 }
0x1aea   : > { %v8342_v24 = vpop.f32.mrf.mxu2 }
0x1aeb   : > { %8439 = vmatpush.bf16.msra.mxu0 %v15782_v15 }
0x1aef   : > { %8440 = vmatpush.bf16.msra.mxu0 %v15783_v6  ;;  %v15811_v6 = vld [vmem:[#allocation274_spill] sm:$0xff] }
0x1af2   : > { %v8344_v32 = vpop.f32.mrf.mxu2 }
0x1af3   : > { %8441 = vmatpush.bf16.msra.mxu0 %v15784_v1  ;;  %v15812_v1 = vld [vmem:[#allocation276_spill] sm:$0xff] }
0x1af7   : > { %8442 = vmatpush.bf16.msra.mxu0 %v15785_v49  ;;  %v15813_v49 = vld [vmem:[#allocation278_spill] sm:$0xff] }
0x1afb   : > { %8443 = vmatpush.bf16.msra.mxu0 %v15786_v30  ;;  %v15814_v30 = vld [vmem:[#allocation280_spill] sm:$0xff] }
0x1afe   : > { %8444 = vmatmul.bf16.vlgmr.msra.gmra.mxu0 %v15593_v40 }
0x1b2b   : > { %v8229_v23 = vpop.f32.mrf.mxu3 }
0x1b2c   : > { %v8233_v55 = vadd.f32 %v8229_v23, %v8130_v26  ;;  %v15816_v26 = vld [vmem:[#allocation284_spill] sm:$0xff]  ;;  %v15831_v23 = vld [vmem:[#allocation305_spill] sm:$0xff] }
0x1b3b   : > { %v8308_v13 = vpop.f32.mrf.mxu0 }
0x1b3c   : > { %v14577_v48 = vadd.f32 %v8308_v13, %v8232_v41  ;;  %v15833_v13 = vld [vmem:[#allocation296_spill] sm:$0xff] }
0x1b4b   : > { %v8282_v46 = vpop.f32.mrf.mxu3 }
0x1b4c   : > { %v8283_v62 = vadd.f32 %v8282_v46, %v8269_v9 }
0x1b4e   : > { %8326 = vmatpush.msra.mxu1 %v8283_v62 }
0x1b4f   : > { %10927 = vmatmul.msk.f32.vlgmr.msra.gmra.mxu1 %vm4365_vm3, %v8287_v38 }
0x1b50   : > { %8375 = vmatpush.bf16.msrb.mxu1 %v15803_v51 }
0x1b53   : > { %v8284_v4 = vpop.f32.mrf.mxu3 }
0x1b54   : > { %8376 = vmatpush.bf16.msrb.mxu1 %v15804_v54 }
0x1b58   : > { %8377 = vmatpush.bf16.msrb.mxu1 %v15805_v3 }
0x1b5b   : > { %v8370_v56 = vpop.f32.mrf.mxu0 }
0x1b5c   : > { %8378 = vmatpush.bf16.msrb.mxu1 %v15806_v16 }
0x1b60   : > { %8379 = vmatpush.bf16.msrb.mxu1 %v15807_v29 }
0x1b63   : > { %v8372_v8 = vpop.f32.mrf.mxu0 }
0x1b64   : > { %8380 = vmatpush.bf16.msrb.mxu1 %v15808_v5 }
0x1b68   : > { %8381 = vmatpush.bf16.msrb.mxu1 %v15809_v11 }
0x1b6b   : > { %v8356_v44 = vpop.f32.mrf.mxu3 }
0x1b6c   : > { %8382 = vmatpush.bf16.msrb.mxu1 %v15810_v12  ;;  %v8357_v25 = vadd.f32 %v8356_v44, %v8342_v24  ;;  %v15839_v24 = vld [vmem:[#allocation310_spill] sm:$0xff]  ;;  %v15840_v44 = vld [vmem:[#allocation311_spill] sm:$0xff] }
0x1b6f   : > { %8383 = vmatmul.bf16.vlgmr.msrb.gmra.mxu1 %v14018_v17 }
0x1b70   : > { %8449 = vmatpush.bf16.msra.mxu1 %v15790_v34  ;;  %v15819_v34 = vld [vmem:[#allocation298_spill] sm:$0xff] }
0x1b73   : > { %v8358_v37 = vpop.f32.mrf.mxu3 }
0x1b74   : > { %v8359_v33 = vadd.f32 %v8358_v37, %v8344_v32  ;;  %8450 = vmatpush.bf16.msra.mxu1 %v15792_v18  ;;  %v15821_v18 = vld [vmem:[#allocation300_spill] sm:$0xff]  ;;  %v15842_v37 = vld [vmem:[#allocation313_spill] sm:$0xff] }
0x1b76   : > { %8408 = vmatpush.msrb.mxu2 %v8359_v33 }
0x1b78   : > { %8451 = vmatpush.bf16.msra.mxu1 %v15794_v2  ;;  %8409 = vmatpush.msrb.mxu2 %v8357_v25 }
0x1b79   : > { %10928 = vmatmul.msk.f32.vlgmr.msrb.gmra.mxu2 %vm5208_vm4, %v8390_v45 }
0x1b7a   : > { %8462 = vmatpush.bf16.msra.mxu2 %v15787_v22 }
0x1b7b   : > { %v8445_v10 = vpop.f32.mrf.mxu0 }
0x1b7c   : > { %8452 = vmatpush.bf16.msra.mxu1 %v15796_v20  ;;  %v15825_v20 = vld [vmem:[#allocation302_spill] sm:$0xff] }
0x1b7e   : > { %8463 = vmatpush.bf16.msra.mxu2 %v15788_v39 }
0x1b80   : > { %8453 = vmatpush.bf16.msra.mxu1 %v15798_v36 }
0x1b82   : > { %8464 = vmatpush.bf16.msra.mxu2 %v15789_v63  ;;  %v8489_v63 = vld [vmem:[#allocation28 + $0x38] sm:$0xff] }
0x1b83   : > { %v8447_v15 = vpop.f32.mrf.mxu0 }
0x1b84   : > { %8454 = vmatpush.bf16.msra.mxu1 %v15800_v19  ;;  %v15828_v19 = vld [vmem:[#allocation293_spill] sm:$0xff] }
0x1b86   : > { %8465 = vmatpush.bf16.msra.mxu2 %v15791_v14  ;;  %v15820_v14 = vld [vmem:[#allocation299_spill] sm:$0xff] }
0x1b88   : > { %8455 = vmatpush.bf16.msra.mxu1 %v15801_v35  ;;  %v15829_v35 = vld [vmem:[#allocation304_spill] sm:$0xff] }
0x1b8a   : > { %8466 = vmatpush.bf16.msra.mxu2 %v15793_v61  ;;  %v15822_v61 = vld [vmem:[#allocation290_spill] sm:$0xff] }
0x1b8c   : > { %8456 = vmatpush.bf16.msra.mxu1 %v15802_v58  ;;  %v15830_v58 = vld [vmem:[#allocation294_spill] sm:$0xff] }
0x1b8e   : > { %8467 = vmatpush.bf16.msra.mxu2 %v15795_v47  ;;  %v15824_v47 = vld [vmem:[#allocation291_spill] sm:$0xff] }
0x1b8f   : > { %8457 = vmatmul.bf16.vlgmr.msra.gmra.mxu1 %v15594_v42 }
0x1b92   : > { %8468 = vmatpush.bf16.msra.mxu2 %v15797_v57  ;;  %v15826_v57 = vld [vmem:[#allocation292_spill] sm:$0xff] }
0x1b96   : > { %8469 = vmatpush.bf16.msra.mxu2 %v15799_v52  ;;  %v15827_v52 = vld [vmem:[#allocation303_spill] sm:$0xff] }
0x1b99   : > { %8470 = vmatmul.bf16.vlgmr.msra.gmra.mxu2 %v15593_v40 }
0x1b9a   : > { %8535 = vmatpush.bf16.msrb.mxu2 %v15811_v6 }
0x1b9e   : > { %8536 = vmatpush.bf16.msrb.mxu2 %v15812_v1 }
0x1ba2   : > { %8537 = vmatpush.bf16.msrb.mxu2 %v15813_v49 }
0x1ba6   : > { %8538 = vmatpush.bf16.msrb.mxu2 %v15814_v30 }
0x1baa   : > { %8539 = vmatpush.bf16.msrb.mxu2 %v15815_v31 }
0x1bae   : > { %8540 = vmatpush.bf16.msrb.mxu2 %v15816_v26 }
0x1bb2   : > { %8541 = vmatpush.bf16.msrb.mxu2 %v15817_v60 }
0x1bb6   : > { %8542 = vmatpush.bf16.msrb.mxu2 %v15818_v43 }
0x1bb9   : > { %8543 = vmatmul.bf16.vlgmr.msrb.gmra.mxu2 %v14016_v7 }
0x1bcc   : > { %v8328_v59 = vpop.f32.mrf.mxu1 }
0x1bcd   : > { %v8332_v53 = vadd.f32 %v8328_v59, %v8233_v55  ;;  %v15832_v55 = vld [vmem:[#allocation295_spill] sm:$0xff] }
0x1bec   : > { %v8384_v28 = vpop.f32.mrf.mxu1 }
0x1bed   : > { %v8385_v21 = vadd.f32 %v8384_v28, %v8370_v56  ;;  %v15837_v56 = vld [vmem:[#allocation308_spill] sm:$0xff] }
0x1bf4   : > { %v8386_v41 = vpop.f32.mrf.mxu1 }
0x1bf5   : > { %v8387_v27 = vadd.f32 %v8386_v41, %v8372_v8  ;;  %v15841_v8 = vld [vmem:[#allocation312_spill] sm:$0xff]  ;;  %v8691_v41 = vld [vmem:[#allocation28 + $0x40] sm:$0xff] }
0x1bf7   : > { %8428 = vmatpush.msra.mxu3 %v8387_v27 }
0x1bf9   : > { %8429 = vmatpush.msra.mxu3 %v8385_v21 }
0x1bfa   : > { %10929 = vmatmul.msk.f32.vlgmr.msra.gmra.mxu3 %vm5208_vm4, %v8390_v45 }
0x1bfb   : > { %8475 = vmatpush.bf16.msrb.mxu3 %v15803_v51 }
0x1bfc   : > { %v8411_v38 = vpop.f32.mrf.mxu2 }
0x1bfd   : > { %v8434_v22 = vadd.f32 %v8411_v38, %v14577_v48  ;;  %v15834_v48 = vld [vmem:[#allocation297_spill] sm:$0xff] }
0x1bff   : > { %8476 = vmatpush.bf16.msrb.mxu3 %v15804_v54 }
0x1c03   : > { %8477 = vmatpush.bf16.msrb.mxu3 %v15805_v3  ;;  %v15835_v3 = vld [vmem:[#allocation306_spill] sm:$0xff] }
0x1c07   : > { %8478 = vmatpush.bf16.msrb.mxu3 %v15806_v16 }
0x1c0b   : > { %8479 = vmatpush.bf16.msrb.mxu3 %v15807_v29  ;;  %v15836_v29 = vld [vmem:[#allocation307_spill] sm:$0xff] }
0x1c0c   : > { %v8458_v50 = vpop.f32.mrf.mxu1 }
0x1c0d   : > { %v8459_v39 = vadd.f32 %v8458_v50, %v8445_v10 }
0x1c0f   : > { %8508 = vmatpush.msrb.mxu0 %v8459_v39  ;;  %8480 = vmatpush.bf16.msrb.mxu3 %v15808_v5  ;;  %v15838_v5 = vld [vmem:[#allocation309_spill] sm:$0xff] }
0x1c10   : > { %10930 = vmatmul.msk.f32.vlgmr.msrb.gmra.mxu0 %vm4365_vm3, %v8489_v63 }
0x1c11   : > { %8563 = vmatpush.bf16.msra.mxu0 %v15819_v34 }
0x1c13   : > { %8481 = vmatpush.bf16.msrb.mxu3 %v15809_v11 }
0x1c14   : > { %v8460_v9 = vpop.f32.mrf.mxu1 }
0x1c15   : > { %8564 = vmatpush.bf16.msra.mxu0 %v15820_v14 }
0x1c17   : > { %8482 = vmatpush.bf16.msrb.mxu3 %v15810_v12 }
0x1c19   : > { %8565 = vmatpush.bf16.msra.mxu0 %v15821_v18 }
0x1c1a   : > { %8483 = vmatmul.bf16.vlgmr.msrb.gmra.mxu3 %v15594_v42 }
0x1c1b   : > { %8549 = vmatpush.bf16.msra.mxu3 %v15822_v61 }
0x1c1c   : > { %v8471_v2 = vpop.f32.mrf.mxu2 }
0x1c1d   : > { %8566 = vmatpush.bf16.msra.mxu0 %v15823_v0 }
0x1c1f   : > { %8550 = vmatpush.bf16.msra.mxu3 %v15824_v47 }
0x1c21   : > { %8567 = vmatpush.bf16.msra.mxu0 %v15825_v20 }
0x1c23   : > { %8551 = vmatpush.bf16.msra.mxu3 %v15826_v57 }
0x1c24   : > { %v8473_v36 = vpop.f32.mrf.mxu2 }
0x1c25   : > { %8568 = vmatpush.bf16.msra.mxu0 %v15827_v52 }
0x1c27   : > { %8552 = vmatpush.bf16.msra.mxu3 %v15828_v19 }
0x1c29   : > { %8569 = vmatpush.bf16.msra.mxu0 %v15829_v35 }
0x1c2b   : > { %8553 = vmatpush.bf16.msra.mxu3 %v15830_v58 }
0x1c2d   : > { %8570 = vmatpush.bf16.msra.mxu0 %v15831_v23 }
0x1c2f   : > { %8554 = vmatpush.bf16.msra.mxu3 %v15832_v55 }
0x1c30   : > { %8571 = vmatmul.bf16.vlgmr.msra.gmra.mxu0 %v14016_v7 }
0x1c31   : > { %8638 = vmatpush.bf16.msrb.mxu0 %v15811_v6  ;;  %v8592_v6 = vld [vmem:[#allocation27 + $0x40] sm:$0xff] }
0x1c33   : > { %8555 = vmatpush.bf16.msra.mxu3 %v15833_v13 }
0x1c35   : > { %8639 = vmatpush.bf16.msrb.mxu0 %v15812_v1 }
0x1c37   : > { %8556 = vmatpush.bf16.msra.mxu3 %v15834_v48 }
0x1c39   : > { %8640 = vmatpush.bf16.msrb.mxu0 %v15813_v49 }
0x1c3a   : > { %8557 = vmatmul.bf16.vlgmr.msra.gmra.mxu3 %v14018_v17 }
0x1c3c   : > { %v8544_v12 = vpop.f32.mrf.mxu2 }
0x1c3d   : > { %8641 = vmatpush.bf16.msrb.mxu0 %v15814_v30 }
0x1c41   : > { %8642 = vmatpush.bf16.msrb.mxu0 %v15815_v31 }
0x1c44   : > { %v8546_v25 = vpop.f32.mrf.mxu2 }
0x1c45   : > { %8643 = vmatpush.bf16.msrb.mxu0 %v15816_v26 }
0x1c49   : > { %8644 = vmatpush.bf16.msrb.mxu0 %v15817_v60 }
0x1c4d   : > { %8645 = vmatpush.bf16.msrb.mxu0 %v15818_v43 }
0x1c50   : > { %8646 = vmatmul.bf16.vlgmr.msrb.gmra.mxu0 %v15593_v40 }
0x1c7d   : > { %v8431_v7 = vpop.f32.mrf.mxu3 }
0x1c7e   : > { %v8435_v46 = vadd.f32 %v8431_v7, %v8332_v53 }
0x1c8d   : > { %v8510_v62 = vpop.f32.mrf.mxu0 }
0x1c8e   : > { %v8533_v51 = vadd.f32 %v8510_v62, %v8434_v22 }
0x1c9d   : > { %v8484_v4 = vpop.f32.mrf.mxu3 }
0x1c9e   : > { %v8485_v54 = vadd.f32 %v8484_v4, %v8471_v2 }
0x1ca0   : > { %8528 = vmatpush.msrb.mxu1 %v8485_v54 }
0x1ca1   : > { %10931 = vmatmul.msk.f32.vlgmr.msrb.gmra.mxu1 %vm4365_vm3, %v8489_v63 }
0x1ca2   : > { %8577 = vmatpush.bf16.msra.mxu1 %v15835_v3 }
0x1ca5   : > { %v8486_v16 = vpop.f32.mrf.mxu3 }
0x1ca6   : > { %8578 = vmatpush.bf16.msra.mxu1 %v15836_v29 }
0x1caa   : > { %8579 = vmatpush.bf16.msra.mxu1 %v15837_v56 }
0x1cad   : > { %v8572_v11 = vpop.f32.mrf.mxu0 }
0x1cae   : > { %8580 = vmatpush.bf16.msra.mxu1 %v15838_v5 }
0x1cb2   : > { %8581 = vmatpush.bf16.msra.mxu1 %v15839_v24 }
0x1cb5   : > { %v8574_v33 = vpop.f32.mrf.mxu0 }
0x1cb6   : > { %8582 = vmatpush.bf16.msra.mxu1 %v15840_v44 }
0x1cba   : > { %8583 = vmatpush.bf16.msra.mxu1 %v15841_v8 }
0x1cbd   : > { %v8558_v32 = vpop.f32.mrf.mxu3 }
0x1cbe   : > { %8584 = vmatpush.bf16.msra.mxu1 %v15842_v37  ;;  %v8559_v15 = vadd.f32 %v8558_v32, %v8544_v12 }
0x1cc1   : > { %8585 = vmatmul.bf16.vlgmr.msra.gmra.mxu1 %v14018_v17 }
0x1cc2   : > { %8651 = vmatpush.bf16.msrb.mxu1 %v15822_v61 }
0x1cc5   : > { %v8560_v45 = vpop.f32.mrf.mxu3 }
0x1cc6   : > { %v8561_v10 = vadd.f32 %v8560_v45, %v8546_v25  ;;  %8652 = vmatpush.bf16.msrb.mxu1 %v15824_v47 }
0x1cc8   : > { %8610 = vmatpush.msra.mxu2 %v8561_v10 }
0x1cca   : > { %8653 = vmatpush.bf16.msrb.mxu1 %v15826_v57  ;;  %8611 = vmatpush.msra.mxu2 %v8559_v15 }
0x1ccb   : > { %10932 = vmatmul.msk.f32.vlgmr.msra.gmra.mxu2 %vm5208_vm4, %v8592_v6 }
0x1ccc   : > { %8664 = vmatpush.bf16.msrb.mxu2 %v15819_v34  ;;  %v8740_v34 = vpop.permute.xlu0 %8739 }
0x1ccd   : > { %v8647_v1 = vpop.f32.mrf.mxu0 }
0x1cce   : > { %8654 = vmatpush.bf16.msrb.mxu1 %v15828_v19 }
0x1cd0   : > { %8665 = vmatpush.bf16.msrb.mxu2 %v15820_v14 }
0x1cd2   : > { %8655 = vmatpush.bf16.msrb.mxu1 %v15830_v58 }
0x1cd4   : > { %8666 = vmatpush.bf16.msrb.mxu2 %v15821_v18 }
0x1cd5   : > { %v8649_v17 = vpop.f32.mrf.mxu0 }
0x1cd6   : > { %8656 = vmatpush.bf16.msrb.mxu1 %v15832_v55 }
0x1cd8   : > { %8667 = vmatpush.bf16.msrb.mxu2 %v15823_v0 }
0x1cda   : > { %8657 = vmatpush.bf16.msrb.mxu1 %v15833_v13 }
0x1cdc   : > { %8668 = vmatpush.bf16.msrb.mxu2 %v15825_v20 }
0x1cde   : > { %8658 = vmatpush.bf16.msrb.mxu1 %v15834_v48 }
0x1ce0   : > { %8669 = vmatpush.bf16.msrb.mxu2 %v15827_v52 }
0x1ce1   : > { %8659 = vmatmul.bf16.vlgmr.msrb.gmra.mxu1 %v15594_v42 }
0x1ce4   : > { %8670 = vmatpush.bf16.msrb.mxu2 %v15829_v35 }
0x1ce8   : > { %8671 = vmatpush.bf16.msrb.mxu2 %v15831_v23 }
0x1ceb   : > { %8672 = vmatmul.bf16.vlgmr.msrb.gmra.mxu2 %v15593_v40 }
0x1d1e   : > { %v8530_v49 = vpop.f32.mrf.mxu1 }
0x1d1f   : > { %v8534_v30 = vadd.f32 %v8530_v49, %v8435_v46 }
0x1d3e   : > { %v8586_v31 = vpop.f32.mrf.mxu1 }
0x1d3f   : > { %v8587_v43 = vadd.f32 %v8586_v31, %v8572_v11 }
0x1d46   : > { %v8588_v26 = vpop.f32.mrf.mxu1 }
0x1d47   : > { %v8589_v60 = vadd.f32 %v8588_v26, %v8574_v33 }
0x1d49   : > { %8630 = vmatpush.msrb.mxu3 %v8589_v60 }
0x1d4b   : > { %8631 = vmatpush.msrb.mxu3 %v8587_v43 }
0x1d4c   : > { %10933 = vmatmul.msk.f32.vlgmr.msrb.gmra.mxu3 %vm5208_vm4, %v8592_v6 }
0x1d4d   : > { %8677 = vmatpush.bf16.msra.mxu3 %v15835_v3 }
0x1d4e   : > { %v8613_v59 = vpop.f32.mrf.mxu2 }
0x1d4f   : > { %v8636_v53 = vadd.f32 %v8613_v59, %v8533_v51 }
0x1d51   : > { %8678 = vmatpush.bf16.msra.mxu3 %v15836_v29 }
0x1d55   : > { %8679 = vmatpush.bf16.msra.mxu3 %v15837_v56 }
0x1d59   : > { %8680 = vmatpush.bf16.msra.mxu3 %v15838_v5 }
0x1d5d   : > { %8681 = vmatpush.bf16.msra.mxu3 %v15839_v24 }
0x1d5e   : > { %v8660_v40 = vpop.f32.mrf.mxu1 }
0x1d5f   : > { %v8661_v28 = vadd.f32 %v8660_v40, %v8647_v1 }
0x1d61   : > { %8710 = vmatpush.msra.mxu0 %v8661_v28  ;;  %8682 = vmatpush.bf16.msra.mxu3 %v15840_v44 }
0x1d62   : > { %10934 = vmatmul.msk.f32.vlgmr.msra.gmra.mxu0 %vm4365_vm3, %v8691_v41 }
0x1d65   : > { %8683 = vmatpush.bf16.msra.mxu3 %v15841_v8 }
0x1d66   : > { %v8662_v27 = vpop.f32.mrf.mxu1 }
0x1d69   : > { %8684 = vmatpush.bf16.msra.mxu3 %v15842_v37 }
0x1d6c   : > { %8685 = vmatmul.bf16.vlgmr.msra.gmra.mxu3 %v15594_v42 }
0x1d6e   : > { %v8673_v21 = vpop.f32.mrf.mxu2 }
0x1d76   : > { %v8675_v38 = vpop.f32.mrf.mxu2 }
0x1dcf   : > { %v8633_v22 = vpop.f32.mrf.mxu3 }
0x1dd0   : > { %v8637_v50 = vadd.f32 %v8633_v22, %v8534_v30 }
0x1ddf   : > { %v8712_v39 = vpop.f32.mrf.mxu0 }
0x1de0   : > { %v8735_v63 = vadd.f32 %v8712_v39, %v8636_v53 }
0x1de2   : > { %v8742_v9 = vadd.f32 %v8740_v34, %v8735_v63 }
0x1de4   : > { %v8744_v14 = vmax.f32 %v8742_v9, 0.0 }
0x1de6   : > { %8746 = vst [vmem:[%s939_s25] sm:$0xff] %v8744_v14 }
0x1def   : > { %v8686_v18 = vpop.f32.mrf.mxu3 }
0x1df0   : > { %v8687_v61 = vadd.f32 %v8686_v18, %v8673_v21 }
0x1df2   : > { %8730 = vmatpush.msra.mxu1 %v8687_v61 }
0x1df3   : > { %10935 = vmatmul.msk.f32.vlgmr.msra.gmra.mxu1 %vm4365_vm3, %v8691_v41 }
0x1df7   : > { %v8688_v42 = vpop.f32.mrf.mxu3 }
0x1e70   : > { %v8732_v2 = vpop.f32.mrf.mxu1 }
0x1e71   : > { %v8736_v0 = vadd.f32 %v8732_v2, %v8637_v50 }
0x1e73   : > { %v8743_v47 = vadd.f32 %v8740_v34, %v8736_v0 }
0x1e75   : > { %v8745_v20 = vmax.f32 %v8743_v47, 0.0 }
0x1e77   : > { %8747 = vst [vmem:[%s939_s25 + $0x8] sm:$0xff] %v8745_v20 }
0x1e78 PF: > { %s15844_s22 = sld [smem:[#allocation41_spill]] }
0x1e7e   : > { %s40_s1 = sadd.s32 1, %s15844_s22  }
0x1e7f   : > { %p37_p7 = scmp.ge.s32.totalorder %s40_s1, 4  }
0x1e81   :  { %39 = sbr.rel (!%p37_p7) target bundleno = 18 (0x12), region = 293 }
0x1e86   :  { %8769 = vsyncpa [#allocation3], 1 }
0x1e87   :  { %8771 = vsyncpa [#allocation3 + $0x1], 1 }
0x1e88   :  { %8772 = vsyncpa [#allocation5], 1 }
0x1e89   :  { %8773 = vsyncpa [#allocation8], 1 }
0x1e8a   :  { %8774 = vsyncpa [#allocation11], 1 }
0x1e8b   :  { %8775 = vsyncpa [#allocation14], 1 }
0x1e8c   :  { %8776 = vsyncpa [#allocation17], 1 }
0x1e8d   :  { %8777 = vsyncpa [#allocation20], 1 }
0x1e8e   :  { %8778 = vsyncpa [#allocation23], 1 }
0x1e8f   :  { %8779 = vsyncpa [#allocation26], 1 }
0x1e90   :  { %8780 = vsyncpa [#allocation29], 1 }

</bundles_post_ra>
